<compile_context>
chip_gen: v7x
topology: tpu7x:2x2x1
jax: 0.10.0
libtpu: 0.0.40
codegen_flags: <defaults>
</compile_context>

<pallas_src>
import math
import functools

import numpy as np
import jax
import jax.numpy as jnp
from jax.experimental import pallas as pl
from jax.experimental.pallas import tpu as pltpu


# ----------------------------- kernel helpers ------------------------------


def _nt(a, b):
    """a @ b.T via dot_general (contract last dims of both) — MXU-native,
    avoids materializing any transpose of computed tensors."""
    return jax.lax.dot_general(a, b, (((1,), (1,)), ((), ())),
                               preferred_element_type=jnp.float32)


def _nn(a, b):
    return jnp.dot(a, b, preferred_element_type=jnp.float32)


def _layernorm(x, w, b, eps=1e-5):
    mu = jnp.mean(x, axis=-1, keepdims=True)
    var = jnp.mean((x - mu) ** 2, axis=-1, keepdims=True)
    return (x - mu) * jax.lax.rsqrt(var + eps) * w + b


def _encoder_layer(xf, mask, enc, nheads,
                   qkv_w_ref, qkv_b_ref, aout_w_ref, aout_b_ref,
                   w1_ref, b1_ref, w2_ref, b2_ref, ln_ref):
    """One post-norm TransformerEncoderLayer over all rows at once.

    Group structure (same batch element AND same time/feature group) is carried
    entirely by the additive `mask`, so this code is shared by both attention
    passes.  All per-head weights are separate slab entries (static leading-dim
    indexing) — no lane-offset slicing of computed activations."""
    rows, C = xf.shape

    attn = jnp.zeros((rows, C), jnp.float32)
    base = enc * 3 * nheads
    for h in range(nheads):                                   # static unroll
        q = _nt(xf, qkv_w_ref[base + h]) + qkv_b_ref[base + h]   # scale pre-folded
        k = _nt(xf, qkv_w_ref[base + nheads + h]) + qkv_b_ref[base + nheads + h]
        v = _nt(xf, qkv_w_ref[base + 2 * nheads + h]) + qkv_b_ref[base + 2 * nheads + h]
        s = _nt(q, k) + mask                                  # (rows, rows), masked
        s = s - jnp.max(s, axis=-1, keepdims=True)
        p = jnp.exp(s)
        p = p / jnp.sum(p, axis=-1, keepdims=True)
        ctx = _nn(p, v)                                       # (rows, dh)
        attn = attn + _nn(ctx, aout_w_ref[enc * nheads + h])  # per-head out-proj slice
    attn = attn + aout_b_ref[enc]

    x1 = _layernorm(xf + attn, ln_ref[enc * 4 + 0], ln_ref[enc * 4 + 1])
    h1 = jax.nn.gelu(_nt(x1, w1_ref[enc]) + b1_ref[enc], approximate=True)
    h2 = _nt(h1, w2_ref[enc]) + b2_ref[enc]
    return _layernorm(x1 + h2, ln_ref[enc * 4 + 2], ln_ref[enc * 4 + 3])


# ------------------------------ fused kernel -------------------------------


def residual_block_kernel(
        x_rows_ref, x_cm_ref, side_ref, attr_ref, diff_ref,    # batched data
        tmask_ref, fmask_ref, tile_ref,                        # masks + attr-row tiler
        attr_w_ref, diff_w_ref, ad_b_ref,                      # attr / diffusion Linear
        qkv_w_ref, qkv_b_ref, aout_w_ref, aout_b_ref,          # attention (both encoders)
        w1_ref, b1_ref, w2_ref, b2_ref, ln_ref,                # FFN + LayerNorm
        mid_w_ref, side_w_ref, out_w_ref, conv_b_ref,          # conv1x1 (pre-split halves)
        out_ref,                                               # fused (2C, T) channel-major
        *, nheads, K, L, N, bt):
    C = x_cm_ref.shape[1]
    T = K * L
    R = K * (L + N)

    # ---- build transformer rows; attr / diffusion projections fused in-kernel ----
    attr_w = attr_w_ref[...]
    diff_w = diff_w_ref[...]
    attr_b = ad_b_ref[0:1, :]
    diff_b = ad_b_ref[1:2, :]
    tile = tile_ref[...]                                        # (K*N, N) row replicator
    blocks = []
    for bi in range(bt):                                        # static unroll
        d_b = _nn(diff_ref[bi], diff_w) + diff_b                # (1, C)
        a_b = _nn(attr_ref[bi], attr_w) + attr_b                # (N, C)
        blocks.append(x_rows_ref[bi] + d_b)                     # K*L data rows
        blocks.append(_nn(tile, a_b) + d_b)                     # K*N attr rows (K copies)
    xf = jnp.concatenate(blocks, axis=0)                        # (bt*R, C), aligned pieces

    # ---- time transformer (same batch & feature), then feature transformer ----
    xf = _encoder_layer(xf, tmask_ref[...], 0, nheads,
                        qkv_w_ref, qkv_b_ref, aout_w_ref, aout_b_ref,
                        w1_ref, b1_ref, w2_ref, b2_ref, ln_ref)
    xf = _encoder_layer(xf, fmask_ref[...], 1, nheads,
                        qkv_w_ref, qkv_b_ref, aout_w_ref, aout_b_ref,
                        w1_ref, b1_ref, w2_ref, b2_ref, ln_ref)

    # ---- conv1x1 gating / output, channel-major so stores match torch layout ----
    inv_sqrt2 = 1.0 / math.sqrt(2.0)
    for bi in range(bt):                                        # static unroll
        y_rows = xf[bi * R:bi * R + T, :]                       # drop attr rows (aligned slice)
        side_b = side_ref[bi]                                   # (Sd, T) native layout
        z_gate = _nt(mid_w_ref[0], y_rows) + _nn(side_w_ref[0], side_b) + conv_b_ref[0]
        z_filt = _nt(mid_w_ref[1], y_rows) + _nn(side_w_ref[1], side_b) + conv_b_ref[1]
        g = jax.nn.sigmoid(z_gate) * jnp.tanh(z_filt)           # (C, T)
        res = (x_cm_ref[bi] + _nn(out_w_ref[0], g) + conv_b_ref[2]) * inv_sqrt2
        skip = _nn(out_w_ref[1], g) + conv_b_ref[3]
        out_ref[bi, 0:C, :] = res                               # residual channels
        out_ref[bi, C:2 * C, :] = skip                          # skip channels


# ------------------------------- wrapper ------------------------------------


def _group_masks(K, L, N, bt):
    """Additive attention masks over the bt*R rows of one grid step.

    Per-batch row order: K*L data rows (k, l), then K*N attr rows (k, n).
    time mask : attend iff same batch element and same feature k.
    feat mask : attend iff same batch element and same time position.
    """
    T, R = K * L, K * (L + N)
    rx, ra = np.arange(T), np.arange(K * N)
    k_id = np.concatenate([rx // L, ra // N])
    l_id = np.concatenate([N + (rx % L), ra % N])          # attr occupies time 0..N-1
    b_id = np.repeat(np.arange(bt), R)
    k_all = np.tile(k_id, bt) + b_id * K
    l_all = np.tile(l_id, bt) + b_id * (L + N)
    neg = np.float32(-1e30)
    tb = np.where(k_all[:, None] == k_all[None, :], np.float32(0.0), neg)
    fb = np.where(l_all[:, None] == l_all[None, :], np.float32(0.0), neg)
    return jnp.asarray(tb), jnp.asarray(fb)


def _pick_batch_tile(B, R, max_rows=512):
    """Largest Bt dividing B with Bt*R <= max_rows, keeping >=2 grid steps
    (v7x megacore) when B >= 2."""
    best = 1
    for bt in range(1, B + 1):
        if B % bt == 0 and bt * R <= max_rows and (B // bt >= 2 or B == 1):
            best = bt
    return best


def residual_block_forward(x, side_emb, attr_emb, diffusion_emb, packed, *, nheads, bt):
    B, C, K, L = x.shape
    N = attr_emb.shape[1]
    Sd = side_emb.shape[1]
    T = K * L
    R = K * (L + N)
    assert C % nheads == 0 and B % bt == 0 and K > 1 and L > 1

    # native-layout views (free) + the single pre-kernel relayout the row-major
    # transformer stage needs
    x_cm = x.reshape(B, C, T)
    side_cm = side_emb.reshape(B, Sd, T)
    x_rows = jnp.transpose(x_cm, (0, 2, 1))                    # (B, T, C)
    diff3 = diffusion_emb[:, None, :]                          # (B, 1, dd)

    tmask, fmask = _group_masks(K, L, N, bt)
    tile_mat = jnp.asarray(np.tile(np.eye(N, dtype=np.float32), (K, 1)))   # (K*N, N)

    consts = [tmask, fmask, tile_mat,
              packed["attr_w"], packed["diff_w"], packed["ad_b"],
              packed["qkv_w"], packed["qkv_b"], packed["aout_w"], packed["aout_b"],
              packed["ffn_w1"], packed["ffn_b1"], packed["ffn_w2"], packed["ffn_b2"],
              packed["ln"],
              packed["mid_w"], packed["side_w"], packed["out_w"], packed["conv_b"]]

    def batch_spec(arr):
        return pl.BlockSpec((bt,) + arr.shape[1:], lambda g: (g, 0, 0))

    def const_spec(arr):
        nd = arr.ndim
        return pl.BlockSpec(arr.shape, lambda g, _n=nd: (0,) * _n)

    kernel = functools.partial(residual_block_kernel,
                               nheads=nheads, K=K, L=L, N=N, bt=bt)
    out = pl.pallas_call(
        kernel,
        out_shape=jax.ShapeDtypeStruct((B, 2 * C, T), jnp.float32),
        grid=(B // bt,),
        in_specs=[batch_spec(x_rows), batch_spec(x_cm), batch_spec(side_cm),
                  batch_spec(attr_emb), batch_spec(diff3)]
                 + [const_spec(a) for a in consts],
        out_specs=pl.BlockSpec((bt, 2 * C, T), lambda g: (g, 0, 0)),
        compiler_params=pltpu.CompilerParams(dimension_semantics=("parallel",)),
    )(x_rows, x_cm, side_cm, attr_emb, diff3, *consts)

    residual = out[:, :C, :].reshape(B, C, K, L)
    skip = out[:, C:, :].reshape(B, C, K, L)
    return residual, skip


# ------------------------------ parameters ----------------------------------


def init_params(key, side_dim, attr_dim, channels, diff_dim, ff=64):
    """Parameters in torch orientation (Linear/Conv weight = (out, in))."""
    C = channels
    keys = iter(jax.random.split(key, 40))

    def w(shape, scale=0.05):
        return scale * jax.random.normal(next(keys), shape, jnp.float32)

    def transformer_params():
        return dict(
            in_w=w((3 * C, C)), in_b=w((3 * C,)),
            out_w=w((C, C)), out_b=w((C,)),
            l1_w=w((ff, C)), l1_b=w((ff,)),
            l2_w=w((C, ff)), l2_b=w((C,)),
            ln1_w=jnp.ones((C,), jnp.float32), ln1_b=jnp.zeros((C,), jnp.float32),
            ln2_w=jnp.ones((C,), jnp.float32), ln2_b=jnp.zeros((C,), jnp.float32))

    return dict(
        attr_w=w((C, attr_dim)), attr_b=w((C,)),
        diff_w=w((C, diff_dim)), diff_b=w((C,)),
        mid_w=w((2 * C, C)), mid_b=w((2 * C,)),            # Conv1d(C, 2C, 1)
        side_w=w((2 * C, side_dim)), side_b=w((2 * C,)),   # Conv1d(side_dim, 2C, 1)
        out_w=w((2 * C, C)), out_b=w((2 * C,)),            # Conv1d(C, 2C, 1)
        time=transformer_params(), feat=transformer_params())


def pack_params(params, nheads):
    """Host-side weight prep (called once, outside jit): per-head, gate/filter
    and residual/skip splits, 1/sqrt(dh) folded into q, everything packed into
    a small number of slabs to keep the kernel operand count low."""
    C = params["mid_w"].shape[1]
    dh = C // nheads
    scale = 1.0 / math.sqrt(dh)

    def enc(p):
        qkv_w = p["in_w"].reshape(3, nheads, dh, C)
        qkv_b = p["in_b"].reshape(3, nheads, 1, dh)
        qkv_w = qkv_w.at[0].multiply(scale)                 # fold score scale into q
        qkv_b = qkv_b.at[0].multiply(scale)
        aout_w = p["out_w"].T.reshape(nheads, dh, C)        # per-head out-proj slices
        ln = jnp.stack([p["ln1_w"], p["ln1_b"], p["ln2_w"], p["ln2_b"]]).reshape(4, 1, C)
        return dict(qkv_w=qkv_w.reshape(3 * nheads, dh, C),
                    qkv_b=qkv_b.reshape(3 * nheads, 1, dh),
                    aout_w=aout_w, aout_b=p["out_b"].reshape(1, C),
                    w1=p["l1_w"], b1=p["l1_b"].reshape(1, -1),
                    w2=p["l2_w"], b2=p["l2_b"].reshape(1, C), ln=ln)

    t, f = enc(params["time"]), enc(params["feat"])
    return dict(
        attr_w=params["attr_w"].T,                          # (attr_dim, C)
        diff_w=params["diff_w"].T,                          # (diff_dim, C)
        ad_b=jnp.stack([params["attr_b"], params["diff_b"]]),              # (2, C)
        qkv_w=jnp.stack([t["qkv_w"], f["qkv_w"]]).reshape(6 * nheads, dh, C),
        qkv_b=jnp.stack([t["qkv_b"], f["qkv_b"]]).reshape(6 * nheads, 1, dh),
        aout_w=jnp.stack([t["aout_w"], f["aout_w"]]).reshape(2 * nheads, dh, C),
        aout_b=jnp.stack([t["aout_b"], f["aout_b"]]),                      # (2, 1, C)
        ffn_w1=jnp.stack([t["w1"], f["w1"]]),                              # (2, ff, C)
        ffn_b1=jnp.stack([t["b1"], f["b1"]]),                              # (2, 1, ff)
        ffn_w2=jnp.stack([t["w2"], f["w2"]]),                              # (2, C, ff)
        ffn_b2=jnp.stack([t["b2"], f["b2"]]),                              # (2, 1, C)
        ln=jnp.stack([t["ln"], f["ln"]]).reshape(8, 1, C),
        mid_w=params["mid_w"].reshape(2, C, C),             # [gate, filter] halves
        side_w=params["side_w"].reshape(2, C, -1),
        out_w=params["out_w"].reshape(2, C, C),             # [residual, skip] halves
        conv_b=jnp.stack([params["mid_b"][:C] + params["side_b"][:C],
                          params["mid_b"][C:] + params["side_b"][C:],
                          params["out_b"][:C],
                          params["out_b"][C:]]).reshape(4, C, 1))


# --------------------------------- main --------------------------------------


if __name__ == "__main__":
    B, C, K, L = 4, 32, 4, 8          # batch, channels, features, time
    N = 4                             # attr sequence length
    attr_dim, diff_dim, side_dim = 16, 16, 8
    nheads = 4

    key = jax.random.PRNGKey(0)
    k1, k2, k3, k4, kp = jax.random.split(key, 5)
    x = jax.random.normal(k1, (B, C, K, L), jnp.float32)
    side_emb = jax.random.normal(k2, (B, side_dim, K, L), jnp.float32)
    attr_emb = jax.random.normal(k3, (B, N, attr_dim), jnp.float32)
    diffusion_emb = jax.random.normal(k4, (B, diff_dim), jnp.float32)

    params = init_params(kp, side_dim, attr_dim, C, diff_dim)
    packed = pack_params(params, nheads)

    bt = _pick_batch_tile(B, K * (L + N))
    fwd = jax.jit(functools.partial(residual_block_forward, nheads=nheads, bt=bt))
    residual, skip = fwd(x, side_emb, attr_emb, diffusion_emb, packed)
    jax.block_until_ready((residual, skip))

    assert residual.shape == (B, C, K, L) and skip.shape == (B, C, K, L)
    assert bool(jnp.all(jnp.isfinite(residual))) and bool(jnp.all(jnp.isfinite(skip)))
    print("KERNEL_OK")
</pallas_src>

<mosaic_0001>
module attributes {stable_mosaic.version = 11 : i64} {
  func.func @residual_block_kernel(%arg0: i32, %arg1: memref<2x32x32xf32, #tpu.memory_space<vmem>>, %arg2: memref<2x32x32xf32, #tpu.memory_space<vmem>>, %arg3: memref<2x8x32xf32, #tpu.memory_space<vmem>>, %arg4: memref<2x4x16xf32, #tpu.memory_space<vmem>>, %arg5: memref<2x1x16xf32, #tpu.memory_space<vmem>>, %arg6: memref<96x96xf32, #tpu.memory_space<vmem>>, %arg7: memref<96x96xf32, #tpu.memory_space<vmem>>, %arg8: memref<16x4xf32, #tpu.memory_space<vmem>>, %arg9: memref<16x32xf32, #tpu.memory_space<vmem>>, %arg10: memref<16x32xf32, #tpu.memory_space<vmem>>, %arg11: memref<2x32xf32, #tpu.memory_space<vmem>>, %arg12: memref<24x8x32xf32, #tpu.memory_space<vmem>>, %arg13: memref<24x1x8xf32, #tpu.memory_space<vmem>>, %arg14: memref<8x8x32xf32, #tpu.memory_space<vmem>>, %arg15: memref<2x1x32xf32, #tpu.memory_space<vmem>>, %arg16: memref<2x64x32xf32, #tpu.memory_space<vmem>>, %arg17: memref<2x1x64xf32, #tpu.memory_space<vmem>>, %arg18: memref<2x32x64xf32, #tpu.memory_space<vmem>>, %arg19: memref<2x1x32xf32, #tpu.memory_space<vmem>>, %arg20: memref<8x1x32xf32, #tpu.memory_space<vmem>>, %arg21: memref<2x32x32xf32, #tpu.memory_space<vmem>>, %arg22: memref<2x32x8xf32, #tpu.memory_space<vmem>>, %arg23: memref<2x32x32xf32, #tpu.memory_space<vmem>>, %arg24: memref<4x32x1xf32, #tpu.memory_space<vmem>>, %arg25: memref<2x64x32xf32, #tpu.memory_space<vmem>>) attributes {dimension_semantics = [#tpu.dimension_semantics<parallel>], iteration_bounds = array<i64: 2>, scalar_prefetch = 0 : i64, scratch_operands = 0 : i64, tpu.core_type = #tpu.core_type<tc>, window_params = [{transform_indices = @transform_0, window_bounds = array<i64: 2, 32, 32>}, {transform_indices = @transform_1, window_bounds = array<i64: 2, 32, 32>}, {transform_indices = @transform_2, window_bounds = array<i64: 2, 8, 32>}, {transform_indices = @transform_3, window_bounds = array<i64: 2, 4, 16>}, {transform_indices = @transform_4, window_bounds = array<i64: 2, 1, 16>}, {pipeline_mode = #tpu.pipeline_mode<synchronous>, transform_indices = @transform_5, window_bounds = array<i64: 96, 96>}, {pipeline_mode = #tpu.pipeline_mode<synchronous>, transform_indices = @transform_6, window_bounds = array<i64: 96, 96>}, {pipeline_mode = #tpu.pipeline_mode<synchronous>, transform_indices = @transform_7, window_bounds = array<i64: 16, 4>}, {pipeline_mode = #tpu.pipeline_mode<synchronous>, transform_indices = @transform_8, window_bounds = array<i64: 16, 32>}, {pipeline_mode = #tpu.pipeline_mode<synchronous>, transform_indices = @transform_9, window_bounds = array<i64: 16, 32>}, {pipeline_mode = #tpu.pipeline_mode<synchronous>, transform_indices = @transform_10, window_bounds = array<i64: 2, 32>}, {pipeline_mode = #tpu.pipeline_mode<synchronous>, transform_indices = @transform_11, window_bounds = array<i64: 24, 8, 32>}, {pipeline_mode = #tpu.pipeline_mode<synchronous>, transform_indices = @transform_12, window_bounds = array<i64: 24, 1, 8>}, {pipeline_mode = #tpu.pipeline_mode<synchronous>, transform_indices = @transform_13, window_bounds = array<i64: 8, 8, 32>}, {pipeline_mode = #tpu.pipeline_mode<synchronous>, transform_indices = @transform_14, window_bounds = array<i64: 2, 1, 32>}, {pipeline_mode = #tpu.pipeline_mode<synchronous>, transform_indices = @transform_15, window_bounds = array<i64: 2, 64, 32>}, {pipeline_mode = #tpu.pipeline_mode<synchronous>, transform_indices = @transform_16, window_bounds = array<i64: 2, 1, 64>}, {pipeline_mode = #tpu.pipeline_mode<synchronous>, transform_indices = @transform_17, window_bounds = array<i64: 2, 32, 64>}, {pipeline_mode = #tpu.pipeline_mode<synchronous>, transform_indices = @transform_18, window_bounds = array<i64: 2, 1, 32>}, {pipeline_mode = #tpu.pipeline_mode<synchronous>, transform_indices = @transform_19, window_bounds = array<i64: 8, 1, 32>}, {pipeline_mode = #tpu.pipeline_mode<synchronous>, transform_indices = @transform_20, window_bounds = array<i64: 2, 32, 32>}, {pipeline_mode = #tpu.pipeline_mode<synchronous>, transform_indices = @transform_21, window_bounds = array<i64: 2, 32, 8>}, {pipeline_mode = #tpu.pipeline_mode<synchronous>, transform_indices = @transform_22, window_bounds = array<i64: 2, 32, 32>}, {pipeline_mode = #tpu.pipeline_mode<synchronous>, transform_indices = @transform_23, window_bounds = array<i64: 4, 32, 1>}, {transform_indices = @transform_24, window_bounds = array<i64: 2, 64, 32>}]} {
    %c0 = arith.constant 0 : index
    %c0_0 = arith.constant 0 : index
    %0 = vector.load %arg9[%c0, %c0_0] : memref<16x32xf32, #tpu.memory_space<vmem>>, vector<16x32xf32>
    %c0_1 = arith.constant 0 : index
    %c0_2 = arith.constant 0 : index
    %1 = vector.load %arg10[%c0_1, %c0_2] : memref<16x32xf32, #tpu.memory_space<vmem>>, vector<16x32xf32>
    %c0_3 = arith.constant 0 : index
    %c0_4 = arith.constant 0 : index
    %2 = vector.load %arg11[%c0_3, %c0_4] : memref<2x32xf32, #tpu.memory_space<vmem>>, vector<1x32xf32>
    %c1 = arith.constant 1 : index
    %c0_5 = arith.constant 0 : index
    %3 = vector.load %arg11[%c1, %c0_5] : memref<2x32xf32, #tpu.memory_space<vmem>>, vector<1x32xf32>
    %c0_6 = arith.constant 0 : index
    %c0_7 = arith.constant 0 : index
    %4 = vector.load %arg8[%c0_6, %c0_7] : memref<16x4xf32, #tpu.memory_space<vmem>>, vector<16x4xf32>
    %c0_8 = arith.constant 0 : index
    %c0_9 = arith.constant 0 : index
    %c0_10 = arith.constant 0 : index
    %5 = vector.load %arg5[%c0_8, %c0_9, %c0_10] : memref<2x1x16xf32, #tpu.memory_space<vmem>>, vector<1x1x16xf32>
    %6 = vector.shape_cast %5 : vector<1x1x16xf32> to vector<1x16xf32>
    %cst = arith.constant dense<0.000000e+00> : vector<1x32xf32>
    %7 = tpu.matmul %6, %1, %cst {dimension_numbers = #tpu.dot_dimension_numbers<[1], [0], [0], [1], [0, 0, 1, 1], [], []>} : vector<1x16xf32>, vector<16x32xf32>, vector<1x32xf32> -> vector<1x32xf32>
    %8 = arith.addf %7, %3 : vector<1x32xf32>
    %c0_11 = arith.constant 0 : index
    %c0_12 = arith.constant 0 : index
    %c0_13 = arith.constant 0 : index
    %9 = vector.load %arg4[%c0_11, %c0_12, %c0_13] : memref<2x4x16xf32, #tpu.memory_space<vmem>>, vector<1x4x16xf32>
    %10 = vector.shape_cast %9 : vector<1x4x16xf32> to vector<4x16xf32>
    %cst_14 = arith.constant dense<0.000000e+00> : vector<4x32xf32>
    %11 = tpu.matmul %10, %0, %cst_14 {dimension_numbers = #tpu.dot_dimension_numbers<[1], [0], [0], [1], [0, 0, 1, 1], [], []>} : vector<4x16xf32>, vector<16x32xf32>, vector<4x32xf32> -> vector<4x32xf32>
    %12 = vector.broadcast %2 : vector<1x32xf32> to vector<4x32xf32>
    %13 = arith.addf %11, %12 : vector<4x32xf32>
    %c0_15 = arith.constant 0 : index
    %c0_16 = arith.constant 0 : index
    %c0_17 = arith.constant 0 : index
    %14 = vector.load %arg1[%c0_15, %c0_16, %c0_17] : memref<2x32x32xf32, #tpu.memory_space<vmem>>, vector<1x32x32xf32>
    %15 = vector.shape_cast %14 : vector<1x32x32xf32> to vector<32x32xf32>
    %16 = vector.broadcast %8 : vector<1x32xf32> to vector<32x32xf32>
    %17 = arith.addf %15, %16 : vector<32x32xf32>
    %cst_18 = arith.constant dense<0.000000e+00> : vector<16x32xf32>
    %18 = tpu.matmul %4, %13, %cst_18 {dimension_numbers = #tpu.dot_dimension_numbers<[1], [0], [0], [1], [0, 0, 1, 1], [], []>} : vector<16x4xf32>, vector<4x32xf32>, vector<16x32xf32> -> vector<16x32xf32>
    %19 = vector.broadcast %8 : vector<1x32xf32> to vector<16x32xf32>
    %20 = arith.addf %18, %19 : vector<16x32xf32>
    %c1_19 = arith.constant 1 : index
    %c0_20 = arith.constant 0 : index
    %c0_21 = arith.constant 0 : index
    %21 = vector.load %arg5[%c1_19, %c0_20, %c0_21] : memref<2x1x16xf32, #tpu.memory_space<vmem>>, vector<1x1x16xf32>
    %22 = vector.shape_cast %21 : vector<1x1x16xf32> to vector<1x16xf32>
    %cst_22 = arith.constant dense<0.000000e+00> : vector<1x32xf32>
    %23 = tpu.matmul %22, %1, %cst_22 {dimension_numbers = #tpu.dot_dimension_numbers<[1], [0], [0], [1], [0, 0, 1, 1], [], []>} : vector<1x16xf32>, vector<16x32xf32>, vector<1x32xf32> -> vector<1x32xf32>
    %24 = arith.addf %23, %3 : vector<1x32xf32>
    %c1_23 = arith.constant 1 : index
    %c0_24 = arith.constant 0 : index
    %c0_25 = arith.constant 0 : index
    %25 = vector.load %arg4[%c1_23, %c0_24, %c0_25] : memref<2x4x16xf32, #tpu.memory_space<vmem>>, vector<1x4x16xf32>
    %26 = vector.shape_cast %25 : vector<1x4x16xf32> to vector<4x16xf32>
    %cst_26 = arith.constant dense<0.000000e+00> : vector<4x32xf32>
    %27 = tpu.matmul %26, %0, %cst_26 {dimension_numbers = #tpu.dot_dimension_numbers<[1], [0], [0], [1], [0, 0, 1, 1], [], []>} : vector<4x16xf32>, vector<16x32xf32>, vector<4x32xf32> -> vector<4x32xf32>
    %28 = vector.broadcast %2 : vector<1x32xf32> to vector<4x32xf32>
    %29 = arith.addf %27, %28 : vector<4x32xf32>
    %c1_27 = arith.constant 1 : index
    %c0_28 = arith.constant 0 : index
    %c0_29 = arith.constant 0 : index
    %30 = vector.load %arg1[%c1_27, %c0_28, %c0_29] : memref<2x32x32xf32, #tpu.memory_space<vmem>>, vector<1x32x32xf32>
    %31 = vector.shape_cast %30 : vector<1x32x32xf32> to vector<32x32xf32>
    %32 = vector.broadcast %24 : vector<1x32xf32> to vector<32x32xf32>
    %33 = arith.addf %31, %32 : vector<32x32xf32>
    %cst_30 = arith.constant dense<0.000000e+00> : vector<16x32xf32>
    %34 = tpu.matmul %4, %29, %cst_30 {dimension_numbers = #tpu.dot_dimension_numbers<[1], [0], [0], [1], [0, 0, 1, 1], [], []>} : vector<16x4xf32>, vector<4x32xf32>, vector<16x32xf32> -> vector<16x32xf32>
    %35 = vector.broadcast %24 : vector<1x32xf32> to vector<16x32xf32>
    %36 = arith.addf %34, %35 : vector<16x32xf32>
    %37 = tpu.concatenate %17, %20, %33, %36 in 0 : vector<32x32xf32>, vector<16x32xf32>, vector<32x32xf32>, vector<16x32xf32> -> vector<96x32xf32>
    %c0_31 = arith.constant 0 : index
    %c0_32 = arith.constant 0 : index
    %38 = vector.load %arg6[%c0_31, %c0_32] : memref<96x96xf32, #tpu.memory_space<vmem>>, vector<96x96xf32>
    %cst_33 = arith.constant 0.000000e+00 : f32
    %39 = vector.broadcast %cst_33 : f32 to vector<96x32xf32>
    %c0_34 = arith.constant 0 : index
    %c0_35 = arith.constant 0 : index
    %c0_36 = arith.constant 0 : index
    %40 = vector.load %arg12[%c0_34, %c0_35, %c0_36] : memref<24x8x32xf32, #tpu.memory_space<vmem>>, vector<1x8x32xf32>
    %41 = vector.shape_cast %40 : vector<1x8x32xf32> to vector<8x32xf32>
    %cst_37 = arith.constant dense<0.000000e+00> : vector<96x8xf32>
    %42 = tpu.matmul %37, %41, %cst_37 {dimension_numbers = #tpu.dot_dimension_numbers<[1], [1], [0], [0], [0, 0, 1, 0], [], []>} : vector<96x32xf32>, vector<8x32xf32>, vector<96x8xf32> -> vector<96x8xf32>
    %c0_38 = arith.constant 0 : index
    %c0_39 = arith.constant 0 : index
    %c0_40 = arith.constant 0 : index
    %43 = vector.load %arg13[%c0_38, %c0_39, %c0_40] : memref<24x1x8xf32, #tpu.memory_space<vmem>>, vector<1x1x8xf32>
    %44 = vector.shape_cast %43 : vector<1x1x8xf32> to vector<1x8xf32>
    %45 = vector.broadcast %44 : vector<1x8xf32> to vector<96x8xf32>
    %46 = arith.addf %42, %45 : vector<96x8xf32>
    %c4 = arith.constant 4 : index
    %c0_41 = arith.constant 0 : index
    %c0_42 = arith.constant 0 : index
    %47 = vector.load %arg12[%c4, %c0_41, %c0_42] : memref<24x8x32xf32, #tpu.memory_space<vmem>>, vector<1x8x32xf32>
    %48 = vector.shape_cast %47 : vector<1x8x32xf32> to vector<8x32xf32>
    %cst_43 = arith.constant dense<0.000000e+00> : vector<96x8xf32>
    %49 = tpu.matmul %37, %48, %cst_43 {dimension_numbers = #tpu.dot_dimension_numbers<[1], [1], [0], [0], [0, 0, 1, 0], [], []>} : vector<96x32xf32>, vector<8x32xf32>, vector<96x8xf32> -> vector<96x8xf32>
    %c4_44 = arith.constant 4 : index
    %c0_45 = arith.constant 0 : index
    %c0_46 = arith.constant 0 : index
    %50 = vector.load %arg13[%c4_44, %c0_45, %c0_46] : memref<24x1x8xf32, #tpu.memory_space<vmem>>, vector<1x1x8xf32>
    %51 = vector.shape_cast %50 : vector<1x1x8xf32> to vector<1x8xf32>
    %52 = vector.broadcast %51 : vector<1x8xf32> to vector<96x8xf32>
    %53 = arith.addf %49, %52 : vector<96x8xf32>
    %c8 = arith.constant 8 : index
    %c0_47 = arith.constant 0 : index
    %c0_48 = arith.constant 0 : index
    %54 = vector.load %arg12[%c8, %c0_47, %c0_48] : memref<24x8x32xf32, #tpu.memory_space<vmem>>, vector<1x8x32xf32>
    %55 = vector.shape_cast %54 : vector<1x8x32xf32> to vector<8x32xf32>
    %cst_49 = arith.constant dense<0.000000e+00> : vector<96x8xf32>
    %56 = tpu.matmul %37, %55, %cst_49 {dimension_numbers = #tpu.dot_dimension_numbers<[1], [1], [0], [0], [0, 0, 1, 0], [], []>} : vector<96x32xf32>, vector<8x32xf32>, vector<96x8xf32> -> vector<96x8xf32>
    %c8_50 = arith.constant 8 : index
    %c0_51 = arith.constant 0 : index
    %c0_52 = arith.constant 0 : index
    %57 = vector.load %arg13[%c8_50, %c0_51, %c0_52] : memref<24x1x8xf32, #tpu.memory_space<vmem>>, vector<1x1x8xf32>
    %58 = vector.shape_cast %57 : vector<1x1x8xf32> to vector<1x8xf32>
    %59 = vector.broadcast %58 : vector<1x8xf32> to vector<96x8xf32>
    %60 = arith.addf %56, %59 : vector<96x8xf32>
    %cst_53 = arith.constant dense<0.000000e+00> : vector<96x96xf32>
    %61 = tpu.matmul %46, %53, %cst_53 {dimension_numbers = #tpu.dot_dimension_numbers<[1], [1], [0], [0], [0, 0, 1, 0], [], []>} : vector<96x8xf32>, vector<96x8xf32>, vector<96x96xf32> -> vector<96x96xf32>
    %62 = arith.addf %61, %38 : vector<96x96xf32>
    %cst_54 = arith.constant dense<0xFF800000> : vector<96xf32>
    %63 = vector.multi_reduction <maximumf>, %62, %cst_54 [1] : vector<96x96xf32> to vector<96xf32>
    %64 = vector.shape_cast %63 : vector<96xf32> to vector<96x1xf32>
    %65 = vector.broadcast %64 : vector<96x1xf32> to vector<96x96xf32>
    %66 = arith.subf %62, %65 : vector<96x96xf32>
    %67 = math.exp %66 : vector<96x96xf32>
    %cst_55 = arith.constant dense<0.000000e+00> : vector<96xf32>
    %68 = vector.multi_reduction <add>, %67, %cst_55 [1] : vector<96x96xf32> to vector<96xf32>
    %69 = vector.shape_cast %68 : vector<96xf32> to vector<96x1xf32>
    %70 = vector.broadcast %69 : vector<96x1xf32> to vector<96x96xf32>
    %71 = arith.divf %67, %70 : vector<96x96xf32>
    %cst_56 = arith.constant dense<0.000000e+00> : vector<96x8xf32>
    %72 = tpu.matmul %71, %60, %cst_56 {dimension_numbers = #tpu.dot_dimension_numbers<[1], [0], [0], [1], [0, 0, 1, 1], [], []>} : vector<96x96xf32>, vector<96x8xf32>, vector<96x8xf32> -> vector<96x8xf32>
    %c0_57 = arith.constant 0 : index
    %c0_58 = arith.constant 0 : index
    %c0_59 = arith.constant 0 : index
    %73 = vector.load %arg14[%c0_57, %c0_58, %c0_59] : memref<8x8x32xf32, #tpu.memory_space<vmem>>, vector<1x8x32xf32>
    %74 = vector.shape_cast %73 : vector<1x8x32xf32> to vector<8x32xf32>
    %cst_60 = arith.constant dense<0.000000e+00> : vector<96x32xf32>
    %75 = tpu.matmul %72, %74, %cst_60 {dimension_numbers = #tpu.dot_dimension_numbers<[1], [0], [0], [1], [0, 0, 1, 1], [], []>} : vector<96x8xf32>, vector<8x32xf32>, vector<96x32xf32> -> vector<96x32xf32>
    %76 = arith.addf %39, %75 : vector<96x32xf32>
    %c1_61 = arith.constant 1 : index
    %c0_62 = arith.constant 0 : index
    %c0_63 = arith.constant 0 : index
    %77 = vector.load %arg12[%c1_61, %c0_62, %c0_63] : memref<24x8x32xf32, #tpu.memory_space<vmem>>, vector<1x8x32xf32>
    %78 = vector.shape_cast %77 : vector<1x8x32xf32> to vector<8x32xf32>
    %cst_64 = arith.constant dense<0.000000e+00> : vector<96x8xf32>
    %79 = tpu.matmul %37, %78, %cst_64 {dimension_numbers = #tpu.dot_dimension_numbers<[1], [1], [0], [0], [0, 0, 1, 0], [], []>} : vector<96x32xf32>, vector<8x32xf32>, vector<96x8xf32> -> vector<96x8xf32>
    %c1_65 = arith.constant 1 : index
    %c0_66 = arith.constant 0 : index
    %c0_67 = arith.constant 0 : index
    %80 = vector.load %arg13[%c1_65, %c0_66, %c0_67] : memref<24x1x8xf32, #tpu.memory_space<vmem>>, vector<1x1x8xf32>
    %81 = vector.shape_cast %80 : vector<1x1x8xf32> to vector<1x8xf32>
    %82 = vector.broadcast %81 : vector<1x8xf32> to vector<96x8xf32>
    %83 = arith.addf %79, %82 : vector<96x8xf32>
    %c5 = arith.constant 5 : index
    %c0_68 = arith.constant 0 : index
    %c0_69 = arith.constant 0 : index
    %84 = vector.load %arg12[%c5, %c0_68, %c0_69] : memref<24x8x32xf32, #tpu.memory_space<vmem>>, vector<1x8x32xf32>
    %85 = vector.shape_cast %84 : vector<1x8x32xf32> to vector<8x32xf32>
    %cst_70 = arith.constant dense<0.000000e+00> : vector<96x8xf32>
    %86 = tpu.matmul %37, %85, %cst_70 {dimension_numbers = #tpu.dot_dimension_numbers<[1], [1], [0], [0], [0, 0, 1, 0], [], []>} : vector<96x32xf32>, vector<8x32xf32>, vector<96x8xf32> -> vector<96x8xf32>
    %c5_71 = arith.constant 5 : index
    %c0_72 = arith.constant 0 : index
    %c0_73 = arith.constant 0 : index
    %87 = vector.load %arg13[%c5_71, %c0_72, %c0_73] : memref<24x1x8xf32, #tpu.memory_space<vmem>>, vector<1x1x8xf32>
    %88 = vector.shape_cast %87 : vector<1x1x8xf32> to vector<1x8xf32>
    %89 = vector.broadcast %88 : vector<1x8xf32> to vector<96x8xf32>
    %90 = arith.addf %86, %89 : vector<96x8xf32>
    %c9 = arith.constant 9 : index
    %c0_74 = arith.constant 0 : index
    %c0_75 = arith.constant 0 : index
    %91 = vector.load %arg12[%c9, %c0_74, %c0_75] : memref<24x8x32xf32, #tpu.memory_space<vmem>>, vector<1x8x32xf32>
    %92 = vector.shape_cast %91 : vector<1x8x32xf32> to vector<8x32xf32>
    %cst_76 = arith.constant dense<0.000000e+00> : vector<96x8xf32>
    %93 = tpu.matmul %37, %92, %cst_76 {dimension_numbers = #tpu.dot_dimension_numbers<[1], [1], [0], [0], [0, 0, 1, 0], [], []>} : vector<96x32xf32>, vector<8x32xf32>, vector<96x8xf32> -> vector<96x8xf32>
    %c9_77 = arith.constant 9 : index
    %c0_78 = arith.constant 0 : index
    %c0_79 = arith.constant 0 : index
    %94 = vector.load %arg13[%c9_77, %c0_78, %c0_79] : memref<24x1x8xf32, #tpu.memory_space<vmem>>, vector<1x1x8xf32>
    %95 = vector.shape_cast %94 : vector<1x1x8xf32> to vector<1x8xf32>
    %96 = vector.broadcast %95 : vector<1x8xf32> to vector<96x8xf32>
    %97 = arith.addf %93, %96 : vector<96x8xf32>
    %cst_80 = arith.constant dense<0.000000e+00> : vector<96x96xf32>
    %98 = tpu.matmul %83, %90, %cst_80 {dimension_numbers = #tpu.dot_dimension_numbers<[1], [1], [0], [0], [0, 0, 1, 0], [], []>} : vector<96x8xf32>, vector<96x8xf32>, vector<96x96xf32> -> vector<96x96xf32>
    %99 = arith.addf %98, %38 : vector<96x96xf32>
    %cst_81 = arith.constant dense<0xFF800000> : vector<96xf32>
    %100 = vector.multi_reduction <maximumf>, %99, %cst_81 [1] : vector<96x96xf32> to vector<96xf32>
    %101 = vector.shape_cast %100 : vector<96xf32> to vector<96x1xf32>
    %102 = vector.broadcast %101 : vector<96x1xf32> to vector<96x96xf32>
    %103 = arith.subf %99, %102 : vector<96x96xf32>
    %104 = math.exp %103 : vector<96x96xf32>
    %cst_82 = arith.constant dense<0.000000e+00> : vector<96xf32>
    %105 = vector.multi_reduction <add>, %104, %cst_82 [1] : vector<96x96xf32> to vector<96xf32>
    %106 = vector.shape_cast %105 : vector<96xf32> to vector<96x1xf32>
    %107 = vector.broadcast %106 : vector<96x1xf32> to vector<96x96xf32>
    %108 = arith.divf %104, %107 : vector<96x96xf32>
    %cst_83 = arith.constant dense<0.000000e+00> : vector<96x8xf32>
    %109 = tpu.matmul %108, %97, %cst_83 {dimension_numbers = #tpu.dot_dimension_numbers<[1], [0], [0], [1], [0, 0, 1, 1], [], []>} : vector<96x96xf32>, vector<96x8xf32>, vector<96x8xf32> -> vector<96x8xf32>
    %c1_84 = arith.constant 1 : index
    %c0_85 = arith.constant 0 : index
    %c0_86 = arith.constant 0 : index
    %110 = vector.load %arg14[%c1_84, %c0_85, %c0_86] : memref<8x8x32xf32, #tpu.memory_space<vmem>>, vector<1x8x32xf32>
    %111 = vector.shape_cast %110 : vector<1x8x32xf32> to vector<8x32xf32>
    %cst_87 = arith.constant dense<0.000000e+00> : vector<96x32xf32>
    %112 = tpu.matmul %109, %111, %cst_87 {dimension_numbers = #tpu.dot_dimension_numbers<[1], [0], [0], [1], [0, 0, 1, 1], [], []>} : vector<96x8xf32>, vector<8x32xf32>, vector<96x32xf32> -> vector<96x32xf32>
    %113 = arith.addf %76, %112 : vector<96x32xf32>
    %c2 = arith.constant 2 : index
    %c0_88 = arith.constant 0 : index
    %c0_89 = arith.constant 0 : index
    %114 = vector.load %arg12[%c2, %c0_88, %c0_89] : memref<24x8x32xf32, #tpu.memory_space<vmem>>, vector<1x8x32xf32>
    %115 = vector.shape_cast %114 : vector<1x8x32xf32> to vector<8x32xf32>
    %cst_90 = arith.constant dense<0.000000e+00> : vector<96x8xf32>
    %116 = tpu.matmul %37, %115, %cst_90 {dimension_numbers = #tpu.dot_dimension_numbers<[1], [1], [0], [0], [0, 0, 1, 0], [], []>} : vector<96x32xf32>, vector<8x32xf32>, vector<96x8xf32> -> vector<96x8xf32>
    %c2_91 = arith.constant 2 : index
    %c0_92 = arith.constant 0 : index
    %c0_93 = arith.constant 0 : index
    %117 = vector.load %arg13[%c2_91, %c0_92, %c0_93] : memref<24x1x8xf32, #tpu.memory_space<vmem>>, vector<1x1x8xf32>
    %118 = vector.shape_cast %117 : vector<1x1x8xf32> to vector<1x8xf32>
    %119 = vector.broadcast %118 : vector<1x8xf32> to vector<96x8xf32>
    %120 = arith.addf %116, %119 : vector<96x8xf32>
    %c6 = arith.constant 6 : index
    %c0_94 = arith.constant 0 : index
    %c0_95 = arith.constant 0 : index
    %121 = vector.load %arg12[%c6, %c0_94, %c0_95] : memref<24x8x32xf32, #tpu.memory_space<vmem>>, vector<1x8x32xf32>
    %122 = vector.shape_cast %121 : vector<1x8x32xf32> to vector<8x32xf32>
    %cst_96 = arith.constant dense<0.000000e+00> : vector<96x8xf32>
    %123 = tpu.matmul %37, %122, %cst_96 {dimension_numbers = #tpu.dot_dimension_numbers<[1], [1], [0], [0], [0, 0, 1, 0], [], []>} : vector<96x32xf32>, vector<8x32xf32>, vector<96x8xf32> -> vector<96x8xf32>
    %c6_97 = arith.constant 6 : index
    %c0_98 = arith.constant 0 : index
    %c0_99 = arith.constant 0 : index
    %124 = vector.load %arg13[%c6_97, %c0_98, %c0_99] : memref<24x1x8xf32, #tpu.memory_space<vmem>>, vector<1x1x8xf32>
    %125 = vector.shape_cast %124 : vector<1x1x8xf32> to vector<1x8xf32>
    %126 = vector.broadcast %125 : vector<1x8xf32> to vector<96x8xf32>
    %127 = arith.addf %123, %126 : vector<96x8xf32>
    %c10 = arith.constant 10 : index
    %c0_100 = arith.constant 0 : index
    %c0_101 = arith.constant 0 : index
    %128 = vector.load %arg12[%c10, %c0_100, %c0_101] : memref<24x8x32xf32, #tpu.memory_space<vmem>>, vector<1x8x32xf32>
    %129 = vector.shape_cast %128 : vector<1x8x32xf32> to vector<8x32xf32>
    %cst_102 = arith.constant dense<0.000000e+00> : vector<96x8xf32>
    %130 = tpu.matmul %37, %129, %cst_102 {dimension_numbers = #tpu.dot_dimension_numbers<[1], [1], [0], [0], [0, 0, 1, 0], [], []>} : vector<96x32xf32>, vector<8x32xf32>, vector<96x8xf32> -> vector<96x8xf32>
    %c10_103 = arith.constant 10 : index
    %c0_104 = arith.constant 0 : index
    %c0_105 = arith.constant 0 : index
    %131 = vector.load %arg13[%c10_103, %c0_104, %c0_105] : memref<24x1x8xf32, #tpu.memory_space<vmem>>, vector<1x1x8xf32>
    %132 = vector.shape_cast %131 : vector<1x1x8xf32> to vector<1x8xf32>
    %133 = vector.broadcast %132 : vector<1x8xf32> to vector<96x8xf32>
    %134 = arith.addf %130, %133 : vector<96x8xf32>
    %cst_106 = arith.constant dense<0.000000e+00> : vector<96x96xf32>
    %135 = tpu.matmul %120, %127, %cst_106 {dimension_numbers = #tpu.dot_dimension_numbers<[1], [1], [0], [0], [0, 0, 1, 0], [], []>} : vector<96x8xf32>, vector<96x8xf32>, vector<96x96xf32> -> vector<96x96xf32>
    %136 = arith.addf %135, %38 : vector<96x96xf32>
    %cst_107 = arith.constant dense<0xFF800000> : vector<96xf32>
    %137 = vector.multi_reduction <maximumf>, %136, %cst_107 [1] : vector<96x96xf32> to vector<96xf32>
    %138 = vector.shape_cast %137 : vector<96xf32> to vector<96x1xf32>
    %139 = vector.broadcast %138 : vector<96x1xf32> to vector<96x96xf32>
    %140 = arith.subf %136, %139 : vector<96x96xf32>
    %141 = math.exp %140 : vector<96x96xf32>
    %cst_108 = arith.constant dense<0.000000e+00> : vector<96xf32>
    %142 = vector.multi_reduction <add>, %141, %cst_108 [1] : vector<96x96xf32> to vector<96xf32>
    %143 = vector.shape_cast %142 : vector<96xf32> to vector<96x1xf32>
    %144 = vector.broadcast %143 : vector<96x1xf32> to vector<96x96xf32>
    %145 = arith.divf %141, %144 : vector<96x96xf32>
    %cst_109 = arith.constant dense<0.000000e+00> : vector<96x8xf32>
    %146 = tpu.matmul %145, %134, %cst_109 {dimension_numbers = #tpu.dot_dimension_numbers<[1], [0], [0], [1], [0, 0, 1, 1], [], []>} : vector<96x96xf32>, vector<96x8xf32>, vector<96x8xf32> -> vector<96x8xf32>
    %c2_110 = arith.constant 2 : index
    %c0_111 = arith.constant 0 : index
    %c0_112 = arith.constant 0 : index
    %147 = vector.load %arg14[%c2_110, %c0_111, %c0_112] : memref<8x8x32xf32, #tpu.memory_space<vmem>>, vector<1x8x32xf32>
    %148 = vector.shape_cast %147 : vector<1x8x32xf32> to vector<8x32xf32>
    %cst_113 = arith.constant dense<0.000000e+00> : vector<96x32xf32>
    %149 = tpu.matmul %146, %148, %cst_113 {dimension_numbers = #tpu.dot_dimension_numbers<[1], [0], [0], [1], [0, 0, 1, 1], [], []>} : vector<96x8xf32>, vector<8x32xf32>, vector<96x32xf32> -> vector<96x32xf32>
    %150 = arith.addf %113, %149 : vector<96x32xf32>
    %c3 = arith.constant 3 : index
    %c0_114 = arith.constant 0 : index
    %c0_115 = arith.constant 0 : index
    %151 = vector.load %arg12[%c3, %c0_114, %c0_115] : memref<24x8x32xf32, #tpu.memory_space<vmem>>, vector<1x8x32xf32>
    %152 = vector.shape_cast %151 : vector<1x8x32xf32> to vector<8x32xf32>
    %cst_116 = arith.constant dense<0.000000e+00> : vector<96x8xf32>
    %153 = tpu.matmul %37, %152, %cst_116 {dimension_numbers = #tpu.dot_dimension_numbers<[1], [1], [0], [0], [0, 0, 1, 0], [], []>} : vector<96x32xf32>, vector<8x32xf32>, vector<96x8xf32> -> vector<96x8xf32>
    %c3_117 = arith.constant 3 : index
    %c0_118 = arith.constant 0 : index
    %c0_119 = arith.constant 0 : index
    %154 = vector.load %arg13[%c3_117, %c0_118, %c0_119] : memref<24x1x8xf32, #tpu.memory_space<vmem>>, vector<1x1x8xf32>
    %155 = vector.shape_cast %154 : vector<1x1x8xf32> to vector<1x8xf32>
    %156 = vector.broadcast %155 : vector<1x8xf32> to vector<96x8xf32>
    %157 = arith.addf %153, %156 : vector<96x8xf32>
    %c7 = arith.constant 7 : index
    %c0_120 = arith.constant 0 : index
    %c0_121 = arith.constant 0 : index
    %158 = vector.load %arg12[%c7, %c0_120, %c0_121] : memref<24x8x32xf32, #tpu.memory_space<vmem>>, vector<1x8x32xf32>
    %159 = vector.shape_cast %158 : vector<1x8x32xf32> to vector<8x32xf32>
    %cst_122 = arith.constant dense<0.000000e+00> : vector<96x8xf32>
    %160 = tpu.matmul %37, %159, %cst_122 {dimension_numbers = #tpu.dot_dimension_numbers<[1], [1], [0], [0], [0, 0, 1, 0], [], []>} : vector<96x32xf32>, vector<8x32xf32>, vector<96x8xf32> -> vector<96x8xf32>
    %c7_123 = arith.constant 7 : index
    %c0_124 = arith.constant 0 : index
    %c0_125 = arith.constant 0 : index
    %161 = vector.load %arg13[%c7_123, %c0_124, %c0_125] : memref<24x1x8xf32, #tpu.memory_space<vmem>>, vector<1x1x8xf32>
    %162 = vector.shape_cast %161 : vector<1x1x8xf32> to vector<1x8xf32>
    %163 = vector.broadcast %162 : vector<1x8xf32> to vector<96x8xf32>
    %164 = arith.addf %160, %163 : vector<96x8xf32>
    %c11 = arith.constant 11 : index
    %c0_126 = arith.constant 0 : index
    %c0_127 = arith.constant 0 : index
    %165 = vector.load %arg12[%c11, %c0_126, %c0_127] : memref<24x8x32xf32, #tpu.memory_space<vmem>>, vector<1x8x32xf32>
    %166 = vector.shape_cast %165 : vector<1x8x32xf32> to vector<8x32xf32>
    %cst_128 = arith.constant dense<0.000000e+00> : vector<96x8xf32>
    %167 = tpu.matmul %37, %166, %cst_128 {dimension_numbers = #tpu.dot_dimension_numbers<[1], [1], [0], [0], [0, 0, 1, 0], [], []>} : vector<96x32xf32>, vector<8x32xf32>, vector<96x8xf32> -> vector<96x8xf32>
    %c11_129 = arith.constant 11 : index
    %c0_130 = arith.constant 0 : index
    %c0_131 = arith.constant 0 : index
    %168 = vector.load %arg13[%c11_129, %c0_130, %c0_131] : memref<24x1x8xf32, #tpu.memory_space<vmem>>, vector<1x1x8xf32>
    %169 = vector.shape_cast %168 : vector<1x1x8xf32> to vector<1x8xf32>
    %170 = vector.broadcast %169 : vector<1x8xf32> to vector<96x8xf32>
    %171 = arith.addf %167, %170 : vector<96x8xf32>
    %cst_132 = arith.constant dense<0.000000e+00> : vector<96x96xf32>
    %172 = tpu.matmul %157, %164, %cst_132 {dimension_numbers = #tpu.dot_dimension_numbers<[1], [1], [0], [0], [0, 0, 1, 0], [], []>} : vector<96x8xf32>, vector<96x8xf32>, vector<96x96xf32> -> vector<96x96xf32>
    %173 = arith.addf %172, %38 : vector<96x96xf32>
    %cst_133 = arith.constant dense<0xFF800000> : vector<96xf32>
    %174 = vector.multi_reduction <maximumf>, %173, %cst_133 [1] : vector<96x96xf32> to vector<96xf32>
    %175 = vector.shape_cast %174 : vector<96xf32> to vector<96x1xf32>
    %176 = vector.broadcast %175 : vector<96x1xf32> to vector<96x96xf32>
    %177 = arith.subf %173, %176 : vector<96x96xf32>
    %178 = math.exp %177 : vector<96x96xf32>
    %cst_134 = arith.constant dense<0.000000e+00> : vector<96xf32>
    %179 = vector.multi_reduction <add>, %178, %cst_134 [1] : vector<96x96xf32> to vector<96xf32>
    %180 = vector.shape_cast %179 : vector<96xf32> to vector<96x1xf32>
    %181 = vector.broadcast %180 : vector<96x1xf32> to vector<96x96xf32>
    %182 = arith.divf %178, %181 : vector<96x96xf32>
    %cst_135 = arith.constant dense<0.000000e+00> : vector<96x8xf32>
    %183 = tpu.matmul %182, %171, %cst_135 {dimension_numbers = #tpu.dot_dimension_numbers<[1], [0], [0], [1], [0, 0, 1, 1], [], []>} : vector<96x96xf32>, vector<96x8xf32>, vector<96x8xf32> -> vector<96x8xf32>
    %c3_136 = arith.constant 3 : index
    %c0_137 = arith.constant 0 : index
    %c0_138 = arith.constant 0 : index
    %184 = vector.load %arg14[%c3_136, %c0_137, %c0_138] : memref<8x8x32xf32, #tpu.memory_space<vmem>>, vector<1x8x32xf32>
    %185 = vector.shape_cast %184 : vector<1x8x32xf32> to vector<8x32xf32>
    %cst_139 = arith.constant dense<0.000000e+00> : vector<96x32xf32>
    %186 = tpu.matmul %183, %185, %cst_139 {dimension_numbers = #tpu.dot_dimension_numbers<[1], [0], [0], [1], [0, 0, 1, 1], [], []>} : vector<96x8xf32>, vector<8x32xf32>, vector<96x32xf32> -> vector<96x32xf32>
    %187 = arith.addf %150, %186 : vector<96x32xf32>
    %c0_140 = arith.constant 0 : index
    %c0_141 = arith.constant 0 : index
    %c0_142 = arith.constant 0 : index
    %188 = vector.load %arg15[%c0_140, %c0_141, %c0_142] : memref<2x1x32xf32, #tpu.memory_space<vmem>>, vector<1x1x32xf32>
    %189 = vector.shape_cast %188 : vector<1x1x32xf32> to vector<1x32xf32>
    %190 = vector.broadcast %189 : vector<1x32xf32> to vector<96x32xf32>
    %191 = arith.addf %187, %190 : vector<96x32xf32>
    %192 = arith.addf %37, %191 : vector<96x32xf32>
    %c0_143 = arith.constant 0 : index
    %c0_144 = arith.constant 0 : index
    %c0_145 = arith.constant 0 : index
    %193 = vector.load %arg20[%c0_143, %c0_144, %c0_145] : memref<8x1x32xf32, #tpu.memory_space<vmem>>, vector<1x1x32xf32>
    %194 = vector.shape_cast %193 : vector<1x1x32xf32> to vector<1x32xf32>
    %c1_146 = arith.constant 1 : index
    %c0_147 = arith.constant 0 : index
    %c0_148 = arith.constant 0 : index
    %195 = vector.load %arg20[%c1_146, %c0_147, %c0_148] : memref<8x1x32xf32, #tpu.memory_space<vmem>>, vector<1x1x32xf32>
    %196 = vector.shape_cast %195 : vector<1x1x32xf32> to vector<1x32xf32>
    %cst_149 = arith.constant dense<0.000000e+00> : vector<96xf32>
    %197 = vector.multi_reduction <add>, %192, %cst_149 [1] : vector<96x32xf32> to vector<96xf32>
    %198 = vector.shape_cast %197 : vector<96xf32> to vector<96x1xf32>
    %cst_150 = arith.constant 3.200000e+01 : f32
    %199 = vector.broadcast %cst_150 : f32 to vector<96x1xf32>
    %200 = arith.divf %198, %199 : vector<96x1xf32>
    %201 = vector.broadcast %200 : vector<96x1xf32> to vector<96x32xf32>
    %202 = arith.subf %192, %201 : vector<96x32xf32>
    %203 = arith.mulf %202, %202 : vector<96x32xf32>
    %cst_151 = arith.constant dense<0.000000e+00> : vector<96xf32>
    %204 = vector.multi_reduction <add>, %203, %cst_151 [1] : vector<96x32xf32> to vector<96xf32>
    %205 = vector.shape_cast %204 : vector<96xf32> to vector<96x1xf32>
    %cst_152 = arith.constant 3.200000e+01 : f32
    %206 = vector.broadcast %cst_152 : f32 to vector<96x1xf32>
    %207 = arith.divf %205, %206 : vector<96x1xf32>
    %208 = vector.broadcast %200 : vector<96x1xf32> to vector<96x32xf32>
    %209 = arith.subf %192, %208 : vector<96x32xf32>
    %cst_153 = arith.constant 9.99999974E-6 : f32
    %210 = vector.broadcast %cst_153 : f32 to vector<96x1xf32>
    %211 = arith.addf %207, %210 : vector<96x1xf32>
    %212 = math.rsqrt %211 : vector<96x1xf32>
    %213 = vector.broadcast %212 : vector<96x1xf32> to vector<96x32xf32>
    %214 = arith.mulf %209, %213 : vector<96x32xf32>
    %215 = vector.broadcast %194 : vector<1x32xf32> to vector<96x32xf32>
    %216 = arith.mulf %214, %215 : vector<96x32xf32>
    %217 = vector.broadcast %196 : vector<1x32xf32> to vector<96x32xf32>
    %218 = arith.addf %216, %217 : vector<96x32xf32>
    %c0_154 = arith.constant 0 : index
    %c0_155 = arith.constant 0 : index
    %c0_156 = arith.constant 0 : index
    %219 = vector.load %arg16[%c0_154, %c0_155, %c0_156] : memref<2x64x32xf32, #tpu.memory_space<vmem>>, vector<1x64x32xf32>
    %220 = vector.shape_cast %219 : vector<1x64x32xf32> to vector<64x32xf32>
    %cst_157 = arith.constant dense<0.000000e+00> : vector<96x64xf32>
    %221 = tpu.matmul %218, %220, %cst_157 {dimension_numbers = #tpu.dot_dimension_numbers<[1], [1], [0], [0], [0, 0, 1, 0], [], []>} : vector<96x32xf32>, vector<64x32xf32>, vector<96x64xf32> -> vector<96x64xf32>
    %c0_158 = arith.constant 0 : index
    %c0_159 = arith.constant 0 : index
    %c0_160 = arith.constant 0 : index
    %222 = vector.load %arg17[%c0_158, %c0_159, %c0_160] : memref<2x1x64xf32, #tpu.memory_space<vmem>>, vector<1x1x64xf32>
    %223 = vector.shape_cast %222 : vector<1x1x64xf32> to vector<1x64xf32>
    %224 = vector.broadcast %223 : vector<1x64xf32> to vector<96x64xf32>
    %225 = arith.addf %221, %224 : vector<96x64xf32>
    %226 = arith.mulf %225, %225 : vector<96x64xf32>
    %227 = arith.mulf %225, %226 : vector<96x64xf32>
    %cst_161 = arith.constant 4.471500e-02 : f32
    %228 = vector.broadcast %cst_161 : f32 to vector<96x64xf32>
    %229 = arith.mulf %228, %227 : vector<96x64xf32>
    %230 = arith.addf %225, %229 : vector<96x64xf32>
    %cst_162 = arith.constant 0.797884583 : f32
    %231 = vector.broadcast %cst_162 : f32 to vector<96x64xf32>
    %232 = arith.mulf %231, %230 : vector<96x64xf32>
    %233 = math.tanh %232 : vector<96x64xf32>
    %cst_163 = arith.constant 1.000000e+00 : f32
    %234 = vector.broadcast %cst_163 : f32 to vector<96x64xf32>
    %235 = arith.addf %234, %233 : vector<96x64xf32>
    %cst_164 = arith.constant 5.000000e-01 : f32
    %236 = vector.broadcast %cst_164 : f32 to vector<96x64xf32>
    %237 = arith.mulf %236, %235 : vector<96x64xf32>
    %238 = arith.mulf %225, %237 : vector<96x64xf32>
    %c0_165 = arith.constant 0 : index
    %c0_166 = arith.constant 0 : index
    %c0_167 = arith.constant 0 : index
    %239 = vector.load %arg18[%c0_165, %c0_166, %c0_167] : memref<2x32x64xf32, #tpu.memory_space<vmem>>, vector<1x32x64xf32>
    %240 = vector.shape_cast %239 : vector<1x32x64xf32> to vector<32x64xf32>
    %cst_168 = arith.constant dense<0.000000e+00> : vector<96x32xf32>
    %241 = tpu.matmul %238, %240, %cst_168 {dimension_numbers = #tpu.dot_dimension_numbers<[1], [1], [0], [0], [0, 0, 1, 0], [], []>} : vector<96x64xf32>, vector<32x64xf32>, vector<96x32xf32> -> vector<96x32xf32>
    %c0_169 = arith.constant 0 : index
    %c0_170 = arith.constant 0 : index
    %c0_171 = arith.constant 0 : index
    %242 = vector.load %arg19[%c0_169, %c0_170, %c0_171] : memref<2x1x32xf32, #tpu.memory_space<vmem>>, vector<1x1x32xf32>
    %243 = vector.shape_cast %242 : vector<1x1x32xf32> to vector<1x32xf32>
    %244 = vector.broadcast %243 : vector<1x32xf32> to vector<96x32xf32>
    %245 = arith.addf %241, %244 : vector<96x32xf32>
    %246 = arith.addf %218, %245 : vector<96x32xf32>
    %c2_172 = arith.constant 2 : index
    %c0_173 = arith.constant 0 : index
    %c0_174 = arith.constant 0 : index
    %247 = vector.load %arg20[%c2_172, %c0_173, %c0_174] : memref<8x1x32xf32, #tpu.memory_space<vmem>>, vector<1x1x32xf32>
    %248 = vector.shape_cast %247 : vector<1x1x32xf32> to vector<1x32xf32>
    %c3_175 = arith.constant 3 : index
    %c0_176 = arith.constant 0 : index
    %c0_177 = arith.constant 0 : index
    %249 = vector.load %arg20[%c3_175, %c0_176, %c0_177] : memref<8x1x32xf32, #tpu.memory_space<vmem>>, vector<1x1x32xf32>
    %250 = vector.shape_cast %249 : vector<1x1x32xf32> to vector<1x32xf32>
    %cst_178 = arith.constant dense<0.000000e+00> : vector<96xf32>
    %251 = vector.multi_reduction <add>, %246, %cst_178 [1] : vector<96x32xf32> to vector<96xf32>
    %252 = vector.shape_cast %251 : vector<96xf32> to vector<96x1xf32>
    %cst_179 = arith.constant 3.200000e+01 : f32
    %253 = vector.broadcast %cst_179 : f32 to vector<96x1xf32>
    %254 = arith.divf %252, %253 : vector<96x1xf32>
    %255 = vector.broadcast %254 : vector<96x1xf32> to vector<96x32xf32>
    %256 = arith.subf %246, %255 : vector<96x32xf32>
    %257 = arith.mulf %256, %256 : vector<96x32xf32>
    %cst_180 = arith.constant dense<0.000000e+00> : vector<96xf32>
    %258 = vector.multi_reduction <add>, %257, %cst_180 [1] : vector<96x32xf32> to vector<96xf32>
    %259 = vector.shape_cast %258 : vector<96xf32> to vector<96x1xf32>
    %cst_181 = arith.constant 3.200000e+01 : f32
    %260 = vector.broadcast %cst_181 : f32 to vector<96x1xf32>
    %261 = arith.divf %259, %260 : vector<96x1xf32>
    %262 = vector.broadcast %254 : vector<96x1xf32> to vector<96x32xf32>
    %263 = arith.subf %246, %262 : vector<96x32xf32>
    %cst_182 = arith.constant 9.99999974E-6 : f32
    %264 = vector.broadcast %cst_182 : f32 to vector<96x1xf32>
    %265 = arith.addf %261, %264 : vector<96x1xf32>
    %266 = math.rsqrt %265 : vector<96x1xf32>
    %267 = vector.broadcast %266 : vector<96x1xf32> to vector<96x32xf32>
    %268 = arith.mulf %263, %267 : vector<96x32xf32>
    %269 = vector.broadcast %248 : vector<1x32xf32> to vector<96x32xf32>
    %270 = arith.mulf %268, %269 : vector<96x32xf32>
    %271 = vector.broadcast %250 : vector<1x32xf32> to vector<96x32xf32>
    %272 = arith.addf %270, %271 : vector<96x32xf32>
    %c0_183 = arith.constant 0 : index
    %c0_184 = arith.constant 0 : index
    %273 = vector.load %arg7[%c0_183, %c0_184] : memref<96x96xf32, #tpu.memory_space<vmem>>, vector<96x96xf32>
    %cst_185 = arith.constant 0.000000e+00 : f32
    %274 = vector.broadcast %cst_185 : f32 to vector<96x32xf32>
    %c12 = arith.constant 12 : index
    %c0_186 = arith.constant 0 : index
    %c0_187 = arith.constant 0 : index
    %275 = vector.load %arg12[%c12, %c0_186, %c0_187] : memref<24x8x32xf32, #tpu.memory_space<vmem>>, vector<1x8x32xf32>
    %276 = vector.shape_cast %275 : vector<1x8x32xf32> to vector<8x32xf32>
    %cst_188 = arith.constant dense<0.000000e+00> : vector<96x8xf32>
    %277 = tpu.matmul %272, %276, %cst_188 {dimension_numbers = #tpu.dot_dimension_numbers<[1], [1], [0], [0], [0, 0, 1, 0], [], []>} : vector<96x32xf32>, vector<8x32xf32>, vector<96x8xf32> -> vector<96x8xf32>
    %c12_189 = arith.constant 12 : index
    %c0_190 = arith.constant 0 : index
    %c0_191 = arith.constant 0 : index
    %278 = vector.load %arg13[%c12_189, %c0_190, %c0_191] : memref<24x1x8xf32, #tpu.memory_space<vmem>>, vector<1x1x8xf32>
    %279 = vector.shape_cast %278 : vector<1x1x8xf32> to vector<1x8xf32>
    %280 = vector.broadcast %279 : vector<1x8xf32> to vector<96x8xf32>
    %281 = arith.addf %277, %280 : vector<96x8xf32>
    %c16 = arith.constant 16 : index
    %c0_192 = arith.constant 0 : index
    %c0_193 = arith.constant 0 : index
    %282 = vector.load %arg12[%c16, %c0_192, %c0_193] : memref<24x8x32xf32, #tpu.memory_space<vmem>>, vector<1x8x32xf32>
    %283 = vector.shape_cast %282 : vector<1x8x32xf32> to vector<8x32xf32>
    %cst_194 = arith.constant dense<0.000000e+00> : vector<96x8xf32>
    %284 = tpu.matmul %272, %283, %cst_194 {dimension_numbers = #tpu.dot_dimension_numbers<[1], [1], [0], [0], [0, 0, 1, 0], [], []>} : vector<96x32xf32>, vector<8x32xf32>, vector<96x8xf32> -> vector<96x8xf32>
    %c16_195 = arith.constant 16 : index
    %c0_196 = arith.constant 0 : index
    %c0_197 = arith.constant 0 : index
    %285 = vector.load %arg13[%c16_195, %c0_196, %c0_197] : memref<24x1x8xf32, #tpu.memory_space<vmem>>, vector<1x1x8xf32>
    %286 = vector.shape_cast %285 : vector<1x1x8xf32> to vector<1x8xf32>
    %287 = vector.broadcast %286 : vector<1x8xf32> to vector<96x8xf32>
    %288 = arith.addf %284, %287 : vector<96x8xf32>
    %c20 = arith.constant 20 : index
    %c0_198 = arith.constant 0 : index
    %c0_199 = arith.constant 0 : index
    %289 = vector.load %arg12[%c20, %c0_198, %c0_199] : memref<24x8x32xf32, #tpu.memory_space<vmem>>, vector<1x8x32xf32>
    %290 = vector.shape_cast %289 : vector<1x8x32xf32> to vector<8x32xf32>
    %cst_200 = arith.constant dense<0.000000e+00> : vector<96x8xf32>
    %291 = tpu.matmul %272, %290, %cst_200 {dimension_numbers = #tpu.dot_dimension_numbers<[1], [1], [0], [0], [0, 0, 1, 0], [], []>} : vector<96x32xf32>, vector<8x32xf32>, vector<96x8xf32> -> vector<96x8xf32>
    %c20_201 = arith.constant 20 : index
    %c0_202 = arith.constant 0 : index
    %c0_203 = arith.constant 0 : index
    %292 = vector.load %arg13[%c20_201, %c0_202, %c0_203] : memref<24x1x8xf32, #tpu.memory_space<vmem>>, vector<1x1x8xf32>
    %293 = vector.shape_cast %292 : vector<1x1x8xf32> to vector<1x8xf32>
    %294 = vector.broadcast %293 : vector<1x8xf32> to vector<96x8xf32>
    %295 = arith.addf %291, %294 : vector<96x8xf32>
    %cst_204 = arith.constant dense<0.000000e+00> : vector<96x96xf32>
    %296 = tpu.matmul %281, %288, %cst_204 {dimension_numbers = #tpu.dot_dimension_numbers<[1], [1], [0], [0], [0, 0, 1, 0], [], []>} : vector<96x8xf32>, vector<96x8xf32>, vector<96x96xf32> -> vector<96x96xf32>
    %297 = arith.addf %296, %273 : vector<96x96xf32>
    %cst_205 = arith.constant dense<0xFF800000> : vector<96xf32>
    %298 = vector.multi_reduction <maximumf>, %297, %cst_205 [1] : vector<96x96xf32> to vector<96xf32>
    %299 = vector.shape_cast %298 : vector<96xf32> to vector<96x1xf32>
    %300 = vector.broadcast %299 : vector<96x1xf32> to vector<96x96xf32>
    %301 = arith.subf %297, %300 : vector<96x96xf32>
    %302 = math.exp %301 : vector<96x96xf32>
    %cst_206 = arith.constant dense<0.000000e+00> : vector<96xf32>
    %303 = vector.multi_reduction <add>, %302, %cst_206 [1] : vector<96x96xf32> to vector<96xf32>
    %304 = vector.shape_cast %303 : vector<96xf32> to vector<96x1xf32>
    %305 = vector.broadcast %304 : vector<96x1xf32> to vector<96x96xf32>
    %306 = arith.divf %302, %305 : vector<96x96xf32>
    %cst_207 = arith.constant dense<0.000000e+00> : vector<96x8xf32>
    %307 = tpu.matmul %306, %295, %cst_207 {dimension_numbers = #tpu.dot_dimension_numbers<[1], [0], [0], [1], [0, 0, 1, 1], [], []>} : vector<96x96xf32>, vector<96x8xf32>, vector<96x8xf32> -> vector<96x8xf32>
    %c4_208 = arith.constant 4 : index
    %c0_209 = arith.constant 0 : index
    %c0_210 = arith.constant 0 : index
    %308 = vector.load %arg14[%c4_208, %c0_209, %c0_210] : memref<8x8x32xf32, #tpu.memory_space<vmem>>, vector<1x8x32xf32>
    %309 = vector.shape_cast %308 : vector<1x8x32xf32> to vector<8x32xf32>
    %cst_211 = arith.constant dense<0.000000e+00> : vector<96x32xf32>
    %310 = tpu.matmul %307, %309, %cst_211 {dimension_numbers = #tpu.dot_dimension_numbers<[1], [0], [0], [1], [0, 0, 1, 1], [], []>} : vector<96x8xf32>, vector<8x32xf32>, vector<96x32xf32> -> vector<96x32xf32>
    %311 = arith.addf %274, %310 : vector<96x32xf32>
    %c13 = arith.constant 13 : index
    %c0_212 = arith.constant 0 : index
    %c0_213 = arith.constant 0 : index
    %312 = vector.load %arg12[%c13, %c0_212, %c0_213] : memref<24x8x32xf32, #tpu.memory_space<vmem>>, vector<1x8x32xf32>
    %313 = vector.shape_cast %312 : vector<1x8x32xf32> to vector<8x32xf32>
    %cst_214 = arith.constant dense<0.000000e+00> : vector<96x8xf32>
    %314 = tpu.matmul %272, %313, %cst_214 {dimension_numbers = #tpu.dot_dimension_numbers<[1], [1], [0], [0], [0, 0, 1, 0], [], []>} : vector<96x32xf32>, vector<8x32xf32>, vector<96x8xf32> -> vector<96x8xf32>
    %c13_215 = arith.constant 13 : index
    %c0_216 = arith.constant 0 : index
    %c0_217 = arith.constant 0 : index
    %315 = vector.load %arg13[%c13_215, %c0_216, %c0_217] : memref<24x1x8xf32, #tpu.memory_space<vmem>>, vector<1x1x8xf32>
    %316 = vector.shape_cast %315 : vector<1x1x8xf32> to vector<1x8xf32>
    %317 = vector.broadcast %316 : vector<1x8xf32> to vector<96x8xf32>
    %318 = arith.addf %314, %317 : vector<96x8xf32>
    %c17 = arith.constant 17 : index
    %c0_218 = arith.constant 0 : index
    %c0_219 = arith.constant 0 : index
    %319 = vector.load %arg12[%c17, %c0_218, %c0_219] : memref<24x8x32xf32, #tpu.memory_space<vmem>>, vector<1x8x32xf32>
    %320 = vector.shape_cast %319 : vector<1x8x32xf32> to vector<8x32xf32>
    %cst_220 = arith.constant dense<0.000000e+00> : vector<96x8xf32>
    %321 = tpu.matmul %272, %320, %cst_220 {dimension_numbers = #tpu.dot_dimension_numbers<[1], [1], [0], [0], [0, 0, 1, 0], [], []>} : vector<96x32xf32>, vector<8x32xf32>, vector<96x8xf32> -> vector<96x8xf32>
    %c17_221 = arith.constant 17 : index
    %c0_222 = arith.constant 0 : index
    %c0_223 = arith.constant 0 : index
    %322 = vector.load %arg13[%c17_221, %c0_222, %c0_223] : memref<24x1x8xf32, #tpu.memory_space<vmem>>, vector<1x1x8xf32>
    %323 = vector.shape_cast %322 : vector<1x1x8xf32> to vector<1x8xf32>
    %324 = vector.broadcast %323 : vector<1x8xf32> to vector<96x8xf32>
    %325 = arith.addf %321, %324 : vector<96x8xf32>
    %c21 = arith.constant 21 : index
    %c0_224 = arith.constant 0 : index
    %c0_225 = arith.constant 0 : index
    %326 = vector.load %arg12[%c21, %c0_224, %c0_225] : memref<24x8x32xf32, #tpu.memory_space<vmem>>, vector<1x8x32xf32>
    %327 = vector.shape_cast %326 : vector<1x8x32xf32> to vector<8x32xf32>
    %cst_226 = arith.constant dense<0.000000e+00> : vector<96x8xf32>
    %328 = tpu.matmul %272, %327, %cst_226 {dimension_numbers = #tpu.dot_dimension_numbers<[1], [1], [0], [0], [0, 0, 1, 0], [], []>} : vector<96x32xf32>, vector<8x32xf32>, vector<96x8xf32> -> vector<96x8xf32>
    %c21_227 = arith.constant 21 : index
    %c0_228 = arith.constant 0 : index
    %c0_229 = arith.constant 0 : index
    %329 = vector.load %arg13[%c21_227, %c0_228, %c0_229] : memref<24x1x8xf32, #tpu.memory_space<vmem>>, vector<1x1x8xf32>
    %330 = vector.shape_cast %329 : vector<1x1x8xf32> to vector<1x8xf32>
    %331 = vector.broadcast %330 : vector<1x8xf32> to vector<96x8xf32>
    %332 = arith.addf %328, %331 : vector<96x8xf32>
    %cst_230 = arith.constant dense<0.000000e+00> : vector<96x96xf32>
    %333 = tpu.matmul %318, %325, %cst_230 {dimension_numbers = #tpu.dot_dimension_numbers<[1], [1], [0], [0], [0, 0, 1, 0], [], []>} : vector<96x8xf32>, vector<96x8xf32>, vector<96x96xf32> -> vector<96x96xf32>
    %334 = arith.addf %333, %273 : vector<96x96xf32>
    %cst_231 = arith.constant dense<0xFF800000> : vector<96xf32>
    %335 = vector.multi_reduction <maximumf>, %334, %cst_231 [1] : vector<96x96xf32> to vector<96xf32>
    %336 = vector.shape_cast %335 : vector<96xf32> to vector<96x1xf32>
    %337 = vector.broadcast %336 : vector<96x1xf32> to vector<96x96xf32>
    %338 = arith.subf %334, %337 : vector<96x96xf32>
    %339 = math.exp %338 : vector<96x96xf32>
    %cst_232 = arith.constant dense<0.000000e+00> : vector<96xf32>
    %340 = vector.multi_reduction <add>, %339, %cst_232 [1] : vector<96x96xf32> to vector<96xf32>
    %341 = vector.shape_cast %340 : vector<96xf32> to vector<96x1xf32>
    %342 = vector.broadcast %341 : vector<96x1xf32> to vector<96x96xf32>
    %343 = arith.divf %339, %342 : vector<96x96xf32>
    %cst_233 = arith.constant dense<0.000000e+00> : vector<96x8xf32>
    %344 = tpu.matmul %343, %332, %cst_233 {dimension_numbers = #tpu.dot_dimension_numbers<[1], [0], [0], [1], [0, 0, 1, 1], [], []>} : vector<96x96xf32>, vector<96x8xf32>, vector<96x8xf32> -> vector<96x8xf32>
    %c5_234 = arith.constant 5 : index
    %c0_235 = arith.constant 0 : index
    %c0_236 = arith.constant 0 : index
    %345 = vector.load %arg14[%c5_234, %c0_235, %c0_236] : memref<8x8x32xf32, #tpu.memory_space<vmem>>, vector<1x8x32xf32>
    %346 = vector.shape_cast %345 : vector<1x8x32xf32> to vector<8x32xf32>
    %cst_237 = arith.constant dense<0.000000e+00> : vector<96x32xf32>
    %347 = tpu.matmul %344, %346, %cst_237 {dimension_numbers = #tpu.dot_dimension_numbers<[1], [0], [0], [1], [0, 0, 1, 1], [], []>} : vector<96x8xf32>, vector<8x32xf32>, vector<96x32xf32> -> vector<96x32xf32>
    %348 = arith.addf %311, %347 : vector<96x32xf32>
    %c14 = arith.constant 14 : index
    %c0_238 = arith.constant 0 : index
    %c0_239 = arith.constant 0 : index
    %349 = vector.load %arg12[%c14, %c0_238, %c0_239] : memref<24x8x32xf32, #tpu.memory_space<vmem>>, vector<1x8x32xf32>
    %350 = vector.shape_cast %349 : vector<1x8x32xf32> to vector<8x32xf32>
    %cst_240 = arith.constant dense<0.000000e+00> : vector<96x8xf32>
    %351 = tpu.matmul %272, %350, %cst_240 {dimension_numbers = #tpu.dot_dimension_numbers<[1], [1], [0], [0], [0, 0, 1, 0], [], []>} : vector<96x32xf32>, vector<8x32xf32>, vector<96x8xf32> -> vector<96x8xf32>
    %c14_241 = arith.constant 14 : index
    %c0_242 = arith.constant 0 : index
    %c0_243 = arith.constant 0 : index
    %352 = vector.load %arg13[%c14_241, %c0_242, %c0_243] : memref<24x1x8xf32, #tpu.memory_space<vmem>>, vector<1x1x8xf32>
    %353 = vector.shape_cast %352 : vector<1x1x8xf32> to vector<1x8xf32>
    %354 = vector.broadcast %353 : vector<1x8xf32> to vector<96x8xf32>
    %355 = arith.addf %351, %354 : vector<96x8xf32>
    %c18 = arith.constant 18 : index
    %c0_244 = arith.constant 0 : index
    %c0_245 = arith.constant 0 : index
    %356 = vector.load %arg12[%c18, %c0_244, %c0_245] : memref<24x8x32xf32, #tpu.memory_space<vmem>>, vector<1x8x32xf32>
    %357 = vector.shape_cast %356 : vector<1x8x32xf32> to vector<8x32xf32>
    %cst_246 = arith.constant dense<0.000000e+00> : vector<96x8xf32>
    %358 = tpu.matmul %272, %357, %cst_246 {dimension_numbers = #tpu.dot_dimension_numbers<[1], [1], [0], [0], [0, 0, 1, 0], [], []>} : vector<96x32xf32>, vector<8x32xf32>, vector<96x8xf32> -> vector<96x8xf32>
    %c18_247 = arith.constant 18 : index
    %c0_248 = arith.constant 0 : index
    %c0_249 = arith.constant 0 : index
    %359 = vector.load %arg13[%c18_247, %c0_248, %c0_249] : memref<24x1x8xf32, #tpu.memory_space<vmem>>, vector<1x1x8xf32>
    %360 = vector.shape_cast %359 : vector<1x1x8xf32> to vector<1x8xf32>
    %361 = vector.broadcast %360 : vector<1x8xf32> to vector<96x8xf32>
    %362 = arith.addf %358, %361 : vector<96x8xf32>
    %c22 = arith.constant 22 : index
    %c0_250 = arith.constant 0 : index
    %c0_251 = arith.constant 0 : index
    %363 = vector.load %arg12[%c22, %c0_250, %c0_251] : memref<24x8x32xf32, #tpu.memory_space<vmem>>, vector<1x8x32xf32>
    %364 = vector.shape_cast %363 : vector<1x8x32xf32> to vector<8x32xf32>
    %cst_252 = arith.constant dense<0.000000e+00> : vector<96x8xf32>
    %365 = tpu.matmul %272, %364, %cst_252 {dimension_numbers = #tpu.dot_dimension_numbers<[1], [1], [0], [0], [0, 0, 1, 0], [], []>} : vector<96x32xf32>, vector<8x32xf32>, vector<96x8xf32> -> vector<96x8xf32>
    %c22_253 = arith.constant 22 : index
    %c0_254 = arith.constant 0 : index
    %c0_255 = arith.constant 0 : index
    %366 = vector.load %arg13[%c22_253, %c0_254, %c0_255] : memref<24x1x8xf32, #tpu.memory_space<vmem>>, vector<1x1x8xf32>
    %367 = vector.shape_cast %366 : vector<1x1x8xf32> to vector<1x8xf32>
    %368 = vector.broadcast %367 : vector<1x8xf32> to vector<96x8xf32>
    %369 = arith.addf %365, %368 : vector<96x8xf32>
    %cst_256 = arith.constant dense<0.000000e+00> : vector<96x96xf32>
    %370 = tpu.matmul %355, %362, %cst_256 {dimension_numbers = #tpu.dot_dimension_numbers<[1], [1], [0], [0], [0, 0, 1, 0], [], []>} : vector<96x8xf32>, vector<96x8xf32>, vector<96x96xf32> -> vector<96x96xf32>
    %371 = arith.addf %370, %273 : vector<96x96xf32>
    %cst_257 = arith.constant dense<0xFF800000> : vector<96xf32>
    %372 = vector.multi_reduction <maximumf>, %371, %cst_257 [1] : vector<96x96xf32> to vector<96xf32>
    %373 = vector.shape_cast %372 : vector<96xf32> to vector<96x1xf32>
    %374 = vector.broadcast %373 : vector<96x1xf32> to vector<96x96xf32>
    %375 = arith.subf %371, %374 : vector<96x96xf32>
    %376 = math.exp %375 : vector<96x96xf32>
    %cst_258 = arith.constant dense<0.000000e+00> : vector<96xf32>
    %377 = vector.multi_reduction <add>, %376, %cst_258 [1] : vector<96x96xf32> to vector<96xf32>
    %378 = vector.shape_cast %377 : vector<96xf32> to vector<96x1xf32>
    %379 = vector.broadcast %378 : vector<96x1xf32> to vector<96x96xf32>
    %380 = arith.divf %376, %379 : vector<96x96xf32>
    %cst_259 = arith.constant dense<0.000000e+00> : vector<96x8xf32>
    %381 = tpu.matmul %380, %369, %cst_259 {dimension_numbers = #tpu.dot_dimension_numbers<[1], [0], [0], [1], [0, 0, 1, 1], [], []>} : vector<96x96xf32>, vector<96x8xf32>, vector<96x8xf32> -> vector<96x8xf32>
    %c6_260 = arith.constant 6 : index
    %c0_261 = arith.constant 0 : index
    %c0_262 = arith.constant 0 : index
    %382 = vector.load %arg14[%c6_260, %c0_261, %c0_262] : memref<8x8x32xf32, #tpu.memory_space<vmem>>, vector<1x8x32xf32>
    %383 = vector.shape_cast %382 : vector<1x8x32xf32> to vector<8x32xf32>
    %cst_263 = arith.constant dense<0.000000e+00> : vector<96x32xf32>
    %384 = tpu.matmul %381, %383, %cst_263 {dimension_numbers = #tpu.dot_dimension_numbers<[1], [0], [0], [1], [0, 0, 1, 1], [], []>} : vector<96x8xf32>, vector<8x32xf32>, vector<96x32xf32> -> vector<96x32xf32>
    %385 = arith.addf %348, %384 : vector<96x32xf32>
    %c15 = arith.constant 15 : index
    %c0_264 = arith.constant 0 : index
    %c0_265 = arith.constant 0 : index
    %386 = vector.load %arg12[%c15, %c0_264, %c0_265] : memref<24x8x32xf32, #tpu.memory_space<vmem>>, vector<1x8x32xf32>
    %387 = vector.shape_cast %386 : vector<1x8x32xf32> to vector<8x32xf32>
    %cst_266 = arith.constant dense<0.000000e+00> : vector<96x8xf32>
    %388 = tpu.matmul %272, %387, %cst_266 {dimension_numbers = #tpu.dot_dimension_numbers<[1], [1], [0], [0], [0, 0, 1, 0], [], []>} : vector<96x32xf32>, vector<8x32xf32>, vector<96x8xf32> -> vector<96x8xf32>
    %c15_267 = arith.constant 15 : index
    %c0_268 = arith.constant 0 : index
    %c0_269 = arith.constant 0 : index
    %389 = vector.load %arg13[%c15_267, %c0_268, %c0_269] : memref<24x1x8xf32, #tpu.memory_space<vmem>>, vector<1x1x8xf32>
    %390 = vector.shape_cast %389 : vector<1x1x8xf32> to vector<1x8xf32>
    %391 = vector.broadcast %390 : vector<1x8xf32> to vector<96x8xf32>
    %392 = arith.addf %388, %391 : vector<96x8xf32>
    %c19 = arith.constant 19 : index
    %c0_270 = arith.constant 0 : index
    %c0_271 = arith.constant 0 : index
    %393 = vector.load %arg12[%c19, %c0_270, %c0_271] : memref<24x8x32xf32, #tpu.memory_space<vmem>>, vector<1x8x32xf32>
    %394 = vector.shape_cast %393 : vector<1x8x32xf32> to vector<8x32xf32>
    %cst_272 = arith.constant dense<0.000000e+00> : vector<96x8xf32>
    %395 = tpu.matmul %272, %394, %cst_272 {dimension_numbers = #tpu.dot_dimension_numbers<[1], [1], [0], [0], [0, 0, 1, 0], [], []>} : vector<96x32xf32>, vector<8x32xf32>, vector<96x8xf32> -> vector<96x8xf32>
    %c19_273 = arith.constant 19 : index
    %c0_274 = arith.constant 0 : index
    %c0_275 = arith.constant 0 : index
    %396 = vector.load %arg13[%c19_273, %c0_274, %c0_275] : memref<24x1x8xf32, #tpu.memory_space<vmem>>, vector<1x1x8xf32>
    %397 = vector.shape_cast %396 : vector<1x1x8xf32> to vector<1x8xf32>
    %398 = vector.broadcast %397 : vector<1x8xf32> to vector<96x8xf32>
    %399 = arith.addf %395, %398 : vector<96x8xf32>
    %c23 = arith.constant 23 : index
    %c0_276 = arith.constant 0 : index
    %c0_277 = arith.constant 0 : index
    %400 = vector.load %arg12[%c23, %c0_276, %c0_277] : memref<24x8x32xf32, #tpu.memory_space<vmem>>, vector<1x8x32xf32>
    %401 = vector.shape_cast %400 : vector<1x8x32xf32> to vector<8x32xf32>
    %cst_278 = arith.constant dense<0.000000e+00> : vector<96x8xf32>
    %402 = tpu.matmul %272, %401, %cst_278 {dimension_numbers = #tpu.dot_dimension_numbers<[1], [1], [0], [0], [0, 0, 1, 0], [], []>} : vector<96x32xf32>, vector<8x32xf32>, vector<96x8xf32> -> vector<96x8xf32>
    %c23_279 = arith.constant 23 : index
    %c0_280 = arith.constant 0 : index
    %c0_281 = arith.constant 0 : index
    %403 = vector.load %arg13[%c23_279, %c0_280, %c0_281] : memref<24x1x8xf32, #tpu.memory_space<vmem>>, vector<1x1x8xf32>
    %404 = vector.shape_cast %403 : vector<1x1x8xf32> to vector<1x8xf32>
    %405 = vector.broadcast %404 : vector<1x8xf32> to vector<96x8xf32>
    %406 = arith.addf %402, %405 : vector<96x8xf32>
    %cst_282 = arith.constant dense<0.000000e+00> : vector<96x96xf32>
    %407 = tpu.matmul %392, %399, %cst_282 {dimension_numbers = #tpu.dot_dimension_numbers<[1], [1], [0], [0], [0, 0, 1, 0], [], []>} : vector<96x8xf32>, vector<96x8xf32>, vector<96x96xf32> -> vector<96x96xf32>
    %408 = arith.addf %407, %273 : vector<96x96xf32>
    %cst_283 = arith.constant dense<0xFF800000> : vector<96xf32>
    %409 = vector.multi_reduction <maximumf>, %408, %cst_283 [1] : vector<96x96xf32> to vector<96xf32>
    %410 = vector.shape_cast %409 : vector<96xf32> to vector<96x1xf32>
    %411 = vector.broadcast %410 : vector<96x1xf32> to vector<96x96xf32>
    %412 = arith.subf %408, %411 : vector<96x96xf32>
    %413 = math.exp %412 : vector<96x96xf32>
    %cst_284 = arith.constant dense<0.000000e+00> : vector<96xf32>
    %414 = vector.multi_reduction <add>, %413, %cst_284 [1] : vector<96x96xf32> to vector<96xf32>
    %415 = vector.shape_cast %414 : vector<96xf32> to vector<96x1xf32>
    %416 = vector.broadcast %415 : vector<96x1xf32> to vector<96x96xf32>
    %417 = arith.divf %413, %416 : vector<96x96xf32>
    %cst_285 = arith.constant dense<0.000000e+00> : vector<96x8xf32>
    %418 = tpu.matmul %417, %406, %cst_285 {dimension_numbers = #tpu.dot_dimension_numbers<[1], [0], [0], [1], [0, 0, 1, 1], [], []>} : vector<96x96xf32>, vector<96x8xf32>, vector<96x8xf32> -> vector<96x8xf32>
    %c7_286 = arith.constant 7 : index
    %c0_287 = arith.constant 0 : index
    %c0_288 = arith.constant 0 : index
    %419 = vector.load %arg14[%c7_286, %c0_287, %c0_288] : memref<8x8x32xf32, #tpu.memory_space<vmem>>, vector<1x8x32xf32>
    %420 = vector.shape_cast %419 : vector<1x8x32xf32> to vector<8x32xf32>
    %cst_289 = arith.constant dense<0.000000e+00> : vector<96x32xf32>
    %421 = tpu.matmul %418, %420, %cst_289 {dimension_numbers = #tpu.dot_dimension_numbers<[1], [0], [0], [1], [0, 0, 1, 1], [], []>} : vector<96x8xf32>, vector<8x32xf32>, vector<96x32xf32> -> vector<96x32xf32>
    %422 = arith.addf %385, %421 : vector<96x32xf32>
    %c1_290 = arith.constant 1 : index
    %c0_291 = arith.constant 0 : index
    %c0_292 = arith.constant 0 : index
    %423 = vector.load %arg15[%c1_290, %c0_291, %c0_292] : memref<2x1x32xf32, #tpu.memory_space<vmem>>, vector<1x1x32xf32>
    %424 = vector.shape_cast %423 : vector<1x1x32xf32> to vector<1x32xf32>
    %425 = vector.broadcast %424 : vector<1x32xf32> to vector<96x32xf32>
    %426 = arith.addf %422, %425 : vector<96x32xf32>
    %427 = arith.addf %272, %426 : vector<96x32xf32>
    %c4_293 = arith.constant 4 : index
    %c0_294 = arith.constant 0 : index
    %c0_295 = arith.constant 0 : index
    %428 = vector.load %arg20[%c4_293, %c0_294, %c0_295] : memref<8x1x32xf32, #tpu.memory_space<vmem>>, vector<1x1x32xf32>
    %429 = vector.shape_cast %428 : vector<1x1x32xf32> to vector<1x32xf32>
    %c5_296 = arith.constant 5 : index
    %c0_297 = arith.constant 0 : index
    %c0_298 = arith.constant 0 : index
    %430 = vector.load %arg20[%c5_296, %c0_297, %c0_298] : memref<8x1x32xf32, #tpu.memory_space<vmem>>, vector<1x1x32xf32>
    %431 = vector.shape_cast %430 : vector<1x1x32xf32> to vector<1x32xf32>
    %cst_299 = arith.constant dense<0.000000e+00> : vector<96xf32>
    %432 = vector.multi_reduction <add>, %427, %cst_299 [1] : vector<96x32xf32> to vector<96xf32>
    %433 = vector.shape_cast %432 : vector<96xf32> to vector<96x1xf32>
    %cst_300 = arith.constant 3.200000e+01 : f32
    %434 = vector.broadcast %cst_300 : f32 to vector<96x1xf32>
    %435 = arith.divf %433, %434 : vector<96x1xf32>
    %436 = vector.broadcast %435 : vector<96x1xf32> to vector<96x32xf32>
    %437 = arith.subf %427, %436 : vector<96x32xf32>
    %438 = arith.mulf %437, %437 : vector<96x32xf32>
    %cst_301 = arith.constant dense<0.000000e+00> : vector<96xf32>
    %439 = vector.multi_reduction <add>, %438, %cst_301 [1] : vector<96x32xf32> to vector<96xf32>
    %440 = vector.shape_cast %439 : vector<96xf32> to vector<96x1xf32>
    %cst_302 = arith.constant 3.200000e+01 : f32
    %441 = vector.broadcast %cst_302 : f32 to vector<96x1xf32>
    %442 = arith.divf %440, %441 : vector<96x1xf32>
    %443 = vector.broadcast %435 : vector<96x1xf32> to vector<96x32xf32>
    %444 = arith.subf %427, %443 : vector<96x32xf32>
    %cst_303 = arith.constant 9.99999974E-6 : f32
    %445 = vector.broadcast %cst_303 : f32 to vector<96x1xf32>
    %446 = arith.addf %442, %445 : vector<96x1xf32>
    %447 = math.rsqrt %446 : vector<96x1xf32>
    %448 = vector.broadcast %447 : vector<96x1xf32> to vector<96x32xf32>
    %449 = arith.mulf %444, %448 : vector<96x32xf32>
    %450 = vector.broadcast %429 : vector<1x32xf32> to vector<96x32xf32>
    %451 = arith.mulf %449, %450 : vector<96x32xf32>
    %452 = vector.broadcast %431 : vector<1x32xf32> to vector<96x32xf32>
    %453 = arith.addf %451, %452 : vector<96x32xf32>
    %c1_304 = arith.constant 1 : index
    %c0_305 = arith.constant 0 : index
    %c0_306 = arith.constant 0 : index
    %454 = vector.load %arg16[%c1_304, %c0_305, %c0_306] : memref<2x64x32xf32, #tpu.memory_space<vmem>>, vector<1x64x32xf32>
    %455 = vector.shape_cast %454 : vector<1x64x32xf32> to vector<64x32xf32>
    %cst_307 = arith.constant dense<0.000000e+00> : vector<96x64xf32>
    %456 = tpu.matmul %453, %455, %cst_307 {dimension_numbers = #tpu.dot_dimension_numbers<[1], [1], [0], [0], [0, 0, 1, 0], [], []>} : vector<96x32xf32>, vector<64x32xf32>, vector<96x64xf32> -> vector<96x64xf32>
    %c1_308 = arith.constant 1 : index
    %c0_309 = arith.constant 0 : index
    %c0_310 = arith.constant 0 : index
    %457 = vector.load %arg17[%c1_308, %c0_309, %c0_310] : memref<2x1x64xf32, #tpu.memory_space<vmem>>, vector<1x1x64xf32>
    %458 = vector.shape_cast %457 : vector<1x1x64xf32> to vector<1x64xf32>
    %459 = vector.broadcast %458 : vector<1x64xf32> to vector<96x64xf32>
    %460 = arith.addf %456, %459 : vector<96x64xf32>
    %461 = arith.mulf %460, %460 : vector<96x64xf32>
    %462 = arith.mulf %460, %461 : vector<96x64xf32>
    %cst_311 = arith.constant 4.471500e-02 : f32
    %463 = vector.broadcast %cst_311 : f32 to vector<96x64xf32>
    %464 = arith.mulf %463, %462 : vector<96x64xf32>
    %465 = arith.addf %460, %464 : vector<96x64xf32>
    %cst_312 = arith.constant 0.797884583 : f32
    %466 = vector.broadcast %cst_312 : f32 to vector<96x64xf32>
    %467 = arith.mulf %466, %465 : vector<96x64xf32>
    %468 = math.tanh %467 : vector<96x64xf32>
    %cst_313 = arith.constant 1.000000e+00 : f32
    %469 = vector.broadcast %cst_313 : f32 to vector<96x64xf32>
    %470 = arith.addf %469, %468 : vector<96x64xf32>
    %cst_314 = arith.constant 5.000000e-01 : f32
    %471 = vector.broadcast %cst_314 : f32 to vector<96x64xf32>
    %472 = arith.mulf %471, %470 : vector<96x64xf32>
    %473 = arith.mulf %460, %472 : vector<96x64xf32>
    %c1_315 = arith.constant 1 : index
    %c0_316 = arith.constant 0 : index
    %c0_317 = arith.constant 0 : index
    %474 = vector.load %arg18[%c1_315, %c0_316, %c0_317] : memref<2x32x64xf32, #tpu.memory_space<vmem>>, vector<1x32x64xf32>
    %475 = vector.shape_cast %474 : vector<1x32x64xf32> to vector<32x64xf32>
    %cst_318 = arith.constant dense<0.000000e+00> : vector<96x32xf32>
    %476 = tpu.matmul %473, %475, %cst_318 {dimension_numbers = #tpu.dot_dimension_numbers<[1], [1], [0], [0], [0, 0, 1, 0], [], []>} : vector<96x64xf32>, vector<32x64xf32>, vector<96x32xf32> -> vector<96x32xf32>
    %c1_319 = arith.constant 1 : index
    %c0_320 = arith.constant 0 : index
    %c0_321 = arith.constant 0 : index
    %477 = vector.load %arg19[%c1_319, %c0_320, %c0_321] : memref<2x1x32xf32, #tpu.memory_space<vmem>>, vector<1x1x32xf32>
    %478 = vector.shape_cast %477 : vector<1x1x32xf32> to vector<1x32xf32>
    %479 = vector.broadcast %478 : vector<1x32xf32> to vector<96x32xf32>
    %480 = arith.addf %476, %479 : vector<96x32xf32>
    %481 = arith.addf %453, %480 : vector<96x32xf32>
    %c6_322 = arith.constant 6 : index
    %c0_323 = arith.constant 0 : index
    %c0_324 = arith.constant 0 : index
    %482 = vector.load %arg20[%c6_322, %c0_323, %c0_324] : memref<8x1x32xf32, #tpu.memory_space<vmem>>, vector<1x1x32xf32>
    %483 = vector.shape_cast %482 : vector<1x1x32xf32> to vector<1x32xf32>
    %c7_325 = arith.constant 7 : index
    %c0_326 = arith.constant 0 : index
    %c0_327 = arith.constant 0 : index
    %484 = vector.load %arg20[%c7_325, %c0_326, %c0_327] : memref<8x1x32xf32, #tpu.memory_space<vmem>>, vector<1x1x32xf32>
    %485 = vector.shape_cast %484 : vector<1x1x32xf32> to vector<1x32xf32>
    %cst_328 = arith.constant dense<0.000000e+00> : vector<96xf32>
    %486 = vector.multi_reduction <add>, %481, %cst_328 [1] : vector<96x32xf32> to vector<96xf32>
    %487 = vector.shape_cast %486 : vector<96xf32> to vector<96x1xf32>
    %cst_329 = arith.constant 3.200000e+01 : f32
    %488 = vector.broadcast %cst_329 : f32 to vector<96x1xf32>
    %489 = arith.divf %487, %488 : vector<96x1xf32>
    %490 = vector.broadcast %489 : vector<96x1xf32> to vector<96x32xf32>
    %491 = arith.subf %481, %490 : vector<96x32xf32>
    %492 = arith.mulf %491, %491 : vector<96x32xf32>
    %cst_330 = arith.constant dense<0.000000e+00> : vector<96xf32>
    %493 = vector.multi_reduction <add>, %492, %cst_330 [1] : vector<96x32xf32> to vector<96xf32>
    %494 = vector.shape_cast %493 : vector<96xf32> to vector<96x1xf32>
    %cst_331 = arith.constant 3.200000e+01 : f32
    %495 = vector.broadcast %cst_331 : f32 to vector<96x1xf32>
    %496 = arith.divf %494, %495 : vector<96x1xf32>
    %497 = vector.broadcast %489 : vector<96x1xf32> to vector<96x32xf32>
    %498 = arith.subf %481, %497 : vector<96x32xf32>
    %cst_332 = arith.constant 9.99999974E-6 : f32
    %499 = vector.broadcast %cst_332 : f32 to vector<96x1xf32>
    %500 = arith.addf %496, %499 : vector<96x1xf32>
    %501 = math.rsqrt %500 : vector<96x1xf32>
    %502 = vector.broadcast %501 : vector<96x1xf32> to vector<96x32xf32>
    %503 = arith.mulf %498, %502 : vector<96x32xf32>
    %504 = vector.broadcast %483 : vector<1x32xf32> to vector<96x32xf32>
    %505 = arith.mulf %503, %504 : vector<96x32xf32>
    %506 = vector.broadcast %485 : vector<1x32xf32> to vector<96x32xf32>
    %507 = arith.addf %505, %506 : vector<96x32xf32>
    %508 = vector.extract_strided_slice %507 {offsets = [0, 0], sizes = [32, 32], strides = [1, 1]} : vector<96x32xf32> to vector<32x32xf32>
    %c0_333 = arith.constant 0 : index
    %c0_334 = arith.constant 0 : index
    %c0_335 = arith.constant 0 : index
    %509 = vector.load %arg3[%c0_333, %c0_334, %c0_335] : memref<2x8x32xf32, #tpu.memory_space<vmem>>, vector<1x8x32xf32>
    %510 = vector.shape_cast %509 : vector<1x8x32xf32> to vector<8x32xf32>
    %c0_336 = arith.constant 0 : index
    %c0_337 = arith.constant 0 : index
    %c0_338 = arith.constant 0 : index
    %511 = vector.load %arg21[%c0_336, %c0_337, %c0_338] : memref<2x32x32xf32, #tpu.memory_space<vmem>>, vector<1x32x32xf32>
    %512 = vector.shape_cast %511 : vector<1x32x32xf32> to vector<32x32xf32>
    %cst_339 = arith.constant dense<0.000000e+00> : vector<32x32xf32>
    %513 = tpu.matmul %512, %508, %cst_339 {dimension_numbers = #tpu.dot_dimension_numbers<[1], [1], [0], [0], [0, 0, 1, 0], [], []>} : vector<32x32xf32>, vector<32x32xf32>, vector<32x32xf32> -> vector<32x32xf32>
    %c0_340 = arith.constant 0 : index
    %c0_341 = arith.constant 0 : index
    %c0_342 = arith.constant 0 : index
    %514 = vector.load %arg22[%c0_340, %c0_341, %c0_342] : memref<2x32x8xf32, #tpu.memory_space<vmem>>, vector<1x32x8xf32>
    %515 = vector.shape_cast %514 : vector<1x32x8xf32> to vector<32x8xf32>
    %cst_343 = arith.constant dense<0.000000e+00> : vector<32x32xf32>
    %516 = tpu.matmul %515, %510, %cst_343 {dimension_numbers = #tpu.dot_dimension_numbers<[1], [0], [0], [1], [0, 0, 1, 1], [], []>} : vector<32x8xf32>, vector<8x32xf32>, vector<32x32xf32> -> vector<32x32xf32>
    %517 = arith.addf %513, %516 : vector<32x32xf32>
    %c0_344 = arith.constant 0 : index
    %c0_345 = arith.constant 0 : index
    %c0_346 = arith.constant 0 : index
    %518 = vector.load %arg24[%c0_344, %c0_345, %c0_346] : memref<4x32x1xf32, #tpu.memory_space<vmem>>, vector<1x32x1xf32>
    %519 = vector.shape_cast %518 : vector<1x32x1xf32> to vector<32x1xf32>
    %520 = vector.broadcast %519 : vector<32x1xf32> to vector<32x32xf32>
    %521 = arith.addf %517, %520 : vector<32x32xf32>
    %c1_347 = arith.constant 1 : index
    %c0_348 = arith.constant 0 : index
    %c0_349 = arith.constant 0 : index
    %522 = vector.load %arg21[%c1_347, %c0_348, %c0_349] : memref<2x32x32xf32, #tpu.memory_space<vmem>>, vector<1x32x32xf32>
    %523 = vector.shape_cast %522 : vector<1x32x32xf32> to vector<32x32xf32>
    %cst_350 = arith.constant dense<0.000000e+00> : vector<32x32xf32>
    %524 = tpu.matmul %523, %508, %cst_350 {dimension_numbers = #tpu.dot_dimension_numbers<[1], [1], [0], [0], [0, 0, 1, 0], [], []>} : vector<32x32xf32>, vector<32x32xf32>, vector<32x32xf32> -> vector<32x32xf32>
    %c1_351 = arith.constant 1 : index
    %c0_352 = arith.constant 0 : index
    %c0_353 = arith.constant 0 : index
    %525 = vector.load %arg22[%c1_351, %c0_352, %c0_353] : memref<2x32x8xf32, #tpu.memory_space<vmem>>, vector<1x32x8xf32>
    %526 = vector.shape_cast %525 : vector<1x32x8xf32> to vector<32x8xf32>
    %cst_354 = arith.constant dense<0.000000e+00> : vector<32x32xf32>
    %527 = tpu.matmul %526, %510, %cst_354 {dimension_numbers = #tpu.dot_dimension_numbers<[1], [0], [0], [1], [0, 0, 1, 1], [], []>} : vector<32x8xf32>, vector<8x32xf32>, vector<32x32xf32> -> vector<32x32xf32>
    %528 = arith.addf %524, %527 : vector<32x32xf32>
    %c1_355 = arith.constant 1 : index
    %c0_356 = arith.constant 0 : index
    %c0_357 = arith.constant 0 : index
    %529 = vector.load %arg24[%c1_355, %c0_356, %c0_357] : memref<4x32x1xf32, #tpu.memory_space<vmem>>, vector<1x32x1xf32>
    %530 = vector.shape_cast %529 : vector<1x32x1xf32> to vector<32x1xf32>
    %531 = vector.broadcast %530 : vector<32x1xf32> to vector<32x32xf32>
    %532 = arith.addf %528, %531 : vector<32x32xf32>
    %533 = arith.negf %521 : vector<32x32xf32>
    %534 = math.exp %533 : vector<32x32xf32>
    %cst_358 = arith.constant 1.000000e+00 : f32
    %535 = vector.broadcast %cst_358 : f32 to vector<32x32xf32>
    %536 = arith.addf %535, %534 : vector<32x32xf32>
    %537 = arith.divf %535, %536 : vector<32x32xf32>
    %538 = math.tanh %532 : vector<32x32xf32>
    %539 = arith.mulf %537, %538 : vector<32x32xf32>
    %c0_359 = arith.constant 0 : index
    %c0_360 = arith.constant 0 : index
    %c0_361 = arith.constant 0 : index
    %540 = vector.load %arg2[%c0_359, %c0_360, %c0_361] : memref<2x32x32xf32, #tpu.memory_space<vmem>>, vector<1x32x32xf32>
    %541 = vector.shape_cast %540 : vector<1x32x32xf32> to vector<32x32xf32>
    %c0_362 = arith.constant 0 : index
    %c0_363 = arith.constant 0 : index
    %c0_364 = arith.constant 0 : index
    %542 = vector.load %arg23[%c0_362, %c0_363, %c0_364] : memref<2x32x32xf32, #tpu.memory_space<vmem>>, vector<1x32x32xf32>
    %543 = vector.shape_cast %542 : vector<1x32x32xf32> to vector<32x32xf32>
    %cst_365 = arith.constant dense<0.000000e+00> : vector<32x32xf32>
    %544 = tpu.matmul %543, %539, %cst_365 {dimension_numbers = #tpu.dot_dimension_numbers<[1], [0], [0], [1], [0, 0, 1, 1], [], []>} : vector<32x32xf32>, vector<32x32xf32>, vector<32x32xf32> -> vector<32x32xf32>
    %545 = arith.addf %541, %544 : vector<32x32xf32>
    %c2_366 = arith.constant 2 : index
    %c0_367 = arith.constant 0 : index
    %c0_368 = arith.constant 0 : index
    %546 = vector.load %arg24[%c2_366, %c0_367, %c0_368] : memref<4x32x1xf32, #tpu.memory_space<vmem>>, vector<1x32x1xf32>
    %547 = vector.shape_cast %546 : vector<1x32x1xf32> to vector<32x1xf32>
    %548 = vector.broadcast %547 : vector<32x1xf32> to vector<32x32xf32>
    %549 = arith.addf %545, %548 : vector<32x32xf32>
    %cst_369 = arith.constant 0.707106769 : f32
    %550 = vector.broadcast %cst_369 : f32 to vector<32x32xf32>
    %551 = arith.mulf %549, %550 : vector<32x32xf32>
    %c1_370 = arith.constant 1 : index
    %c0_371 = arith.constant 0 : index
    %c0_372 = arith.constant 0 : index
    %552 = vector.load %arg23[%c1_370, %c0_371, %c0_372] : memref<2x32x32xf32, #tpu.memory_space<vmem>>, vector<1x32x32xf32>
    %553 = vector.shape_cast %552 : vector<1x32x32xf32> to vector<32x32xf32>
    %cst_373 = arith.constant dense<0.000000e+00> : vector<32x32xf32>
    %554 = tpu.matmul %553, %539, %cst_373 {dimension_numbers = #tpu.dot_dimension_numbers<[1], [0], [0], [1], [0, 0, 1, 1], [], []>} : vector<32x32xf32>, vector<32x32xf32>, vector<32x32xf32> -> vector<32x32xf32>
    %c3_374 = arith.constant 3 : index
    %c0_375 = arith.constant 0 : index
    %c0_376 = arith.constant 0 : index
    %555 = vector.load %arg24[%c3_374, %c0_375, %c0_376] : memref<4x32x1xf32, #tpu.memory_space<vmem>>, vector<1x32x1xf32>
    %556 = vector.shape_cast %555 : vector<1x32x1xf32> to vector<32x1xf32>
    %557 = vector.broadcast %556 : vector<32x1xf32> to vector<32x32xf32>
    %558 = arith.addf %554, %557 : vector<32x32xf32>
    %c0_377 = arith.constant 0 : index
    %c0_378 = arith.constant 0 : index
    %c0_379 = arith.constant 0 : index
    %559 = vector.load %arg25[%c0_377, %c0_378, %c0_379] : memref<2x64x32xf32, #tpu.memory_space<vmem>>, vector<1x32x32xf32>
    %560 = vector.shape_cast %559 : vector<1x32x32xf32> to vector<32x32xf32>
    %561 = vector.shape_cast %551 : vector<32x32xf32> to vector<1x32x32xf32>
    tpu.vector_store %arg25[%c0_377, %c0_378, %c0_379], %561 {strides = array<i32>} : memref<2x64x32xf32, #tpu.memory_space<vmem>>, vector<1x32x32xf32>,
    %c0_380 = arith.constant 0 : index
    %c32 = arith.constant 32 : index
    %c0_381 = arith.constant 0 : index
    %562 = vector.load %arg25[%c0_380, %c32, %c0_381] : memref<2x64x32xf32, #tpu.memory_space<vmem>>, vector<1x32x32xf32>
    %563 = vector.shape_cast %562 : vector<1x32x32xf32> to vector<32x32xf32>
    %564 = vector.shape_cast %558 : vector<32x32xf32> to vector<1x32x32xf32>
    tpu.vector_store %arg25[%c0_380, %c32, %c0_381], %564 {strides = array<i32>} : memref<2x64x32xf32, #tpu.memory_space<vmem>>, vector<1x32x32xf32>,
    %565 = vector.extract_strided_slice %507 {offsets = [48, 0], sizes = [32, 32], strides = [1, 1]} : vector<96x32xf32> to vector<32x32xf32>
    %c1_382 = arith.constant 1 : index
    %c0_383 = arith.constant 0 : index
    %c0_384 = arith.constant 0 : index
    %566 = vector.load %arg3[%c1_382, %c0_383, %c0_384] : memref<2x8x32xf32, #tpu.memory_space<vmem>>, vector<1x8x32xf32>
    %567 = vector.shape_cast %566 : vector<1x8x32xf32> to vector<8x32xf32>
    %c0_385 = arith.constant 0 : index
    %c0_386 = arith.constant 0 : index
    %c0_387 = arith.constant 0 : index
    %568 = vector.load %arg21[%c0_385, %c0_386, %c0_387] : memref<2x32x32xf32, #tpu.memory_space<vmem>>, vector<1x32x32xf32>
    %569 = vector.shape_cast %568 : vector<1x32x32xf32> to vector<32x32xf32>
    %cst_388 = arith.constant dense<0.000000e+00> : vector<32x32xf32>
    %570 = tpu.matmul %569, %565, %cst_388 {dimension_numbers = #tpu.dot_dimension_numbers<[1], [1], [0], [0], [0, 0, 1, 0], [], []>} : vector<32x32xf32>, vector<32x32xf32>, vector<32x32xf32> -> vector<32x32xf32>
    %c0_389 = arith.constant 0 : index
    %c0_390 = arith.constant 0 : index
    %c0_391 = arith.constant 0 : index
    %571 = vector.load %arg22[%c0_389, %c0_390, %c0_391] : memref<2x32x8xf32, #tpu.memory_space<vmem>>, vector<1x32x8xf32>
    %572 = vector.shape_cast %571 : vector<1x32x8xf32> to vector<32x8xf32>
    %cst_392 = arith.constant dense<0.000000e+00> : vector<32x32xf32>
    %573 = tpu.matmul %572, %567, %cst_392 {dimension_numbers = #tpu.dot_dimension_numbers<[1], [0], [0], [1], [0, 0, 1, 1], [], []>} : vector<32x8xf32>, vector<8x32xf32>, vector<32x32xf32> -> vector<32x32xf32>
    %574 = arith.addf %570, %573 : vector<32x32xf32>
    %c0_393 = arith.constant 0 : index
    %c0_394 = arith.constant 0 : index
    %c0_395 = arith.constant 0 : index
    %575 = vector.load %arg24[%c0_393, %c0_394, %c0_395] : memref<4x32x1xf32, #tpu.memory_space<vmem>>, vector<1x32x1xf32>
    %576 = vector.shape_cast %575 : vector<1x32x1xf32> to vector<32x1xf32>
    %577 = vector.broadcast %576 : vector<32x1xf32> to vector<32x32xf32>
    %578 = arith.addf %574, %577 : vector<32x32xf32>
    %c1_396 = arith.constant 1 : index
    %c0_397 = arith.constant 0 : index
    %c0_398 = arith.constant 0 : index
    %579 = vector.load %arg21[%c1_396, %c0_397, %c0_398] : memref<2x32x32xf32, #tpu.memory_space<vmem>>, vector<1x32x32xf32>
    %580 = vector.shape_cast %579 : vector<1x32x32xf32> to vector<32x32xf32>
    %cst_399 = arith.constant dense<0.000000e+00> : vector<32x32xf32>
    %581 = tpu.matmul %580, %565, %cst_399 {dimension_numbers = #tpu.dot_dimension_numbers<[1], [1], [0], [0], [0, 0, 1, 0], [], []>} : vector<32x32xf32>, vector<32x32xf32>, vector<32x32xf32> -> vector<32x32xf32>
    %c1_400 = arith.constant 1 : index
    %c0_401 = arith.constant 0 : index
    %c0_402 = arith.constant 0 : index
    %582 = vector.load %arg22[%c1_400, %c0_401, %c0_402] : memref<2x32x8xf32, #tpu.memory_space<vmem>>, vector<1x32x8xf32>
    %583 = vector.shape_cast %582 : vector<1x32x8xf32> to vector<32x8xf32>
    %cst_403 = arith.constant dense<0.000000e+00> : vector<32x32xf32>
    %584 = tpu.matmul %583, %567, %cst_403 {dimension_numbers = #tpu.dot_dimension_numbers<[1], [0], [0], [1], [0, 0, 1, 1], [], []>} : vector<32x8xf32>, vector<8x32xf32>, vector<32x32xf32> -> vector<32x32xf32>
    %585 = arith.addf %581, %584 : vector<32x32xf32>
    %c1_404 = arith.constant 1 : index
    %c0_405 = arith.constant 0 : index
    %c0_406 = arith.constant 0 : index
    %586 = vector.load %arg24[%c1_404, %c0_405, %c0_406] : memref<4x32x1xf32, #tpu.memory_space<vmem>>, vector<1x32x1xf32>
    %587 = vector.shape_cast %586 : vector<1x32x1xf32> to vector<32x1xf32>
    %588 = vector.broadcast %587 : vector<32x1xf32> to vector<32x32xf32>
    %589 = arith.addf %585, %588 : vector<32x32xf32>
    %590 = arith.negf %578 : vector<32x32xf32>
    %591 = math.exp %590 : vector<32x32xf32>
    %cst_407 = arith.constant 1.000000e+00 : f32
    %592 = vector.broadcast %cst_407 : f32 to vector<32x32xf32>
    %593 = arith.addf %592, %591 : vector<32x32xf32>
    %594 = arith.divf %592, %593 : vector<32x32xf32>
    %595 = math.tanh %589 : vector<32x32xf32>
    %596 = arith.mulf %594, %595 : vector<32x32xf32>
    %c1_408 = arith.constant 1 : index
    %c0_409 = arith.constant 0 : index
    %c0_410 = arith.constant 0 : index
    %597 = vector.load %arg2[%c1_408, %c0_409, %c0_410] : memref<2x32x32xf32, #tpu.memory_space<vmem>>, vector<1x32x32xf32>
    %598 = vector.shape_cast %597 : vector<1x32x32xf32> to vector<32x32xf32>
    %c0_411 = arith.constant 0 : index
    %c0_412 = arith.constant 0 : index
    %c0_413 = arith.constant 0 : index
    %599 = vector.load %arg23[%c0_411, %c0_412, %c0_413] : memref<2x32x32xf32, #tpu.memory_space<vmem>>, vector<1x32x32xf32>
    %600 = vector.shape_cast %599 : vector<1x32x32xf32> to vector<32x32xf32>
    %cst_414 = arith.constant dense<0.000000e+00> : vector<32x32xf32>
    %601 = tpu.matmul %600, %596, %cst_414 {dimension_numbers = #tpu.dot_dimension_numbers<[1], [0], [0], [1], [0, 0, 1, 1], [], []>} : vector<32x32xf32>, vector<32x32xf32>, vector<32x32xf32> -> vector<32x32xf32>
    %602 = arith.addf %598, %601 : vector<32x32xf32>
    %c2_415 = arith.constant 2 : index
    %c0_416 = arith.constant 0 : index
    %c0_417 = arith.constant 0 : index
    %603 = vector.load %arg24[%c2_415, %c0_416, %c0_417] : memref<4x32x1xf32, #tpu.memory_space<vmem>>, vector<1x32x1xf32>
    %604 = vector.shape_cast %603 : vector<1x32x1xf32> to vector<32x1xf32>
    %605 = vector.broadcast %604 : vector<32x1xf32> to vector<32x32xf32>
    %606 = arith.addf %602, %605 : vector<32x32xf32>
    %cst_418 = arith.constant 0.707106769 : f32
    %607 = vector.broadcast %cst_418 : f32 to vector<32x32xf32>
    %608 = arith.mulf %606, %607 : vector<32x32xf32>
    %c1_419 = arith.constant 1 : index
    %c0_420 = arith.constant 0 : index
    %c0_421 = arith.constant 0 : index
    %609 = vector.load %arg23[%c1_419, %c0_420, %c0_421] : memref<2x32x32xf32, #tpu.memory_space<vmem>>, vector<1x32x32xf32>
    %610 = vector.shape_cast %609 : vector<1x32x32xf32> to vector<32x32xf32>
    %cst_422 = arith.constant dense<0.000000e+00> : vector<32x32xf32>
    %611 = tpu.matmul %610, %596, %cst_422 {dimension_numbers = #tpu.dot_dimension_numbers<[1], [0], [0], [1], [0, 0, 1, 1], [], []>} : vector<32x32xf32>, vector<32x32xf32>, vector<32x32xf32> -> vector<32x32xf32>
    %c3_423 = arith.constant 3 : index
    %c0_424 = arith.constant 0 : index
    %c0_425 = arith.constant 0 : index
    %612 = vector.load %arg24[%c3_423, %c0_424, %c0_425] : memref<4x32x1xf32, #tpu.memory_space<vmem>>, vector<1x32x1xf32>
    %613 = vector.shape_cast %612 : vector<1x32x1xf32> to vector<32x1xf32>
    %614 = vector.broadcast %613 : vector<32x1xf32> to vector<32x32xf32>
    %615 = arith.addf %611, %614 : vector<32x32xf32>
    %c1_426 = arith.constant 1 : index
    %c0_427 = arith.constant 0 : index
    %c0_428 = arith.constant 0 : index
    %616 = vector.load %arg25[%c1_426, %c0_427, %c0_428] : memref<2x64x32xf32, #tpu.memory_space<vmem>>, vector<1x32x32xf32>
    %617 = vector.shape_cast %616 : vector<1x32x32xf32> to vector<32x32xf32>
    %618 = vector.shape_cast %608 : vector<32x32xf32> to vector<1x32x32xf32>
    tpu.vector_store %arg25[%c1_426, %c0_427, %c0_428], %618 {strides = array<i32>} : memref<2x64x32xf32, #tpu.memory_space<vmem>>, vector<1x32x32xf32>,
    %c1_429 = arith.constant 1 : index
    %c32_430 = arith.constant 32 : index
    %c0_431 = arith.constant 0 : index
    %619 = vector.load %arg25[%c1_429, %c32_430, %c0_431] : memref<2x64x32xf32, #tpu.memory_space<vmem>>, vector<1x32x32xf32>
    %620 = vector.shape_cast %619 : vector<1x32x32xf32> to vector<32x32xf32>
    %621 = vector.shape_cast %615 : vector<32x32xf32> to vector<1x32x32xf32>
    tpu.vector_store %arg25[%c1_429, %c32_430, %c0_431], %621 {strides = array<i32>} : memref<2x64x32xf32, #tpu.memory_space<vmem>>, vector<1x32x32xf32>,
    return
  }
  func.func @transform_0(%arg0: i32) -> (i32, i32, i32) {
    %c0_i32 = arith.constant 0 : i32
    %c0_i32_0 = arith.constant 0 : i32
    %c0_i32_1 = arith.constant 0 : i32
    return %arg0, %c0_i32, %c0_i32_0 : i32, i32, i32
  }
  func.func @transform_1(%arg0: i32) -> (i32, i32, i32) {
    %c0_i32 = arith.constant 0 : i32
    %c0_i32_0 = arith.constant 0 : i32
    %c0_i32_1 = arith.constant 0 : i32
    return %arg0, %c0_i32, %c0_i32_0 : i32, i32, i32
  }
  func.func @transform_2(%arg0: i32) -> (i32, i32, i32) {
    %c0_i32 = arith.constant 0 : i32
    %c0_i32_0 = arith.constant 0 : i32
    %c0_i32_1 = arith.constant 0 : i32
    return %arg0, %c0_i32, %c0_i32_0 : i32, i32, i32
  }
  func.func @transform_3(%arg0: i32) -> (i32, i32, i32) {
    %c0_i32 = arith.constant 0 : i32
    %c0_i32_0 = arith.constant 0 : i32
    %c0_i32_1 = arith.constant 0 : i32
    return %arg0, %c0_i32, %c0_i32_0 : i32, i32, i32
  }
  func.func @transform_4(%arg0: i32) -> (i32, i32, i32) {
    %c0_i32 = arith.constant 0 : i32
    %c0_i32_0 = arith.constant 0 : i32
    %c0_i32_1 = arith.constant 0 : i32
    return %arg0, %c0_i32, %c0_i32_0 : i32, i32, i32
  }
  func.func @transform_5(%arg0: i32) -> (i32, i32) {
    %c0_i32 = arith.constant 0 : i32
    %c0_i32_0 = arith.constant 0 : i32
    %c0_i32_1 = arith.constant 0 : i32
    return %c0_i32, %c0_i32_0 : i32, i32
  }
  func.func @transform_6(%arg0: i32) -> (i32, i32) {
    %c0_i32 = arith.constant 0 : i32
    %c0_i32_0 = arith.constant 0 : i32
    %c0_i32_1 = arith.constant 0 : i32
    return %c0_i32, %c0_i32_0 : i32, i32
  }
  func.func @transform_7(%arg0: i32) -> (i32, i32) {
    %c0_i32 = arith.constant 0 : i32
    %c0_i32_0 = arith.constant 0 : i32
    %c0_i32_1 = arith.constant 0 : i32
    return %c0_i32, %c0_i32_0 : i32, i32
  }
  func.func @transform_8(%arg0: i32) -> (i32, i32) {
    %c0_i32 = arith.constant 0 : i32
    %c0_i32_0 = arith.constant 0 : i32
    %c0_i32_1 = arith.constant 0 : i32
    return %c0_i32, %c0_i32_0 : i32, i32
  }
  func.func @transform_9(%arg0: i32) -> (i32, i32) {
    %c0_i32 = arith.constant 0 : i32
    %c0_i32_0 = arith.constant 0 : i32
    %c0_i32_1 = arith.constant 0 : i32
    return %c0_i32, %c0_i32_0 : i32, i32
  }
  func.func @transform_10(%arg0: i32) -> (i32, i32) {
    %c0_i32 = arith.constant 0 : i32
    %c0_i32_0 = arith.constant 0 : i32
    %c0_i32_1 = arith.constant 0 : i32
    return %c0_i32, %c0_i32_0 : i32, i32
  }
  func.func @transform_11(%arg0: i32) -> (i32, i32, i32) {
    %c0_i32 = arith.constant 0 : i32
    %c0_i32_0 = arith.constant 0 : i32
    %c0_i32_1 = arith.constant 0 : i32
    %c0_i32_2 = arith.constant 0 : i32
    return %c0_i32, %c0_i32_0, %c0_i32_1 : i32, i32, i32
  }
  func.func @transform_12(%arg0: i32) -> (i32, i32, i32) {
    %c0_i32 = arith.constant 0 : i32
    %c0_i32_0 = arith.constant 0 : i32
    %c0_i32_1 = arith.constant 0 : i32
    %c0_i32_2 = arith.constant 0 : i32
    return %c0_i32, %c0_i32_0, %c0_i32_1 : i32, i32, i32
  }
  func.func @transform_13(%arg0: i32) -> (i32, i32, i32) {
    %c0_i32 = arith.constant 0 : i32
    %c0_i32_0 = arith.constant 0 : i32
    %c0_i32_1 = arith.constant 0 : i32
    %c0_i32_2 = arith.constant 0 : i32
    return %c0_i32, %c0_i32_0, %c0_i32_1 : i32, i32, i32
  }
  func.func @transform_14(%arg0: i32) -> (i32, i32, i32) {
    %c0_i32 = arith.constant 0 : i32
    %c0_i32_0 = arith.constant 0 : i32
    %c0_i32_1 = arith.constant 0 : i32
    %c0_i32_2 = arith.constant 0 : i32
    return %c0_i32, %c0_i32_0, %c0_i32_1 : i32, i32, i32
  }
  func.func @transform_15(%arg0: i32) -> (i32, i32, i32) {
    %c0_i32 = arith.constant 0 : i32
    %c0_i32_0 = arith.constant 0 : i32
    %c0_i32_1 = arith.constant 0 : i32
    %c0_i32_2 = arith.constant 0 : i32
    return %c0_i32, %c0_i32_0, %c0_i32_1 : i32, i32, i32
  }
  func.func @transform_16(%arg0: i32) -> (i32, i32, i32) {
    %c0_i32 = arith.constant 0 : i32
    %c0_i32_0 = arith.constant 0 : i32
    %c0_i32_1 = arith.constant 0 : i32
    %c0_i32_2 = arith.constant 0 : i32
    return %c0_i32, %c0_i32_0, %c0_i32_1 : i32, i32, i32
  }
  func.func @transform_17(%arg0: i32) -> (i32, i32, i32) {
    %c0_i32 = arith.constant 0 : i32
    %c0_i32_0 = arith.constant 0 : i32
    %c0_i32_1 = arith.constant 0 : i32
    %c0_i32_2 = arith.constant 0 : i32
    return %c0_i32, %c0_i32_0, %c0_i32_1 : i32, i32, i32
  }
  func.func @transform_18(%arg0: i32) -> (i32, i32, i32) {
    %c0_i32 = arith.constant 0 : i32
    %c0_i32_0 = arith.constant 0 : i32
    %c0_i32_1 = arith.constant 0 : i32
    %c0_i32_2 = arith.constant 0 : i32
    return %c0_i32, %c0_i32_0, %c0_i32_1 : i32, i32, i32
  }
  func.func @transform_19(%arg0: i32) -> (i32, i32, i32) {
    %c0_i32 = arith.constant 0 : i32
    %c0_i32_0 = arith.constant 0 : i32
    %c0_i32_1 = arith.constant 0 : i32
    %c0_i32_2 = arith.constant 0 : i32
    return %c0_i32, %c0_i32_0, %c0_i32_1 : i32, i32, i32
  }
  func.func @transform_20(%arg0: i32) -> (i32, i32, i32) {
    %c0_i32 = arith.constant 0 : i32
    %c0_i32_0 = arith.constant 0 : i32
    %c0_i32_1 = arith.constant 0 : i32
    %c0_i32_2 = arith.constant 0 : i32
    return %c0_i32, %c0_i32_0, %c0_i32_1 : i32, i32, i32
  }
  func.func @transform_21(%arg0: i32) -> (i32, i32, i32) {
    %c0_i32 = arith.constant 0 : i32
    %c0_i32_0 = arith.constant 0 : i32
    %c0_i32_1 = arith.constant 0 : i32
    %c0_i32_2 = arith.constant 0 : i32
    return %c0_i32, %c0_i32_0, %c0_i32_1 : i32, i32, i32
  }
  func.func @transform_22(%arg0: i32) -> (i32, i32, i32) {
    %c0_i32 = arith.constant 0 : i32
    %c0_i32_0 = arith.constant 0 : i32
    %c0_i32_1 = arith.constant 0 : i32
    %c0_i32_2 = arith.constant 0 : i32
    return %c0_i32, %c0_i32_0, %c0_i32_1 : i32, i32, i32
  }
  func.func @transform_23(%arg0: i32) -> (i32, i32, i32) {
    %c0_i32 = arith.constant 0 : i32
    %c0_i32_0 = arith.constant 0 : i32
    %c0_i32_1 = arith.constant 0 : i32
    %c0_i32_2 = arith.constant 0 : i32
    return %c0_i32, %c0_i32_0, %c0_i32_1 : i32, i32, i32
  }
  func.func @transform_24(%arg0: i32) -> (i32, i32, i32) {
    %c0_i32 = arith.constant 0 : i32
    %c0_i32_0 = arith.constant 0 : i32
    %c0_i32_1 = arith.constant 0 : i32
    return %arg0, %c0_i32, %c0_i32_0 : i32, i32, i32
  }
}

</mosaic_0001>

<bundles_post_ra>
// kernel: residual_block_forward.1
= control target key start
LH: loop header
LB: loop body
LE: loop exit
PB: predicated region body
PF: predicated region fallthrough
CT: control target
= control target key end

     0   :  { %s23650_s0 = inlined_call_operand.vmem [shape: f32[4,32,32], index: 0, kind: input, shape index: {}]   ;;  %s23651_s1 = inlined_call_operand.vmem [shape: f32[4,32,32], index: 1, kind: input, shape index: {}]   ;;  %s23652_s2 = inlined_call_operand.vmem [shape: f32[4,8,32], index: 2, kind: input, shape index: {}]   ;;  %s23653_s3 = inlined_call_operand.vmem [shape: f32[4,4,16], index: 3, kind: input, shape index: {}]   ;;  %s23654_s4 = inlined_call_operand.hbm [shape: f32[4,1,16], index: 4, kind: input, shape index: {}]   ;;  %s23655_s5 = inlined_call_operand.vmem [shape: f32[96,96], index: 5, kind: input, shape index: {}]   ;;  %s23656_s6 = inlined_call_operand.vmem [shape: f32[96,96], index: 6, kind: input, shape index: {}]   ;;  %s23657_s7 = inlined_call_operand.vmem [shape: f32[16,4], index: 7, kind: input, shape index: {}]   ;;  %s23658_s8 = inlined_call_operand.vmem [shape: f32[16,32], index: 8, kind: input, shape index: {}]   ;;  %s23659_s9 = inlined_call_operand.vmem [shape: f32[16,32], index: 9, kind: input, shape index: {}]   ;;  %s23660_s10 = inlined_call_operand.hbm [shape: f32[2,32], index: 10, kind: input, shape index: {}]   ;;  %s23661_s11 = inlined_call_operand.vmem [shape: f32[24,8,32], index: 11, kind: input, shape index: {}]   ;;  %s23662_s12 = inlined_call_operand.vmem [shape: f32[24,1,8], index: 12, kind: input, shape index: {}]   ;;  %s23663_s13 = inlined_call_operand.vmem [shape: f32[8,8,32], index: 13, kind: input, shape index: {}]   ;;  %s23664_s14 = inlined_call_operand.hbm [shape: f32[2,1,32], index: 14, kind: input, shape index: {}]   ;;  %s23665_s15 = inlined_call_operand.vmem [shape: f32[2,64,32], index: 15, kind: input, shape index: {}]   ;;  %s23666_s16 = inlined_call_operand.hbm [shape: f32[2,1,64], index: 16, kind: input, shape index: {}]   ;;  %s23667_s17 = inlined_call_operand.vmem [shape: f32[2,32,64], index: 17, kind: input, shape index: {}]   ;;  %s23668_s18 = inlined_call_operand.hbm [shape: f32[2,1,32], index: 18, kind: input, shape index: {}]   ;;  %s23669_s19 = inlined_call_operand.hbm [shape: f32[8,1,32], index: 19, kind: input, shape index: {}]   ;;  %s23670_s20 = inlined_call_operand.vmem [shape: f32[2,32,32], index: 20, kind: input, shape index: {}]   ;;  %s23671_s21 = inlined_call_operand.vmem [shape: f32[2,32,8], index: 21, kind: input, shape index: {}]   ;;  %s23672_s22 = inlined_call_operand.vmem [shape: f32[2,32,32], index: 22, kind: input, shape index: {}]   ;;  %s23673_s23 = inlined_call_operand.vmem [shape: f32[4,32,1], index: 23, kind: input, shape index: {}]   ;;  %s23674_s24 = inlined_call_operand.vmem [shape: f32[4,64,32], index: 24, kind: output, shape index: {}]  }
   0x1   :  { %23716 = sst [smem:[#allocation33_spill]] %s23650_s0 }
   0x2   :  { %23717 = sst [smem:[#allocation34_spill]] %s23651_s1 }
   0x3   :  { %23718 = sst [smem:[#allocation35_spill]] %s23652_s2 }
   0x4   :  { %23719 = sst [smem:[#allocation36_spill]] %s23653_s3 }
   0x5   :  { %23720 = sst [smem:[#allocation37_spill]] %s23654_s4 }
   0x6   :  { %23721 = sst [smem:[#allocation38_spill]] %s23655_s5 }
   0x7   :  { %23722 = sst [smem:[#allocation39_spill]] %s23656_s6 }
   0x8   :  { %23723 = sst [smem:[#allocation40_spill]] %s23657_s7 }
   0x9   :  { %23724 = sst [smem:[#allocation41_spill]] %s23658_s8 }
   0xa   :  { %23725 = sst [smem:[#allocation42_spill]] %s23660_s10 }
   0xb   :  { %23726 = sst [smem:[#allocation43_spill]] %s23666_s16 }
   0xc   :  { %23727 = sst [smem:[#allocation44_spill]] %s23667_s17 }
   0xd   :  { %23728 = sst [smem:[#allocation45_spill]] %s23670_s20 }
   0xe   :  { %23729 = sst [smem:[#allocation46_spill]] %s23671_s21 }
   0xf   :  { %23730 = sst [smem:[#allocation47_spill]] %s23672_s22 }
  0x10   :  { %23731 = sst [smem:[#allocation48_spill]] %s23673_s23 }
  0x11   :  { %23732 = sst [smem:[#allocation49_spill]] %s23674_s24 }
  0x12   :  { %29 = vsyncpa [#allocation3], 0 }
  0x13   :  { %31 = vsyncpa [#allocation3 + $0x1], 0 }
  0x14   :  { %32 = vsyncpa [#allocation5], 0 }
  0x15   :  { %33 = vsyncpa [#allocation8], 0 }
  0x16   :  { %34 = vsyncpa [#allocation11], 0  ;;  %s19057_s5 = smov 0   ;;  %s19059_s26 = smov 0  }
  0x17   :  { %s19061_s27 = smov 0   ;;  %s19063_s28 = smov 0  }
  0x18 LB: > { %s18920_s6 = smov [#allocation4]   ;;  %s23680_s29 = sadd.s32 4294967295, %s18918_s28   ;;  %s18918_s28 = sphi %s19063_s28, %s23840_s28   ;;  %s18914_s27 = sphi %s19061_s27, %s23839_s27   ;;  %s18910_s26 = sphi %s19059_s26, %s23838_s26   ;;  %s18906_s5 = sphi %s19057_s5, %s23837_s5  }
  0x19   : > { %s628_s2 = sshll.u32 %s18920_s6, 4  ;;  %p13633_p0 = scmp.ge.s32.totalorder %s18918_s28, 1  ;;  %s629_s2 = int_to_ptr.vmem [resolvable:$true] %s628_s2 }
  0x1a   : > { %p19081_p1 = scmp.eq.s32.totalorder %s23680_s29, 0  ;;  %p600_p2 = scmp.lt.s32.totalorder %s18918_s28, 3 }
  0x1b   : > { %s18921_s30 = smov [#allocation7]   ;;  %s18922_s8 = smov [#allocation6]  }
  0x1c   : > { %s23733_s0 = scalar_select %p19081_p1, 1, 0 }
  0x1d   : > { %p19086_p3 = pnand %p13633_p0, %p600_p2  ;;  %s663_s3 = sshll.u32 %s18921_s30, 4  ;;  %s19098_s3 = int_to_ptr.vmem [resolvable:$true] %s663_s3 }
  0x1e   : > { %s647_s4 = sshll.u32 %s18922_s8, 4  ;;  %s23736_s10 = sld [smem:[#allocation42_spill]]  ;;  %s19100_s4 = int_to_ptr.vmem [resolvable:$true] %s647_s4 }
  0x1f   : > { %s23734_s7 = scalar_select %p19086_p3, 1, 0 }
  0x20   : > { %p18032_p4 = pneg %p19086_p3 }
  0x22   : > { %p19094_p5 = pnand %p18032_p4, %p19081_p1 }
  0x24   : > { %s18702_s29 = scalar_lea.hbm %s23736_s10, 32  ;;  %p19110_p7 = pneg %p19094_p5 }
  0x25   : > { %p18703_p6 = scmp.ne.s32.totalorder %s23736_s10, %s18702_s29  ;;  %p18709_p10 = scmp.lt.u32.totalorder %s18702_s29, %s23736_s10 }
  0x27   : > { %p18705_p8 = pnand %p19110_p7, %p18703_p6 }
  0x29   : > { %p18706_p9 = pneg %p18705_p8 }
  0x2b   : > { %p18711_p11 = pnand %p18709_p10, %p18706_p9 }
  0x2d   : > { %18714 = shalt.err (!%p18711_p11)
}
  0x2e   : > { %s18715_s1 = scalar_lea.vmem %s629_s2, 32  ;;  %p18723_p2 = scmp.lt.s32.totalorder %s629_s2, %s629_s2 }
  0x2f   : > { %p18716_p12 = scmp.ne.s32.totalorder %s629_s2, %s18715_s1  ;;  %p18724_p4 = scmp.lt.s32.totalorder %s18715_s1, %s18715_s1 }
  0x31   : > { %p18718_p13 = pnand %p18716_p12, %p19110_p7  ;;  %p18725_p3 = por %p18724_p4, %p18723_p2 }
  0x33   : > { %p18719_p0 = pneg %p18718_p13 }
  0x35   : > { %p18726_p1 = pnand %p18725_p3, %p18719_p0 }
  0x37   : > { %18729 = shalt.err (!%p18726_p1)
}
  0x38   : > { %18035 = dma.hbm_to_vmem [thread:$0]  (!%p19094_p5), %s23736_s10, 32, %s629_s2, [#allocation5]  }
  0x39   : > { %s23738_s16 = sld [smem:[#allocation43_spill]] }
  0x3f   : > { %s18730_s6 = scalar_lea.hbm %s23738_s16, 32 }
  0x40   : > { %p18731_p6 = scmp.ne.s32.totalorder %s23738_s16, %s18730_s6  ;;  %p18737_p1 = scmp.lt.u32.totalorder %s18730_s6, %s23738_s16 }
  0x42   : > { %p18733_p8 = pnand %p18731_p6, %p19110_p7 }
  0x44   : > { %p18734_p9 = pneg %p18733_p8 }
  0x46   : > { %p18739_p3 = pnand %p18737_p1, %p18734_p9 }
  0x48   : > { %18742 = shalt.err (!%p18739_p3)
}
  0x49   : > { %s18743_s2 = scalar_lea.vmem %s19098_s3, 32  ;;  %p18751_p13 = scmp.lt.s32.totalorder %s19098_s3, %s19098_s3 }
  0x4a   : > { %p18744_p10 = scmp.ne.s32.totalorder %s19098_s3, %s18743_s2  ;;  %p18752_p0 = scmp.lt.s32.totalorder %s18743_s2, %s18743_s2 }
  0x4c   : > { %p18746_p11 = pnand %p18744_p10, %p19110_p7  ;;  %p18753_p2 = por %p18752_p0, %p18751_p13 }
  0x4e   : > { %p18747_p12 = pneg %p18746_p11 }
  0x50   : > { %p18754_p4 = pnand %p18753_p2, %p18747_p12 }
  0x52   : > { %18757 = shalt.err (!%p18754_p4)
}
  0x53   : > { %s18923_s23 = smov 16   ;;  %s18924_s21 = smov 1  }
  0x54   : > { %18041 = dma.hbm_to_vmem [thread:$0]  (!%p19094_p5), %s23738_s16, 32, %s19098_s3, [#allocation8], %s18923_s23, %s18923_s23, %s18924_s21  }
  0x55   : > { %s18758_s6 = scalar_lea.hbm %s23664_s14, 32 }
  0x56   : > { %p18759_p6 = scmp.ne.s32.totalorder %s23664_s14, %s18758_s6  ;;  %p18765_p1 = scmp.lt.u32.totalorder %s18758_s6, %s23664_s14 }
  0x58   : > { %p18761_p8 = pnand %p18759_p6, %p19110_p7 }
  0x5a   : > { %p18762_p9 = pneg %p18761_p8 }
  0x5c   : > { %p18767_p3 = pnand %p18765_p1, %p18762_p9 }
  0x5e   : > { %18770 = shalt.err (!%p18767_p3)
}
  0x5f   : > { %s18771_s3 = scalar_lea.vmem %s19100_s4, 32  ;;  %p18779_p13 = scmp.lt.s32.totalorder %s19100_s4, %s19100_s4 }
  0x60   : > { %p18772_p10 = scmp.ne.s32.totalorder %s19100_s4, %s18771_s3  ;;  %p18780_p0 = scmp.lt.s32.totalorder %s18771_s3, %s18771_s3 }
  0x62   : > { %p18774_p11 = pnand %p18772_p10, %p19110_p7  ;;  %p18781_p2 = por %p18780_p0, %p18779_p13 }
  0x64   : > { %p18775_p12 = pneg %p18774_p11 }
  0x66   : > { %p18782_p4 = pnand %p18781_p2, %p18775_p12 }
  0x68   : > { %18785 = shalt.err (!%p18782_p4)
}
  0x69   : > { %18038 = dma.hbm_to_vmem [thread:$0]  (!%p19094_p5), %s23664_s14, 32, %s19100_s4, [#allocation5], %s18923_s23, %s18923_s23, %s18924_s21  }
  0x6a   : > { %s18925_s24 = smov [#allocation9]   ;;  %s18926_s29 = smov [#allocation10]  }
  0x6b   : > { %s679_s20 = sshll.u32 %s18925_s24, 4  ;;  %s692_s6 = sshll.u32 %s18926_s29, 4  ;;  %s680_s20 = int_to_ptr.vmem [resolvable:$true] %s679_s20  ;;  %s693_s6 = int_to_ptr.vmem [resolvable:$true] %s692_s6 }
  0x6c   : > { %s18786_s2 = scalar_lea.hbm %s23668_s18, 32 }
  0x6d   : > { %p18787_p6 = scmp.ne.s32.totalorder %s23668_s18, %s18786_s2  ;;  %p18793_p1 = scmp.lt.u32.totalorder %s18786_s2, %s23668_s18 }
  0x6f   : > { %p18789_p8 = pnand %p18787_p6, %p19110_p7 }
  0x71   : > { %p18790_p9 = pneg %p18789_p8 }
  0x73   : > { %p18795_p3 = pnand %p18793_p1, %p18790_p9 }
  0x75   : > { %18798 = shalt.err (!%p18795_p3)
}
  0x76   : > { %s18799_s4 = scalar_lea.vmem %s680_s20, 32  ;;  %p18807_p13 = scmp.lt.s32.totalorder %s680_s20, %s680_s20 }
  0x77   : > { %p18800_p10 = scmp.ne.s32.totalorder %s680_s20, %s18799_s4  ;;  %p18808_p0 = scmp.lt.s32.totalorder %s18799_s4, %s18799_s4 }
  0x79   : > { %p18802_p11 = pnand %p18800_p10, %p19110_p7  ;;  %p18809_p2 = por %p18808_p0, %p18807_p13 }
  0x7b   : > { %p18803_p12 = pneg %p18802_p11 }
  0x7d   : > { %p18810_p4 = pnand %p18809_p2, %p18803_p12 }
  0x7f   : > { %18813 = shalt.err (!%p18810_p4)
}
  0x80   : > { %18044 = dma.hbm_to_vmem [thread:$0]  (!%p19094_p5), %s23668_s18, 32, %s680_s20, [#allocation8], %s18923_s23, %s18923_s23, %s18924_s21  }
  0x81   : > { %s18814_s29 = scalar_lea.hbm %s23669_s19, 128 }
  0x82   : > { %p18815_p6 = scmp.ne.s32.totalorder %s23669_s19, %s18814_s29  ;;  %p18821_p1 = scmp.lt.u32.totalorder %s18814_s29, %s23669_s19 }
  0x84   : > { %p18817_p8 = pnand %p18815_p6, %p19110_p7 }
  0x86   : > { %p18818_p9 = pneg %p18817_p8 }
  0x88   : > { %p18823_p3 = pnand %p18821_p1, %p18818_p9 }
  0x8a   : > { %18826 = shalt.err (!%p18823_p3)
}
  0x8b   : > { %s18827_s10 = scalar_lea.vmem %s693_s6, 128  ;;  %p18835_p13 = scmp.lt.s32.totalorder %s693_s6, %s693_s6 }
  0x8c   : > { %p18828_p10 = scmp.ne.s32.totalorder %s693_s6, %s18827_s10  ;;  %p18836_p0 = scmp.lt.s32.totalorder %s18827_s10, %s18827_s10 }
  0x8e   : > { %p18830_p11 = pnand %p18828_p10, %p19110_p7  ;;  %p18837_p2 = por %p18836_p0, %p18835_p13 }
  0x90   : > { %p18831_p12 = pneg %p18830_p11 }
  0x92   : > { %p18838_p4 = pnand %p18837_p2, %p18831_p12 }
  0x94   : > { %18841 = shalt.err (!%p18838_p4)
}
  0x95   : > { %18047 = dma.hbm_to_vmem [thread:$0]  (!%p19094_p5), %s23669_s19, 128, %s693_s6, [#allocation11], %s18923_s23, %s18923_s23, %s18924_s21  }
  0x96   : > { %s19221_s25 = sadd.s32 1, %s18918_s28   ;;  %s151_s16 = sadd.s32 1, %s18914_s27 }
  0x97   : > { %s148_s30 = ssub.s32 %s18918_s28, %s19221_s25  ;;  %p158_p6 = scmp.ne.s32.totalorder %s18914_s27, %s18910_s26 }
  0x98   : > { %p149_p7 = scmp.eq.s32.totalorder %s148_s30, 0  ;;  %p159_p8 = scmp.eq.s32.totalorder %s18918_s28, 0 }
  0x99   : > { %p164_p9 = scmp.ne.s32.totalorder %s18910_s26, %s18906_s5  ;;  %p23739_p3 = scmp.ne.s32.totalorder %s23733_s0, 0 }
  0x9a   : > { %s19232_s17 = scalar_select %p149_p7, %s18914_s27, %s151_s16  }
  0x9b   : > { %p160_p1 = por %p159_p8, %p158_p6  ;;  %p19236_p10 = por %p23739_p3, %p164_p9 }
  0x9c   : > { %p18057_p11 = scmp.lt.s32.totalorder %s18918_s28, 2  ;;  %s756_s24 = sand.u32 1, %s18914_s27  }
  0x9d   : > { %s13640_s6 = sshll.u32 %s756_s24, 1  ;;  %s14686_s29 = sshll.u32 %s18918_s28, 5 }
  0x9e   : > { %s23741_s2 = sld [smem:[#allocation37_spill]]  ;;  %s760_s5 = scalar_lea.vmem [#allocation2], %s13640_s6 }
  0x9f   : > { %s767_s10 = sshll.u32 %s760_s5, 4  ;;  %p19250_p5 = pnand %p18057_p11, %p160_p1  ;;  %s19248_s10 = int_to_ptr.vmem [resolvable:$true] %s767_s10 }
  0xa0   : > { %s19254_s4 = scalar_lea.sflag [#allocation3], %s756_s24 }
  0xa1   : > { %p18844_p13 = pneg %p19250_p5 }
  0xa4   : > { %s19246_s3 = scalar_lea.hbm %s23741_s2, %s14686_s29  ;;  %s18847_s29 = scalar_lea.hbm %s23741_s2, 64 }
  0xa5   : > { %s18842_s30 = scalar_lea.hbm %s19246_s3, 32  ;;  %p18848_p4 = scmp.lt.u32.totalorder %s19246_s3, %s23741_s2 }
  0xa6   : > { %p18843_p12 = scmp.ne.s32.totalorder %s19246_s3, %s18842_s30  ;;  %p18849_p7 = scmp.lt.u32.totalorder %s18847_s29, %s18842_s30 }
  0xa7   : > { %p18851_p8 = scmp.lt.u32.totalorder %s18842_s30, %s19246_s3 }
  0xa8   : > { %p18845_p0 = pnand %p18844_p13, %p18843_p12  ;;  %p18850_p6 = por %p18849_p7, %p18848_p4 }
  0xaa   : > { %p18846_p2 = pneg %p18845_p0  ;;  %p18852_p9 = por %p18851_p8, %p18850_p6 }
  0xac   : > { %p18853_p1 = pnand %p18852_p9, %p18846_p2 }
  0xae   : > { %18856 = shalt.err (!%p18853_p1)
}
  0xaf   : > { %s18857_s24 = scalar_lea.vmem %s19248_s10, 32  ;;  %s18927_s5 = smov [#allocation2]  }
  0xb0   : > { %p18858_p3 = scmp.ne.s32.totalorder %s19248_s10, %s18857_s24  ;;  %s18862_s16 = sshll.u32 %s18927_s5, 4  ;;  %s18863_s16 = int_to_ptr.vmem [resolvable:$false] %s18862_s16 }
  0xb1   : > { %s18864_s6 = scalar_lea.vmem %s18863_s16, 64  ;;  %p18865_p0 = scmp.lt.s32.totalorder %s19248_s10, %s18863_s16 }
  0xb2   : > { %p18860_p11 = pnand %p18858_p3, %p18844_p13  ;;  %p18866_p4 = scmp.lt.s32.totalorder %s18864_s6, %s18857_s24 }
  0xb4   : > { %p18861_p12 = pneg %p18860_p11  ;;  %p18867_p7 = por %p18866_p4, %p18865_p0 }
  0xb6   : > { %p18868_p6 = pnand %p18867_p7, %p18861_p12 }
  0xb8   : > { %18871 = shalt.err (!%p18868_p6)
}
  0xb9   : > { %18051 = dma.hbm_to_vmem [thread:$0]  (!%p19250_p5), %s19246_s3, 32, %s19248_s10, %s19254_s4, %s18923_s23, %s18923_s23, %s18924_s21  }
  0xba   : > { %p23743_p13 = scmp.ne.s32.totalorder %s23734_s7, 0 }
  0xbc   : > { %779 = sbr.rel (%p23743_p13) target bundleno = 10854 (0x2a66), region = 116 }
  0xc3   : > { %s781_s30 = sand.u32 1, %s18910_s26  }
  0xc4   : > { %s19288_s29 = sshll.u32 %s781_s30, 1  ;;  %s782_s8 = scalar_lea.sflag [#allocation3], %s781_s30 }
  0xc5   : > { %s785_s1 = scalar_lea.vmem [#allocation2], %s19288_s29 }
  0xc6   : > { %18889 = dma.done.wait (%p19236_p10), %s782_s8, 32  }
  0xc7   : > { %18891 = vsyncadd (%p19236_p10), %s782_s8, 4294967264  ;;  %p23744_p2 = scmp.ne.s32.totalorder %s23733_s0, 0 }
  0xc9   : > { %18893 = dma.done.wait (%p23744_p2), [#allocation5], 64  }
  0xca   : > { %18895 = vsyncadd (%p23744_p2), [#allocation5], 4294967232 }
  0xcb   : > { %18897 = dma.done.wait (%p23744_p2), [#allocation8], 64  }
  0xcc   : > { %18899 = vsyncadd (%p23744_p2), [#allocation8], 4294967232 }
  0xcd   : > { %18901 = dma.done.wait (%p23744_p2), [#allocation11], 128  }
  0xce   : > { %18903 = vsyncadd (%p23744_p2), [#allocation11], 4294967168  ;;  %s23745_s7 = sadd.s32 4294967295, %s18918_s28   ;;  %v18928_v0 = vmov 0.0|0.0   ;;  %vm18929_vm0 = vmmov 0   ;;  %v18930_v1 = vmov 0.0   ;;  %v1092_v12 = vlaneseq }
  0xcf   : > { %s13650_s23 = sshll.u32 %s23745_s7, 1  ;;  %17281 = vmatprep.subr.bf16.mxu1 %v18928_v0  ;;  %15675 = vmatprep.mubr.msk.f32.mxu1 %vm18929_vm0, %v18930_v1  ;;  %s23746_s3 = sld [smem:[#allocation41_spill]]  ;;  %v929_v5 = vld [vmem:[%s23659_s9] sm:$0xff]  ;;  %v930_v6 = vld [vmem:[%s23659_s9 + $0x8] sm:$0xff]  ;;  %vm936_vm1 = vcmask 130048   ;;  %vm1100_vm2 = vcmask 31744  }
  0xd0   : > { %p894_p10 = scmp.lt.s32.totalorder %s13650_s23, 3  ;;  %17278 = vmatprep.subr.bf16.mxu0 %v18928_v0  ;;  %15668 = vmatprep.mubr.msk.f32.mxu0 %vm18929_vm0, %v18930_v1  ;;  %s23747_s24 = sld [smem:[#allocation36_spill]]  ;;  %v17279_v7 = vpack.c.bf16 %v930_v6, %v929_v5  ;;  %v935_v9 = vld [vmem:[%s785_s1] sm:$0x1]  ;;  %v13669_v11 = vld [vmem:[%s785_s1 + $0x1] sm:$0x1] }
  0xd1   : > { %s23748_s0 = sld [smem:[#allocation40_spill]]  ;;  %v1093_v13 = vshrl.u32 %v1092_v12, 7  ;;  %v13664_v14 = vld [vmem:[#allocation4] ss:$0 sm:$0xff]  ;;  %v932_v15 = vld [vmem:[#allocation4 + $0x1] sm:$0x1] }
  0xd2   : > { %s23842_s23 = smov (!%p894_p10, %s13650_s23), 3  ;;  %17280 = vmatpush3.bf16.msra.mxu0 %v17279_v7  ;;  %s23749_s20 = sld [smem:[#allocation33_spill]]  ;;  %vm1107_vm3 = vcmask 1043456   ;;  %v1439_v26 = vld [vmem:[%s23661_s11] sm:$0xff]  ;;  %vm1447_vm4 = vcmask 261120   ;;  %vm1888_vm5 = vcmask 64512  }
  0xd3   : > { %s13659_s21 = sshll.u32 %s23842_s23, 2  ;;  %s23715_s22 = sshll.u32 %s23842_s23, 5  ;;  %v1094_v17 = vsub.s32 0, %v1093_v13  ;;  %v13694_v50 = vld [vmem:[%s23661_s11 + $0x20] sm:$0xff]  ;;  %vm19496_vm6 = vmpackc.low %vm1888_vm5, %vm1888_vm5  ;;  %vm2086_vm7 = vcmask 785408   ;;  %vm6313_vm9 = vcmask 523264  }
  0xd4   : > { %v13710_v59 = vld [vmem:[%s23661_s11 + $0x40] sm:$0xff]  ;;  %vm20873_vm8 = vmpackc.low %vm1447_vm4, %vm1447_vm4  ;;  %s23791_s7 = sld [smem:[#allocation44_spill]]  ;;  %s23795_s30 = sld [smem:[#allocation39_spill]] }
  0xd5   : > { %v927_v2 = vld [vmem:[%s23746_s3] sm:$0xff]  ;;  %v928_v3 = vld [vmem:[%s23746_s3 + $0x8] sm:$0xff]  ;;  %15669 = vmatmul.mubr.msk.f32.vlgmr.msra.gmra.mrb[0].mxu0 %vm936_vm1, %v935_v9  ;;  %vm21079_vm10 = vmpackc.low %vm6313_vm9, %vm6313_vm9  ;;  %s13657_s29 = sshll.u32 %s23842_s23, 3  ;;  %s23828_s16 = sld [smem:[#allocation35_spill]] }
  0xd6   : > { %s19323_s5 = scalar_lea.vmem %s23747_s24, %s13659_s21  ;;  %v17282_v4 = vpack.c.bf16 %v928_v3, %v927_v2  ;;  %v19461_v63 = vld [vmem:[%s23662_s12] ss:$0 sm:$0xff]  ;;  %s23829_s28 = sld [smem:[#allocation46_spill]] }
  0xd7   : > { %v1010_v8 = vld [vmem:[%s19323_s5] sm:$0xf]  ;;  %v934_v21 = vld [vmem:[%s23748_s0 + $0x8] sm:$0xff]  ;;  %v13671_v27 = vld [vmem:[%s19323_s5 + $0x4] sm:$0xf]  ;;  %s23752_s5 = sld [smem:[#allocation38_spill]] }
  0xd8   : > { %17283 = vmatpush3.bf16.msra.mxu1 %v17282_v4  ;;  %v933_v10 = vld [vmem:[%s23748_s0] sm:$0xff]  ;;  %s19351_s4 = scalar_lea.vmem %s23749_s20, %s23715_s22  ;;  %s23832_s8 = sld [smem:[#allocation45_spill]] }
  0xd9   : > { %17284 = vmatprep.subr.bf16.mxu1 %v18928_v0  ;;  %15680 = vmatprep.mubr.msk.f32.mxu0 %vm1100_vm2, %v933_v10  ;;  %v1088_v24 = vld [vmem:[%s19351_s4] sm:$0xff]  ;;  %v1089_v29 = vld [vmem:[%s19351_s4 + $0x8] sm:$0xff]  ;;  %v1090_v30 = vld [vmem:[%s19351_s4 + $0x10] sm:$0xff]  ;;  %s23833_s24 = sld [smem:[#allocation47_spill]]  ;;  %s14689_s22 = sshll.u32 %s23842_s23, 6 }
  0xda   : > { %v1091_v32 = vld [vmem:[%s19351_s4 + $0x18] sm:$0xff]  ;;  %v13673_v41 = vld [vmem:[%s19351_s4 + $0x20] sm:$0xff]  ;;  %v13675_v45 = vld [vmem:[%s19351_s4 + $0x30] sm:$0xff] }
  0xdb   : > { %15676 = vmatmul.mubr.msk.f32.vlgmr.msra.gmra.mrb[0].mxu1 %vm936_vm1, %v1010_v8  ;;  %v13674_v49 = vld [vmem:[%s19351_s4 + $0x28] sm:$0xff]  ;;  %v13676_v51 = vld [vmem:[%s19351_s4 + $0x38] sm:$0xff]  ;;  %v13696_v8 = vld [vmem:[%s23662_s12 + $0x4] ss:$0 sm:$0xff]  ;;  %s23834_s4 = sshll.u32 %s23842_s23, 5 }
  0xdc   : > { %17286 = vmatpush3.bf16.msra.mxu1 %v17279_v7  ;;  %15687 = vmatprep.mubr.msk.f32.mxu1 %vm18929_vm0, %v18930_v1  ;;  %s23830_s10 = smov %s23829_s28 }
  0xdd   : > { %s23753_s6 = smov %s23752_s5 }
  0xdf   : > { %15688 = vmatmul.mubr.msk.f32.vlgmr.msra.gmra.mrb[2].mxu1 %vm936_vm1, %v13669_v11 }
  0xe0   : > { %15699 = vmatprep.mubr.msk.f32.mxu1 %vm1100_vm2, %v933_v10 }
 0x1a8   : > { %v1006_v20 = vpop.f32.mrb[0].mxu0 }
 0x1a9   : > { %v1007_v22 = vadd.f32 %v1006_v20, %v932_v15  ;;  %v15670_v23 = vpop.f32.mrb[1].mxu0 }
 0x1ab   : > { %v1095_v25 = vrot.slane %v1007_v22, %v1094_v17 }
 0x1ad   : > { %v19365_v28 = vadd.f32 %v1095_v25, %v1088_v24  ;;  %v19373_v31 = vadd.f32 %v1095_v25, %v1089_v29  ;;  %v19376_v33 = vadd.f32 %v1095_v25, %v1090_v30  ;;  %v19379_v34 = vadd.f32 %v1095_v25, %v1091_v32 }
 0x1ae   : > { %v1084_v16 = vpop.f32.mrb[0].mxu1 }
 0x1af   : > { %v1085_v18 = vadd.f32 %v13664_v14, %v1084_v16  ;;  %v15677_v19 = vpop.f32.mrb[1].mxu1 }
 0x1b1   : > { %15678 = vmatprep.subr.msk.mxu0 %vm1107_vm3, %v1085_v18 }
 0x1b2   : > { %15679 = vmatpush3.msk.msra.mxu0 %vm1107_vm3, %v1085_v18  ;;  %v1257_v35 = vpop.f32.mrb[2].mxu1 }
 0x1b3   : > { %15681 = vmatmul.mubr.msk.f32.vlgmr.msra.gmra.mrb[2].mxu0 %vm1100_vm2, %v934_v21  ;;  %17287 = vmatprep.subr.bf16.mxu0 %v18928_v0  ;;  %v15689_v36 = vpop.f32.mrb[3].mxu1  ;;  %v1258_v37 = vadd.f32 %v1257_v35, %v932_v15 }
 0x1b4   : > { %17289 = vmatpush3.bf16.msra.mxu0 %v17282_v4  ;;  %15694 = vmatprep.mubr.msk.f32.mxu0 %vm18929_vm0, %v18930_v1 }
 0x1b5   : > { %15702 = vmatprep.subr.msk.mxu0 %vm1447_vm4, %v1439_v26  ;;  %v1344_v39 = vrot.slane %v1258_v37, %v1094_v17 }
 0x1b7   : > { %15695 = vmatmul.mubr.msk.f32.vlgmr.msra.gmra.mrb[4].mxu0 %vm936_vm1, %v13671_v27  ;;  %v19395_v46 = vadd.f32 %v13673_v41, %v1344_v39  ;;  %v19407_v52 = vadd.f32 %v13675_v45, %v1344_v39  ;;  %v19410_v53 = vadd.f32 %v13674_v49, %v1344_v39  ;;  %v19416_v54 = vadd.f32 %v13676_v51, %v1344_v39 }
 0x1b8   : > { %15704 = vmatprep.mubr.msk.f32.mxu0 %vm1447_vm4, %v19365_v28 }
 0x1bd   : > { %15703 = vmatpush3.xpose.msk.msra.mxu0 %vm1447_vm4, %v1439_v26 }
 0x1be   : > { %15742 = vmatprep.subr.msk.mxu0 %vm1447_vm4, %v13710_v59 }
 0x1c0   : > { %15705 = vmatmul.mubr.msk.f32.vlgmr.msra.gmra.mrb[6].mxu0 %vm1447_vm4, %v19373_v31 }
 0x1c1   : > { %15707 = vmatprep.mubr.msk.f32.mxu0 %vm1447_vm4, %v19376_v33  ;;  %15743 = vmatpush3.xpose.msk.msra.mxu0 %vm1447_vm4, %v13710_v59  ;;  %v13778_v59 = vld [vmem:[%s23661_s11 + $0x28] sm:$0xff] }
 0x1c4   : > { %15708 = vmatmul.mubr.msk.f32.gmra.mrb[8].mxu0 %vm1447_vm4, %v19379_v34 }
 0x286   : > { %v15682_v38 = vpop.f32.mrb[2].mxu0 }
 0x287   : > { %v1177_v40 = vpop.f32.mrb[3].mxu0  ;;  %v19390_v43 = vadd.f32 %v15682_v38, %v1095_v25 }
 0x288   : > { %v19388_v42 = vadd.f32 %v1177_v40, %v1095_v25 }
 0x28a   : > { %v1332_v44 = vpop.f32.mrb[4].mxu0  ;;  %15710 = vmatprep.mubr.msk.f32.mxu0 %vm1447_vm4, %v19388_v42 }
 0x28b   : > { %v1333_v47 = vadd.f32 %v13664_v14, %v1332_v44  ;;  %v15696_v48 = vpop.f32.mrb[5].mxu0  ;;  %15711 = vmatmul.mubr.msk.f32.gmra.mrb[10].mxu0 %vm1447_vm4, %v19390_v43 }
 0x28c   : > { %15713 = vmatprep.mubr.msk.f32.mxu0 %vm1447_vm4, %v19395_v46  ;;  %v13712_v48 = vld [vmem:[%s23662_s12 + $0x8] ss:$0 sm:$0xff] }
 0x28d   : > { %15697 = vmatprep.subr.msk.mxu1 %vm1107_vm3, %v1333_v47 }
 0x28e   : > { %15698 = vmatpush3.msk.msra.mxu1 %vm1107_vm3, %v1333_v47 }
 0x28f   : > { %15700 = vmatmul.mubr.msk.f32.vlgmr.msra.gmra.mrb[4].mxu1 %vm1100_vm2, %v934_v21  ;;  %15722 = vmatprep.subr.msk.mxu1 %vm1447_vm4, %v13694_v50 }
 0x290   : > { %15724 = vmatprep.mubr.msk.f32.mxu1 %vm1447_vm4, %v19365_v28  ;;  %15714 = vmatmul.mubr.msk.f32.gmra.mrb[12].mxu0 %vm1447_vm4, %v19410_v53 }
 0x291   : > { %15716 = vmatprep.mubr.msk.f32.mxu0 %vm1447_vm4, %v19407_v52 }
 0x293   : > { %v19422_v55 = vpop.f32.mrb[6].mxu0 }
 0x294   : > { %15717 = vmatmul.mubr.msk.f32.gmra.mrb[14].mxu0 %vm1447_vm4, %v19416_v54  ;;  %v1553_v56 = vpop.f32.mrb[7].mxu0 }
 0x295   : > { %15723 = vmatpush3.xpose.msk.msra.mxu1 %vm1447_vm4, %v13694_v50  ;;  %v1554_v5 = vadd.f32 %v19461_v63, %v1553_v56 }
 0x297   : > { %v19427_v57 = vpop.f32.mrb[8].mxu0 }
 0x298   : > { %15725 = vmatmul.mubr.msk.f32.vlgmr.msra.gmra.mrb[6].mxu1 %vm1447_vm4, %v19373_v31  ;;  %v19431_v58 = vpop.f32.mrb[9].mxu0 }
 0x299   : > { %15727 = vmatprep.mubr.msk.f32.mxu1 %vm1447_vm4, %v19376_v33 }
 0x29c   : > { %15728 = vmatmul.mubr.msk.f32.gmra.mrb[8].mxu1 %vm1447_vm4, %v19379_v34 }
 0x29d   : > { %15730 = vmatprep.mubr.msk.f32.mxu1 %vm1447_vm4, %v19388_v42 }
 0x2a0   : > { %15731 = vmatmul.mubr.msk.f32.gmra.mrb[10].mxu1 %vm1447_vm4, %v19390_v43 }
 0x2a1   : > { %15733 = vmatprep.mubr.msk.f32.mxu1 %vm1447_vm4, %v19395_v46 }
 0x2a4   : > { %15734 = vmatmul.mubr.msk.f32.gmra.mrb[12].mxu1 %vm1447_vm4, %v19410_v53 }
 0x2a5   : > { %15736 = vmatprep.mubr.msk.f32.mxu1 %vm1447_vm4, %v19407_v52 }
 0x2a8   : > { %15737 = vmatmul.mubr.msk.f32.gmra.mrb[14].mxu1 %vm1447_vm4, %v19416_v54 }
 0x35e   : > { %v19454_v60 = vpop.f32.mrb[10].mxu0 }
 0x35f   : > { %v19456_v61 = vpop.f32.mrb[11].mxu0 }
 0x362   : > { %v15701_v62 = vpop.f32.mrb[4].mxu1 }
 0x363   : > { %v1418_v0 = vpop.f32.mrb[5].mxu1  ;;  %v19463_v1 = vpop.f32.mrb[12].mxu0  ;;  %v19469_v4 = vadd.f32 %v15701_v62, %v1344_v39 }
 0x364   : > { %v19465_v2 = vadd.f32 %v1418_v0, %v1344_v39  ;;  %v19467_v3 = vpop.f32.mrb[13].mxu0 }
 0x366   : > { %15719 = vmatprep.mubr.msk.f32.mxu0 %vm1447_vm4, %v19465_v2  ;;  %15739 = vmatprep.mubr.msk.f32.mxu1 %vm1447_vm4, %v19465_v2 }
 0x367   : > { %15720 = vmatmul.mubr.msk.f32.gmra.mrb[16].mxu0 %vm1447_vm4, %v19469_v4  ;;  %15740 = vmatmul.mubr.msk.f32.gmra.mrb[16].mxu1 %vm1447_vm4, %v19469_v4  ;;  %v19480_v6 = vpop.f32.mrb[14].mxu0 }
 0x368   : > { %15744 = vmatprep.mubr.msk.f32.mxu0 %vm1447_vm4, %v19365_v28  ;;  %15786 = vmatprep.mubr.msk.f32.mxu1 %vm1888_vm5, %v1554_v5  ;;  %v19485_v7 = vpop.f32.mrb[15].mxu0 }
 0x36b   : > { %v15726_v9 = vpop.f32.mrb[6].mxu1  ;;  %15745 = vmatmul.mubr.msk.f32.vlgmr.msra.gmra.mrb[18].mxu0 %vm1447_vm4, %v19373_v31 }
 0x36c   : > { %v1697_v10 = vadd.f32 %v15726_v9, %v13696_v8  ;;  %v1691_v11 = vpop.f32.mrb[7].mxu1  ;;  %15747 = vmatprep.mubr.msk.f32.mxu0 %vm1447_vm4, %v19376_v33 }
 0x36d   : > { %v1692_v12 = vadd.f32 %v13696_v8, %v1691_v11  ;;  %v1559_v11 = vadd.f32 %v19422_v55, %v19461_v63  ;;  %v1574_v55 = vadd.f32 %v19461_v63, %v19456_v61 }
 0x36f   : > { %v17290_v14 = vpack.c.bf16 %v1697_v10, %v1692_v12  ;;  %v15729_v15 = vpop.f32.mrb[8].mxu1  ;;  %15748 = vmatmul.mubr.msk.f32.gmra.mrb[20].mxu0 %vm1447_vm4, %v19379_v34 }
 0x370   : > { %v1707_v16 = vadd.f32 %v15729_v15, %v13696_v8  ;;  %v1701_v17 = vpop.f32.mrb[9].mxu1  ;;  %15750 = vmatprep.mubr.msk.f32.mxu0 %vm1447_vm4, %v19388_v42  ;;  %v1564_v15 = vadd.f32 %v19461_v63, %v19431_v58 }
 0x371   : > { %v1702_v18 = vadd.f32 %v13696_v8, %v1701_v17  ;;  %17292 = vmatprep.subr.msk.bf16.mxu1 %vm19496_vm6, %v17290_v14 }
 0x372   : > { %17295 = vmatpush3.bf16.xpose.msk.msra.mxu1 %vm19496_vm6, %v17290_v14 }
 0x373   : > { %v17296_v19 = vpack.c.bf16 %v1707_v16, %v1702_v18  ;;  %v15732_v20 = vpop.f32.mrb[10].mxu1  ;;  %15751 = vmatmul.mubr.msk.f32.gmra.mrb[22].mxu0 %vm1447_vm4, %v19390_v43 }
 0x374   : > { %v1717_v21 = vadd.f32 %v15732_v20, %v13696_v8  ;;  %v1711_v22 = vpop.f32.mrb[11].mxu1  ;;  %15753 = vmatprep.mubr.msk.f32.mxu0 %vm1447_vm4, %v19395_v46 }
 0x375   : > { %v1712_v23 = vadd.f32 %v13696_v8, %v1711_v22  ;;  %17298 = vmatprep.subr.msk.bf16.mxu1 %vm19496_vm6, %v17296_v19 }
 0x377   : > { %v17302_v24 = vpack.c.bf16 %v1717_v21, %v1712_v23  ;;  %15754 = vmatmul.mubr.msk.f32.gmra.mrb[24].mxu0 %vm1447_vm4, %v19410_v53  ;;  %v15735_v25 = vpop.f32.mrb[12].mxu1 }
 0x378   : > { %15756 = vmatprep.mubr.msk.f32.mxu0 %vm1447_vm4, %v19407_v52  ;;  %v1727_v26 = vadd.f32 %v15735_v25, %v13696_v8  ;;  %v1721_v27 = vpop.f32.mrb[13].mxu1 }
 0x379   : > { %v1722_v29 = vadd.f32 %v13696_v8, %v1721_v27 }
 0x37a   : > { %17301 = vmatpush3.bf16.xpose.msk.msra.mxu1 %vm19496_vm6, %v17296_v19  ;;  %v1569_v19 = vadd.f32 %v19427_v57, %v19461_v63 }
 0x37b   : > { %15757 = vmatmul.mubr.msk.f32.gmra.mrb[26].mxu0 %vm1447_vm4, %v19416_v54  ;;  %17304 = vmatprep.subr.msk.bf16.mxu1 %vm19496_vm6, %v17302_v24  ;;  %v17308_v30 = vpack.c.bf16 %v1727_v26, %v1722_v29  ;;  %v15738_v32 = vpop.f32.mrb[14].mxu1  ;;  %v1584_v26 = vadd.f32 %v19461_v63, %v19467_v3 }
 0x37c   : > { %15759 = vmatprep.mubr.msk.f32.mxu0 %vm1447_vm4, %v19465_v2  ;;  %v1737_v35 = vadd.f32 %v15738_v32, %v13696_v8  ;;  %v1731_v36 = vpop.f32.mrb[15].mxu1 }
 0x37d   : > { %v1732_v37 = vadd.f32 %v13696_v8, %v1731_v36 }
 0x37f   : > { %15760 = vmatmul.mubr.msk.f32.gmra.mrb[28].mxu0 %vm1447_vm4, %v19469_v4  ;;  %v17314_v38 = vpack.c.bf16 %v1737_v35, %v1732_v37 }
 0x382   : > { %17307 = vmatpush3.bf16.xpose.msk.msra.mxu1 %vm19496_vm6, %v17302_v24  ;;  %v1579_v24 = vadd.f32 %v19454_v60, %v19461_v63  ;;  %v1594_v60 = vadd.f32 %v19461_v63, %v19485_v7 }
 0x383   : > { %17310 = vmatprep.subr.msk.bf16.mxu1 %vm19496_vm6, %v17308_v30 }
 0x38a   : > { %17313 = vmatpush3.bf16.xpose.msk.msra.mxu1 %vm19496_vm6, %v17308_v30  ;;  %v1589_v30 = vadd.f32 %v19463_v1, %v19461_v63 }
 0x38b   : > { %17316 = vmatprep.subr.msk.bf16.mxu1 %vm19496_vm6, %v17314_v38 }
 0x392   : > { %17319 = vmatpush3.bf16.xpose.msk.msra.mxu1 %vm19496_vm6, %v17314_v38  ;;  %v1599_v38 = vadd.f32 %v19480_v6, %v19461_v63 }
 0x43a   : > { %v19538_v39 = vpop.f32.mrb[16].mxu0  ;;  %v15741_v40 = vpop.f32.mrb[16].mxu1 }
 0x43b   : > { %v1747_v41 = vadd.f32 %v15741_v40, %v13696_v8  ;;  %v19540_v44 = vpop.f32.mrb[17].mxu0  ;;  %v1741_v45 = vpop.f32.mrb[17].mxu1  ;;  %v1609_v7 = vadd.f32 %v19538_v39, %v19461_v63 }
 0x43c   : > { %v1742_v47 = vadd.f32 %v13696_v8, %v1741_v45  ;;  %v1604_v1 = vadd.f32 %v19461_v63, %v19540_v44  ;;  %v19614_v63 = vld [vmem:[%s23752_s5] sm:$0xff]  ;;  %v19627_v45 = vld [vmem:[%s23753_s6 + $0x10] sm:$0xff]  ;;  %s23128_s5 = scalar_lea.vmem %s23828_s16, %s13657_s29  ;;  %s23831_s29 = sld [smem:[#allocation48_spill]] }
 0x43e   : > { %v17320_v49 = vpack.c.bf16 %v1747_v41, %v1742_v47  ;;  %v15746_v50 = vpop.f32.mrb[18].mxu0  ;;  %v19619_v41 = vld [vmem:[%s23753_s6 + $0x8] sm:$0xff] }
 0x43f   : > { %v1835_v51 = vadd.f32 %v15746_v50, %v13712_v48  ;;  %v1829_v56 = vpop.f32.mrb[19].mxu0 }
 0x440   : > { %v1830_v62 = vadd.f32 %v13712_v48, %v1829_v56  ;;  %17322 = vmatprep.subr.msk.bf16.mxu1 %vm19496_vm6, %v17320_v49 }
 0x441   : > { %17325 = vmatpush3.bf16.xpose.msk.msra.mxu1 %vm19496_vm6, %v17320_v49 }
 0x442   : > { %v15749_v0 = vpop.f32.mrb[20].mxu0  ;;  %v17326_v5 = vpack.c.bf16 %v1835_v51, %v1830_v62  ;;  %15866 = vmatprep.subr.msk.mxu1 %vm1447_vm4, %v13778_v59  ;;  %v19637_v51 = vld [vmem:[%s23753_s6 + $0x18] sm:$0xff] }
 0x443   : > { %v1845_v8 = vadd.f32 %v15749_v0, %v13712_v48  ;;  %v1839_v9 = vpop.f32.mrb[21].mxu0 }
 0x444   : > { %v1840_v10 = vadd.f32 %v13712_v48, %v1839_v9  ;;  %17327 = vmatprep.subr.bf16.mxu0 %v17326_v5 }
 0x445   : > { %17329 = vmatpush3.bf16.msra.mxu0 %v17326_v5 }
 0x446   : > { %v15752_v12 = vpop.f32.mrb[22].mxu0  ;;  %v17330_v14 = vpack.c.bf16 %v1845_v8, %v1840_v10  ;;  %v19657_v10 = vld [vmem:[%s23753_s6 + $0x28] sm:$0xff] }
 0x447   : > { %v1855_v16 = vadd.f32 %v15752_v12, %v13712_v48  ;;  %v1849_v17 = vpop.f32.mrb[23].mxu0  ;;  %v19665_v12 = vld [vmem:[%s23753_s6 + $0x30] sm:$0xff] }
 0x448   : > { %v1850_v18 = vadd.f32 %v13712_v48, %v1849_v17  ;;  %15787 = vmatmul.mubr.msk.f32.vlgmr.msra.gmra.mrb[18].mxu1 %vm1888_vm5, %v1559_v11  ;;  %17331 = vmatprep.subr.bf16.mxu0 %v17330_v14 }
 0x449   : > { %15789 = vmatprep.mubr.msk.f32.mxu1 %vm1888_vm5, %v1564_v15  ;;  %17333 = vmatpush3.bf16.msra.mxu0 %v17330_v14 }
 0x44a   : > { %v15755_v20 = vpop.f32.mrb[24].mxu0  ;;  %v17334_v21 = vpack.c.bf16 %v1855_v16, %v1850_v18  ;;  %15867 = vmatpush3.xpose.msk.msra.mxu1 %vm1447_vm4, %v13778_v59  ;;  %v19645_v59 = vld [vmem:[%s23753_s6 + $0x20] sm:$0xff] }
 0x44b   : > { %v1865_v58 = vadd.f32 %v15755_v20, %v13712_v48  ;;  %v1859_v22 = vpop.f32.mrb[25].mxu0 }
 0x44c   : > { %v1860_v23 = vadd.f32 %v13712_v48, %v1859_v22  ;;  %15790 = vmatmul.mubr.msk.f32.gmra.mrb[20].mxu1 %vm1888_vm5, %v1569_v19  ;;  %17335 = vmatprep.subr.bf16.mxu0 %v17334_v21  ;;  %v19677_v19 = vld [vmem:[%s23753_s6 + $0x38] sm:$0xff] }
 0x44d   : > { %15792 = vmatprep.mubr.msk.f32.mxu1 %vm1888_vm5, %v1574_v55  ;;  %17337 = vmatpush3.bf16.msra.mxu0 %v17334_v21  ;;  %v19685_v21 = vld [vmem:[%s23753_s6 + $0x40] sm:$0xff] }
 0x44e   : > { %v15758_v57 = vpop.f32.mrb[26].mxu0  ;;  %v17338_v25 = vpack.c.bf16 %v1865_v58, %v1860_v23 }
 0x44f   : > { %v1875_v27 = vadd.f32 %v15758_v57, %v13712_v48  ;;  %v1869_v29 = vpop.f32.mrb[27].mxu0  ;;  %v19697_v57 = vld [vmem:[%s23753_s6 + $0x48] sm:$0xff] }
 0x450   : > { %v1870_v61 = vadd.f32 %v13712_v48, %v1869_v29  ;;  %15793 = vmatmul.mubr.msk.f32.gmra.mrb[22].mxu1 %vm1888_vm5, %v1579_v24  ;;  %17339 = vmatprep.subr.bf16.mxu0 %v17338_v25 }
 0x451   : > { %15795 = vmatprep.mubr.msk.f32.mxu1 %vm1888_vm5, %v1584_v26  ;;  %17341 = vmatpush3.bf16.msra.mxu0 %v17338_v25  ;;  %v19705_v26 = vld [vmem:[%s23753_s6 + $0x50] sm:$0xff] }
 0x452   : > { %v15761_v32 = vpop.f32.mrb[28].mxu0  ;;  %v17342_v35 = vpack.c.bf16 %v1875_v27, %v1870_v61 }
 0x453   : > { %v1885_v36 = vadd.f32 %v15761_v32, %v13712_v48  ;;  %v1879_v37 = vpop.f32.mrb[29].mxu0 }
 0x454   : > { %v1880_v3 = vadd.f32 %v13712_v48, %v1879_v37  ;;  %15796 = vmatmul.mubr.msk.f32.gmra.mrb[24].mxu1 %vm1888_vm5, %v1589_v30  ;;  %17343 = vmatprep.subr.bf16.mxu0 %v17342_v35 }
 0x455   : > { %15798 = vmatprep.mubr.msk.f32.mxu1 %vm1888_vm5, %v1594_v60  ;;  %17345 = vmatpush3.bf16.msra.mxu0 %v17342_v35  ;;  %v19717_v35 = vld [vmem:[%s23753_s6 + $0x58] sm:$0xff]  ;;  %v13780_v60 = vld [vmem:[%s23662_s12 + $0x5] ss:$0 sm:$0xff] }
 0x456   : > { %v17346_v40 = vpack.c.bf16 %v1885_v36, %v1880_v3 }
 0x458   : > { %15799 = vmatmul.mubr.msk.f32.gmra.mrb[26].mxu1 %vm1888_vm5, %v1599_v38  ;;  %17347 = vmatprep.subr.bf16.mxu0 %v17346_v40 }
 0x459   : > { %15801 = vmatprep.mubr.msk.f32.mxu1 %vm1888_vm5, %v1604_v1  ;;  %17349 = vmatpush3.bf16.msra.mxu0 %v17346_v40 }
 0x45c   : > { %15802 = vmatmul.mubr.msk.f32.gmra.mrb[28].mxu1 %vm1888_vm5, %v1609_v7 }
 0x45d   : > { %15868 = vmatprep.mubr.msk.f32.mxu1 %vm1447_vm4, %v19365_v28 }
 0x460   : > { %15869 = vmatmul.mubr.msk.f32.vlgmr.msra.gmra.mrb[30].mxu1 %vm1447_vm4, %v19373_v31 }
 0x461   : > { %15871 = vmatprep.mubr.msk.f32.mxu1 %vm1447_vm4, %v19376_v33 }
 0x464   : > { %15872 = vmatmul.mubr.msk.f32.gmra.mrb[32].mxu1 %vm1447_vm4, %v19379_v34 }
 0x465   : > { %15874 = vmatprep.mubr.msk.f32.mxu1 %vm1447_vm4, %v19388_v42 }
 0x468   : > { %15875 = vmatmul.mubr.msk.f32.gmra.mrb[34].mxu1 %vm1447_vm4, %v19390_v43 }
 0x469   : > { %15877 = vmatprep.mubr.msk.f32.mxu1 %vm1447_vm4, %v19395_v46 }
 0x46c   : > { %15878 = vmatmul.mubr.msk.f32.gmra.mrb[36].mxu1 %vm1447_vm4, %v19410_v53 }
 0x46d   : > { %15880 = vmatprep.mubr.msk.f32.mxu1 %vm1447_vm4, %v19407_v52 }
 0x470   : > { %15881 = vmatmul.mubr.msk.f32.gmra.mrb[38].mxu1 %vm1447_vm4, %v19416_v54 }
 0x471   : > { %15883 = vmatprep.mubr.msk.f32.mxu1 %vm1447_vm4, %v19465_v2 }
 0x474   : > { %15884 = vmatmul.mubr.msk.f32.gmra.mrb[40].mxu1 %vm1447_vm4, %v19469_v4 }
 0x51b   : > { %v15788_v6 = vpop.f32.mrb[18].mxu1 }
 0x51c   : > { %v2027_v39 = vpop.f32.mrb[19].mxu1  ;;  %v19632_v49 = vadd.f32 %v15788_v6, %v19619_v41 }
 0x51d   : > { %v19622_v44 = vadd.f32 %v2027_v39, %v19614_v63 }
 0x51e   : > { %v2090_v5 = vsel %vm2086_vm7, %v19632_v49, -inf }
 0x51f   : > { %v15791_v47 = vpop.f32.mrb[20].mxu1  ;;  %v2087_v48 = vsel %vm2086_vm7, %v19622_v44, -inf }
 0x520   : > { %v2037_v50 = vpop.f32.mrb[21].mxu1  ;;  %2088 = vmax.xlane.f32.xlu0 %v2087_v48  ;;  %v19652_v8 = vadd.f32 %v15791_v47, %v19637_v51 }
 0x521   : > { %v19640_v56 = vadd.f32 %v2037_v50, %v19627_v45 }
 0x522   : > { %v2096_v15 = vsel %vm2086_vm7, %v19652_v8, -inf }
 0x523   : > { %v15794_v62 = vpop.f32.mrb[22].mxu1  ;;  %v2093_v0 = vsel %vm2086_vm7, %v19640_v56, -inf }
 0x524   : > { %v2047_v9 = vpop.f32.mrb[23].mxu1  ;;  %2094 = vmax.xlane.f32.xlu1 %v2093_v0  ;;  %2091 = vmax.xlane.f32.xlu0 %v2090_v5  ;;  %v19672_v17 = vadd.f32 %v15794_v62, %v19657_v10 }
 0x525   : > { %v19660_v11 = vadd.f32 %v2047_v9, %v19645_v59 }
 0x526   : > { %v2102_v58 = vsel %vm2086_vm7, %v19672_v17, -inf }
 0x527   : > { %v15797_v14 = vpop.f32.mrb[24].mxu1  ;;  %v2099_v16 = vsel %vm2086_vm7, %v19660_v11, -inf }
 0x528   : > { %v2057_v18 = vpop.f32.mrb[25].mxu1  ;;  %2097 = vmax.xlane.f32.xlu1 %v2096_v15  ;;  %2100 = vmax.xlane.f32.xlu0 %v2099_v16  ;;  %v19692_v23 = vadd.f32 %v15797_v14, %v19677_v19 }
 0x529   : > { %v19680_v20 = vadd.f32 %v2057_v18, %v19665_v12 }
 0x52a   : > { %v2108_v29 = vsel %vm2086_vm7, %v19692_v23, -inf }
 0x52b   : > { %v15800_v55 = vpop.f32.mrb[26].mxu1  ;;  %v2105_v22 = vsel %vm2086_vm7, %v19680_v20, -inf }
 0x52c   : > { %v2067_v24 = vpop.f32.mrb[27].mxu1  ;;  %2103 = vmax.xlane.f32.xlu1 %v2102_v58  ;;  %2106 = vmax.xlane.f32.xlu0 %v2105_v22  ;;  %v19712_v30 = vadd.f32 %v15800_v55, %v19697_v57 }
 0x52d   : > { %v19700_v25 = vadd.f32 %v2067_v24, %v19685_v21 }
 0x52e   : > { %v2114_v3 = vsel %vm2086_vm7, %v19712_v30, -inf }
 0x52f   : > { %v15803_v27 = vpop.f32.mrb[28].mxu1  ;;  %v2111_v61 = vsel %vm2086_vm7, %v19700_v25, -inf }
 0x530   : > { %2109 = vmax.xlane.f32.xlu1 %v2108_v29  ;;  %2112 = vmax.xlane.f32.xlu0 %v2111_v61  ;;  %v2077_v32 = vpop.f32.mrb[29].mxu1  ;;  %v19730_v40 = vadd.f32 %v15803_v27, %v19717_v35 }
 0x531   : > { %v19723_v36 = vadd.f32 %v2077_v32, %v19705_v26 }
 0x532   : > { %v2120_v48 = vsel %vm2086_vm7, %v19730_v40, -inf }
 0x533   : > { %v15870_v37 = vpop.f32.mrb[30].mxu1  ;;  %v2117_v38 = vsel %vm2086_vm7, %v19723_v36, -inf }
 0x534   : > { %v2604_v1 = vadd.f32 %v15870_v37, %v13780_v60  ;;  %2115 = vmax.xlane.f32.xlu1 %v2114_v3  ;;  %v2598_v7 = vpop.f32.mrb[31].mxu1  ;;  %2118 = vmax.xlane.f32.xlu0 %v2117_v38 }
 0x535   : > { %v2599_v6 = vadd.f32 %v13780_v60, %v2598_v7 }
 0x537   : > { %v17350_v39 = vpack.c.bf16 %v2604_v1, %v2599_v6  ;;  %v15873_v47 = vpop.f32.mrb[32].mxu1 }
 0x538   : > { %v2614_v50 = vadd.f32 %v15873_v47, %v13780_v60  ;;  %2121 = vmax.xlane.f32.xlu1 %v2120_v48  ;;  %v2608_v62 = vpop.f32.mrb[33].mxu1 }
 0x539   : > { %v2609_v0 = vadd.f32 %v13780_v60, %v2608_v62  ;;  %17352 = vmatprep.subr.msk.bf16.mxu1 %vm19496_vm6, %v17350_v39 }
 0x53a   : > { %17355 = vmatpush3.bf16.xpose.msk.msra.mxu1 %vm19496_vm6, %v17350_v39 }
 0x53b   : > { %v17356_v5 = vpack.c.bf16 %v2614_v50, %v2609_v0  ;;  %v15876_v9 = vpop.f32.mrb[34].mxu1 }
 0x53c   : > { %v2624_v14 = vadd.f32 %v15876_v9, %v13780_v60  ;;  %v2618_v15 = vpop.f32.mrb[35].mxu1 }
 0x53d   : > { %v2619_v16 = vadd.f32 %v13780_v60, %v2618_v15  ;;  %17358 = vmatprep.subr.msk.bf16.mxu1 %vm19496_vm6, %v17356_v5 }
 0x53f   : > { %v17362_v18 = vpack.c.bf16 %v2624_v14, %v2619_v16  ;;  %v15879_v55 = vpop.f32.mrb[36].mxu1 }
 0x540   : > { %v2634_v58 = vadd.f32 %v15879_v55, %v13780_v60  ;;  %v2628_v22 = vpop.f32.mrb[37].mxu1 }
 0x541   : > { %v2629_v24 = vadd.f32 %v13780_v60, %v2628_v22 }
 0x542   : > { %17361 = vmatpush3.bf16.xpose.msk.msra.mxu1 %vm19496_vm6, %v17356_v5 }
 0x543   : > { %v17368_v27 = vpack.c.bf16 %v2634_v58, %v2629_v24  ;;  %v15882_v29 = vpop.f32.mrb[38].mxu1  ;;  %17364 = vmatprep.subr.msk.bf16.mxu1 %vm19496_vm6, %v17362_v18 }
 0x544   : > { %v2644_v61 = vadd.f32 %v15882_v29, %v13780_v60  ;;  %v2638_v32 = vpop.f32.mrb[39].mxu1 }
 0x545   : > { %v2639_v37 = vadd.f32 %v13780_v60, %v2638_v32 }
 0x547   : > { %v15885_v3 = vpop.f32.mrb[40].mxu1  ;;  %v17374_v38 = vpack.c.bf16 %v2644_v61, %v2639_v37 }
 0x548   : > { %v2654_v1 = vadd.f32 %v15885_v3, %v13780_v60  ;;  %v2648_v7 = vpop.f32.mrb[41].mxu1 }
 0x549   : > { %v2649_v6 = vadd.f32 %v13780_v60, %v2648_v7 }
 0x54a   : > { %17367 = vmatpush3.bf16.xpose.msk.msra.mxu1 %vm19496_vm6, %v17362_v18 }
 0x54b   : > { %17370 = vmatprep.subr.msk.bf16.mxu1 %vm19496_vm6, %v17368_v27  ;;  %v17380_v39 = vpack.c.bf16 %v2654_v1, %v2649_v6 }
 0x552   : > { %17373 = vmatpush3.bf16.xpose.msk.msra.mxu1 %vm19496_vm6, %v17368_v27 }
 0x553   : > { %17376 = vmatprep.subr.msk.bf16.mxu1 %vm19496_vm6, %v17374_v38 }
 0x55a   : > { %17379 = vmatpush3.bf16.xpose.msk.msra.mxu1 %vm19496_vm6, %v17374_v38 }
 0x55b   : > { %17382 = vmatprep.subr.msk.bf16.mxu1 %vm19496_vm6, %v17380_v39 }
 0x562   : > { %17385 = vmatpush3.bf16.xpose.msk.msra.mxu1 %vm19496_vm6, %v17380_v39 }
 0x5ad   : > { %v2089_v60 = vpop.xlane.xlu0 %2088 }
 0x5ae   : > { %v2123_v47 = vsub.f32 %v19622_v44, %v2089_v60 }
 0x5b0   : > { %v2135_v48 = vmul.f32 1.442695, %v2123_v47 }
 0x5b1   : > { %v2095_v50 = vpop.xlane.xlu1 %2094  ;;  %v2092_v62 = vpop.xlane.xlu0 %2091 }
 0x5b2   : > { %18108 = vpow2.f32 %v2135_v48  ;;  %v2125_v0 = vsub.f32 %v19640_v56, %v2095_v50  ;;  %v2124_v5 = vsub.f32 %v19632_v49, %v2092_v62 }
 0x5b4   : > { %v2139_v9 = vmul.f32 1.442695, %v2125_v0  ;;  %v2137_v14 = vmul.f32 1.442695, %v2124_v5 }
 0x5b5   : > { %v2098_v15 = vpop.xlane.xlu1 %2097  ;;  %v2101_v16 = vpop.xlane.xlu0 %2100 }
 0x5b6   : > { %18110 = vpow2.f32 %v2139_v9  ;;  %v2126_v18 = vsub.f32 %v19652_v8, %v2098_v15  ;;  %v2127_v55 = vsub.f32 %v19660_v11, %v2101_v16 }
 0x5b7   : > { %18112 = vpow2.f32 %v2137_v14 }
 0x5b8   : > { %v2141_v58 = vmul.f32 1.442695, %v2126_v18  ;;  %v2143_v44 = vmul.f32 1.442695, %v2127_v55 }
 0x5b9   : > { %v2104_v22 = vpop.xlane.xlu1 %2103  ;;  %v2107_v24 = vpop.xlane.xlu0 %2106 }
 0x5ba   : > { %18114 = vpow2.f32 %v2141_v58  ;;  %v2128_v27 = vsub.f32 %v19672_v17, %v2104_v22  ;;  %v2129_v56 = vsub.f32 %v19680_v20, %v2107_v24 }
 0x5bb   : > { %18116 = vpow2.f32 %v2143_v44 }
 0x5bc   : > { %v19765_v49 = vpop.eup %18108  ;;  %v2145_v29 = vmul.f32 1.442695, %v2128_v27  ;;  %v2147_v61 = vmul.f32 1.442695, %v2129_v56 }
 0x5bd   : > { %v2110_v32 = vpop.xlane.xlu1 %2109  ;;  %v2113_v37 = vpop.xlane.xlu0 %2112  ;;  %v2159_v8 = vsel %vm2086_vm7, %v19765_v49, 0.0 }
 0x5be   : > { %18118 = vpow2.f32 %v2145_v29  ;;  %v2130_v11 = vsub.f32 %v19692_v23, %v2110_v32  ;;  %v2131_v3 = vsub.f32 %v19700_v25, %v2113_v37  ;;  %2160 = vadd.xlane.f32.xlu0 %v2159_v8  ;;  %v13762_v32 = vld [vmem:[%s23661_s11 + $0x8] sm:$0xff] }
 0x5bf   : > { %18120 = vpow2.f32 %v2147_v61  ;;  %15846 = vmatprep.subr.msk.mxu0 %vm1447_vm4, %v13762_v32 }
 0x5c0   : > { %v19771_v17 = vpop.eup %18110  ;;  %v2149_v20 = vmul.f32 1.442695, %v2130_v11  ;;  %v2151_v38 = vmul.f32 1.442695, %v2131_v3 }
 0x5c1   : > { %v19773_v1 = vpop.eup %18112  ;;  %v2116_v7 = vpop.xlane.xlu1 %2115  ;;  %v2165_v39 = vsel %vm2086_vm7, %v19771_v17, 0.0 }
 0x5c2   : > { %v2119_v6 = vpop.xlane.xlu0 %2118  ;;  %18122 = vpow2.f32 %v2149_v20  ;;  %v2132_v60 = vsub.f32 %v19712_v30, %v2116_v7  ;;  %v2162_v25 = vsel %vm2086_vm7, %v19773_v1, 0.0  ;;  %2166 = vadd.xlane.f32.xlu0 %v2165_v39 }
 0x5c3   : > { %v2133_v23 = vsub.f32 %v19723_v36, %v2119_v6  ;;  %18124 = vpow2.f32 %v2151_v38  ;;  %2163 = vadd.xlane.f32.xlu1 %v2162_v25 }
 0x5c4   : > { %v19781_v47 = vpop.eup %18114  ;;  %v2153_v48 = vmul.f32 1.442695, %v2132_v60 }
 0x5c5   : > { %v2155_v50 = vmul.f32 1.442695, %v2133_v23  ;;  %v19783_v62 = vpop.eup %18116  ;;  %v2122_v0 = vpop.xlane.xlu1 %2121  ;;  %v2168_v5 = vsel %vm2086_vm7, %v19781_v47, 0.0 }
 0x5c6   : > { %18126 = vpow2.f32 %v2153_v48  ;;  %v2134_v30 = vsub.f32 %v19730_v40, %v2122_v0  ;;  %v2171_v36 = vsel %vm2086_vm7, %v19783_v62, 0.0 }
 0x5c7   : > { %18128 = vpow2.f32 %v2155_v50  ;;  %2169 = vadd.xlane.f32.xlu1 %v2168_v5  ;;  %2172 = vadd.xlane.f32.xlu0 %v2171_v36  ;;  %v13794_v5 = vld [vmem:[%s23661_s11 + $0x48] sm:$0xff] }
 0x5c8   : > { %v19790_v9 = vpop.eup %18118  ;;  %v2157_v14 = vmul.f32 1.442695, %v2134_v30 }
 0x5c9   : > { %v19792_v15 = vpop.eup %18120  ;;  %v2174_v16 = vsel %vm2086_vm7, %v19790_v9, 0.0 }
 0x5ca   : > { %18130 = vpow2.f32 %v2157_v14  ;;  %v2177_v18 = vsel %vm2086_vm7, %v19792_v15, 0.0 }
 0x5cb   : > { %2175 = vadd.xlane.f32.xlu1 %v2174_v16  ;;  %2178 = vadd.xlane.f32.xlu0 %v2177_v18 }
 0x5cc   : > { %v19798_v40 = vpop.eup %18122 }
 0x5cd   : > { %v19800_v55 = vpop.eup %18124  ;;  %v2180_v58 = vsel %vm2086_vm7, %v19798_v40, 0.0 }
 0x5ce   : > { %v2183_v44 = vsel %vm2086_vm7, %v19800_v55, 0.0 }
 0x5cf   : > { %2181 = vadd.xlane.f32.xlu1 %v2180_v58  ;;  %2184 = vadd.xlane.f32.xlu0 %v2183_v44 }
 0x5d0   : > { %v19806_v22 = vpop.eup %18126 }
 0x5d1   : > { %v19808_v24 = vpop.eup %18128  ;;  %v2186_v27 = vsel %vm2086_vm7, %v19806_v22, 0.0 }
 0x5d2   : > { %v2189_v56 = vsel %vm2086_vm7, %v19808_v24, 0.0 }
 0x5d3   : > { %2187 = vadd.xlane.f32.xlu1 %v2186_v27  ;;  %2190 = vadd.xlane.f32.xlu0 %v2189_v56 }
 0x5d4   : > { %v19814_v29 = vpop.eup %18130 }
 0x5d5   : > { %v2192_v61 = vsel %vm2086_vm7, %v19814_v29, 0.0 }
 0x5d7   : > { %2193 = vadd.xlane.f32.xlu1 %v2192_v61 }
 0x64b   : > { %v2161_v37 = vpop.xlane.xlu0 %2160 }
 0x64c   : > { %18132 = vrcp.f32 %v2161_v37 }
 0x64f   : > { %v2167_v8 = vpop.xlane.xlu0 %2166 }
 0x650   : > { %v2164_v11 = vpop.xlane.xlu1 %2163  ;;  %18134 = vrcp.f32 %v2167_v8 }
 0x651   : > { %18136 = vrcp.f32 %v2164_v11 }
 0x654   : > { %v2170_v3 = vpop.xlane.xlu1 %2169  ;;  %v2173_v20 = vpop.xlane.xlu0 %2172 }
 0x655   : > { %18138 = vrcp.f32 %v2170_v3 }
 0x656   : > { %v18133_v38 = vpop.eup %18132  ;;  %18140 = vrcp.f32 %v2173_v20 }
 0x657   : > { %v2196_v7 = vmul.f32 %v18133_v38, %v19765_v49 }
 0x658   : > { %v2176_v6 = vpop.xlane.xlu1 %2175  ;;  %v2179_v39 = vpop.xlane.xlu0 %2178 }
 0x659   : > { %18142 = vrcp.f32 %v2176_v6  ;;  %15828 = vmatprep.mubr.msk.f32.mxu0 %vm2086_vm7, %v2196_v7 }
 0x65a   : > { %v18135_v60 = vpop.eup %18134  ;;  %18144 = vrcp.f32 %v2179_v39 }
 0x65b   : > { %v18137_v23 = vpop.eup %18136  ;;  %v2200_v25 = vmul.f32 %v18135_v60, %v19771_v17 }
 0x65c   : > { %v2198_v48 = vmul.f32 %v18137_v23, %v19773_v1  ;;  %v2182_v50 = vpop.xlane.xlu1 %2181  ;;  %v2185_v0 = vpop.xlane.xlu0 %2184 }
 0x65d   : > { %18146 = vrcp.f32 %v2182_v50 }
 0x65e   : > { %18148 = vrcp.f32 %v2185_v0  ;;  %15829 = vmatmul.mubr.msk.f32.vlgmr.msra.gmra.mrb[30].mxu0 %vm2086_vm7, %v2198_v48 }
 0x65f   : > { %v18139_v49 = vpop.eup %18138  ;;  %15831 = vmatprep.mubr.msk.f32.mxu0 %vm2086_vm7, %v2200_v25  ;;  %15847 = vmatpush3.xpose.msk.msra.mxu0 %vm1447_vm4, %v13762_v32  ;;  %v13764_v25 = vld [vmem:[%s23662_s12 + $0x1] ss:$0 sm:$0xff] }
 0x660   : > { %v18141_v30 = vpop.eup %18140  ;;  %v2188_v36 = vpop.xlane.xlu1 %2187  ;;  %v2202_v1 = vmul.f32 %v18139_v49, %v19781_v47  ;;  %15886 = vmatprep.subr.msk.mxu0 %vm1447_vm4, %v13794_v5 }
 0x661   : > { %v2191_v17 = vpop.xlane.xlu0 %2190  ;;  %18150 = vrcp.f32 %v2188_v36  ;;  %v2204_v14 = vmul.f32 %v18141_v30, %v19783_v62  ;;  %v13887_v30 = vld [vmem:[%s23661_s11 + $0x30] sm:$0xff] }
 0x662   : > { %18152 = vrcp.f32 %v2191_v17  ;;  %15832 = vmatmul.mubr.msk.f32.gmra.mrb[32].mxu0 %vm2086_vm7, %v2202_v1 }
 0x663   : > { %v18143_v16 = vpop.eup %18142  ;;  %15834 = vmatprep.mubr.msk.f32.mxu0 %vm2086_vm7, %v2204_v14 }
 0x664   : > { %v18145_v18 = vpop.eup %18144  ;;  %v2194_v58 = vpop.xlane.xlu1 %2193  ;;  %v2206_v44 = vmul.f32 %v18143_v16, %v19790_v9 }
 0x665   : > { %18154 = vrcp.f32 %v2194_v58  ;;  %v2208_v27 = vmul.f32 %v18145_v18, %v19792_v15 }
 0x666   : > { %15835 = vmatmul.mubr.msk.f32.gmra.mrb[34].mxu0 %vm2086_vm7, %v2206_v44 }
 0x667   : > { %v18147_v47 = vpop.eup %18146  ;;  %15837 = vmatprep.mubr.msk.f32.mxu0 %vm2086_vm7, %v2208_v27 }
 0x668   : > { %v18149_v56 = vpop.eup %18148  ;;  %v2210_v62 = vmul.f32 %v18147_v47, %v19798_v40  ;;  %v13871_v40 = vld [vmem:[%s23661_s11 + $0x10] sm:$0xff] }
 0x669   : > { %v2212_v61 = vmul.f32 %v18149_v56, %v19800_v55  ;;  %16030 = vmatprep.subr.msk.mxu1 %vm1447_vm4, %v13871_v40 }
 0x66a   : > { %15838 = vmatmul.mubr.msk.f32.gmra.mrb[36].mxu0 %vm2086_vm7, %v2210_v62 }
 0x66b   : > { %v18151_v32 = vpop.eup %18150  ;;  %15840 = vmatprep.mubr.msk.f32.mxu0 %vm2086_vm7, %v2212_v61 }
 0x66c   : > { %v18153_v37 = vpop.eup %18152  ;;  %v2214_v9 = vmul.f32 %v18151_v32, %v19806_v22 }
 0x66d   : > { %v2216_v15 = vmul.f32 %v18153_v37, %v19808_v24 }
 0x66e   : > { %15841 = vmatmul.mubr.msk.f32.gmra.mrb[38].mxu0 %vm2086_vm7, %v2214_v9 }
 0x66f   : > { %v18155_v8 = vpop.eup %18154  ;;  %15843 = vmatprep.mubr.msk.f32.mxu0 %vm2086_vm7, %v2216_v15 }
 0x670   : > { %v2218_v11 = vmul.f32 %v18155_v8, %v19814_v29 }
 0x672   : > { %15844 = vmatmul.mubr.msk.f32.gmra.mrb[40].mxu0 %vm2086_vm7, %v2218_v11  ;;  %v13796_v11 = vld [vmem:[%s23662_s12 + $0x9] ss:$0 sm:$0xff] }
 0x673   : > { %15848 = vmatprep.mubr.msk.f32.mxu0 %vm1447_vm4, %v19365_v28 }
 0x676   : > { %15849 = vmatmul.mubr.msk.f32.vlgmr.msra.gmra.mrb[42].mxu0 %vm1447_vm4, %v19373_v31 }
 0x677   : > { %15851 = vmatprep.mubr.msk.f32.mxu0 %vm1447_vm4, %v19376_v33  ;;  %15887 = vmatpush3.xpose.msk.msra.mxu0 %vm1447_vm4, %v13794_v5 }
 0x67a   : > { %15852 = vmatmul.mubr.msk.f32.gmra.mrb[44].mxu0 %vm1447_vm4, %v19379_v34 }
 0x67b   : > { %15854 = vmatprep.mubr.msk.f32.mxu0 %vm1447_vm4, %v19388_v42 }
 0x67e   : > { %15855 = vmatmul.mubr.msk.f32.gmra.mrb[46].mxu0 %vm1447_vm4, %v19390_v43 }
 0x67f   : > { %15857 = vmatprep.mubr.msk.f32.mxu0 %vm1447_vm4, %v19395_v46 }
 0x682   : > { %15858 = vmatmul.mubr.msk.f32.gmra.mrb[48].mxu0 %vm1447_vm4, %v19410_v53 }
 0x683   : > { %15860 = vmatprep.mubr.msk.f32.mxu0 %vm1447_vm4, %v19407_v52 }
 0x686   : > { %15861 = vmatmul.mubr.msk.f32.gmra.mrb[50].mxu0 %vm1447_vm4, %v19416_v54 }
 0x687   : > { %15863 = vmatprep.mubr.msk.f32.mxu0 %vm1447_vm4, %v19465_v2 }
 0x68a   : > { %15864 = vmatmul.mubr.msk.f32.gmra.mrb[52].mxu0 %vm1447_vm4, %v19469_v4 }
 0x68b   : > { %15888 = vmatprep.mubr.msk.f32.mxu0 %vm1447_vm4, %v19365_v28 }
 0x68e   : > { %15889 = vmatmul.mubr.msk.f32.vlgmr.msra.gmra.mrb[54].mxu0 %vm1447_vm4, %v19373_v31 }
 0x68f   : > { %15891 = vmatprep.mubr.msk.f32.mxu0 %vm1447_vm4, %v19376_v33 }
 0x692   : > { %15892 = vmatmul.mubr.msk.f32.gmra.mrb[56].mxu0 %vm1447_vm4, %v19379_v34 }
 0x693   : > { %15894 = vmatprep.mubr.msk.f32.mxu0 %vm1447_vm4, %v19388_v42 }
 0x696   : > { %15895 = vmatmul.mubr.msk.f32.gmra.mrb[58].mxu0 %vm1447_vm4, %v19390_v43 }
 0x697   : > { %15897 = vmatprep.mubr.msk.f32.mxu0 %vm1447_vm4, %v19395_v46 }
 0x69a   : > { %15898 = vmatmul.mubr.msk.f32.gmra.mrb[60].mxu0 %vm1447_vm4, %v19410_v53 }
 0x69b   : > { %15900 = vmatprep.mubr.msk.f32.mxu0 %vm1447_vm4, %v19407_v52 }
 0x69e   : > { %15901 = vmatmul.mubr.msk.f32.gmra.mrb[62].mxu0 %vm1447_vm4, %v19416_v54 }
 0x69f   : > { %15903 = vmatprep.mubr.msk.f32.mxu0 %vm1447_vm4, %v19465_v2 }
 0x6a2   : > { %15904 = vmatmul.mubr.msk.f32.gmra.mrb[64].mxu0 %vm1447_vm4, %v19469_v4 }
 0x731   : > { %v19904_v55 = vpop.f32.mrb[30].mxu0 }
 0x732   : > { %v19906_v22 = vpop.f32.mrb[31].mxu0 }
 0x735   : > { %v19908_v24 = vpop.f32.mrb[32].mxu0 }
 0x736   : > { %v19910_v29 = vpop.f32.mrb[33].mxu0 }
 0x739   : > { %v19912_v3 = vpop.f32.mrb[34].mxu0 }
 0x73a   : > { %v19914_v20 = vpop.f32.mrb[35].mxu0 }
 0x73d   : > { %v19916_v38 = vpop.f32.mrb[36].mxu0 }
 0x73e   : > { %v19918_v7 = vpop.f32.mrb[37].mxu0 }
 0x741   : > { %v19920_v6 = vpop.f32.mrb[38].mxu0 }
 0x742   : > { %v19922_v39 = vpop.f32.mrb[39].mxu0 }
 0x745   : > { %v19924_v60 = vpop.f32.mrb[40].mxu0 }
 0x746   : > { %23754 = vst [vmem:[#allocation16_spill] sm:$0xff] %v19924_v60  ;;  %v19926_v23 = vpop.f32.mrb[41].mxu0 }
 0x747   : > { %23755 = vst [vmem:[#allocation17_spill] sm:$0xff] %v19926_v23 }
 0x749   : > { %v15850_v48 = vpop.f32.mrb[42].mxu0 }
 0x74a   : > { %v2460_v50 = vpop.f32.mrb[43].mxu0  ;;  %v2466_v5 = vadd.f32 %v15850_v48, %v13764_v25 }
 0x74b   : > { %v2461_v0 = vadd.f32 %v13764_v25, %v2460_v50 }
 0x74d   : > { %v15853_v49 = vpop.f32.mrb[44].mxu0  ;;  %15930 = vmatprep.mubr.msk.f32.mxu1 %vm1888_vm5, %v2461_v0 }
 0x74e   : > { %v2470_v36 = vpop.f32.mrb[45].mxu0  ;;  %15931 = vmatmul.mubr.msk.f32.vlgmr.msra.gmra.mrb[42].mxu1 %vm1888_vm5, %v2466_v5  ;;  %v2476_v1 = vadd.f32 %v15853_v49, %v13764_v25 }
 0x74f   : > { %v2471_v17 = vadd.f32 %v13764_v25, %v2470_v36  ;;  %16031 = vmatpush3.xpose.msk.msra.mxu1 %vm1447_vm4, %v13871_v40 }
 0x750   : > { %16050 = vmatprep.subr.msk.mxu1 %vm1447_vm4, %v13887_v30 }
 0x751   : > { %v15856_v14 = vpop.f32.mrb[46].mxu0  ;;  %15933 = vmatprep.mubr.msk.f32.mxu1 %vm1888_vm5, %v2471_v17 }
 0x752   : > { %v2480_v16 = vpop.f32.mrb[47].mxu0  ;;  %15934 = vmatmul.mubr.msk.f32.gmra.mrb[44].mxu1 %vm1888_vm5, %v2476_v1  ;;  %v2486_v58 = vadd.f32 %v15856_v14, %v13764_v25 }
 0x753   : > { %v2481_v18 = vadd.f32 %v13764_v25, %v2480_v16 }
 0x755   : > { %v15859_v44 = vpop.f32.mrb[48].mxu0  ;;  %15936 = vmatprep.mubr.msk.f32.mxu1 %vm1888_vm5, %v2481_v18 }
 0x756   : > { %v2490_v27 = vpop.f32.mrb[49].mxu0  ;;  %15937 = vmatmul.mubr.msk.f32.gmra.mrb[46].mxu1 %vm1888_vm5, %v2486_v58  ;;  %v2496_v56 = vadd.f32 %v15859_v44, %v13764_v25 }
 0x757   : > { %v2491_v47 = vadd.f32 %v13764_v25, %v2490_v27 }
 0x759   : > { %v15862_v62 = vpop.f32.mrb[50].mxu0  ;;  %15939 = vmatprep.mubr.msk.f32.mxu1 %vm1888_vm5, %v2491_v47 }
 0x75a   : > { %v2500_v61 = vpop.f32.mrb[51].mxu0  ;;  %15940 = vmatmul.mubr.msk.f32.gmra.mrb[48].mxu1 %vm1888_vm5, %v2496_v56  ;;  %v2506_v37 = vadd.f32 %v15862_v62, %v13764_v25 }
 0x75b   : > { %v2501_v32 = vadd.f32 %v13764_v25, %v2500_v61 }
 0x75d   : > { %v15865_v9 = vpop.f32.mrb[52].mxu0  ;;  %15942 = vmatprep.mubr.msk.f32.mxu1 %vm1888_vm5, %v2501_v32 }
 0x75e   : > { %v2510_v15 = vpop.f32.mrb[53].mxu0  ;;  %15943 = vmatmul.mubr.msk.f32.gmra.mrb[50].mxu1 %vm1888_vm5, %v2506_v37  ;;  %v2516_v40 = vadd.f32 %v15865_v9, %v13764_v25 }
 0x75f   : > { %v2511_v8 = vadd.f32 %v13764_v25, %v2510_v15 }
 0x761   : > { %v15890_v48 = vpop.f32.mrb[54].mxu0  ;;  %15945 = vmatprep.mubr.msk.f32.mxu1 %vm1888_vm5, %v2511_v8 }
 0x762   : > { %v2742_v50 = vadd.f32 %v15890_v48, %v13796_v11  ;;  %v2736_v0 = vpop.f32.mrb[55].mxu0  ;;  %15946 = vmatmul.mubr.msk.f32.gmra.mrb[52].mxu1 %vm1888_vm5, %v2516_v40 }
 0x763   : > { %v2737_v5 = vadd.f32 %v13796_v11, %v2736_v0  ;;  %16032 = vmatprep.mubr.msk.f32.mxu1 %vm1447_vm4, %v19365_v28 }
 0x765   : > { %v17386_v49 = vpack.c.bf16 %v2742_v50, %v2737_v5  ;;  %v15893_v36 = vpop.f32.mrb[56].mxu0 }
 0x766   : > { %v2752_v17 = vadd.f32 %v15893_v36, %v13796_v11  ;;  %v2746_v1 = vpop.f32.mrb[57].mxu0  ;;  %16033 = vmatmul.mubr.msk.f32.vlgmr.msra.gmra.mrb[54].mxu1 %vm1447_vm4, %v19373_v31 }
 0x767   : > { %v2747_v14 = vadd.f32 %v13796_v11, %v2746_v1  ;;  %17387 = vmatprep.subr.bf16.mxu0 %v17386_v49  ;;  %16035 = vmatprep.mubr.msk.f32.mxu1 %vm1447_vm4, %v19376_v33 }
 0x768   : > { %17389 = vmatpush3.bf16.msra.mxu0 %v17386_v49  ;;  %16051 = vmatpush3.xpose.msk.msra.mxu1 %vm1447_vm4, %v13887_v30 }
 0x769   : > { %v17390_v25 = vpack.c.bf16 %v2752_v17, %v2747_v14  ;;  %v15896_v16 = vpop.f32.mrb[58].mxu0 }
 0x76a   : > { %v2762_v18 = vadd.f32 %v15896_v16, %v13796_v11  ;;  %v2756_v58 = vpop.f32.mrb[59].mxu0  ;;  %16036 = vmatmul.mubr.msk.f32.gmra.mrb[56].mxu1 %vm1447_vm4, %v19379_v34 }
 0x76b   : > { %v2757_v44 = vadd.f32 %v13796_v11, %v2756_v58  ;;  %17391 = vmatprep.subr.bf16.mxu0 %v17390_v25  ;;  %16038 = vmatprep.mubr.msk.f32.mxu1 %vm1447_vm4, %v19388_v42 }
 0x76c   : > { %17393 = vmatpush3.bf16.msra.mxu0 %v17390_v25 }
 0x76d   : > { %v17394_v27 = vpack.c.bf16 %v2762_v18, %v2757_v44  ;;  %v15899_v47 = vpop.f32.mrb[60].mxu0 }
 0x76e   : > { %v2772_v56 = vadd.f32 %v15899_v47, %v13796_v11  ;;  %v2766_v62 = vpop.f32.mrb[61].mxu0  ;;  %16039 = vmatmul.mubr.msk.f32.gmra.mrb[58].mxu1 %vm1447_vm4, %v19390_v43 }
 0x76f   : > { %v2767_v30 = vadd.f32 %v13796_v11, %v2766_v62  ;;  %17395 = vmatprep.subr.bf16.mxu0 %v17394_v27  ;;  %16041 = vmatprep.mubr.msk.f32.mxu1 %vm1447_vm4, %v19395_v46 }
 0x770   : > { %17397 = vmatpush3.bf16.msra.mxu0 %v17394_v27 }
 0x771   : > { %v17398_v61 = vpack.c.bf16 %v2772_v56, %v2767_v30  ;;  %v15902_v32 = vpop.f32.mrb[62].mxu0 }
 0x772   : > { %v2782_v37 = vadd.f32 %v15902_v32, %v13796_v11  ;;  %v2776_v9 = vpop.f32.mrb[63].mxu0  ;;  %16042 = vmatmul.mubr.msk.f32.gmra.mrb[60].mxu1 %vm1447_vm4, %v19410_v53 }
 0x773   : > { %v2777_v15 = vadd.f32 %v13796_v11, %v2776_v9  ;;  %17399 = vmatprep.subr.bf16.mxu0 %v17398_v61  ;;  %16044 = vmatprep.mubr.msk.f32.mxu1 %vm1447_vm4, %v19407_v52 }
 0x774   : > { %17401 = vmatpush3.bf16.msra.mxu0 %v17398_v61 }
 0x775   : > { %v17402_v8 = vpack.c.bf16 %v2782_v37, %v2777_v15  ;;  %v15905_v40 = vpop.f32.mrb[64].mxu0 }
 0x776   : > { %v2792_v48 = vadd.f32 %v15905_v40, %v13796_v11  ;;  %v2786_v50 = vpop.f32.mrb[65].mxu0  ;;  %16045 = vmatmul.mubr.msk.f32.gmra.mrb[62].mxu1 %vm1447_vm4, %v19416_v54 }
 0x777   : > { %v2787_v0 = vadd.f32 %v13796_v11, %v2786_v50  ;;  %17403 = vmatprep.subr.bf16.mxu0 %v17402_v8  ;;  %16047 = vmatprep.mubr.msk.f32.mxu1 %vm1447_vm4, %v19465_v2 }
 0x778   : > { %17405 = vmatpush3.bf16.msra.mxu0 %v17402_v8 }
 0x779   : > { %v17406_v5 = vpack.c.bf16 %v2792_v48, %v2787_v0 }
 0x77a   : > { %16048 = vmatmul.mubr.msk.f32.gmra.mrb[64].mxu1 %vm1447_vm4, %v19469_v4 }
 0x77b   : > { %17407 = vmatprep.subr.bf16.mxu0 %v17406_v5  ;;  %16052 = vmatprep.mubr.msk.f32.mxu1 %vm1447_vm4, %v19365_v28 }
 0x77c   : > { %17409 = vmatpush3.bf16.msra.mxu0 %v17406_v5 }
 0x77e   : > { %16053 = vmatmul.mubr.msk.f32.vlgmr.msra.gmra.mrb[66].mxu1 %vm1447_vm4, %v19373_v31 }
 0x77f   : > { %16055 = vmatprep.mubr.msk.f32.mxu1 %vm1447_vm4, %v19376_v33 }
 0x782   : > { %16056 = vmatmul.mubr.msk.f32.gmra.mrb[68].mxu1 %vm1447_vm4, %v19379_v34 }
 0x783   : > { %16058 = vmatprep.mubr.msk.f32.mxu1 %vm1447_vm4, %v19388_v42 }
 0x786   : > { %16059 = vmatmul.mubr.msk.f32.gmra.mrb[70].mxu1 %vm1447_vm4, %v19390_v43 }
 0x787   : > { %16061 = vmatprep.mubr.msk.f32.mxu1 %vm1447_vm4, %v19395_v46 }
 0x78a   : > { %16062 = vmatmul.mubr.msk.f32.gmra.mrb[72].mxu1 %vm1447_vm4, %v19410_v53 }
 0x78b   : > { %16064 = vmatprep.mubr.msk.f32.mxu1 %vm1447_vm4, %v19407_v52 }
 0x78e   : > { %16065 = vmatmul.mubr.msk.f32.gmra.mrb[74].mxu1 %vm1447_vm4, %v19416_v54 }
 0x78f   : > { %16067 = vmatprep.mubr.msk.f32.mxu1 %vm1447_vm4, %v19465_v2 }
 0x792   : > { %16068 = vmatmul.mubr.msk.f32.gmra.mrb[76].mxu1 %vm1447_vm4, %v19469_v4 }
 0x821   : > { %v15932_v11 = vpop.f32.mrb[42].mxu1 }
 0x822   : > { %v2933_v49 = vpop.f32.mrb[43].mxu1  ;;  %v20001_v36 = vadd.f32 %v15932_v11, %v19619_v41 }
 0x823   : > { %v20004_v17 = vadd.f32 %v2933_v49, %v19614_v63 }
 0x824   : > { %v2995_v1 = vsel %vm2086_vm7, %v20001_v36, -inf }
 0x825   : > { %2996 = vmax.xlane.f32.xlu1 %v2995_v1  ;;  %v15935_v14 = vpop.f32.mrb[44].mxu1  ;;  %v2992_v25 = vsel %vm2086_vm7, %v20004_v17, -inf }
 0x826   : > { %v2943_v16 = vpop.f32.mrb[45].mxu1  ;;  %2993 = vmax.xlane.f32.xlu0 %v2992_v25  ;;  %v20011_v18 = vadd.f32 %v15935_v14, %v19637_v51 }
 0x827   : > { %v20014_v58 = vadd.f32 %v2943_v16, %v19627_v45 }
 0x828   : > { %v3001_v63 = vsel %vm2086_vm7, %v20011_v18, -inf }
 0x829   : > { %3002 = vmax.xlane.f32.xlu1 %v3001_v63  ;;  %v15938_v41 = vpop.f32.mrb[46].mxu1  ;;  %v2998_v44 = vsel %vm2086_vm7, %v20014_v58, -inf }
 0x82a   : > { %v2953_v27 = vpop.f32.mrb[47].mxu1  ;;  %2999 = vmax.xlane.f32.xlu0 %v2998_v44  ;;  %v20021_v47 = vadd.f32 %v15938_v41, %v19657_v10 }
 0x82b   : > { %v20024_v56 = vadd.f32 %v2953_v27, %v19645_v59 }
 0x82c   : > { %v3007_v45 = vsel %vm2086_vm7, %v20021_v47, -inf }
 0x82d   : > { %3008 = vmax.xlane.f32.xlu1 %v3007_v45  ;;  %v15941_v51 = vpop.f32.mrb[48].mxu1  ;;  %v3004_v62 = vsel %vm2086_vm7, %v20024_v56, -inf }
 0x82e   : > { %v2963_v30 = vpop.f32.mrb[49].mxu1  ;;  %3005 = vmax.xlane.f32.xlu0 %v3004_v62  ;;  %v20031_v61 = vadd.f32 %v15941_v51, %v19677_v19 }
 0x82f   : > { %v20034_v32 = vadd.f32 %v2963_v30, %v19665_v12 }
 0x830   : > { %v3013_v59 = vsel %vm2086_vm7, %v20031_v61, -inf }
 0x831   : > { %3014 = vmax.xlane.f32.xlu1 %v3013_v59  ;;  %v15944_v10 = vpop.f32.mrb[50].mxu1  ;;  %v3010_v37 = vsel %vm2086_vm7, %v20034_v32, -inf }
 0x832   : > { %v20041_v9 = vadd.f32 %v15944_v10, %v19697_v57  ;;  %v2973_v15 = vpop.f32.mrb[51].mxu1  ;;  %3011 = vmax.xlane.f32.xlu0 %v3010_v37 }
 0x833   : > { %v20044_v8 = vadd.f32 %v2973_v15, %v19685_v21  ;;  %v13873_v21 = vld [vmem:[%s23662_s12 + $0x2] ss:$0 sm:$0xff] }
 0x834   : > { %v3019_v12 = vsel %vm2086_vm7, %v20041_v9, -inf }
 0x835   : > { %3020 = vmax.xlane.f32.xlu1 %v3019_v12  ;;  %v15947_v19 = vpop.f32.mrb[52].mxu1  ;;  %v3016_v40 = vsel %vm2086_vm7, %v20044_v8, -inf }
 0x836   : > { %v20051_v48 = vadd.f32 %v15947_v19, %v19717_v35  ;;  %v2983_v50 = vpop.f32.mrb[53].mxu1  ;;  %3017 = vmax.xlane.f32.xlu0 %v3016_v40 }
 0x837   : > { %v20054_v57 = vadd.f32 %v2983_v50, %v19705_v26 }
 0x838   : > { %v3025_v0 = vsel %vm2086_vm7, %v20051_v48, -inf }
 0x839   : > { %3026 = vmax.xlane.f32.xlu1 %v3025_v0  ;;  %v16034_v5 = vpop.f32.mrb[54].mxu1  ;;  %v3022_v11 = vsel %vm2086_vm7, %v20054_v57, -inf  ;;  %v13889_v0 = vld [vmem:[%s23662_s12 + $0x6] ss:$0 sm:$0xff] }
 0x83a   : > { %v20063_v49 = vadd.f32 %v16034_v5, %v13873_v21  ;;  %v3688_v35 = vpop.f32.mrb[55].mxu1  ;;  %3023 = vmax.xlane.f32.xlu0 %v3022_v11 }
 0x83b   : > { %v3689_v1 = vadd.f32 %v13873_v21, %v3688_v35 }
 0x83d   : > { %v16037_v14 = vpop.f32.mrb[56].mxu1  ;;  %16114 = vmatprep.mubr.msk.f32.mxu1 %vm1888_vm5, %v3689_v1 }
 0x83e   : > { %v20066_v26 = vadd.f32 %v16037_v14, %v13873_v21  ;;  %v3698_v25 = vpop.f32.mrb[57].mxu1 }
 0x83f   : > { %v20068_v16 = vadd.f32 %v13873_v21, %v3698_v25 }
 0x841   : > { %v16040_v63 = vpop.f32.mrb[58].mxu1 }
 0x842   : > { %v20070_v41 = vadd.f32 %v16040_v63, %v13873_v21  ;;  %v3708_v44 = vpop.f32.mrb[59].mxu1 }
 0x843   : > { %v20072_v27 = vadd.f32 %v13873_v21, %v3708_v44 }
 0x845   : > { %v16043_v45 = vpop.f32.mrb[60].mxu1 }
 0x846   : > { %v20074_v51 = vadd.f32 %v16043_v45, %v13873_v21  ;;  %v3718_v62 = vpop.f32.mrb[61].mxu1 }
 0x847   : > { %v3719_v30 = vadd.f32 %v13873_v21, %v3718_v62 }
 0x849   : > { %v16046_v59 = vpop.f32.mrb[62].mxu1 }
 0x84a   : > { %v20076_v10 = vadd.f32 %v16046_v59, %v13873_v21  ;;  %v3728_v37 = vpop.f32.mrb[63].mxu1 }
 0x84b   : > { %v3729_v15 = vadd.f32 %v13873_v21, %v3728_v37 }
 0x84d   : > { %v16049_v12 = vpop.f32.mrb[64].mxu1 }
 0x84e   : > { %v3744_v19 = vadd.f32 %v16049_v12, %v13873_v21  ;;  %v3738_v40 = vpop.f32.mrb[65].mxu1 }
 0x84f   : > { %v3739_v50 = vadd.f32 %v13873_v21, %v3738_v40 }
 0x851   : > { %v16054_v5 = vpop.f32.mrb[66].mxu1 }
 0x852   : > { %v3832_v11 = vadd.f32 %v16054_v5, %v13889_v0  ;;  %v3826_v35 = vpop.f32.mrb[67].mxu1 }
 0x853   : > { %v3827_v1 = vadd.f32 %v13889_v0, %v3826_v35 }
 0x855   : > { %v17410_v14 = vpack.c.bf16 %v3832_v11, %v3827_v1  ;;  %v16057_v25 = vpop.f32.mrb[68].mxu1 }
 0x856   : > { %v3842_v63 = vadd.f32 %v16057_v25, %v13889_v0  ;;  %v3836_v44 = vpop.f32.mrb[69].mxu1 }
 0x857   : > { %v3837_v45 = vadd.f32 %v13889_v0, %v3836_v44  ;;  %17412 = vmatprep.subr.msk.bf16.mxu1 %vm19496_vm6, %v17410_v14 }
 0x858   : > { %17415 = vmatpush3.bf16.xpose.msk.msra.mxu1 %vm19496_vm6, %v17410_v14 }
 0x859   : > { %v17416_v21 = vpack.c.bf16 %v3842_v63, %v3837_v45  ;;  %v16060_v62 = vpop.f32.mrb[70].mxu1 }
 0x85a   : > { %v3852_v59 = vadd.f32 %v16060_v62, %v13889_v0  ;;  %v3846_v37 = vpop.f32.mrb[71].mxu1 }
 0x85b   : > { %v3847_v12 = vadd.f32 %v13889_v0, %v3846_v37  ;;  %17418 = vmatprep.subr.msk.bf16.mxu1 %vm19496_vm6, %v17416_v21 }
 0x85d   : > { %v17422_v40 = vpack.c.bf16 %v3852_v59, %v3847_v12  ;;  %v16063_v5 = vpop.f32.mrb[72].mxu1 }
 0x85e   : > { %v3862_v11 = vadd.f32 %v16063_v5, %v13889_v0  ;;  %v3856_v35 = vpop.f32.mrb[73].mxu1 }
 0x85f   : > { %v3857_v1 = vadd.f32 %v13889_v0, %v3856_v35 }
 0x860   : > { %17421 = vmatpush3.bf16.xpose.msk.msra.mxu1 %vm19496_vm6, %v17416_v21 }
 0x861   : > { %v17428_v25 = vpack.c.bf16 %v3862_v11, %v3857_v1  ;;  %v16066_v44 = vpop.f32.mrb[74].mxu1  ;;  %17424 = vmatprep.subr.msk.bf16.mxu1 %vm19496_vm6, %v17422_v40 }
 0x862   : > { %v3872_v14 = vadd.f32 %v16066_v44, %v13889_v0  ;;  %v3866_v63 = vpop.f32.mrb[75].mxu1 }
 0x863   : > { %v3867_v45 = vadd.f32 %v13889_v0, %v3866_v63 }
 0x865   : > { %v17434_v62 = vpack.c.bf16 %v3872_v14, %v3867_v45  ;;  %v16069_v37 = vpop.f32.mrb[76].mxu1 }
 0x866   : > { %v3882_v60 = vadd.f32 %v16069_v37, %v13889_v0  ;;  %v3876_v23 = vpop.f32.mrb[77].mxu1 }
 0x867   : > { %v3877_v59 = vadd.f32 %v13889_v0, %v3876_v23  ;;  %v13968_v23 = vld [vmem:[%s23661_s11 + $0x18] sm:$0xff] }
 0x868   : > { %17427 = vmatpush3.bf16.xpose.msk.msra.mxu1 %vm19496_vm6, %v17422_v40 }
 0x869   : > { %v17440_v12 = vpack.c.bf16 %v3882_v60, %v3877_v59  ;;  %17430 = vmatprep.subr.msk.bf16.mxu1 %vm19496_vm6, %v17428_v25  ;;  %v14000_v60 = vld [vmem:[%s23661_s11 + $0x58] sm:$0xff] }
 0x870   : > { %17433 = vmatpush3.bf16.xpose.msk.msra.mxu1 %vm19496_vm6, %v17428_v25 }
 0x871   : > { %17436 = vmatprep.subr.msk.bf16.mxu1 %vm19496_vm6, %v17434_v62 }
 0x878   : > { %17439 = vmatpush3.bf16.xpose.msk.msra.mxu1 %vm19496_vm6, %v17434_v62 }
 0x879   : > { %17442 = vmatprep.subr.msk.bf16.mxu1 %vm19496_vm6, %v17440_v12 }
 0x880   : > { %17445 = vmatpush3.bf16.xpose.msk.msra.mxu1 %vm19496_vm6, %v17440_v12 }
 0x881   : > { %16194 = vmatprep.subr.msk.mxu1 %vm1447_vm4, %v13968_v23 }
 0x887   : > { %16115 = vmatmul.mubr.msk.f32.vlgmr.msra.gmra.mrb[78].mxu1 %vm1888_vm5, %v20063_v49 }
 0x888   : > { %16117 = vmatprep.mubr.msk.f32.mxu1 %vm1888_vm5, %v20068_v16  ;;  %16195 = vmatpush3.xpose.msk.msra.mxu1 %vm1447_vm4, %v13968_v23 }
 0x889   : > { %16234 = vmatprep.subr.msk.mxu1 %vm1447_vm4, %v14000_v60 }
 0x88b   : > { %16118 = vmatmul.mubr.msk.f32.gmra.mrb[80].mxu1 %vm1888_vm5, %v20066_v26 }
 0x88c   : > { %16120 = vmatprep.mubr.msk.f32.mxu1 %vm1888_vm5, %v20072_v27 }
 0x88f   : > { %16121 = vmatmul.mubr.msk.f32.gmra.mrb[82].mxu1 %vm1888_vm5, %v20070_v41 }
 0x890   : > { %16123 = vmatprep.mubr.msk.f32.mxu1 %vm1888_vm5, %v3719_v30 }
 0x893   : > { %16124 = vmatmul.mubr.msk.f32.gmra.mrb[84].mxu1 %vm1888_vm5, %v20074_v51 }
 0x894   : > { %16126 = vmatprep.mubr.msk.f32.mxu1 %vm1888_vm5, %v3729_v15 }
 0x897   : > { %16127 = vmatmul.mubr.msk.f32.gmra.mrb[86].mxu1 %vm1888_vm5, %v20076_v10 }
 0x898   : > { %16129 = vmatprep.mubr.msk.f32.mxu1 %vm1888_vm5, %v3739_v50 }
 0x89b   : > { %16130 = vmatmul.mubr.msk.f32.gmra.mrb[88].mxu1 %vm1888_vm5, %v3744_v19 }
 0x89c   : > { %16196 = vmatprep.mubr.msk.f32.mxu1 %vm1447_vm4, %v19365_v28 }
 0x89f   : > { %16197 = vmatmul.mubr.msk.f32.vlgmr.msra.gmra.mrb[90].mxu1 %vm1447_vm4, %v19373_v31 }
 0x8a0   : > { %16199 = vmatprep.mubr.msk.f32.mxu1 %vm1447_vm4, %v19376_v33  ;;  %16235 = vmatpush3.xpose.msk.msra.mxu1 %vm1447_vm4, %v14000_v60 }
 0x8a3   : > { %16200 = vmatmul.mubr.msk.f32.gmra.mrb[92].mxu1 %vm1447_vm4, %v19379_v34 }
 0x8a4   : > { %16202 = vmatprep.mubr.msk.f32.mxu1 %vm1447_vm4, %v19388_v42 }
 0x8a7   : > { %16203 = vmatmul.mubr.msk.f32.gmra.mrb[94].mxu1 %vm1447_vm4, %v19390_v43 }
 0x8a8   : > { %16205 = vmatprep.mubr.msk.f32.mxu1 %vm1447_vm4, %v19395_v46 }
 0x8ab   : > { %16206 = vmatmul.mubr.msk.f32.gmra.mrb[96].mxu1 %vm1447_vm4, %v19410_v53 }
 0x8ac   : > { %16208 = vmatprep.mubr.msk.f32.mxu1 %vm1447_vm4, %v19407_v52 }
 0x8af   : > { %16209 = vmatmul.mubr.msk.f32.gmra.mrb[98].mxu1 %vm1447_vm4, %v19416_v54 }
 0x8b0   : > { %16211 = vmatprep.mubr.msk.f32.mxu1 %vm1447_vm4, %v19465_v2 }
 0x8b2   : > { %v2997_v49 = vpop.xlane.xlu1 %2996 }
 0x8b3   : > { %v3029_v26 = vsub.f32 %v20001_v36, %v2997_v49  ;;  %16212 = vmatmul.mubr.msk.f32.gmra.mrb[100].mxu1 %vm1447_vm4, %v19469_v4  ;;  %v2994_v16 = vpop.xlane.xlu0 %2993 }
 0x8b4   : > { %v3028_v41 = vsub.f32 %v20004_v17, %v2994_v16  ;;  %16236 = vmatprep.mubr.msk.f32.mxu1 %vm1447_vm4, %v19365_v28 }
 0x8b5   : > { %v3042_v27 = vmul.f32 1.442695, %v3029_v26 }
 0x8b6   : > { %v3040_v51 = vmul.f32 1.442695, %v3028_v41  ;;  %v3003_v30 = vpop.xlane.xlu1 %3002 }
 0x8b7   : > { %18156 = vpow2.f32 %v3042_v27  ;;  %v3031_v10 = vsub.f32 %v20011_v18, %v3003_v30  ;;  %16237 = vmatmul.mubr.msk.f32.vlgmr.msra.gmra.mrb[102].mxu1 %vm1447_vm4, %v19373_v31  ;;  %v3000_v15 = vpop.xlane.xlu0 %2999 }
 0x8b8   : > { %18158 = vpow2.f32 %v3040_v51  ;;  %v3030_v36 = vsub.f32 %v20014_v58, %v3000_v15  ;;  %16239 = vmatprep.mubr.msk.f32.mxu1 %vm1447_vm4, %v19376_v33 }
 0x8b9   : > { %v3046_v17 = vmul.f32 1.442695, %v3031_v10 }
 0x8ba   : > { %v3044_v19 = vmul.f32 1.442695, %v3030_v36  ;;  %v3009_v50 = vpop.xlane.xlu1 %3008 }
 0x8bb   : > { %18160 = vpow2.f32 %v3046_v17  ;;  %v3033_v0 = vsub.f32 %v20021_v47, %v3009_v50  ;;  %16240 = vmatmul.mubr.msk.f32.gmra.mrb[104].mxu1 %vm1447_vm4, %v19379_v34  ;;  %v3006_v18 = vpop.xlane.xlu0 %3005 }
 0x8bc   : > { %18162 = vpow2.f32 %v3044_v19  ;;  %v3032_v21 = vsub.f32 %v20024_v56, %v3006_v18  ;;  %16242 = vmatprep.mubr.msk.f32.mxu1 %vm1447_vm4, %v19388_v42 }
 0x8bd   : > { %v3050_v58 = vmul.f32 1.442695, %v3033_v0 }
 0x8be   : > { %v3048_v40 = vmul.f32 1.442695, %v3032_v21  ;;  %v3015_v5 = vpop.xlane.xlu1 %3014 }
 0x8bf   : > { %18164 = vpow2.f32 %v3050_v58  ;;  %v3035_v11 = vsub.f32 %v20031_v61, %v3015_v5  ;;  %16243 = vmatmul.mubr.msk.f32.gmra.mrb[106].mxu1 %vm1447_vm4, %v19390_v43  ;;  %v3012_v47 = vpop.xlane.xlu0 %3011 }
 0x8c0   : > { %18166 = vpow2.f32 %v3048_v40  ;;  %v3034_v35 = vsub.f32 %v20034_v32, %v3012_v47  ;;  %16245 = vmatprep.mubr.msk.f32.mxu1 %vm1447_vm4, %v19395_v46 }
 0x8c1   : > { %v20179_v56 = vpop.eup %18156  ;;  %v3054_v1 = vmul.f32 1.442695, %v3035_v11 }
 0x8c2   : > { %v20181_v25 = vpop.eup %18158  ;;  %v3052_v44 = vmul.f32 1.442695, %v3034_v35  ;;  %v3021_v14 = vpop.xlane.xlu1 %3020  ;;  %v3067_v61 = vsel %vm2086_vm7, %v20179_v56, 0.0 }
 0x8c3   : > { %18168 = vpow2.f32 %v3054_v1  ;;  %v3037_v63 = vsub.f32 %v20041_v9, %v3021_v14  ;;  %3068 = vadd.xlane.f32.xlu1 %v3067_v61  ;;  %16246 = vmatmul.mubr.msk.f32.gmra.mrb[108].mxu1 %vm1447_vm4, %v19410_v53  ;;  %v3018_v32 = vpop.xlane.xlu0 %3017  ;;  %v3064_v45 = vsel %vm2086_vm7, %v20181_v25, 0.0 }
 0x8c4   : > { %18170 = vpow2.f32 %v3052_v44  ;;  %v3036_v62 = vsub.f32 %v20044_v8, %v3018_v32  ;;  %16248 = vmatprep.mubr.msk.f32.mxu1 %vm1447_vm4, %v19407_v52  ;;  %3065 = vadd.xlane.f32.xlu0 %v3064_v45  ;;  %v20244_v32 = vld [vmem:[%s23753_s6 + $0x8] sm:$0xff] }
 0x8c5   : > { %v20193_v37 = vpop.eup %18160  ;;  %v3058_v59 = vmul.f32 1.442695, %v3037_v63  ;;  %23756 = vst [vmem:[#allocation18_spill] sm:$0xff] %v20244_v32 }
 0x8c6   : > { %v20195_v12 = vpop.eup %18162  ;;  %v3056_v9 = vmul.f32 1.442695, %v3036_v62  ;;  %v3027_v23 = vpop.xlane.xlu1 %3026  ;;  %v3073_v60 = vsel %vm2086_vm7, %v20193_v37, 0.0 }
 0x8c7   : > { %18172 = vpow2.f32 %v3058_v59  ;;  %v3039_v49 = vsub.f32 %v20051_v48, %v3027_v23  ;;  %3074 = vadd.xlane.f32.xlu1 %v3073_v60  ;;  %16249 = vmatmul.mubr.msk.f32.gmra.mrb[110].mxu1 %vm1447_vm4, %v19416_v54  ;;  %v3024_v8 = vpop.xlane.xlu0 %3023  ;;  %v3070_v26 = vsel %vm2086_vm7, %v20195_v12, 0.0 }
 0x8c8   : > { %18174 = vpow2.f32 %v3056_v9  ;;  %v3038_v16 = vsub.f32 %v20054_v57, %v3024_v8  ;;  %16251 = vmatprep.mubr.msk.f32.mxu1 %vm1447_vm4, %v19465_v2  ;;  %3071 = vadd.xlane.f32.xlu0 %v3070_v26  ;;  %v20252_v9 = vld [vmem:[%s23753_s6] sm:$0xff] }
 0x8c9   : > { %v20207_v41 = vpop.eup %18164  ;;  %v3062_v27 = vmul.f32 1.442695, %v3039_v49  ;;  %23757 = vst [vmem:[#allocation19_spill] sm:$0xff] %v20252_v9 }
 0x8ca   : > { %v20209_v51 = vpop.eup %18166  ;;  %v3060_v48 = vmul.f32 1.442695, %v3038_v16  ;;  %v3079_v30 = vsel %vm2086_vm7, %v20207_v41, 0.0 }
 0x8cb   : > { %18176 = vpow2.f32 %v3062_v27  ;;  %3080 = vadd.xlane.f32.xlu1 %v3079_v30  ;;  %16252 = vmatmul.mubr.msk.f32.gmra.mrb[112].mxu1 %vm1447_vm4, %v19469_v4  ;;  %v3076_v57 = vsel %vm2086_vm7, %v20209_v51, 0.0 }
 0x8cc   : > { %18178 = vpow2.f32 %v3060_v48  ;;  %3077 = vadd.xlane.f32.xlu0 %v3076_v57  ;;  %v20266_v57 = vld [vmem:[%s23753_s6 + $0x18] sm:$0xff] }
 0x8cd   : > { %v20217_v10 = vpop.eup %18168  ;;  %23758 = vst [vmem:[#allocation20_spill] sm:$0xff] %v20266_v57 }
 0x8ce   : > { %v20219_v15 = vpop.eup %18170  ;;  %v3085_v36 = vsel %vm2086_vm7, %v20217_v10, 0.0 }
 0x8cf   : > { %3086 = vadd.xlane.f32.xlu1 %v3085_v36  ;;  %v3082_v17 = vsel %vm2086_vm7, %v20219_v15, 0.0 }
 0x8d0   : > { %3083 = vadd.xlane.f32.xlu0 %v3082_v17 }
 0x8d1   : > { %v20225_v19 = vpop.eup %18172 }
 0x8d2   : > { %v20227_v50 = vpop.eup %18174  ;;  %v3091_v0 = vsel %vm2086_vm7, %v20225_v19, 0.0 }
 0x8d3   : > { %3092 = vadd.xlane.f32.xlu1 %v3091_v0  ;;  %v3088_v18 = vsel %vm2086_vm7, %v20227_v50, 0.0 }
 0x8d4   : > { %3089 = vadd.xlane.f32.xlu0 %v3088_v18 }
 0x8d5   : > { %v20233_v21 = vpop.eup %18176 }
 0x8d6   : > { %v20235_v58 = vpop.eup %18178  ;;  %v3097_v40 = vsel %vm2086_vm7, %v20233_v21, 0.0 }
 0x8d7   : > { %3098 = vadd.xlane.f32.xlu1 %v3097_v40  ;;  %v3094_v5 = vsel %vm2086_vm7, %v20235_v58, 0.0 }
 0x8d8   : > { %3095 = vadd.xlane.f32.xlu0 %v3094_v5 }
 0x950   : > { %v3069_v11 = vpop.xlane.xlu1 %3068 }
 0x951   : > { %18180 = vrcp.f32 %v3069_v11  ;;  %v3066_v47 = vpop.xlane.xlu0 %3065 }
 0x952   : > { %18182 = vrcp.f32 %v3066_v47 }
 0x954   : > { %v3075_v35 = vpop.xlane.xlu1 %3074 }
 0x955   : > { %18184 = vrcp.f32 %v3075_v35  ;;  %v3072_v1 = vpop.xlane.xlu0 %3071 }
 0x956   : > { %18186 = vrcp.f32 %v3072_v1 }
 0x958   : > { %v3081_v44 = vpop.xlane.xlu1 %3080 }
 0x959   : > { %18188 = vrcp.f32 %v3081_v44  ;;  %v3078_v14 = vpop.xlane.xlu0 %3077 }
 0x95a   : > { %18190 = vrcp.f32 %v3078_v14  ;;  %v16116_v61 = vpop.f32.mrb[78].mxu1  ;;  %v20290_v14 = vld [vmem:[%s23753_s6 + $0x28] sm:$0xff] }
 0x95b   : > { %v18181_v63 = vpop.eup %18180  ;;  %v20247_v45 = vadd.f32 %v20244_v32, %v16116_v61  ;;  %v4161_v62 = vpop.f32.mrb[79].mxu1  ;;  %23760 = vst [vmem:[#allocation22_spill] sm:$0xff] %v20290_v14 }
 0x95c   : > { %v18183_v59 = vpop.eup %18182  ;;  %v20255_v23 = vadd.f32 %v20252_v9, %v4161_v62  ;;  %v3087_v60 = vpop.xlane.xlu1 %3086  ;;  %v3103_v16 = vmul.f32 %v18181_v63, %v20179_v56  ;;  %v20299_v62 = vld [vmem:[%s23753_s6 + $0x20] sm:$0xff] }
 0x95d   : > { %18192 = vrcp.f32 %v3087_v60  ;;  %v3084_v49 = vpop.xlane.xlu0 %3083  ;;  %v4223_v8 = vsel %vm2086_vm7, %v20247_v45, -inf  ;;  %v3101_v26 = vmul.f32 %v18183_v59, %v20181_v25  ;;  %v20275_v25 = vld [vmem:[%s23753_s6 + $0x10] sm:$0xff]  ;;  %23761 = vst [vmem:[#allocation23_spill] sm:$0xff] %v20299_v62 }
 0x95e   : > { %18194 = vrcp.f32 %v3084_v49  ;;  %4224 = vmax.xlane.f32.xlu1 %v4223_v8  ;;  %v16119_v27 = vpop.f32.mrb[80].mxu1  ;;  %v4220_v48 = vsel %vm2086_vm7, %v20255_v23, -inf  ;;  %23759 = vst [vmem:[#allocation21_spill] sm:$0xff] %v20275_v25 }
 0x95f   : > { %v18185_v30 = vpop.eup %18184  ;;  %v20269_v36 = vadd.f32 %v20266_v57, %v16119_v27  ;;  %v4171_v17 = vpop.f32.mrb[81].mxu1  ;;  %4221 = vmax.xlane.f32.xlu0 %v4220_v48  ;;  %15972 = vmatprep.mubr.msk.f32.mxu0 %vm2086_vm7, %v3101_v26 }
 0x960   : > { %v18187_v56 = vpop.eup %18186  ;;  %v20278_v0 = vadd.f32 %v20275_v25, %v4171_v17  ;;  %v3093_v18 = vpop.xlane.xlu1 %3092  ;;  %15973 = vmatmul.mubr.msk.f32.vlgmr.msra.gmra.mrb[66].mxu0 %vm2086_vm7, %v3103_v16  ;;  %v3107_v1 = vmul.f32 %v18185_v30, %v20193_v37  ;;  %v20314_v30 = vld [vmem:[%s23753_s6 + $0x38] sm:$0xff] }
 0x961   : > { %18196 = vrcp.f32 %v3093_v18  ;;  %v3090_v40 = vpop.xlane.xlu0 %3089  ;;  %v4229_v5 = vsel %vm2086_vm7, %v20269_v36, -inf  ;;  %v3105_v11 = vmul.f32 %v18187_v56, %v20195_v12  ;;  %23762 = vst [vmem:[#allocation24_spill] sm:$0xff] %v20314_v30  ;;  %v20323_v18 = vld [vmem:[%s23753_s6 + $0x30] sm:$0xff] }
 0x962   : > { %18198 = vrcp.f32 %v3090_v40  ;;  %4230 = vmax.xlane.f32.xlu1 %v4229_v5  ;;  %v16122_v47 = vpop.f32.mrb[82].mxu1  ;;  %v4226_v35 = vsel %vm2086_vm7, %v20278_v0, -inf  ;;  %23763 = vst [vmem:[#allocation25_spill] sm:$0xff] %v20323_v18 }
 0x963   : > { %v18189_v44 = vpop.eup %18188  ;;  %v20293_v61 = vadd.f32 %v20290_v14, %v16122_v47  ;;  %v4181_v63 = vpop.f32.mrb[83].mxu1  ;;  %4227 = vmax.xlane.f32.xlu0 %v4226_v35  ;;  %15975 = vmatprep.mubr.msk.f32.mxu0 %vm2086_vm7, %v3105_v11 }
 0x964   : > { %v18191_v12 = vpop.eup %18190  ;;  %v20302_v37 = vadd.f32 %v20299_v62, %v4181_v63  ;;  %v3099_v59 = vpop.xlane.xlu1 %3098  ;;  %15976 = vmatmul.mubr.msk.f32.gmra.mrb[68].mxu0 %vm2086_vm7, %v3107_v1  ;;  %v3111_v27 = vmul.f32 %v18189_v44, %v20207_v41  ;;  %v20338_v44 = vld [vmem:[%s23753_s6 + $0x48] sm:$0xff] }
 0x965   : > { %18200 = vrcp.f32 %v3099_v59  ;;  %v3096_v60 = vpop.xlane.xlu0 %3095  ;;  %v4235_v49 = vsel %vm2086_vm7, %v20293_v61, -inf  ;;  %v3109_v8 = vmul.f32 %v18191_v12, %v20209_v51  ;;  %23764 = vst [vmem:[#allocation26_spill] sm:$0xff] %v20338_v44  ;;  %v20347_v59 = vld [vmem:[%s23753_s6 + $0x40] sm:$0xff] }
 0x966   : > { %18202 = vrcp.f32 %v3096_v60  ;;  %4236 = vmax.xlane.f32.xlu1 %v4235_v49  ;;  %v16125_v26 = vpop.f32.mrb[84].mxu1  ;;  %v4232_v16 = vsel %vm2086_vm7, %v20302_v37, -inf  ;;  %23765 = vst [vmem:[#allocation27_spill] sm:$0xff] %v20347_v59 }
 0x967   : > { %v18193_v48 = vpop.eup %18192  ;;  %v20317_v17 = vadd.f32 %v20314_v30, %v16125_v26  ;;  %v4191_v56 = vpop.f32.mrb[85].mxu1  ;;  %4233 = vmax.xlane.f32.xlu0 %v4232_v16  ;;  %15978 = vmatprep.mubr.msk.f32.mxu0 %vm2086_vm7, %v3109_v8 }
 0x968   : > { %v18195_v51 = vpop.eup %18194  ;;  %v20326_v41 = vadd.f32 %v20323_v18, %v4191_v56  ;;  %15979 = vmatmul.mubr.msk.f32.gmra.mrb[70].mxu0 %vm2086_vm7, %v3111_v27  ;;  %v3115_v35 = vmul.f32 %v18193_v48, %v20217_v10  ;;  %v20362_v48 = vld [vmem:[%s23753_s6 + $0x58] sm:$0xff] }
 0x969   : > { %v4241_v40 = vsel %vm2086_vm7, %v20317_v17, -inf  ;;  %v3113_v5 = vmul.f32 %v18195_v51, %v20219_v15  ;;  %23766 = vst [vmem:[#allocation28_spill] sm:$0xff] %v20362_v48 }
 0x96a   : > { %4242 = vmax.xlane.f32.xlu1 %v4241_v40  ;;  %v16128_v11 = vpop.f32.mrb[86].mxu1  ;;  %v4238_v47 = vsel %vm2086_vm7, %v20326_v41, -inf  ;;  %v20371_v40 = vld [vmem:[%s23753_s6 + $0x50] sm:$0xff] }
 0x96b   : > { %v18197_v1 = vpop.eup %18196  ;;  %v20341_v63 = vadd.f32 %v20338_v44, %v16128_v11  ;;  %v4201_v12 = vpop.f32.mrb[87].mxu1  ;;  %4239 = vmax.xlane.f32.xlu0 %v4238_v47  ;;  %15981 = vmatprep.mubr.msk.f32.mxu0 %vm2086_vm7, %v3113_v5  ;;  %23767 = vst [vmem:[#allocation29_spill] sm:$0xff] %v20371_v40  ;;  %v20380_v5 = vld [vmem:[%s23662_s12 + $0x3] ss:$0 sm:$0xff] }
 0x96c   : > { %v18199_v15 = vpop.eup %18198  ;;  %v20350_v10 = vadd.f32 %v20347_v59, %v4201_v12  ;;  %15982 = vmatmul.mubr.msk.f32.gmra.mrb[72].mxu0 %vm2086_vm7, %v3115_v35  ;;  %v3119_v16 = vmul.f32 %v18197_v1, %v20225_v19 }
 0x96d   : > { %v4247_v60 = vsel %vm2086_vm7, %v20341_v63, -inf  ;;  %v3117_v49 = vmul.f32 %v18199_v15, %v20227_v50 }
 0x96e   : > { %4248 = vmax.xlane.f32.xlu1 %v4247_v60  ;;  %v16131_v8 = vpop.f32.mrb[88].mxu1  ;;  %v4244_v26 = vsel %vm2086_vm7, %v20350_v10, -inf }
 0x96f   : > { %v18201_v27 = vpop.eup %18200  ;;  %v20365_v56 = vadd.f32 %v20362_v48, %v16131_v8  ;;  %v4211_v51 = vpop.f32.mrb[89].mxu1  ;;  %4245 = vmax.xlane.f32.xlu0 %v4244_v26  ;;  %15984 = vmatprep.mubr.msk.f32.mxu0 %vm2086_vm7, %v3117_v49 }
 0x970   : > { %v18203_v50 = vpop.eup %18202  ;;  %v20374_v19 = vadd.f32 %v20371_v40, %v4211_v51  ;;  %15985 = vmatmul.mubr.msk.f32.gmra.mrb[74].mxu0 %vm2086_vm7, %v3119_v16  ;;  %v3123_v12 = vmul.f32 %v18201_v27, %v20233_v21 }
 0x971   : > { %v4253_v11 = vsel %vm2086_vm7, %v20365_v56, -inf  ;;  %v3121_v47 = vmul.f32 %v18203_v50, %v20235_v58 }
 0x972   : > { %4254 = vmax.xlane.f32.xlu1 %v4253_v11  ;;  %v16198_v35 = vpop.f32.mrb[90].mxu1  ;;  %v4250_v1 = vsel %vm2086_vm7, %v20374_v19, -inf }
 0x973   : > { %v20389_v15 = vadd.f32 %v16198_v35, %v20380_v5  ;;  %v20391_v60 = vpop.f32.mrb[91].mxu1  ;;  %4251 = vmax.xlane.f32.xlu0 %v4250_v1  ;;  %15987 = vmatprep.mubr.msk.f32.mxu0 %vm2086_vm7, %v3121_v47 }
 0x974   : > { %15988 = vmatmul.mubr.msk.f32.gmra.mrb[76].mxu0 %vm2086_vm7, %v3123_v12 }
 0x976   : > { %v16201_v49 = vpop.f32.mrb[92].mxu1 }
 0x977   : > { %v20396_v58 = vadd.f32 %v16201_v49, %v20380_v5  ;;  %v4777_v8 = vpop.f32.mrb[93].mxu1 }
 0x978   : > { %v20399_v26 = vadd.f32 %v20380_v5, %v4777_v8 }
 0x97a   : > { %v16204_v16 = vpop.f32.mrb[94].mxu1 }
 0x97b   : > { %v20402_v21 = vadd.f32 %v16204_v16, %v20380_v5  ;;  %v4787_v27 = vpop.f32.mrb[95].mxu1 }
 0x97c   : > { %v20405_v51 = vadd.f32 %v20380_v5, %v4787_v27 }
 0x97e   : > { %v16207_v50 = vpop.f32.mrb[96].mxu1 }
 0x97f   : > { %v20408_v11 = vadd.f32 %v16207_v50, %v20380_v5  ;;  %v4797_v47 = vpop.f32.mrb[97].mxu1 }
 0x980   : > { %v20411_v35 = vadd.f32 %v20380_v5, %v4797_v47  ;;  %v14002_v47 = vld [vmem:[%s23662_s12 + $0xb] ss:$0 sm:$0xff] }
 0x982   : > { %v16210_v1 = vpop.f32.mrb[98].mxu1 }
 0x983   : > { %v20414_v12 = vadd.f32 %v16210_v1, %v20380_v5  ;;  %v4807_v49 = vpop.f32.mrb[99].mxu1 }
 0x984   : > { %v20417_v8 = vadd.f32 %v20380_v5, %v4807_v49 }
 0x985   : > { %23768 = vst [vmem:[#allocation30_spill] sm:$0xff] %v20414_v12 }
 0x986   : > { %v16213_v16 = vpop.f32.mrb[100].mxu1 }
 0x987   : > { %v20420_v27 = vadd.f32 %v16213_v16, %v20380_v5  ;;  %v4817_v40 = vpop.f32.mrb[101].mxu1 }
 0x988   : > { %v20423_v50 = vadd.f32 %v20380_v5, %v4817_v40  ;;  %v13846_v40 = vld [vmem:[%s23663_s13 + $0x8] sm:$0xff] }
 0x989   : > { %23769 = vst [vmem:[#allocation31_spill] sm:$0xff] %v20420_v27  ;;  %15990 = vmatprep.subr.mxu0 %v13846_v40 }
 0x98a   : > { %23770 = vst [vmem:[#allocation32_spill] sm:$0xff] %v20423_v50  ;;  %v16238_v48 = vpop.f32.mrb[102].mxu1  ;;  %15991 = vmatpush3.msra.mxu0 %v13846_v40 }
 0x98b   : > { %v5049_v59 = vadd.f32 %v16238_v48, %v14002_v47  ;;  %v5043_v1 = vpop.f32.mrb[103].mxu1 }
 0x98c   : > { %v5044_v44 = vadd.f32 %v14002_v47, %v5043_v1 }
 0x98e   : > { %v17506_v18 = vpack.c.bf16 %v5049_v59, %v5044_v44  ;;  %v16241_v30 = vpop.f32.mrb[104].mxu1 }
 0x98f   : > { %v5059_v49 = vadd.f32 %v16241_v30, %v14002_v47  ;;  %v5053_v62 = vpop.f32.mrb[105].mxu1 }
 0x990   : > { %v5054_v14 = vadd.f32 %v14002_v47, %v5053_v62  ;;  %17507 = vmatprep.subr.bf16.mxu1 %v17506_v18 }
 0x991   : > { %17509 = vmatpush3.bf16.msra.mxu1 %v17506_v18 }
 0x992   : > { %v17510_v16 = vpack.c.bf16 %v5059_v49, %v5054_v14  ;;  %v16244_v25 = vpop.f32.mrb[106].mxu1 }
 0x993   : > { %v5069_v57 = vadd.f32 %v16244_v25, %v14002_v47  ;;  %v5063_v9 = vpop.f32.mrb[107].mxu1 }
 0x994   : > { %v5064_v48 = vadd.f32 %v14002_v47, %v5063_v9  ;;  %17511 = vmatprep.subr.bf16.mxu1 %v17510_v16 }
 0x995   : > { %17513 = vmatpush3.bf16.msra.mxu1 %v17510_v16  ;;  %v20434_v16 = vld [vmem:[%s23663_s13] sm:$0xff] }
 0x996   : > { %v17514_v44 = vpack.c.bf16 %v5069_v57, %v5064_v48  ;;  %v16247_v59 = vpop.f32.mrb[108].mxu1  ;;  %16010 = vmatprep.subr.mxu0 %v20434_v16 }
 0x997   : > { %v5079_v30 = vadd.f32 %v16247_v59, %v14002_v47  ;;  %v5073_v1 = vpop.f32.mrb[109].mxu1 }
 0x998   : > { %v5074_v62 = vadd.f32 %v14002_v47, %v5073_v1  ;;  %17515 = vmatprep.subr.bf16.mxu1 %v17514_v44 }
 0x999   : > { %17517 = vmatpush3.bf16.msra.mxu1 %v17514_v44 }
 0x99a   : > { %v17518_v18 = vpack.c.bf16 %v5079_v30, %v5074_v62  ;;  %v16250_v32 = vpop.f32.mrb[110].mxu1 }
 0x99b   : > { %v5089_v27 = vadd.f32 %v16250_v32, %v14002_v47  ;;  %v5083_v50 = vpop.f32.mrb[111].mxu1 }
 0x99c   : > { %v5084_v14 = vadd.f32 %v14002_v47, %v5083_v50  ;;  %17519 = vmatprep.subr.bf16.mxu1 %v17518_v18 }
 0x99d   : > { %17521 = vmatpush3.bf16.msra.mxu1 %v17518_v18 }
 0x99e   : > { %v17522_v25 = vpack.c.bf16 %v5089_v27, %v5084_v14  ;;  %v16253_v49 = vpop.f32.mrb[112].mxu1 }
 0x99f   : > { %v5099_v40 = vadd.f32 %v16253_v49, %v14002_v47  ;;  %v5093_v9 = vpop.f32.mrb[113].mxu1 }
 0x9a0   : > { %v5094_v12 = vadd.f32 %v14002_v47, %v5093_v9  ;;  %17523 = vmatprep.subr.bf16.mxu1 %v17522_v25 }
 0x9a1   : > { %17525 = vmatpush3.bf16.msra.mxu1 %v17522_v25 }
 0x9a2   : > { %v17526_v57 = vpack.c.bf16 %v5099_v40, %v5094_v12 }
 0x9a4   : > { %17527 = vmatprep.subr.bf16.mxu1 %v17526_v57 }
 0x9a5   : > { %17529 = vmatpush3.bf16.msra.mxu1 %v17526_v57 }
 0x9eb   : > { %v4225_v32 = vpop.xlane.xlu1 %4224 }
 0x9ec   : > { %v4257_v50 = vsub.f32 %v20247_v45, %v4225_v32  ;;  %v4222_v27 = vpop.xlane.xlu0 %4221 }
 0x9ed   : > { %v4256_v48 = vsub.f32 %v20255_v23, %v4222_v27 }
 0x9ee   : > { %v4270_v44 = vmul.f32 1.442695, %v4257_v50 }
 0x9ef   : > { %v4268_v47 = vmul.f32 1.442695, %v4256_v48  ;;  %v4231_v59 = vpop.xlane.xlu1 %4230 }
 0x9f0   : > { %18204 = vpow2.f32 %v4270_v44  ;;  %v4259_v12 = vsub.f32 %v20269_v36, %v4231_v59  ;;  %v4228_v30 = vpop.xlane.xlu0 %4227 }
 0x9f1   : > { %18206 = vpow2.f32 %v4268_v47  ;;  %v4258_v1 = vsub.f32 %v20278_v0, %v4228_v30 }
 0x9f2   : > { %v4274_v62 = vmul.f32 1.442695, %v4259_v12 }
 0x9f3   : > { %v4272_v18 = vmul.f32 1.442695, %v4258_v1  ;;  %v4237_v14 = vpop.xlane.xlu1 %4236 }
 0x9f4   : > { %18208 = vpow2.f32 %v4274_v62  ;;  %v4261_v25 = vsub.f32 %v20293_v61, %v4237_v14  ;;  %v4234_v45 = vpop.xlane.xlu0 %4233 }
 0x9f5   : > { %18210 = vpow2.f32 %v4272_v18  ;;  %v4260_v23 = vsub.f32 %v20302_v37, %v4234_v45 }
 0x9f6   : > { %v4278_v49 = vmul.f32 1.442695, %v4261_v25 }
 0x9f7   : > { %v4276_v40 = vmul.f32 1.442695, %v4260_v23  ;;  %v4243_v9 = vpop.xlane.xlu1 %4242 }
 0x9f8   : > { %18212 = vpow2.f32 %v4278_v49  ;;  %v4263_v36 = vsub.f32 %v20317_v17, %v4243_v9  ;;  %v4240_v57 = vpop.xlane.xlu0 %4239 }
 0x9f9   : > { %18214 = vpow2.f32 %v4276_v40  ;;  %v4262_v0 = vsub.f32 %v20326_v41, %v4240_v57 }
 0x9fa   : > { %v20445_v32 = vpop.eup %18204  ;;  %v4282_v50 = vmul.f32 1.442695, %v4263_v36 }
 0x9fb   : > { %v20447_v27 = vpop.eup %18206  ;;  %v4280_v61 = vmul.f32 1.442695, %v4262_v0  ;;  %v4249_v48 = vpop.xlane.xlu1 %4248  ;;  %v4295_v37 = vsel %vm2086_vm7, %v20445_v32, 0.0 }
 0x9fc   : > { %18216 = vpow2.f32 %v4282_v50  ;;  %v4265_v44 = vsub.f32 %v20341_v63, %v4249_v48  ;;  %4296 = vadd.xlane.f32.xlu1 %v4295_v37  ;;  %v4246_v47 = vpop.xlane.xlu0 %4245  ;;  %v4292_v17 = vsel %vm2086_vm7, %v20447_v27, 0.0 }
 0x9fd   : > { %18218 = vpow2.f32 %v4280_v61  ;;  %v4264_v41 = vsub.f32 %v20350_v10, %v4246_v47  ;;  %4293 = vadd.xlane.f32.xlu0 %v4292_v17 }
 0x9fe   : > { %v20455_v59 = vpop.eup %18208  ;;  %v4286_v12 = vmul.f32 1.442695, %v4265_v44 }
 0x9ff   : > { %v20457_v30 = vpop.eup %18210  ;;  %v4284_v1 = vmul.f32 1.442695, %v4264_v41  ;;  %v4255_v62 = vpop.xlane.xlu1 %4254  ;;  %v4301_v18 = vsel %vm2086_vm7, %v20455_v59, 0.0 }
 0xa00   : > { %18220 = vpow2.f32 %v4286_v12  ;;  %v4267_v63 = vsub.f32 %v20365_v56, %v4255_v62  ;;  %4302 = vadd.xlane.f32.xlu1 %v4301_v18  ;;  %v4252_v14 = vpop.xlane.xlu0 %4251  ;;  %v4298_v25 = vsel %vm2086_vm7, %v20457_v30, 0.0  ;;  %v13903_v62 = vld [vmem:[%s23661_s11 + $0x50] sm:$0xff] }
 0xa01   : > { %18222 = vpow2.f32 %v4284_v1  ;;  %v4266_v10 = vsub.f32 %v20374_v19, %v4252_v14  ;;  %4299 = vadd.xlane.f32.xlu0 %v4298_v25 }
 0xa02   : > { %v20465_v45 = vpop.eup %18212  ;;  %v4290_v23 = vmul.f32 1.442695, %v4267_v63 }
 0xa03   : > { %v20467_v49 = vpop.eup %18214  ;;  %v4288_v40 = vmul.f32 1.442695, %v4266_v10  ;;  %v4307_v9 = vsel %vm2086_vm7, %v20465_v45, 0.0 }
 0xa04   : > { %18224 = vpow2.f32 %v4290_v23  ;;  %4308 = vadd.xlane.f32.xlu1 %v4307_v9  ;;  %v4304_v56 = vsel %vm2086_vm7, %v20467_v49, 0.0 }
 0xa05   : > { %18226 = vpow2.f32 %v4288_v40  ;;  %4305 = vadd.xlane.f32.xlu0 %v4304_v56 }
 0xa06   : > { %v20473_v36 = vpop.eup %18216 }
 0xa07   : > { %v20475_v19 = vpop.eup %18218  ;;  %v4313_v57 = vsel %vm2086_vm7, %v20473_v36, 0.0 }
 0xa08   : > { %4314 = vadd.xlane.f32.xlu1 %v4313_v57  ;;  %v4310_v0 = vsel %vm2086_vm7, %v20475_v19, 0.0 }
 0xa09   : > { %4311 = vadd.xlane.f32.xlu0 %v4310_v0 }
 0xa0a   : > { %v20481_v50 = vpop.eup %18220 }
 0xa0b   : > { %v20483_v61 = vpop.eup %18222  ;;  %v4319_v48 = vsel %vm2086_vm7, %v20481_v50, 0.0 }
 0xa0c   : > { %4320 = vadd.xlane.f32.xlu1 %v4319_v48  ;;  %v4316_v37 = vsel %vm2086_vm7, %v20483_v61, 0.0 }
 0xa0d   : > { %4317 = vadd.xlane.f32.xlu0 %v4316_v37 }
 0xa0e   : > { %v20489_v44 = vpop.eup %18224 }
 0xa0f   : > { %v20491_v47 = vpop.eup %18226  ;;  %v4325_v17 = vsel %vm2086_vm7, %v20489_v44, 0.0 }
 0xa10   : > { %4326 = vadd.xlane.f32.xlu1 %v4325_v17  ;;  %v4322_v41 = vsel %vm2086_vm7, %v20491_v47, 0.0 }
 0xa11   : > { %4323 = vadd.xlane.f32.xlu0 %v4322_v41 }
 0xa33   : > { %v15974_v12 = vpop.f32.mrb[66].mxu0 }
 0xa34   : > { %v3226_v1 = vpop.f32.mrb[67].mxu0 }
 0xa35   : > { %15992 = vmatprep.mubr.msk.f32.mxu0 %vm1888_vm5, %v3226_v1 }
 0xa36   : > { %15993 = vmatmul.mubr.msk.f32.vlgmr.msra.gmra.mrb[78].mxu0 %vm1888_vm5, %v15974_v12 }
 0xa37   : > { %v15977_v18 = vpop.f32.mrb[68].mxu0  ;;  %16011 = vmatpush3.msra.mxu0 %v20434_v16 }
 0xa38   : > { %v3236_v63 = vpop.f32.mrb[69].mxu0  ;;  %16070 = vmatprep.subr.msk.mxu0 %vm1447_vm4, %v13903_v62 }
 0xa39   : > { %15995 = vmatprep.mubr.msk.f32.mxu0 %vm1888_vm5, %v3236_v63 }
 0xa3a   : > { %15996 = vmatmul.mubr.msk.f32.gmra.mrb[80].mxu0 %vm1888_vm5, %v15977_v18 }
 0xa3b   : > { %v15980_v14 = vpop.f32.mrb[70].mxu0 }
 0xa3c   : > { %v3246_v25 = vpop.f32.mrb[71].mxu0 }
 0xa3d   : > { %15998 = vmatprep.mubr.msk.f32.mxu0 %vm1888_vm5, %v3246_v25 }
 0xa3e   : > { %15999 = vmatmul.mubr.msk.f32.gmra.mrb[82].mxu0 %vm1888_vm5, %v15980_v14 }
 0xa3f   : > { %v15983_v10 = vpop.f32.mrb[72].mxu0 }
 0xa40   : > { %v3256_v23 = vpop.f32.mrb[73].mxu0 }
 0xa41   : > { %16001 = vmatprep.mubr.msk.f32.mxu0 %vm1888_vm5, %v3256_v23 }
 0xa42   : > { %16002 = vmatmul.mubr.msk.f32.gmra.mrb[84].mxu0 %vm1888_vm5, %v15983_v10 }
 0xa43   : > { %v15986_v16 = vpop.f32.mrb[74].mxu0 }
 0xa44   : > { %v3266_v40 = vpop.f32.mrb[75].mxu0 }
 0xa45   : > { %16004 = vmatprep.mubr.msk.f32.mxu0 %vm1888_vm5, %v3266_v40 }
 0xa46   : > { %16005 = vmatmul.mubr.msk.f32.gmra.mrb[86].mxu0 %vm1888_vm5, %v15986_v16 }
 0xa47   : > { %v15989_v9 = vpop.f32.mrb[76].mxu0 }
 0xa48   : > { %v3276_v56 = vpop.f32.mrb[77].mxu0 }
 0xa49   : > { %16007 = vmatprep.mubr.msk.f32.mxu0 %vm1888_vm5, %v3276_v56 }
 0xa4a   : > { %16008 = vmatmul.mubr.msk.f32.gmra.mrb[88].mxu0 %vm1888_vm5, %v15989_v9 }
 0xa4b   : > { %16012 = vmatprep.mubr.msk.f32.mxu0 %vm1888_vm5, %v19906_v22  ;;  %v23772_v22 = vld [vmem:[#allocation16_spill] sm:$0xff] }
 0xa4e   : > { %16013 = vmatmul.mubr.msk.f32.vlgmr.msra.gmra.mrb[78].mxu0 %vm1888_vm5, %v19904_v55  ;;  %v23771_v55 = vld [vmem:[#allocation17_spill] sm:$0xff] }
 0xa4f   : > { %16015 = vmatprep.mubr.msk.f32.mxu0 %vm1888_vm5, %v19910_v29  ;;  %16071 = vmatpush3.xpose.msk.msra.mxu0 %vm1447_vm4, %v13903_v62 }
 0xa52   : > { %16016 = vmatmul.mubr.msk.f32.gmra.mrb[80].mxu0 %vm1888_vm5, %v19908_v24 }
 0xa53   : > { %16018 = vmatprep.mubr.msk.f32.mxu0 %vm1888_vm5, %v19914_v20  ;;  %v13905_v20 = vld [vmem:[%s23662_s12 + $0xa] ss:$0 sm:$0xff] }
 0xa56   : > { %16019 = vmatmul.mubr.msk.f32.gmra.mrb[82].mxu0 %vm1888_vm5, %v19912_v3 }
 0xa57   : > { %16021 = vmatprep.mubr.msk.f32.mxu0 %vm1888_vm5, %v19918_v7 }
 0xa5a   : > { %16022 = vmatmul.mubr.msk.f32.gmra.mrb[84].mxu0 %vm1888_vm5, %v19916_v38 }
 0xa5b   : > { %16024 = vmatprep.mubr.msk.f32.mxu0 %vm1888_vm5, %v19922_v39 }
 0xa5e   : > { %16025 = vmatmul.mubr.msk.f32.gmra.mrb[86].mxu0 %vm1888_vm5, %v19920_v6 }
 0xa5f   : > { %16027 = vmatprep.mubr.msk.f32.mxu0 %vm1888_vm5, %v23771_v55 }
 0xa62   : > { %16028 = vmatmul.mubr.msk.f32.gmra.mrb[88].mxu0 %vm1888_vm5, %v23772_v22 }
 0xa63   : > { %16072 = vmatprep.mubr.msk.f32.mxu0 %vm1447_vm4, %v19365_v28 }
 0xa66   : > { %16073 = vmatmul.mubr.msk.f32.vlgmr.msra.gmra.mrb[90].mxu0 %vm1447_vm4, %v19373_v31 }
 0xa67   : > { %16075 = vmatprep.mubr.msk.f32.mxu0 %vm1447_vm4, %v19376_v33 }
 0xa6a   : > { %16076 = vmatmul.mubr.msk.f32.gmra.mrb[92].mxu0 %vm1447_vm4, %v19379_v34 }
 0xa6b   : > { %16078 = vmatprep.mubr.msk.f32.mxu0 %vm1447_vm4, %v19388_v42 }
 0xa6e   : > { %16079 = vmatmul.mubr.msk.f32.gmra.mrb[94].mxu0 %vm1447_vm4, %v19390_v43 }
 0xa6f   : > { %16081 = vmatprep.mubr.msk.f32.mxu0 %vm1447_vm4, %v19395_v46 }
 0xa72   : > { %16082 = vmatmul.mubr.msk.f32.gmra.mrb[96].mxu0 %vm1447_vm4, %v19410_v53 }
 0xa73   : > { %16084 = vmatprep.mubr.msk.f32.mxu0 %vm1447_vm4, %v19407_v52 }
 0xa76   : > { %16085 = vmatmul.mubr.msk.f32.gmra.mrb[98].mxu0 %vm1447_vm4, %v19416_v54 }
 0xa77   : > { %16087 = vmatprep.mubr.msk.f32.mxu0 %vm1447_vm4, %v19465_v2 }
 0xa7a   : > { %16088 = vmatmul.mubr.msk.f32.gmra.mrb[100].mxu0 %vm1447_vm4, %v19469_v4 }
 0xa89   : > { %v4297_v39 = vpop.xlane.xlu1 %4296 }
 0xa8a   : > { %v4294_v24 = vpop.xlane.xlu0 %4293 }
 0xa8b   : > { %18228 = vrcp.f32 %v4294_v24 }
 0xa8c   : > { %18230 = vrcp.f32 %v4297_v39 }
 0xa8e   : > { %v4300_v37 = vpop.xlane.xlu0 %4299 }
 0xa8f   : > { %18232 = vrcp.f32 %v4300_v37 }
 0xa92   : > { %v4306_v25 = vpop.xlane.xlu0 %4305 }
 0xa95   : > { %v18229_v29 = vpop.eup %18228 }
 0xa96   : > { %v4329_v3 = vmul.f32 %v18229_v29, %v20447_v27  ;;  %v4303_v27 = vpop.xlane.xlu1 %4302  ;;  %v4312_v24 = vpop.xlane.xlu0 %4311 }
 0xa97   : > { %18234 = vrcp.f32 %v4303_v27 }
 0xa98   : > { %16156 = vmatprep.mubr.msk.f32.mxu0 %vm2086_vm7, %v4329_v3  ;;  %18236 = vrcp.f32 %v4306_v25 }
 0xa9a   : > { %v4309_v9 = vpop.xlane.xlu1 %4308  ;;  %v4318_v39 = vpop.xlane.xlu0 %4317 }
 0xa9b   : > { %18238 = vrcp.f32 %v4309_v9 }
 0xa9c   : > { %18240 = vrcp.f32 %v4312_v24 }
 0xb39   : > { %v16074_v38 = vpop.f32.mrb[90].mxu0 }
 0xb3a   : > { %v3970_v7 = vadd.f32 %v16074_v38, %v13905_v20  ;;  %v3964_v6 = vpop.f32.mrb[91].mxu0 }
 0xb3b   : > { %v3965_v57 = vadd.f32 %v13905_v20, %v3964_v6 }
 0xb3d   : > { %v17446_v0 = vpack.c.bf16 %v3970_v7, %v3965_v57  ;;  %v16077_v48 = vpop.f32.mrb[92].mxu0  ;;  %v4315_v7 = vpop.xlane.xlu1 %4314 }
 0xb3e   : > { %v3980_v17 = vadd.f32 %v16077_v48, %v13905_v20  ;;  %v3974_v41 = vpop.f32.mrb[93].mxu0  ;;  %18242 = vrcp.f32 %v4315_v7 }
 0xb3f   : > { %v3975_v12 = vadd.f32 %v13905_v20, %v3974_v41  ;;  %17447 = vmatprep.subr.bf16.mxu0 %v17446_v0  ;;  %v18231_v41 = vpop.eup %18230  ;;  %18244 = vrcp.f32 %v4318_v39  ;;  %v4768_v39 = vadd.f32 %v20380_v5, %v20391_v60 }
 0xb40   : > { %17449 = vmatpush3.bf16.msra.mxu0 %v17446_v0  ;;  %v18233_v27 = vpop.eup %18232 }
 0xb41   : > { %v17450_v1 = vpack.c.bf16 %v3980_v17, %v3975_v12  ;;  %v16080_v62 = vpop.f32.mrb[94].mxu0  ;;  %v13955_v12 = vld [vmem:[%s23663_s13 + $0x10] sm:$0xff] }
 0xb42   : > { %v3990_v18 = vadd.f32 %v16080_v62, %v13905_v20  ;;  %v3984_v63 = vpop.f32.mrb[95].mxu0  ;;  %v4331_v62 = vmul.f32 %v18231_v41, %v20445_v32 }
 0xb43   : > { %v3985_v14 = vadd.f32 %v13905_v20, %v3984_v63  ;;  %17451 = vmatprep.subr.bf16.mxu0 %v17450_v1  ;;  %v4333_v63 = vmul.f32 %v18233_v27, %v20457_v30 }
 0xb44   : > { %17453 = vmatpush3.bf16.msra.mxu0 %v17450_v1  ;;  %v4321_v1 = vpop.xlane.xlu1 %4320 }
 0xb45   : > { %v17454_v10 = vpack.c.bf16 %v3990_v18, %v3985_v14  ;;  %v16083_v23 = vpop.f32.mrb[96].mxu0  ;;  %v4324_v18 = vpop.xlane.xlu0 %4323  ;;  %18246 = vrcp.f32 %v4321_v1 }
 0xb46   : > { %v4000_v16 = vadd.f32 %v16083_v23, %v13905_v20  ;;  %v3994_v40 = vpop.f32.mrb[97].mxu0  ;;  %18248 = vrcp.f32 %v4324_v18 }
 0xb47   : > { %v3995_v56 = vadd.f32 %v13905_v20, %v3994_v40  ;;  %17455 = vmatprep.subr.bf16.mxu0 %v17454_v10 }
 0xb48   : > { %17457 = vmatpush3.bf16.msra.mxu0 %v17454_v10  ;;  %v4327_v25 = vpop.xlane.xlu1 %4326 }
 0xb49   : > { %v17458_v55 = vpack.c.bf16 %v4000_v16, %v3995_v56  ;;  %v16086_v22 = vpop.f32.mrb[98].mxu0  ;;  %18250 = vrcp.f32 %v4327_v25 }
 0xb4a   : > { %v4010_v29 = vadd.f32 %v16086_v22, %v13905_v20  ;;  %v4004_v3 = vpop.f32.mrb[99].mxu0 }
 0xb4b   : > { %v4005_v38 = vadd.f32 %v13905_v20, %v4004_v3  ;;  %17459 = vmatprep.subr.bf16.mxu0 %v17458_v55 }
 0xb4c   : > { %17461 = vmatpush3.bf16.msra.mxu0 %v17458_v55 }
 0xb4d   : > { %v17462_v6 = vpack.c.bf16 %v4010_v29, %v4005_v38  ;;  %v16089_v57 = vpop.f32.mrb[100].mxu0 }
 0xb4e   : > { %v4020_v0 = vadd.f32 %v16089_v57, %v13905_v20  ;;  %v4014_v48 = vpop.f32.mrb[101].mxu0 }
 0xb4f   : > { %v4015_v17 = vadd.f32 %v13905_v20, %v4014_v48  ;;  %17463 = vmatprep.subr.bf16.mxu0 %v17462_v6  ;;  %v18235_v20 = vpop.eup %18234 }
 0xb50   : > { %17465 = vmatpush3.bf16.msra.mxu0 %v17462_v6  ;;  %v18237_v14 = vpop.eup %18236  ;;  %v4335_v10 = vmul.f32 %v18235_v20, %v20455_v59 }
 0xb51   : > { %v17466_v37 = vpack.c.bf16 %v4020_v0, %v4015_v17  ;;  %v18239_v23 = vpop.eup %18238  ;;  %v4337_v32 = vmul.f32 %v18237_v14, %v20467_v49 }
 0xb52   : > { %v18241_v16 = vpop.eup %18240  ;;  %v4339_v30 = vmul.f32 %v18239_v23, %v20465_v45 }
 0xb53   : > { %17467 = vmatprep.subr.bf16.mxu0 %v17466_v37  ;;  %v18243_v40 = vpop.eup %18242  ;;  %v4341_v9 = vmul.f32 %v18241_v16, %v20475_v19 }
 0xb54   : > { %17469 = vmatpush3.bf16.msra.mxu0 %v17466_v37  ;;  %v18245_v56 = vpop.eup %18244  ;;  %v4343_v59 = vmul.f32 %v18243_v40, %v20473_v36  ;;  %v13984_v36 = vld [vmem:[%s23661_s11 + $0x38] sm:$0xff]  ;;  %v13986_v37 = vld [vmem:[%s23662_s12 + $0x7] ss:$0 sm:$0xff] }
 0xb55   : > { %16174 = vmatprep.subr.mxu0 %v13955_v12  ;;  %v18247_v55 = vpop.eup %18246  ;;  %v4345_v49 = vmul.f32 %v18245_v56, %v20483_v61 }
 0xb56   : > { %v18249_v22 = vpop.eup %18248  ;;  %v4347_v45 = vmul.f32 %v18247_v55, %v20481_v50 }
 0xb57   : > { %16157 = vmatmul.mubr.msk.f32.vlgmr.msra.gmra.mrb[102].mxu0 %vm2086_vm7, %v4331_v62  ;;  %v18251_v24 = vpop.eup %18250  ;;  %v4349_v19 = vmul.f32 %v18249_v22, %v20491_v47 }
 0xb58   : > { %16159 = vmatprep.mubr.msk.f32.mxu0 %vm2086_vm7, %v4333_v63  ;;  %16175 = vmatpush3.msra.mxu0 %v13955_v12  ;;  %v4351_v29 = vmul.f32 %v18251_v24, %v20489_v44 }
 0xb59   : > { %16214 = vmatprep.subr.msk.mxu0 %vm1447_vm4, %v13984_v36 }
 0xb5b   : > { %16160 = vmatmul.mubr.msk.f32.gmra.mrb[104].mxu0 %vm2086_vm7, %v4335_v10 }
 0xb5c   : > { %16162 = vmatprep.mubr.msk.f32.mxu0 %vm2086_vm7, %v4337_v32 }
 0xb5f   : > { %16163 = vmatmul.mubr.msk.f32.gmra.mrb[106].mxu0 %vm2086_vm7, %v4339_v30 }
 0xb60   : > { %16165 = vmatprep.mubr.msk.f32.mxu0 %vm2086_vm7, %v4341_v9 }
 0xb63   : > { %16166 = vmatmul.mubr.msk.f32.gmra.mrb[108].mxu0 %vm2086_vm7, %v4343_v59 }
 0xb64   : > { %16168 = vmatprep.mubr.msk.f32.mxu0 %vm2086_vm7, %v4345_v49 }
 0xb67   : > { %16169 = vmatmul.mubr.msk.f32.gmra.mrb[110].mxu0 %vm2086_vm7, %v4347_v45 }
 0xb68   : > { %16171 = vmatprep.mubr.msk.f32.mxu0 %vm2086_vm7, %v4349_v19 }
 0xb6b   : > { %16172 = vmatmul.mubr.msk.f32.gmra.mrb[112].mxu0 %vm2086_vm7, %v4351_v29 }
 0xc2a   : > { %v16158_v61 = vpop.f32.mrb[102].mxu0 }
 0xc2b   : > { %v4454_v3 = vpop.f32.mrb[103].mxu0 }
 0xc2c   : > { %16176 = vmatprep.mubr.msk.f32.mxu0 %vm1888_vm5, %v4454_v3 }
 0xc2d   : > { %16177 = vmatmul.mubr.msk.f32.vlgmr.msra.gmra.mrb[78].mxu0 %vm1888_vm5, %v16158_v61 }
 0xc2e   : > { %v16161_v50 = vpop.f32.mrb[104].mxu0  ;;  %16215 = vmatpush3.xpose.msk.msra.mxu0 %vm1447_vm4, %v13984_v36 }
 0xc2f   : > { %v4464_v47 = vpop.f32.mrb[105].mxu0 }
 0xc30   : > { %16179 = vmatprep.mubr.msk.f32.mxu0 %vm1888_vm5, %v4464_v47 }
 0xc31   : > { %16180 = vmatmul.mubr.msk.f32.gmra.mrb[80].mxu0 %vm1888_vm5, %v16161_v50 }
 0xc32   : > { %v16164_v44 = vpop.f32.mrb[106].mxu0 }
 0xc33   : > { %v4474_v38 = vpop.f32.mrb[107].mxu0 }
 0xc34   : > { %16182 = vmatprep.mubr.msk.f32.mxu0 %vm1888_vm5, %v4474_v38  ;;  %v23778_v38 = vld [vmem:[#allocation20_spill] sm:$0xff] }
 0xc35   : > { %16183 = vmatmul.mubr.msk.f32.gmra.mrb[82].mxu0 %vm1888_vm5, %v16164_v44 }
 0xc36   : > { %v16167_v7 = vpop.f32.mrb[108].mxu0 }
 0xc37   : > { %v4484_v6 = vpop.f32.mrb[109].mxu0 }
 0xc38   : > { %16185 = vmatprep.mubr.msk.f32.mxu0 %vm1888_vm5, %v4484_v6 }
 0xc39   : > { %16186 = vmatmul.mubr.msk.f32.gmra.mrb[84].mxu0 %vm1888_vm5, %v16167_v7 }
 0xc3a   : > { %v16170_v57 = vpop.f32.mrb[110].mxu0 }
 0xc3b   : > { %v4494_v0 = vpop.f32.mrb[111].mxu0 }
 0xc3c   : > { %16188 = vmatprep.mubr.msk.f32.mxu0 %vm1888_vm5, %v4494_v0 }
 0xc3d   : > { %16189 = vmatmul.mubr.msk.f32.gmra.mrb[86].mxu0 %vm1888_vm5, %v16170_v57  ;;  %v23779_v57 = vld [vmem:[#allocation21_spill] sm:$0xff] }
 0xc3e   : > { %v16173_v48 = vpop.f32.mrb[112].mxu0 }
 0xc3f   : > { %v4504_v17 = vpop.f32.mrb[113].mxu0 }
 0xc40   : > { %16191 = vmatprep.mubr.msk.f32.mxu0 %vm1888_vm5, %v4504_v17 }
 0xc41   : > { %16192 = vmatmul.mubr.msk.f32.gmra.mrb[88].mxu0 %vm1888_vm5, %v16173_v48 }
 0xc42   : > { %16216 = vmatprep.mubr.msk.f32.mxu0 %vm1447_vm4, %v19365_v28 }
 0xc45   : > { %16217 = vmatmul.mubr.msk.f32.vlgmr.msra.gmra.mrb[114].mxu0 %vm1447_vm4, %v19373_v31 }
 0xc46   : > { %16219 = vmatprep.mubr.msk.f32.mxu0 %vm1447_vm4, %v19376_v33 }
 0xc49   : > { %16220 = vmatmul.mubr.msk.f32.gmra.mrb[116].mxu0 %vm1447_vm4, %v19379_v34 }
 0xc4a   : > { %16222 = vmatprep.mubr.msk.f32.mxu0 %vm1447_vm4, %v19388_v42 }
 0xc4d   : > { %16223 = vmatmul.mubr.msk.f32.gmra.mrb[118].mxu0 %vm1447_vm4, %v19390_v43 }
 0xc4e   : > { %16225 = vmatprep.mubr.msk.f32.mxu0 %vm1447_vm4, %v19395_v46 }
 0xc51   : > { %16226 = vmatmul.mubr.msk.f32.gmra.mrb[120].mxu0 %vm1447_vm4, %v19410_v53 }
 0xc52   : > { %16228 = vmatprep.mubr.msk.f32.mxu0 %vm1447_vm4, %v19407_v52 }
 0xc55   : > { %16229 = vmatmul.mubr.msk.f32.gmra.mrb[122].mxu0 %vm1447_vm4, %v19416_v54 }
 0xc56   : > { %16231 = vmatprep.mubr.msk.f32.mxu0 %vm1447_vm4, %v19465_v2 }
 0xc59   : > { %16232 = vmatmul.mubr.msk.f32.gmra.mrb[124].mxu0 %vm1447_vm4, %v19469_v4 }
 0xc5a   : > { %16278 = vmatprep.mubr.msk.f32.mxu0 %vm1888_vm5, %v4768_v39 }
 0xd18   : > { %v16218_v41 = vpop.f32.mrb[114].mxu0 }
 0xd19   : > { %v4911_v12 = vadd.f32 %v16218_v41, %v13986_v37  ;;  %v4905_v27 = vpop.f32.mrb[115].mxu0 }
 0xd1a   : > { %v4906_v1 = vadd.f32 %v13986_v37, %v4905_v27  ;;  %v23781_v27 = vld [vmem:[#allocation23_spill] sm:$0xff] }
 0xd1c   : > { %v17470_v62 = vpack.c.bf16 %v4911_v12, %v4906_v1  ;;  %v16221_v20 = vpop.f32.mrb[116].mxu0 }
 0xd1d   : > { %v4921_v18 = vadd.f32 %v16221_v20, %v13986_v37  ;;  %v4915_v63 = vpop.f32.mrb[117].mxu0 }
 0xd1e   : > { %v4916_v14 = vadd.f32 %v13986_v37, %v4915_v63  ;;  %17472 = vmatprep.subr.msk.bf16.mxu0 %vm19496_vm6, %v17470_v62  ;;  %v23782_v63 = vld [vmem:[#allocation24_spill] sm:$0xff] }
 0xd1f   : > { %17475 = vmatpush3.bf16.xpose.msk.msra.mxu0 %vm19496_vm6, %v17470_v62 }
 0xd20   : > { %v17476_v5 = vpack.c.bf16 %v4921_v18, %v4916_v14  ;;  %v16224_v60 = vpop.f32.mrb[118].mxu0 }
 0xd21   : > { %v4931_v25 = vadd.f32 %v16224_v60, %v13986_v37  ;;  %v4925_v10 = vpop.f32.mrb[119].mxu0  ;;  %v23783_v60 = vld [vmem:[#allocation25_spill] sm:$0xff] }
 0xd22   : > { %v4926_v23 = vadd.f32 %v13986_v37, %v4925_v10  ;;  %17478 = vmatprep.subr.msk.bf16.mxu0 %vm19496_vm6, %v17476_v5 }
 0xd24   : > { %v17482_v32 = vpack.c.bf16 %v4931_v25, %v4926_v23  ;;  %v16227_v16 = vpop.f32.mrb[120].mxu0 }
 0xd25   : > { %v4941_v30 = vadd.f32 %v16227_v16, %v13986_v37  ;;  %v4935_v40 = vpop.f32.mrb[121].mxu0  ;;  %v23784_v16 = vld [vmem:[#allocation26_spill] sm:$0xff] }
 0xd26   : > { %v4936_v9 = vadd.f32 %v13986_v37, %v4935_v40 }
 0xd27   : > { %17481 = vmatpush3.bf16.xpose.msk.msra.mxu0 %vm19496_vm6, %v17476_v5 }
 0xd28   : > { %v17488_v56 = vpack.c.bf16 %v4941_v30, %v4936_v9  ;;  %v16230_v59 = vpop.f32.mrb[122].mxu0  ;;  %17484 = vmatprep.subr.msk.bf16.mxu0 %vm19496_vm6, %v17482_v32  ;;  %v23785_v9 = vld [vmem:[#allocation27_spill] sm:$0xff] }
 0xd29   : > { %v4951_v55 = vadd.f32 %v16230_v59, %v13986_v37  ;;  %v4945_v49 = vpop.f32.mrb[123].mxu0 }
 0xd2a   : > { %v4946_v22 = vadd.f32 %v13986_v37, %v4945_v49 }
 0xd2c   : > { %v17494_v45 = vpack.c.bf16 %v4951_v55, %v4946_v22  ;;  %v16233_v24 = vpop.f32.mrb[124].mxu0  ;;  %v23786_v22 = vld [vmem:[#allocation28_spill] sm:$0xff] }
 0xd2d   : > { %v4961_v19 = vadd.f32 %v16233_v24, %v13986_v37  ;;  %v4955_v29 = vpop.f32.mrb[125].mxu0 }
 0xd2e   : > { %v4956_v36 = vadd.f32 %v13986_v37, %v4955_v29  ;;  %v23780_v37 = vld [vmem:[#allocation22_spill] sm:$0xff] }
 0xd2f   : > { %17487 = vmatpush3.bf16.xpose.msk.msra.mxu0 %vm19496_vm6, %v17482_v32 }
 0xd30   : > { %v17500_v61 = vpack.c.bf16 %v4961_v19, %v4956_v36  ;;  %17490 = vmatprep.subr.msk.bf16.mxu0 %vm19496_vm6, %v17488_v56  ;;  %v23787_v19 = vld [vmem:[#allocation29_spill] sm:$0xff] }
 0xd37   : > { %17493 = vmatpush3.bf16.xpose.msk.msra.mxu0 %vm19496_vm6, %v17488_v56 }
 0xd38   : > { %17496 = vmatprep.subr.msk.bf16.mxu0 %vm19496_vm6, %v17494_v45 }
 0xd3f   : > { %17499 = vmatpush3.bf16.xpose.msk.msra.mxu0 %vm19496_vm6, %v17494_v45 }
 0xd40   : > { %17502 = vmatprep.subr.msk.bf16.mxu0 %vm19496_vm6, %v17500_v61 }
 0xd47   : > { %17505 = vmatpush3.bf16.xpose.msk.msra.mxu0 %vm19496_vm6, %v17500_v61 }
 0xd4e   : > { %16279 = vmatmul.mubr.msk.f32.vlgmr.msra.gmra.mrb[126].mxu0 %vm1888_vm5, %v20389_v15  ;;  %v23773_v15 = vld [vmem:[#allocation30_spill] sm:$0xff] }
 0xd4f   : > { %16281 = vmatprep.mubr.msk.f32.mxu0 %vm1888_vm5, %v20399_v26  ;;  %v23774_v26 = vld [vmem:[#allocation32_spill] sm:$0xff] }
 0xd52   : > { %16282 = vmatmul.mubr.msk.f32.gmra.mrb[128].mxu0 %vm1888_vm5, %v20396_v58  ;;  %v23775_v58 = vld [vmem:[#allocation31_spill] sm:$0xff] }
 0xd53   : > { %16284 = vmatprep.mubr.msk.f32.mxu0 %vm1888_vm5, %v20405_v51 }
 0xd56   : > { %16285 = vmatmul.mubr.msk.f32.gmra.mrb[130].mxu0 %vm1888_vm5, %v20402_v21  ;;  %v23776_v21 = vld [vmem:[#allocation18_spill] sm:$0xff] }
 0xd57   : > { %16287 = vmatprep.mubr.msk.f32.mxu0 %vm1888_vm5, %v20411_v35  ;;  %v23777_v35 = vld [vmem:[#allocation19_spill] sm:$0xff] }
 0xd5a   : > { %16288 = vmatmul.mubr.msk.f32.gmra.mrb[132].mxu0 %vm1888_vm5, %v20408_v11 }
 0xd5b   : > { %16290 = vmatprep.mubr.msk.f32.mxu0 %vm1888_vm5, %v20417_v8 }
 0xd5e   : > { %16291 = vmatmul.mubr.msk.f32.gmra.mrb[134].mxu0 %vm1888_vm5, %v23773_v15 }
 0xd5f   : > { %16293 = vmatprep.mubr.msk.f32.mxu0 %vm1888_vm5, %v23774_v26 }
 0xd62   : > { %16294 = vmatmul.mubr.msk.f32.gmra.mrb[136].mxu0 %vm1888_vm5, %v23775_v58 }
 0xe21   : > { %v16280_v51 = vpop.f32.mrb[126].mxu0 }
 0xe22   : > { %v5246_v3 = vadd.f32 %v23776_v21, %v16280_v51  ;;  %v5240_v50 = vpop.f32.mrb[127].mxu0 }
 0xe23   : > { %v5241_v47 = vadd.f32 %v23777_v35, %v5240_v50 }
 0xe24   : > { %v5302_v11 = vsel %vm2086_vm7, %v5246_v3, -inf }
 0xe25   : > { %5303 = vmax.xlane.f32.xlu1 %v5302_v11  ;;  %v16283_v44 = vpop.f32.mrb[128].mxu0  ;;  %v5299_v8 = vsel %vm2086_vm7, %v5241_v47, -inf }
 0xe26   : > { %v5256_v7 = vadd.f32 %v23778_v38, %v16283_v44  ;;  %v5250_v6 = vpop.f32.mrb[129].mxu0  ;;  %5300 = vmax.xlane.f32.xlu0 %v5299_v8 }
 0xe27   : > { %v5251_v0 = vadd.f32 %v23779_v57, %v5250_v6 }
 0xe28   : > { %v5308_v48 = vsel %vm2086_vm7, %v5256_v7, -inf }
 0xe29   : > { %5309 = vmax.xlane.f32.xlu1 %v5308_v48  ;;  %v16286_v17 = vpop.f32.mrb[130].mxu0  ;;  %v5305_v39 = vsel %vm2086_vm7, %v5251_v0, -inf }
 0xe2a   : > { %v5266_v41 = vadd.f32 %v23780_v37, %v16286_v17  ;;  %v5260_v12 = vpop.f32.mrb[131].mxu0  ;;  %5306 = vmax.xlane.f32.xlu0 %v5305_v39 }
 0xe2b   : > { %v5261_v1 = vadd.f32 %v23781_v27, %v5260_v12 }
 0xe2c   : > { %v5314_v62 = vsel %vm2086_vm7, %v5266_v41, -inf }
 0xe2d   : > { %5315 = vmax.xlane.f32.xlu1 %v5314_v62  ;;  %v16289_v20 = vpop.f32.mrb[132].mxu0  ;;  %v5311_v18 = vsel %vm2086_vm7, %v5261_v1, -inf }
 0xe2e   : > { %v5276_v14 = vadd.f32 %v23782_v63, %v16289_v20  ;;  %v5270_v5 = vpop.f32.mrb[133].mxu0  ;;  %5312 = vmax.xlane.f32.xlu0 %v5311_v18 }
 0xe2f   : > { %v5271_v25 = vadd.f32 %v23783_v60, %v5270_v5 }
 0xe30   : > { %v5320_v10 = vsel %vm2086_vm7, %v5276_v14, -inf }
 0xe31   : > { %5321 = vmax.xlane.f32.xlu1 %v5320_v10  ;;  %v16292_v23 = vpop.f32.mrb[134].mxu0  ;;  %v5317_v32 = vsel %vm2086_vm7, %v5271_v25, -inf }
 0xe32   : > { %v5286_v30 = vadd.f32 %v23784_v16, %v16292_v23  ;;  %v5280_v40 = vpop.f32.mrb[135].mxu0  ;;  %5318 = vmax.xlane.f32.xlu0 %v5317_v32 }
 0xe33   : > { %v5281_v56 = vadd.f32 %v23785_v9, %v5280_v40 }
 0xe34   : > { %v5326_v59 = vsel %vm2086_vm7, %v5286_v30, -inf }
 0xe35   : > { %5327 = vmax.xlane.f32.xlu1 %v5326_v59  ;;  %v16295_v55 = vpop.f32.mrb[136].mxu0  ;;  %v5323_v49 = vsel %vm2086_vm7, %v5281_v56, -inf }
 0xe36   : > { %v20707_v45 = vadd.f32 %v23786_v22, %v16295_v55  ;;  %v5290_v24 = vpop.f32.mrb[137].mxu0  ;;  %5324 = vmax.xlane.f32.xlu0 %v5323_v49 }
 0xe37   : > { %v20710_v29 = vadd.f32 %v23787_v19, %v5290_v24 }
 0xe38   : > { %v5332_v36 = vsel %vm2086_vm7, %v20707_v45, -inf }
 0xe39   : > { %5333 = vmax.xlane.f32.xlu1 %v5332_v36  ;;  %v5329_v61 = vsel %vm2086_vm7, %v20710_v29, -inf }
 0xe3a   : > { %5330 = vmax.xlane.f32.xlu0 %v5329_v61 }
 0xeb2   : > { %v5304_v15 = vpop.xlane.xlu1 %5303 }
 0xeb3   : > { %v5336_v26 = vsub.f32 %v5246_v3, %v5304_v15  ;;  %v5301_v58 = vpop.xlane.xlu0 %5300 }
 0xeb4   : > { %v5335_v51 = vsub.f32 %v5241_v47, %v5301_v58 }
 0xeb5   : > { %v5349_v21 = vmul.f32 1.442695, %v5336_v26 }
 0xeb6   : > { %v5347_v50 = vmul.f32 1.442695, %v5335_v51  ;;  %v5310_v35 = vpop.xlane.xlu1 %5309 }
 0xeb7   : > { %18252 = vpow2.f32 %v5349_v21  ;;  %v5338_v11 = vsub.f32 %v5256_v7, %v5310_v35  ;;  %v5307_v44 = vpop.xlane.xlu0 %5306 }
 0xeb8   : > { %18254 = vpow2.f32 %v5347_v50  ;;  %v5337_v8 = vsub.f32 %v5251_v0, %v5307_v44 }
 0xeb9   : > { %v5353_v38 = vmul.f32 1.442695, %v5338_v11 }
 0xeba   : > { %v5351_v6 = vmul.f32 1.442695, %v5337_v8  ;;  %v5316_v57 = vpop.xlane.xlu1 %5315  ;;  %v14052_v8 = vld [vmem:[%s23663_s13 + $0x18] sm:$0xff] }
 0xebb   : > { %18256 = vpow2.f32 %v5353_v38  ;;  %v5340_v48 = vsub.f32 %v5266_v41, %v5316_v57  ;;  %v5313_v17 = vpop.xlane.xlu0 %5312  ;;  %16338 = vmatprep.subr.mxu0 %v14052_v8 }
 0xebc   : > { %18258 = vpow2.f32 %v5351_v6  ;;  %v5339_v39 = vsub.f32 %v5261_v1, %v5313_v17  ;;  %16339 = vmatpush3.msra.mxu0 %v14052_v8 }
 0xebd   : > { %v5357_v37 = vmul.f32 1.442695, %v5340_v48 }
 0xebe   : > { %v5355_v3 = vmul.f32 1.442695, %v5339_v39  ;;  %v5322_v12 = vpop.xlane.xlu1 %5321 }
 0xebf   : > { %18260 = vpow2.f32 %v5357_v37  ;;  %v5342_v47 = vsub.f32 %v5276_v14, %v5322_v12  ;;  %v5319_v27 = vpop.xlane.xlu0 %5318 }
 0xec0   : > { %18262 = vpow2.f32 %v5355_v3  ;;  %v5341_v62 = vsub.f32 %v5271_v25, %v5319_v27 }
 0xec1   : > { %v20716_v7 = vpop.eup %18252  ;;  %v5361_v20 = vmul.f32 1.442695, %v5342_v47 }
 0xec2   : > { %v20718_v0 = vpop.eup %18254  ;;  %v5359_v18 = vmul.f32 1.442695, %v5341_v62  ;;  %v5328_v63 = vpop.xlane.xlu1 %5327  ;;  %v5374_v41 = vsel %vm2086_vm7, %v20716_v7, 0.0 }
 0xec3   : > { %18264 = vpow2.f32 %v5361_v20  ;;  %v5344_v1 = vsub.f32 %v5286_v30, %v5328_v63  ;;  %5375 = vadd.xlane.f32.xlu1 %v5374_v41  ;;  %v5325_v5 = vpop.xlane.xlu0 %5324  ;;  %v5371_v14 = vsel %vm2086_vm7, %v20718_v0, 0.0 }
 0xec4   : > { %18266 = vpow2.f32 %v5359_v18  ;;  %v5343_v60 = vsub.f32 %v5281_v56, %v5325_v5  ;;  %5372 = vadd.xlane.f32.xlu0 %v5371_v14 }
 0xec5   : > { %v20724_v25 = vpop.eup %18256  ;;  %v5365_v10 = vmul.f32 1.442695, %v5344_v1 }
 0xec6   : > { %v20726_v23 = vpop.eup %18258  ;;  %v5363_v32 = vmul.f32 1.442695, %v5343_v60  ;;  %v5334_v16 = vpop.xlane.xlu1 %5333  ;;  %v5380_v40 = vsel %vm2086_vm7, %v20724_v25, 0.0 }
 0xec7   : > { %18268 = vpow2.f32 %v5365_v10  ;;  %v5346_v30 = vsub.f32 %v20707_v45, %v5334_v16  ;;  %5381 = vadd.xlane.f32.xlu1 %v5380_v40  ;;  %v5331_v9 = vpop.xlane.xlu0 %5330  ;;  %v5377_v59 = vsel %vm2086_vm7, %v20726_v23, 0.0 }
 0xec8   : > { %18270 = vpow2.f32 %v5363_v32  ;;  %v5345_v56 = vsub.f32 %v20710_v29, %v5331_v9  ;;  %5378 = vadd.xlane.f32.xlu0 %v5377_v59 }
 0xec9   : > { %v20734_v55 = vpop.eup %18260  ;;  %v5369_v49 = vmul.f32 1.442695, %v5346_v30 }
 0xeca   : > { %v20736_v22 = vpop.eup %18262  ;;  %v5367_v24 = vmul.f32 1.442695, %v5345_v56  ;;  %v5386_v19 = vsel %vm2086_vm7, %v20734_v55, 0.0 }
 0xecb   : > { %18272 = vpow2.f32 %v5369_v49  ;;  %5387 = vadd.xlane.f32.xlu1 %v5386_v19  ;;  %v5383_v45 = vsel %vm2086_vm7, %v20736_v22, 0.0 }
 0xecc   : > { %18274 = vpow2.f32 %v5367_v24  ;;  %5384 = vadd.xlane.f32.xlu0 %v5383_v45 }
 0xecd   : > { %v20742_v36 = vpop.eup %18264 }
 0xece   : > { %v20744_v29 = vpop.eup %18266  ;;  %v5392_v61 = vsel %vm2086_vm7, %v20742_v36, 0.0 }
 0xecf   : > { %5393 = vadd.xlane.f32.xlu1 %v5392_v61  ;;  %v5389_v15 = vsel %vm2086_vm7, %v20744_v29, 0.0 }
 0xed0   : > { %5390 = vadd.xlane.f32.xlu0 %v5389_v15 }
 0xed1   : > { %v20750_v26 = vpop.eup %18268 }
 0xed2   : > { %v20752_v58 = vpop.eup %18270  ;;  %v5398_v51 = vsel %vm2086_vm7, %v20750_v26, 0.0 }
 0xed3   : > { %5399 = vadd.xlane.f32.xlu1 %v5398_v51  ;;  %v5395_v21 = vsel %vm2086_vm7, %v20752_v58, 0.0 }
 0xed4   : > { %5396 = vadd.xlane.f32.xlu0 %v5395_v21 }
 0xed5   : > { %v20758_v50 = vpop.eup %18272 }
 0xed6   : > { %v20760_v35 = vpop.eup %18274  ;;  %v5404_v11 = vsel %vm2086_vm7, %v20758_v50, 0.0 }
 0xed7   : > { %5405 = vadd.xlane.f32.xlu1 %v5404_v11  ;;  %v5401_v44 = vsel %vm2086_vm7, %v20760_v35, 0.0  ;;  %v14065_v11 = vld [vmem:[#allocation6] ss:$0 sm:$0xff] }
 0xed8   : > { %5402 = vadd.xlane.f32.xlu0 %v5401_v44 }
 0xf50   : > { %v5376_v38 = vpop.xlane.xlu1 %5375 }
 0xf51   : > { %18276 = vrcp.f32 %v5376_v38  ;;  %v5373_v6 = vpop.xlane.xlu0 %5372 }
 0xf52   : > { %18278 = vrcp.f32 %v5373_v6 }
 0xf54   : > { %v5382_v57 = vpop.xlane.xlu1 %5381 }
 0xf55   : > { %18280 = vrcp.f32 %v5382_v57  ;;  %v5379_v48 = vpop.xlane.xlu0 %5378 }
 0xf56   : > { %18282 = vrcp.f32 %v5379_v48 }
 0xf58   : > { %v5388_v17 = vpop.xlane.xlu1 %5387 }
 0xf59   : > { %18284 = vrcp.f32 %v5388_v17  ;;  %v5385_v39 = vpop.xlane.xlu0 %5384 }
 0xf5a   : > { %18286 = vrcp.f32 %v5385_v39 }
 0xf5b   : > { %v18277_v37 = vpop.eup %18276 }
 0xf5c   : > { %v18279_v3 = vpop.eup %18278  ;;  %v5394_v12 = vpop.xlane.xlu1 %5393  ;;  %v5410_v62 = vmul.f32 %v18277_v37, %v20716_v7 }
 0xf5d   : > { %18288 = vrcp.f32 %v5394_v12  ;;  %v5391_v47 = vpop.xlane.xlu0 %5390  ;;  %v5408_v27 = vmul.f32 %v18279_v3, %v20718_v0 }
 0xf5e   : > { %18290 = vrcp.f32 %v5391_v47 }
 0xf5f   : > { %v18281_v20 = vpop.eup %18280  ;;  %16320 = vmatprep.mubr.msk.f32.mxu1 %vm2086_vm7, %v5408_v27 }
 0xf60   : > { %v18283_v18 = vpop.eup %18282  ;;  %v5400_v63 = vpop.xlane.xlu1 %5399  ;;  %16321 = vmatmul.mubr.msk.f32.vlgmr.msra.gmra.mrb[114].mxu1 %vm2086_vm7, %v5410_v62  ;;  %v5414_v5 = vmul.f32 %v18281_v20, %v20724_v25 }
 0xf61   : > { %18292 = vrcp.f32 %v5400_v63  ;;  %v5397_v41 = vpop.xlane.xlu0 %5396  ;;  %v5412_v1 = vmul.f32 %v18283_v18, %v20726_v23 }
 0xf62   : > { %18294 = vrcp.f32 %v5397_v41 }
 0xf63   : > { %v18285_v14 = vpop.eup %18284  ;;  %16323 = vmatprep.mubr.msk.f32.mxu1 %vm2086_vm7, %v5412_v1 }
 0xf64   : > { %v18287_v0 = vpop.eup %18286  ;;  %v5406_v7 = vpop.xlane.xlu1 %5405  ;;  %16324 = vmatmul.mubr.msk.f32.gmra.mrb[116].mxu1 %vm2086_vm7, %v5414_v5  ;;  %v5418_v32 = vmul.f32 %v18285_v14, %v20734_v55 }
 0xf65   : > { %18296 = vrcp.f32 %v5406_v7  ;;  %v5403_v60 = vpop.xlane.xlu0 %5402  ;;  %v5416_v10 = vmul.f32 %v18287_v0, %v20736_v22 }
 0xf66   : > { %18298 = vrcp.f32 %v5403_v60 }
 0xf67   : > { %v18289_v16 = vpop.eup %18288  ;;  %16326 = vmatprep.mubr.msk.f32.mxu1 %vm2086_vm7, %v5416_v10 }
 0xf68   : > { %v18291_v23 = vpop.eup %18290  ;;  %16327 = vmatmul.mubr.msk.f32.gmra.mrb[118].mxu1 %vm2086_vm7, %v5418_v32  ;;  %v5422_v40 = vmul.f32 %v18289_v16, %v20742_v36 }
 0xf69   : > { %v5420_v25 = vmul.f32 %v18291_v23, %v20744_v29 }
 0xf6b   : > { %v18293_v30 = vpop.eup %18292  ;;  %16329 = vmatprep.mubr.msk.f32.mxu1 %vm2086_vm7, %v5420_v25 }
 0xf6c   : > { %v18295_v9 = vpop.eup %18294  ;;  %16330 = vmatmul.mubr.msk.f32.gmra.mrb[120].mxu1 %vm2086_vm7, %v5422_v40  ;;  %v5426_v56 = vmul.f32 %v18293_v30, %v20750_v26 }
 0xf6d   : > { %v5424_v59 = vmul.f32 %v18295_v9, %v20752_v58 }
 0xf6f   : > { %v18297_v55 = vpop.eup %18296  ;;  %16332 = vmatprep.mubr.msk.f32.mxu1 %vm2086_vm7, %v5424_v59 }
 0xf70   : > { %v18299_v49 = vpop.eup %18298  ;;  %16333 = vmatmul.mubr.msk.f32.gmra.mrb[122].mxu1 %vm2086_vm7, %v5426_v56  ;;  %v5430_v24 = vmul.f32 %v18297_v55, %v20758_v50 }
 0xf71   : > { %v5428_v22 = vmul.f32 %v18299_v49, %v20760_v35 }
 0xf73   : > { %16335 = vmatprep.mubr.msk.f32.mxu1 %vm2086_vm7, %v5428_v22 }
 0xf74   : > { %16336 = vmatmul.mubr.msk.f32.gmra.mrb[124].mxu1 %vm2086_vm7, %v5430_v24 }
0x1033   : > { %v16322_v19 = vpop.f32.mrb[114].mxu1 }
0x1034   : > { %v5533_v45 = vpop.f32.mrb[115].mxu1 }
0x1035   : > { %16340 = vmatprep.mubr.msk.f32.mxu0 %vm1888_vm5, %v5533_v45 }
0x1036   : > { %16341 = vmatmul.mubr.msk.f32.vlgmr.msra.gmra.mrb[78].mxu0 %vm1888_vm5, %v16322_v19  ;;  %v5994_v19 = vld [vmem:[%s23665_s15] sm:$0xff] }
0x1037   : > { %v16325_v36 = vpop.f32.mrb[116].mxu1 }
0x1038   : > { %v5543_v29 = vpop.f32.mrb[117].mxu1 }
0x1039   : > { %16343 = vmatprep.mubr.msk.f32.mxu0 %vm1888_vm5, %v5543_v29  ;;  %v5997_v29 = vld [vmem:[%s23665_s15 + $0x18] sm:$0xff] }
0x103a   : > { %16344 = vmatmul.mubr.msk.f32.gmra.mrb[80].mxu0 %vm1888_vm5, %v16325_v36  ;;  %v5996_v36 = vld [vmem:[%s23665_s15 + $0x10] sm:$0xff] }
0x103b   : > { %v16328_v61 = vpop.f32.mrb[118].mxu1 }
0x103c   : > { %v5553_v15 = vpop.f32.mrb[119].mxu1 }
0x103d   : > { %16346 = vmatprep.mubr.msk.f32.mxu0 %vm1888_vm5, %v5553_v15 }
0x103e   : > { %16347 = vmatmul.mubr.msk.f32.gmra.mrb[82].mxu0 %vm1888_vm5, %v16328_v61  ;;  %v17536_v61 = vpack.c.bf16 %v5997_v29, %v5996_v36 }
0x103f   : > { %v16331_v26 = vpop.f32.mrb[120].mxu1 }
0x1040   : > { %v5563_v58 = vpop.f32.mrb[121].mxu1 }
0x1041   : > { %16349 = vmatprep.mubr.msk.f32.mxu0 %vm1888_vm5, %v5563_v58 }
0x1042   : > { %16350 = vmatmul.mubr.msk.f32.gmra.mrb[84].mxu0 %vm1888_vm5, %v16331_v26 }
0x1043   : > { %v16334_v51 = vpop.f32.mrb[122].mxu1 }
0x1044   : > { %v5573_v21 = vpop.f32.mrb[123].mxu1 }
0x1045   : > { %16352 = vmatprep.mubr.msk.f32.mxu0 %vm1888_vm5, %v5573_v21 }
0x1046   : > { %16353 = vmatmul.mubr.msk.f32.gmra.mrb[86].mxu0 %vm1888_vm5, %v16334_v51 }
0x1047   : > { %v16337_v50 = vpop.f32.mrb[124].mxu1 }
0x1048   : > { %v5583_v35 = vpop.f32.mrb[125].mxu1 }
0x1049   : > { %16355 = vmatprep.mubr.msk.f32.mxu0 %vm1888_vm5, %v5583_v35 }
0x104a   : > { %16356 = vmatmul.mubr.msk.f32.gmra.mrb[88].mxu0 %vm1888_vm5, %v16337_v50 }
0x1109   : > { %v16342_v44 = vpop.f32.mrb[78].mxu0 }
0x110a   : > { %v5775_v8 = vadd.f32 %v16342_v44, %v14065_v11  ;;  %v5696_v38 = vpop.f32.mrb[79].mxu0 }
0x110b   : > { %v5774_v6 = vadd.f32 %v14065_v11, %v5696_v38 }
0x110c   : > { %v20806_v57 = vadd.f32 %v5775_v8, %v19373_v31 }
0x110d   : > { %v16345_v48 = vpop.f32.mrb[80].mxu0  ;;  %v20809_v17 = vadd.f32 %v5774_v6, %v19365_v28 }
0x110e   : > { %v5777_v39 = vadd.f32 %v16345_v48, %v14065_v11  ;;  %v5706_v37 = vpop.f32.mrb[81].mxu0  ;;  %v5804_v3 = vsel %vm1447_vm4, %v20806_v57, 0.0 }
0x110f   : > { %v5776_v12 = vadd.f32 %v14065_v11, %v5706_v37  ;;  %5805 = vadd.xlane.f32.xlu1 %v5804_v3  ;;  %v5801_v47 = vsel %vm1447_vm4, %v20809_v17, 0.0 }
0x1110   : > { %v20816_v27 = vadd.f32 %v5777_v39, %v19379_v34  ;;  %5802 = vadd.xlane.f32.xlu0 %v5801_v47 }
0x1111   : > { %v20819_v31 = vadd.f32 %v5776_v12, %v19376_v33  ;;  %v16348_v62 = vpop.f32.mrb[82].mxu0 }
0x1112   : > { %v5779_v28 = vadd.f32 %v16348_v62, %v14065_v11  ;;  %v5716_v20 = vpop.f32.mrb[83].mxu0  ;;  %v5810_v18 = vsel %vm1447_vm4, %v20816_v27, 0.0 }
0x1113   : > { %v5778_v63 = vadd.f32 %v14065_v11, %v5716_v20  ;;  %5811 = vadd.xlane.f32.xlu1 %v5810_v18  ;;  %v5807_v41 = vsel %vm1447_vm4, %v20819_v31, 0.0 }
0x1114   : > { %v20826_v1 = vadd.f32 %v5779_v28, %v19390_v43  ;;  %5808 = vadd.xlane.f32.xlu0 %v5807_v41 }
0x1115   : > { %v20829_v34 = vadd.f32 %v5778_v63, %v19388_v42  ;;  %v16351_v33 = vpop.f32.mrb[84].mxu0 }
0x1116   : > { %v5781_v5 = vadd.f32 %v16351_v33, %v14065_v11  ;;  %v5726_v14 = vpop.f32.mrb[85].mxu0  ;;  %v5816_v0 = vsel %vm1447_vm4, %v20826_v1, 0.0 }
0x1117   : > { %v5780_v7 = vadd.f32 %v14065_v11, %v5726_v14  ;;  %5817 = vadd.xlane.f32.xlu1 %v5816_v0  ;;  %v5813_v60 = vsel %vm1447_vm4, %v20829_v34, 0.0 }
0x1118   : > { %v20836_v10 = vadd.f32 %v5781_v5, %v19410_v53  ;;  %5814 = vadd.xlane.f32.xlu0 %v5813_v60 }
0x1119   : > { %v20839_v43 = vadd.f32 %v5780_v7, %v19395_v46  ;;  %v16354_v42 = vpop.f32.mrb[86].mxu0 }
0x111a   : > { %v5783_v32 = vadd.f32 %v16354_v42, %v14065_v11  ;;  %v5736_v16 = vpop.f32.mrb[87].mxu0  ;;  %v5822_v23 = vsel %vm1447_vm4, %v20836_v10, 0.0 }
0x111b   : > { %v5782_v25 = vadd.f32 %v14065_v11, %v5736_v16  ;;  %5823 = vadd.xlane.f32.xlu1 %v5822_v23  ;;  %v5819_v40 = vsel %vm1447_vm4, %v20839_v43, 0.0 }
0x111c   : > { %v20846_v30 = vadd.f32 %v5783_v32, %v19416_v54  ;;  %5820 = vadd.xlane.f32.xlu0 %v5819_v40 }
0x111d   : > { %v20849_v53 = vadd.f32 %v5782_v25, %v19407_v52  ;;  %v16357_v46 = vpop.f32.mrb[88].mxu0 }
0x111e   : > { %v5785_v9 = vadd.f32 %v16357_v46, %v14065_v11  ;;  %v5746_v59 = vpop.f32.mrb[89].mxu0  ;;  %v5828_v56 = vsel %vm1447_vm4, %v20846_v30, 0.0 }
0x111f   : > { %v5784_v55 = vadd.f32 %v14065_v11, %v5746_v59  ;;  %5829 = vadd.xlane.f32.xlu1 %v5828_v56  ;;  %v5825_v49 = vsel %vm1447_vm4, %v20849_v53, 0.0 }
0x1120   : > { %v20856_v22 = vadd.f32 %v5785_v9, %v19469_v4  ;;  %5826 = vadd.xlane.f32.xlu0 %v5825_v49  ;;  %v5995_v4 = vld [vmem:[%s23665_s15 + $0x8] sm:$0xff] }
0x1121   : > { %v20859_v54 = vadd.f32 %v5784_v55, %v19465_v2  ;;  %v23788_v2 = vmov 0  ;;  %v17530_v45 = vpack.c.bf16 %v5995_v4, %v5994_v19 }
0x1122   : > { %v5834_v52 = vsel %vm1447_vm4, %v20856_v22, 0.0  ;;  %v23789_v2 = vsel %vm20873_vm8, 4294967295, %v23788_v2 }
0x1123   : > { %5835 = vadd.xlane.f32.xlu1 %v5834_v52  ;;  %v5831_v24 = vsel %vm1447_vm4, %v20859_v54, 0.0  ;;  %23790 = vst [vmem:[#allocation17_spill] sm:$0xff] %v23789_v2  ;;  %17532 = vmatprep.subr.msk.bf16.mxu1 %vm20873_vm8, %v17530_v45 }
0x1124   : > { %5832 = vadd.xlane.f32.xlu0 %v5831_v24  ;;  %17535 = vmatpush3.bf16.xpose.msk.msra.mxu1 %vm20873_vm8, %v17530_v45 }
0x1125   : > { %17538 = vmatprep.subr.msk.bf16.mxu1 %vm20873_vm8, %v17536_v61 }
0x112c   : > { %17541 = vmatpush3.bf16.xpose.msk.msra.mxu1 %vm20873_vm8, %v17536_v61 }
0x119c   : > { %v5806_v15 = vpop.xlane.xlu1 %5805 }
0x119d   : > { %v5839_v26 = vmul.f32 0.03125, %v5806_v15  ;;  %v5803_v58 = vpop.xlane.xlu0 %5802 }
0x119e   : > { %v5838_v51 = vmul.f32 0.03125, %v5803_v58  ;;  %v6001_v58 = vld [vmem:[%s23665_s15 + $0x38] sm:$0xff] }
0x119f   : > { %v20892_v21 = vsub.f32 %v20806_v57, %v5839_v26  ;;  %v6000_v26 = vld [vmem:[%s23665_s15 + $0x30] sm:$0xff] }
0x11a0   : > { %v20895_v50 = vsub.f32 %v20809_v17, %v5838_v51  ;;  %v5812_v35 = vpop.xlane.xlu1 %5811  ;;  %v17548_v51 = vpack.c.bf16 %v6001_v58, %v6000_v26 }
0x11a1   : > { %v5841_v11 = vmul.f32 0.03125, %v5812_v35  ;;  %v5809_v44 = vpop.xlane.xlu0 %5808  ;;  %v5863_v8 = vmul.f32 %v20892_v21, %v20892_v21 }
0x11a2   : > { %v5840_v38 = vmul.f32 0.03125, %v5809_v44  ;;  %v5862_v6 = vmul.f32 %v20895_v50, %v20895_v50 }
0x11a3   : > { %v20902_v48 = vsub.f32 %v20816_v27, %v5841_v11  ;;  %v5877_v39 = vsel %vm1447_vm4, %v5863_v8, 0.0 }
0x11a4   : > { %v20906_v57 = vsub.f32 %v20819_v31, %v5840_v38  ;;  %v5818_v17 = vpop.xlane.xlu1 %5817  ;;  %5878 = vadd.xlane.f32.xlu1 %v5877_v39  ;;  %v5874_v37 = vsel %vm1447_vm4, %v5862_v6, 0.0 }
0x11a5   : > { %v5843_v3 = vmul.f32 0.03125, %v5818_v17  ;;  %5875 = vadd.xlane.f32.xlu0 %v5874_v37  ;;  %v5815_v12 = vpop.xlane.xlu0 %5814  ;;  %v5865_v47 = vmul.f32 %v20902_v48, %v20902_v48 }
0x11a6   : > { %v5842_v62 = vmul.f32 0.03125, %v5815_v12  ;;  %v5864_v27 = vmul.f32 %v20906_v57, %v20906_v57 }
0x11a7   : > { %v20914_v28 = vsub.f32 %v20826_v1, %v5843_v3  ;;  %v5883_v31 = vsel %vm1447_vm4, %v5865_v47, 0.0 }
0x11a8   : > { %v20918_v20 = vsub.f32 %v20829_v34, %v5842_v62  ;;  %v5824_v18 = vpop.xlane.xlu1 %5823  ;;  %5884 = vadd.xlane.f32.xlu1 %v5883_v31  ;;  %v5880_v63 = vsel %vm1447_vm4, %v5864_v27, 0.0 }
0x11a9   : > { %v5845_v41 = vmul.f32 0.03125, %v5824_v18  ;;  %5881 = vadd.xlane.f32.xlu0 %v5880_v63  ;;  %v5821_v33 = vpop.xlane.xlu0 %5820  ;;  %v5867_v5 = vmul.f32 %v20914_v28, %v20914_v28 }
0x11aa   : > { %v5844_v14 = vmul.f32 0.03125, %v5821_v33  ;;  %v5866_v1 = vmul.f32 %v20918_v20, %v20918_v20 }
0x11ab   : > { %v20926_v0 = vsub.f32 %v20836_v10, %v5845_v41  ;;  %v5889_v34 = vsel %vm1447_vm4, %v5867_v5, 0.0 }
0x11ac   : > { %v20930_v7 = vsub.f32 %v20839_v43, %v5844_v14  ;;  %v5830_v60 = vpop.xlane.xlu1 %5829  ;;  %5890 = vadd.xlane.f32.xlu1 %v5889_v34  ;;  %v5886_v42 = vsel %vm1447_vm4, %v5866_v1, 0.0 }
0x11ad   : > { %v5847_v32 = vmul.f32 0.03125, %v5830_v60  ;;  %5887 = vadd.xlane.f32.xlu0 %v5886_v42  ;;  %v5827_v16 = vpop.xlane.xlu0 %5826  ;;  %v5869_v23 = vmul.f32 %v20926_v0, %v20926_v0  ;;  %v20983_v60 = vld [vmem:[#allocation10] ss:$0 sm:$0xff] }
0x11ae   : > { %v5846_v25 = vmul.f32 0.03125, %v5827_v16  ;;  %v5868_v10 = vmul.f32 %v20930_v7, %v20930_v7 }
0x11af   : > { %v20938_v40 = vsub.f32 %v20846_v30, %v5847_v32  ;;  %v5895_v43 = vsel %vm1447_vm4, %v5869_v23, 0.0 }
0x11b0   : > { %v20942_v46 = vsub.f32 %v20849_v53, %v5846_v25  ;;  %5896 = vadd.xlane.f32.xlu1 %v5895_v43  ;;  %v5836_v9 = vpop.xlane.xlu1 %5835  ;;  %v5892_v59 = vsel %vm1447_vm4, %v5868_v10, 0.0 }
0x11b1   : > { %v5849_v56 = vmul.f32 0.03125, %v5836_v9  ;;  %5893 = vadd.xlane.f32.xlu0 %v5892_v59  ;;  %v5833_v55 = vpop.xlane.xlu0 %5832  ;;  %v5871_v49 = vmul.f32 %v20938_v40, %v20938_v40 }
0x11b2   : > { %v5848_v52 = vmul.f32 0.03125, %v5833_v55  ;;  %v5870_v30 = vmul.f32 %v20942_v46, %v20942_v46  ;;  %v20988_v55 = vld [vmem:[#allocation10 + $0x1] ss:$0 sm:$0xff] }
0x11b3   : > { %v20950_v24 = vsub.f32 %v20856_v22, %v5849_v56  ;;  %v5901_v53 = vsel %vm1447_vm4, %v5871_v49, 0.0  ;;  %v5998_v22 = vld [vmem:[%s23665_s15 + $0x20] sm:$0xff] }
0x11b4   : > { %v20954_v19 = vsub.f32 %v20859_v54, %v5848_v52  ;;  %5902 = vadd.xlane.f32.xlu1 %v5901_v53  ;;  %v5898_v4 = vsel %vm1447_vm4, %v5870_v30, 0.0  ;;  %v5999_v54 = vld [vmem:[%s23665_s15 + $0x28] sm:$0xff] }
0x11b5   : > { %5899 = vadd.xlane.f32.xlu0 %v5898_v4  ;;  %v5873_v45 = vmul.f32 %v20950_v24, %v20950_v24  ;;  %v17542_v15 = vpack.c.bf16 %v5999_v54, %v5998_v22 }
0x11b6   : > { %v5872_v36 = vmul.f32 %v20954_v19, %v20954_v19 }
0x11b7   : > { %v5907_v29 = vsel %vm1447_vm4, %v5873_v45, 0.0  ;;  %17544 = vmatprep.subr.msk.bf16.mxu1 %vm20873_vm8, %v17542_v15 }
0x11b8   : > { %5908 = vadd.xlane.f32.xlu1 %v5907_v29  ;;  %v5904_v61 = vsel %vm1447_vm4, %v5872_v36, 0.0  ;;  %17547 = vmatpush3.bf16.xpose.msk.msra.mxu1 %vm20873_vm8, %v17542_v15 }
0x11b9   : > { %5905 = vadd.xlane.f32.xlu0 %v5904_v61  ;;  %17550 = vmatprep.subr.msk.bf16.mxu1 %vm20873_vm8, %v17548_v51 }
0x11c0   : > { %17553 = vmatpush3.bf16.xpose.msk.msra.mxu1 %vm20873_vm8, %v17548_v51 }
0x1231   : > { %v5879_v35 = vpop.xlane.xlu1 %5878 }
0x1232   : > { %v5911_v11 = vmul.f32 0.03125, %v5879_v35  ;;  %v5876_v44 = vpop.xlane.xlu0 %5875 }
0x1233   : > { %v5910_v8 = vmul.f32 0.03125, %v5876_v44 }
0x1234   : > { %v5923_v38 = vadd.f32 1e-05, %v5911_v11 }
0x1235   : > { %v5922_v6 = vadd.f32 1e-05, %v5910_v8  ;;  %v5885_v39 = vpop.xlane.xlu1 %5884 }
0x1236   : > { %18300 = vrsqrt.f32 %v5923_v38  ;;  %v5913_v17 = vmul.f32 0.03125, %v5885_v39  ;;  %v5882_v37 = vpop.xlane.xlu0 %5881 }
0x1237   : > { %18302 = vrsqrt.f32 %v5922_v6  ;;  %v5912_v3 = vmul.f32 0.03125, %v5882_v37 }
0x1238   : > { %v5925_v12 = vadd.f32 1e-05, %v5913_v17 }
0x1239   : > { %v5924_v47 = vadd.f32 1e-05, %v5912_v3  ;;  %v5891_v62 = vpop.xlane.xlu1 %5890 }
0x123a   : > { %18304 = vrsqrt.f32 %v5925_v12  ;;  %v5915_v27 = vmul.f32 0.03125, %v5891_v62  ;;  %v5888_v31 = vpop.xlane.xlu0 %5887 }
0x123b   : > { %18306 = vrsqrt.f32 %v5924_v47  ;;  %v5914_v18 = vmul.f32 0.03125, %v5888_v31 }
0x123c   : > { %v5927_v63 = vadd.f32 1e-05, %v5915_v27 }
0x123d   : > { %v5926_v41 = vadd.f32 1e-05, %v5914_v18  ;;  %v5897_v33 = vpop.xlane.xlu1 %5896 }
0x123e   : > { %18308 = vrsqrt.f32 %v5927_v63  ;;  %v5917_v5 = vmul.f32 0.03125, %v5897_v33  ;;  %v5894_v14 = vpop.xlane.xlu0 %5893 }
0x123f   : > { %18310 = vrsqrt.f32 %v5926_v41  ;;  %v5916_v1 = vmul.f32 0.03125, %v5894_v14 }
0x1240   : > { %v18301_v34 = vpop.eup %18300  ;;  %v5929_v42 = vadd.f32 1e-05, %v5917_v5 }
0x1241   : > { %v18303_v32 = vpop.eup %18302  ;;  %v5947_v16 = vmul.f32 %v18301_v34, %v20892_v21  ;;  %v5928_v23 = vadd.f32 1e-05, %v5916_v1  ;;  %v5903_v25 = vpop.xlane.xlu1 %5902 }
0x1242   : > { %18312 = vrsqrt.f32 %v5929_v42  ;;  %v5919_v10 = vmul.f32 0.03125, %v5903_v25  ;;  %v5900_v43 = vpop.xlane.xlu0 %5899  ;;  %v5946_v9 = vmul.f32 %v18303_v32, %v20895_v50  ;;  %v6304_v25 = vld [vmem:[%s23791_s7 + $0x10] sm:$0xff] }
0x1243   : > { %v5965_v59 = vmul.f32 %v20983_v60, %v5947_v16  ;;  %18314 = vrsqrt.f32 %v5928_v23  ;;  %v5918_v56 = vmul.f32 0.03125, %v5900_v43  ;;  %v23792_v23 = vmov 0 }
0x1244   : > { %v18305_v49 = vpop.eup %18304  ;;  %v5931_v52 = vadd.f32 1e-05, %v5919_v10  ;;  %v5964_v30 = vmul.f32 %v20983_v60, %v5946_v9  ;;  %v23793_v23 = vsel %vm21079_vm10, 4294967295, %v23792_v23  ;;  %v6305_v10 = vld [vmem:[%s23791_s7 + $0x18] sm:$0xff]  ;;  %v21097_v9 = vld [vmem:[#allocation7] ss:$0 sm:$0xff] }
0x1245   : > { %v18307_v53 = vpop.eup %18306  ;;  %v5930_v4 = vadd.f32 1e-05, %v5918_v56  ;;  %v5909_v21 = vpop.xlane.xlu1 %5908  ;;  %v5949_v45 = vmul.f32 %v18305_v49, %v20902_v48  ;;  %v20997_v61 = vadd.f32 %v20988_v55, %v5965_v59  ;;  %23794 = vst [vmem:[#allocation16_spill] sm:$0xff] %v23793_v23  ;;  %v17560_v43 = vpack.c.bf16 %v6305_v10, %v6304_v25 }
0x1246   : > { %18316 = vrsqrt.f32 %v5931_v52  ;;  %v5921_v36 = vmul.f32 0.03125, %v5909_v21  ;;  %v5906_v29 = vpop.xlane.xlu0 %5905  ;;  %v20993_v50 = vadd.f32 %v20988_v55, %v5964_v30  ;;  %v5948_v22 = vmul.f32 %v18307_v53, %v20906_v57 }
0x1247   : > { %18318 = vrsqrt.f32 %v5930_v4  ;;  %v5920_v54 = vmul.f32 0.03125, %v5906_v29  ;;  %v5967_v15 = vmul.f32 %v20983_v60, %v5949_v45 }
0x1248   : > { %v18309_v26 = vpop.eup %18308  ;;  %v5933_v58 = vadd.f32 1e-05, %v5921_v36  ;;  %16374 = vmatprep.mubr.msk.f32.mxu1 %vm1447_vm4, %v20993_v50  ;;  %v5966_v48 = vmul.f32 %v20983_v60, %v5948_v22 }
0x1249   : > { %v18311_v51 = vpop.eup %18310  ;;  %v5932_v35 = vadd.f32 1e-05, %v5920_v54  ;;  %16375 = vmatmul.mubr.msk.f32.vlgmr.msra.gmra.mrb[126].mxu1 %vm1447_vm4, %v20997_v61  ;;  %v5951_v57 = vmul.f32 %v18309_v26, %v20914_v28  ;;  %v21011_v8 = vadd.f32 %v20988_v55, %v5967_v15 }
0x124a   : > { %18320 = vrsqrt.f32 %v5933_v58  ;;  %v21007_v11 = vadd.f32 %v20988_v55, %v5966_v48  ;;  %v5950_v44 = vmul.f32 %v18311_v51, %v20918_v20 }
0x124b   : > { %18322 = vrsqrt.f32 %v5932_v35  ;;  %v5969_v38 = vmul.f32 %v20983_v60, %v5951_v57 }
0x124c   : > { %v18313_v6 = vpop.eup %18312  ;;  %16377 = vmatprep.mubr.msk.f32.mxu1 %vm1447_vm4, %v21007_v11  ;;  %v5968_v39 = vmul.f32 %v20983_v60, %v5950_v44 }
0x124d   : > { %v18315_v17 = vpop.eup %18314  ;;  %16378 = vmatmul.mubr.msk.f32.gmra.mrb[128].mxu1 %vm1447_vm4, %v21011_v8  ;;  %v5953_v28 = vmul.f32 %v18313_v6, %v20926_v0  ;;  %v21025_v3 = vadd.f32 %v20988_v55, %v5969_v38 }
0x124e   : > { %v21021_v20 = vadd.f32 %v20988_v55, %v5968_v39  ;;  %v5952_v37 = vmul.f32 %v18315_v17, %v20930_v7 }
0x124f   : > { %v5971_v12 = vmul.f32 %v20983_v60, %v5953_v28 }
0x1250   : > { %v18317_v47 = vpop.eup %18316  ;;  %16380 = vmatprep.mubr.msk.f32.mxu1 %vm1447_vm4, %v21021_v20  ;;  %v5970_v62 = vmul.f32 %v20983_v60, %v5952_v37 }
0x1251   : > { %v18319_v27 = vpop.eup %18318  ;;  %16381 = vmatmul.mubr.msk.f32.gmra.mrb[130].mxu1 %vm1447_vm4, %v21025_v3  ;;  %v5955_v0 = vmul.f32 %v18317_v47, %v20938_v40  ;;  %v21039_v18 = vadd.f32 %v20988_v55, %v5971_v12 }
0x1252   : > { %v21035_v31 = vadd.f32 %v20988_v55, %v5970_v62  ;;  %v5954_v7 = vmul.f32 %v18319_v27, %v20942_v46 }
0x1253   : > { %v5973_v63 = vmul.f32 %v20983_v60, %v5955_v0 }
0x1254   : > { %v18321_v41 = vpop.eup %18320  ;;  %16383 = vmatprep.mubr.msk.f32.mxu1 %vm1447_vm4, %v21035_v31  ;;  %v5972_v33 = vmul.f32 %v20983_v60, %v5954_v7 }
0x1255   : > { %v18323_v5 = vpop.eup %18322  ;;  %16384 = vmatmul.mubr.msk.f32.gmra.mrb[132].mxu1 %vm1447_vm4, %v21039_v18  ;;  %v5957_v40 = vmul.f32 %v18321_v41, %v20950_v24  ;;  %v21053_v1 = vadd.f32 %v20988_v55, %v5973_v63 }
0x1256   : > { %v21049_v14 = vadd.f32 %v20988_v55, %v5972_v33  ;;  %v5956_v46 = vmul.f32 %v18323_v5, %v20954_v19  ;;  %v6302_v19 = vld [vmem:[%s23791_s7] sm:$0xff] }
0x1257   : > { %v5975_v34 = vmul.f32 %v20983_v60, %v5957_v40 }
0x1258   : > { %16386 = vmatprep.mubr.msk.f32.mxu1 %vm1447_vm4, %v21049_v14  ;;  %v5974_v42 = vmul.f32 %v20983_v60, %v5956_v46  ;;  %v6303_v60 = vld [vmem:[%s23791_s7 + $0x8] sm:$0xff] }
0x1259   : > { %16387 = vmatmul.mubr.msk.f32.gmra.mrb[134].mxu1 %vm1447_vm4, %v21053_v1  ;;  %v21065_v32 = vadd.f32 %v20988_v55, %v5975_v34  ;;  %v17554_v16 = vpack.c.bf16 %v6303_v60, %v6302_v19 }
0x125a   : > { %v21062_v24 = vadd.f32 %v20988_v55, %v5974_v42 }
0x125b   : > { %17556 = vmatprep.subr.msk.bf16.mxu1 %vm21079_vm10, %v17554_v16 }
0x125c   : > { %16389 = vmatprep.mubr.msk.f32.mxu1 %vm1447_vm4, %v21062_v24  ;;  %17559 = vmatpush3.bf16.xpose.msk.msra.mxu1 %vm21079_vm10, %v17554_v16 }
0x125d   : > { %16390 = vmatmul.mubr.msk.f32.gmra.mrb[136].mxu1 %vm1447_vm4, %v21065_v32  ;;  %17562 = vmatprep.subr.msk.bf16.mxu1 %vm21079_vm10, %v17560_v43 }
0x1264   : > { %17565 = vmatpush3.bf16.xpose.msk.msra.mxu1 %vm21079_vm10, %v17560_v43 }
0x131c   : > { %v16376_v59 = vpop.f32.mrb[126].mxu1 }
0x131d   : > { %v21100_v56 = vadd.f32 %v16376_v59, %v21097_v9  ;;  %v6135_v55 = vpop.f32.mrb[127].mxu1 }
0x131e   : > { %v21103_v49 = vadd.f32 %v21097_v9, %v6135_v55 }
0x131f   : > { %v6195_v52 = vmul.f32 %v21100_v56, %v21100_v56 }
0x1320   : > { %v6194_v30 = vmul.f32 %v21103_v49, %v21103_v49  ;;  %v16379_v53 = vpop.f32.mrb[128].mxu1 }
0x1321   : > { %v6207_v4 = vmul.f32 %v6195_v52, %v21100_v56  ;;  %v21111_v21 = vadd.f32 %v16379_v53, %v21097_v9  ;;  %v6145_v45 = vpop.f32.mrb[129].mxu1 }
0x1322   : > { %v6206_v36 = vmul.f32 %v6194_v30, %v21103_v49  ;;  %v21115_v29 = vadd.f32 %v21097_v9, %v6145_v45 }
0x1323   : > { %v6219_v22 = vmul.f32 0.044715, %v6207_v4  ;;  %v6197_v54 = vmul.f32 %v21111_v21, %v21111_v21 }
0x1324   : > { %v6218_v15 = vmul.f32 0.044715, %v6206_v36  ;;  %v6196_v26 = vmul.f32 %v21115_v29, %v21115_v29  ;;  %v16382_v58 = vpop.f32.mrb[130].mxu1 }
0x1325   : > { %v6231_v48 = vadd.f32 %v6219_v22, %v21100_v56  ;;  %v6209_v51 = vmul.f32 %v6197_v54, %v21111_v21  ;;  %v21124_v35 = vadd.f32 %v16382_v58, %v21097_v9  ;;  %v6155_v57 = vpop.f32.mrb[131].mxu1 }
0x1326   : > { %v6230_v44 = vadd.f32 %v6218_v15, %v21103_v49  ;;  %v6208_v38 = vmul.f32 %v6196_v26, %v21115_v29  ;;  %v21129_v6 = vadd.f32 %v21097_v9, %v6155_v57 }
0x1327   : > { %v6243_v39 = vmul.f32 0.7978846, %v6231_v48  ;;  %v6221_v17 = vmul.f32 0.044715, %v6209_v51  ;;  %v6199_v28 = vmul.f32 %v21124_v35, %v21124_v35 }
0x1328   : > { %v6242_v37 = vmul.f32 0.7978846, %v6230_v44  ;;  %v6220_v12 = vmul.f32 0.044715, %v6208_v38  ;;  %v6198_v47 = vmul.f32 %v21129_v6, %v21129_v6  ;;  %v16385_v62 = vpop.f32.mrb[132].mxu1 }
0x1329   : > { %18324 = vtanh.f32 %v6243_v39  ;;  %v6233_v27 = vadd.f32 %v6221_v17, %v21111_v21  ;;  %v6211_v0 = vmul.f32 %v6199_v28, %v21124_v35  ;;  %v21138_v7 = vadd.f32 %v16385_v62, %v21097_v9  ;;  %v6165_v63 = vpop.f32.mrb[133].mxu1 }
0x132a   : > { %18326 = vtanh.f32 %v6242_v37  ;;  %v6232_v41 = vadd.f32 %v6220_v12, %v21115_v29  ;;  %v6210_v33 = vmul.f32 %v6198_v47, %v21129_v6  ;;  %v21143_v5 = vadd.f32 %v21097_v9, %v6165_v63 }
0x132b   : > { %v6245_v40 = vmul.f32 0.7978846, %v6233_v27  ;;  %v6223_v46 = vmul.f32 0.044715, %v6211_v0  ;;  %v6201_v34 = vmul.f32 %v21138_v7, %v21138_v7 }
0x132c   : > { %v6244_v42 = vmul.f32 0.7978846, %v6232_v41  ;;  %v6222_v19 = vmul.f32 0.044715, %v6210_v33  ;;  %v6200_v60 = vmul.f32 %v21143_v5, %v21143_v5  ;;  %v16388_v16 = vpop.f32.mrb[134].mxu1 }
0x132d   : > { %18328 = vtanh.f32 %v6245_v40  ;;  %v6235_v25 = vadd.f32 %v6223_v46, %v21124_v35  ;;  %v6213_v10 = vmul.f32 %v6201_v34, %v21138_v7  ;;  %v21152_v43 = vadd.f32 %v16388_v16, %v21097_v9  ;;  %v6175_v59 = vpop.f32.mrb[135].mxu1 }
0x132e   : > { %18330 = vtanh.f32 %v6244_v42  ;;  %v6234_v55 = vadd.f32 %v6222_v19, %v21129_v6  ;;  %v6212_v52 = vmul.f32 %v6200_v60, %v21143_v5  ;;  %v21157_v30 = vadd.f32 %v21097_v9, %v6175_v59 }
0x132f   : > { %v6247_v53 = vmul.f32 0.7978846, %v6235_v25  ;;  %v6225_v4 = vmul.f32 0.044715, %v6213_v10  ;;  %v6203_v45 = vmul.f32 %v21152_v43, %v21152_v43 }
0x1330   : > { %v6246_v36 = vmul.f32 0.7978846, %v6234_v55  ;;  %v6224_v22 = vmul.f32 0.044715, %v6212_v52  ;;  %v6202_v54 = vmul.f32 %v21157_v30, %v21157_v30  ;;  %v16391_v15 = vpop.f32.mrb[136].mxu1 }
0x1331   : > { %18332 = vtanh.f32 %v6247_v53  ;;  %v6237_v26 = vadd.f32 %v6225_v4, %v21138_v7  ;;  %v6215_v58 = vmul.f32 %v6203_v45, %v21152_v43  ;;  %v21166_v48 = vadd.f32 %v16391_v15, %v21097_v9  ;;  %v6185_v51 = vpop.f32.mrb[137].mxu1 }
0x1332   : > { %18334 = vtanh.f32 %v6246_v36  ;;  %v6236_v57 = vadd.f32 %v6224_v22, %v21143_v5  ;;  %v6214_v44 = vmul.f32 %v6202_v54, %v21157_v30  ;;  %v21171_v38 = vadd.f32 %v21097_v9, %v6185_v51 }
0x1333   : > { %v18325_v39 = vpop.eup %18324  ;;  %v6249_v17 = vmul.f32 0.7978846, %v6237_v26  ;;  %v6227_v28 = vmul.f32 0.044715, %v6215_v58  ;;  %v6205_v37 = vmul.f32 %v21166_v48, %v21166_v48 }
0x1334   : > { %v18327_v12 = vpop.eup %18326  ;;  %v6267_v47 = vadd.f32 1.0, %v18325_v39  ;;  %v6248_v62 = vmul.f32 0.7978846, %v6236_v57  ;;  %v6226_v27 = vmul.f32 0.044715, %v6214_v44  ;;  %v6204_v0 = vmul.f32 %v21171_v38, %v21171_v38 }
0x1335   : > { %18336 = vtanh.f32 %v6249_v17  ;;  %v6239_v63 = vadd.f32 %v6227_v28, %v21152_v43  ;;  %v6217_v41 = vmul.f32 %v6205_v37, %v21166_v48  ;;  %v6266_v9 = vadd.f32 1.0, %v18327_v12 }
0x1336   : > { %v6279_v33 = vmul.f32 0.5, %v6267_v47  ;;  %18338 = vtanh.f32 %v6248_v62  ;;  %v6238_v40 = vadd.f32 %v6226_v27, %v21157_v30  ;;  %v6216_v46 = vmul.f32 %v6204_v0, %v21171_v38 }
0x1337   : > { %v18329_v34 = vpop.eup %18328  ;;  %v6251_v42 = vmul.f32 0.7978846, %v6239_v63  ;;  %v6229_v19 = vmul.f32 0.044715, %v6217_v41  ;;  %v6278_v60 = vmul.f32 0.5, %v6266_v9 }
0x1338   : > { %v18331_v16 = vpop.eup %18330  ;;  %v6250_v25 = vmul.f32 0.7978846, %v6238_v40  ;;  %v6228_v10 = vmul.f32 0.044715, %v6216_v46  ;;  %v6269_v59 = vadd.f32 1.0, %v18329_v34  ;;  %v6291_v4 = vmul.f32 %v6279_v33, %v21100_v56 }
0x1339   : > { %18340 = vtanh.f32 %v6251_v42  ;;  %v6241_v55 = vadd.f32 %v6229_v19, %v21166_v48  ;;  %v6290_v52 = vmul.f32 %v6278_v60, %v21103_v49  ;;  %v6268_v53 = vadd.f32 1.0, %v18331_v16 }
0x133a   : > { %18342 = vtanh.f32 %v6250_v25  ;;  %v6240_v45 = vadd.f32 %v6228_v10, %v21171_v38  ;;  %v6281_v36 = vmul.f32 0.5, %v6269_v59  ;;  %v14089_v10 = vld [vmem:[#allocation9] ss:$0 sm:$0xff] }
0x133b   : > { %v18333_v22 = vpop.eup %18332  ;;  %v6253_v54 = vmul.f32 0.7978846, %v6241_v55  ;;  %16400 = vmatprep.mubr.msk.f32.mxu1 %vm6313_vm9, %v6290_v52  ;;  %v6280_v15 = vmul.f32 0.5, %v6268_v53 }
0x133c   : > { %v18335_v26 = vpop.eup %18334  ;;  %v6252_v58 = vmul.f32 0.7978846, %v6240_v45  ;;  %16401 = vmatmul.mubr.msk.f32.vlgmr.msra.gmra.mrb[138].mxu1 %vm6313_vm9, %v6291_v4  ;;  %v6271_v51 = vadd.f32 1.0, %v18333_v22  ;;  %v6293_v56 = vmul.f32 %v6281_v36, %v21111_v21 }
0x133d   : > { %18344 = vtanh.f32 %v6253_v54  ;;  %v6292_v49 = vmul.f32 %v6280_v15, %v21115_v29  ;;  %v6270_v57 = vadd.f32 1.0, %v18335_v26 }
0x133e   : > { %18346 = vtanh.f32 %v6252_v58  ;;  %v6283_v44 = vmul.f32 0.5, %v6271_v51 }
0x133f   : > { %v18337_v39 = vpop.eup %18336  ;;  %16403 = vmatprep.mubr.msk.f32.mxu1 %vm6313_vm9, %v6292_v49  ;;  %v6282_v17 = vmul.f32 0.5, %v6270_v57 }
0x1340   : > { %v18339_v28 = vpop.eup %18338  ;;  %16404 = vmatmul.mubr.msk.f32.gmra.mrb[140].mxu1 %vm6313_vm9, %v6293_v56  ;;  %v6273_v37 = vadd.f32 1.0, %v18337_v39  ;;  %v6295_v62 = vmul.f32 %v6283_v44, %v21124_v35 }
0x1341   : > { %v6294_v12 = vmul.f32 %v6282_v17, %v21129_v6  ;;  %v6272_v47 = vadd.f32 1.0, %v18339_v28 }
0x1342   : > { %v6285_v27 = vmul.f32 0.5, %v6273_v37 }
0x1343   : > { %v18341_v29 = vpop.eup %18340  ;;  %16406 = vmatprep.mubr.msk.f32.mxu1 %vm6313_vm9, %v6294_v12  ;;  %v6284_v0 = vmul.f32 0.5, %v6272_v47 }
0x1344   : > { %v18343_v21 = vpop.eup %18342  ;;  %16407 = vmatmul.mubr.msk.f32.gmra.mrb[142].mxu1 %vm6313_vm9, %v6295_v62  ;;  %v6275_v63 = vadd.f32 1.0, %v18341_v29  ;;  %v6297_v33 = vmul.f32 %v6285_v27, %v21138_v7 }
0x1345   : > { %v6296_v41 = vmul.f32 %v6284_v0, %v21143_v5  ;;  %v6274_v9 = vadd.f32 1.0, %v18343_v21 }
0x1346   : > { %v6287_v40 = vmul.f32 0.5, %v6275_v63 }
0x1347   : > { %v18345_v46 = vpop.eup %18344  ;;  %16409 = vmatprep.mubr.msk.f32.mxu1 %vm6313_vm9, %v6296_v41  ;;  %v6286_v6 = vmul.f32 0.5, %v6274_v9 }
0x1348   : > { %v18347_v35 = vpop.eup %18346  ;;  %16410 = vmatmul.mubr.msk.f32.gmra.mrb[144].mxu1 %vm6313_vm9, %v6297_v33  ;;  %v6277_v34 = vadd.f32 1.0, %v18345_v46  ;;  %v6299_v60 = vmul.f32 %v6287_v40, %v21152_v43 }
0x1349   : > { %v6298_v42 = vmul.f32 %v6286_v6, %v21157_v30  ;;  %v6276_v19 = vadd.f32 1.0, %v18347_v35 }
0x134a   : > { %v6289_v16 = vmul.f32 0.5, %v6277_v34 }
0x134b   : > { %16412 = vmatprep.mubr.msk.f32.mxu1 %vm6313_vm9, %v6298_v42  ;;  %v6288_v5 = vmul.f32 0.5, %v6276_v19 }
0x134c   : > { %16413 = vmatmul.mubr.msk.f32.gmra.mrb[146].mxu1 %vm6313_vm9, %v6299_v60  ;;  %v6301_v25 = vmul.f32 %v6289_v16, %v21166_v48 }
0x134d   : > { %v6300_v7 = vmul.f32 %v6288_v5, %v21171_v38 }
0x134f   : > { %16415 = vmatprep.mubr.msk.f32.mxu1 %vm6313_vm9, %v6300_v7 }
0x1350   : > { %16416 = vmatmul.mubr.msk.f32.gmra.mrb[148].mxu1 %vm6313_vm9, %v6301_v25 }
0x140f   : > { %v16402_v59 = vpop.f32.mrb[138].mxu1 }
0x1410   : > { %v6434_v30 = vadd.f32 %v16402_v59, %v14089_v10  ;;  %v6428_v55 = vpop.f32.mrb[139].mxu1 }
0x1411   : > { %v6429_v52 = vadd.f32 %v14089_v10, %v6428_v55 }
0x1412   : > { %v6488_v43 = vadd.f32 %v6434_v30, %v20997_v61 }
0x1413   : > { %v6487_v53 = vadd.f32 %v6429_v52, %v20993_v50  ;;  %v16405_v4 = vpop.f32.mrb[140].mxu1 }
0x1414   : > { %v6444_v45 = vadd.f32 %v16405_v4, %v14089_v10  ;;  %v6438_v36 = vpop.f32.mrb[141].mxu1  ;;  %v6506_v38 = vsel %vm1447_vm4, %v6488_v43, 0.0 }
0x1415   : > { %v6439_v22 = vadd.f32 %v14089_v10, %v6438_v36  ;;  %6507 = vadd.xlane.f32.xlu1 %v6506_v38  ;;  %v6503_v48 = vsel %vm1447_vm4, %v6487_v53, 0.0 }
0x1416   : > { %v6490_v54 = vadd.f32 %v6444_v45, %v21011_v8  ;;  %6504 = vadd.xlane.f32.xlu0 %v6503_v48 }
0x1417   : > { %v6489_v15 = vadd.f32 %v6439_v22, %v21007_v11  ;;  %v16408_v26 = vpop.f32.mrb[142].mxu1 }
0x1418   : > { %v6454_v58 = vadd.f32 %v16408_v26, %v14089_v10  ;;  %v6448_v51 = vpop.f32.mrb[143].mxu1  ;;  %v6512_v61 = vsel %vm1447_vm4, %v6490_v54, 0.0 }
0x1419   : > { %v6449_v50 = vadd.f32 %v14089_v10, %v6448_v51  ;;  %6513 = vadd.xlane.f32.xlu1 %v6512_v61  ;;  %v6509_v49 = vsel %vm1447_vm4, %v6489_v15, 0.0 }
0x141a   : > { %v6492_v57 = vadd.f32 %v6454_v58, %v21025_v3  ;;  %6510 = vadd.xlane.f32.xlu0 %v6509_v49 }
0x141b   : > { %v6491_v56 = vadd.f32 %v6449_v50, %v21021_v20  ;;  %v16411_v44 = vpop.f32.mrb[144].mxu1 }
0x141c   : > { %v6464_v39 = vadd.f32 %v16411_v44, %v14089_v10  ;;  %v6458_v8 = vpop.f32.mrb[145].mxu1  ;;  %v6518_v17 = vsel %vm1447_vm4, %v6492_v57, 0.0 }
0x141d   : > { %v6459_v11 = vadd.f32 %v14089_v10, %v6458_v8  ;;  %6519 = vadd.xlane.f32.xlu1 %v6518_v17  ;;  %v6515_v28 = vsel %vm1447_vm4, %v6491_v56, 0.0 }
0x141e   : > { %v21220_v37 = vadd.f32 %v6464_v39, %v21039_v18  ;;  %6516 = vadd.xlane.f32.xlu0 %v6515_v28 }
0x141f   : > { %v21223_v12 = vadd.f32 %v6459_v11, %v21035_v31  ;;  %v16414_v3 = vpop.f32.mrb[146].mxu1 }
0x1420   : > { %v6474_v47 = vadd.f32 %v16414_v3, %v14089_v10  ;;  %v6468_v62 = vpop.f32.mrb[147].mxu1  ;;  %v6524_v20 = vsel %vm1447_vm4, %v21220_v37, 0.0 }
0x1421   : > { %v6469_v27 = vadd.f32 %v14089_v10, %v6468_v62  ;;  %6525 = vadd.xlane.f32.xlu1 %v6524_v20  ;;  %v6521_v29 = vsel %vm1447_vm4, %v21223_v12, 0.0 }
0x1422   : > { %v21230_v0 = vadd.f32 %v6474_v47, %v21053_v1  ;;  %6522 = vadd.xlane.f32.xlu0 %v6521_v29 }
0x1423   : > { %v21233_v18 = vadd.f32 %v6469_v27, %v21049_v14  ;;  %v16417_v31 = vpop.f32.mrb[148].mxu1 }
0x1424   : > { %v6484_v21 = vadd.f32 %v16417_v31, %v14089_v10  ;;  %v6478_v63 = vpop.f32.mrb[149].mxu1  ;;  %v6530_v41 = vsel %vm1447_vm4, %v21230_v0, 0.0 }
0x1425   : > { %v6479_v9 = vadd.f32 %v14089_v10, %v6478_v63  ;;  %6531 = vadd.xlane.f32.xlu1 %v6530_v41  ;;  %v6527_v33 = vsel %vm1447_vm4, %v21233_v18, 0.0 }
0x1426   : > { %v21240_v40 = vadd.f32 %v6484_v21, %v21065_v32  ;;  %6528 = vadd.xlane.f32.xlu0 %v6527_v33 }
0x1427   : > { %v21243_v1 = vadd.f32 %v6479_v9, %v21062_v24 }
0x1428   : > { %v6536_v14 = vsel %vm1447_vm4, %v21240_v40, 0.0 }
0x1429   : > { %6537 = vadd.xlane.f32.xlu1 %v6536_v14  ;;  %v6533_v46 = vsel %vm1447_vm4, %v21243_v1, 0.0 }
0x142a   : > { %6534 = vadd.xlane.f32.xlu0 %v6533_v46 }
0x14a2   : > { %v6508_v6 = vpop.xlane.xlu1 %6507 }
0x14a3   : > { %v6540_v35 = vmul.f32 0.03125, %v6508_v6  ;;  %v6505_v34 = vpop.xlane.xlu0 %6504  ;;  %v14108_v6 = vld [vmem:[%s23661_s11 + $0x60] sm:$0xff] }
0x14a4   : > { %v6539_v42 = vmul.f32 0.03125, %v6505_v34  ;;  %16418 = vmatprep.subr.msk.mxu0 %vm1447_vm4, %v14108_v6 }
0x14a5   : > { %v21249_v19 = vsub.f32 %v6488_v43, %v6540_v35  ;;  %16419 = vmatpush3.xpose.msk.msra.mxu0 %vm1447_vm4, %v14108_v6  ;;  %v21328_v35 = vld [vmem:[%s23661_s11 + $0xa0] sm:$0xff] }
0x14a6   : > { %v21251_v32 = vsub.f32 %v6487_v53, %v6539_v42  ;;  %v6514_v60 = vpop.xlane.xlu1 %6513  ;;  %16458 = vmatprep.subr.msk.mxu0 %vm1447_vm4, %v21328_v35 }
0x14a7   : > { %v6542_v16 = vmul.f32 0.03125, %v6514_v60  ;;  %v6511_v24 = vpop.xlane.xlu0 %6510  ;;  %v6564_v5 = vmul.f32 %v21249_v19, %v21249_v19 }
0x14a8   : > { %v6541_v7 = vmul.f32 0.03125, %v6511_v24  ;;  %v6563_v25 = vmul.f32 %v21251_v32, %v21251_v32 }
0x14a9   : > { %v21257_v10 = vsub.f32 %v6490_v54, %v6542_v16  ;;  %v6578_v59 = vsel %vm1447_vm4, %v6564_v5, 0.0 }
0x14aa   : > { %v21260_v30 = vsub.f32 %v6489_v15, %v6541_v7  ;;  %v6520_v55 = vpop.xlane.xlu1 %6519  ;;  %6579 = vadd.xlane.f32.xlu1 %v6578_v59  ;;  %v6575_v52 = vsel %vm1447_vm4, %v6563_v25, 0.0 }
0x14ab   : > { %v6544_v43 = vmul.f32 0.03125, %v6520_v55  ;;  %v6517_v53 = vpop.xlane.xlu0 %6516  ;;  %6576 = vadd.xlane.f32.xlu0 %v6575_v52  ;;  %v6566_v4 = vmul.f32 %v21257_v10, %v21257_v10 }
0x14ac   : > { %v6543_v45 = vmul.f32 0.03125, %v6517_v53  ;;  %v6565_v36 = vmul.f32 %v21260_v30, %v21260_v30 }
0x14ad   : > { %v21267_v38 = vsub.f32 %v6492_v57, %v6544_v43  ;;  %v6584_v22 = vsel %vm1447_vm4, %v6566_v4, 0.0 }
0x14ae   : > { %v21270_v48 = vsub.f32 %v6491_v56, %v6543_v45  ;;  %v6526_v54 = vpop.xlane.xlu1 %6525  ;;  %6585 = vadd.xlane.f32.xlu1 %v6584_v22  ;;  %v6581_v15 = vsel %vm1447_vm4, %v6565_v36, 0.0 }
0x14af   : > { %v6546_v26 = vmul.f32 0.03125, %v6526_v54  ;;  %v6523_v58 = vpop.xlane.xlu0 %6522  ;;  %6582 = vadd.xlane.f32.xlu0 %v6581_v15  ;;  %v6568_v51 = vmul.f32 %v21267_v38, %v21267_v38 }
0x14b0   : > { %v6545_v61 = vmul.f32 0.03125, %v6523_v58  ;;  %v6567_v50 = vmul.f32 %v21270_v48, %v21270_v48 }
0x14b1   : > { %v21278_v49 = vsub.f32 %v21220_v37, %v6546_v26  ;;  %v6590_v57 = vsel %vm1447_vm4, %v6568_v51, 0.0 }
0x14b2   : > { %v21282_v56 = vsub.f32 %v21223_v12, %v6545_v61  ;;  %v6532_v44 = vpop.xlane.xlu1 %6531  ;;  %6591 = vadd.xlane.f32.xlu1 %v6590_v57  ;;  %v6587_v39 = vsel %vm1447_vm4, %v6567_v50, 0.0  ;;  %v21332_v50 = vld [vmem:[#allocation10 + $0x2] ss:$0 sm:$0xff] }
0x14b3   : > { %v6548_v8 = vmul.f32 0.03125, %v6532_v44  ;;  %v6529_v17 = vpop.xlane.xlu0 %6528  ;;  %6588 = vadd.xlane.f32.xlu0 %v6587_v39  ;;  %v6570_v11 = vmul.f32 %v21278_v49, %v21278_v49 }
0x14b4   : > { %v6547_v28 = vmul.f32 0.03125, %v6529_v17  ;;  %v6569_v37 = vmul.f32 %v21282_v56, %v21282_v56 }
0x14b5   : > { %v21290_v3 = vsub.f32 %v21230_v0, %v6548_v8  ;;  %v6596_v12 = vsel %vm1447_vm4, %v6570_v11, 0.0 }
0x14b6   : > { %v21294_v47 = vsub.f32 %v21233_v18, %v6547_v28  ;;  %6597 = vadd.xlane.f32.xlu1 %v6596_v12  ;;  %v6538_v62 = vpop.xlane.xlu1 %6537  ;;  %v6593_v20 = vsel %vm1447_vm4, %v6569_v37, 0.0  ;;  %v21336_v12 = vld [vmem:[#allocation10 + $0x3] ss:$0 sm:$0xff] }
0x14b7   : > { %v6550_v27 = vmul.f32 0.03125, %v6538_v62  ;;  %6594 = vadd.xlane.f32.xlu0 %v6593_v20  ;;  %v6535_v29 = vpop.xlane.xlu0 %6534  ;;  %v6572_v31 = vmul.f32 %v21290_v3, %v21290_v3 }
0x14b8   : > { %v6549_v21 = vmul.f32 0.03125, %v6535_v29  ;;  %v6571_v0 = vmul.f32 %v21294_v47, %v21294_v47 }
0x14b9   : > { %v21302_v63 = vsub.f32 %v21240_v40, %v6550_v27  ;;  %v6602_v18 = vsel %vm1447_vm4, %v6572_v31, 0.0 }
0x14ba   : > { %v21306_v41 = vsub.f32 %v21243_v1, %v6549_v21  ;;  %6603 = vadd.xlane.f32.xlu1 %v6602_v18  ;;  %v6599_v9 = vsel %vm1447_vm4, %v6571_v0, 0.0  ;;  %v14124_v1 = vld [vmem:[%s23661_s11 + $0x80] sm:$0xff] }
0x14bb   : > { %6600 = vadd.xlane.f32.xlu0 %v6599_v9  ;;  %v6574_v33 = vmul.f32 %v21302_v63, %v21302_v63  ;;  %16438 = vmatprep.subr.msk.mxu1 %vm1447_vm4, %v14124_v1 }
0x14bc   : > { %v6573_v14 = vmul.f32 %v21306_v41, %v21306_v41  ;;  %16439 = vmatpush3.xpose.msk.msra.mxu1 %vm1447_vm4, %v14124_v1 }
0x14bd   : > { %v6608_v46 = vsel %vm1447_vm4, %v6574_v33, 0.0 }
0x14be   : > { %6609 = vadd.xlane.f32.xlu1 %v6608_v46  ;;  %v6605_v40 = vsel %vm1447_vm4, %v6573_v14, 0.0 }
0x14bf   : > { %6606 = vadd.xlane.f32.xlu0 %v6605_v40 }
0x1537   : > { %v6580_v34 = vpop.xlane.xlu1 %6579 }
0x1538   : > { %v6612_v42 = vmul.f32 0.03125, %v6580_v34  ;;  %v6577_v60 = vpop.xlane.xlu0 %6576 }
0x1539   : > { %v6611_v16 = vmul.f32 0.03125, %v6577_v60 }
0x153a   : > { %v6624_v24 = vadd.f32 1e-05, %v6612_v42 }
0x153b   : > { %v6623_v5 = vadd.f32 1e-05, %v6611_v16  ;;  %v6586_v7 = vpop.xlane.xlu1 %6585 }
0x153c   : > { %18348 = vrsqrt.f32 %v6624_v24  ;;  %v6614_v25 = vmul.f32 0.03125, %v6586_v7  ;;  %v6583_v59 = vpop.xlane.xlu0 %6582 }
0x153d   : > { %18350 = vrsqrt.f32 %v6623_v5  ;;  %v6613_v55 = vmul.f32 0.03125, %v6583_v59 }
0x153e   : > { %v6626_v52 = vadd.f32 1e-05, %v6614_v25 }
0x153f   : > { %v6625_v43 = vadd.f32 1e-05, %v6613_v55  ;;  %v6592_v53 = vpop.xlane.xlu1 %6591 }
0x1540   : > { %18352 = vrsqrt.f32 %v6626_v52  ;;  %v6616_v4 = vmul.f32 0.03125, %v6592_v53  ;;  %v6589_v45 = vpop.xlane.xlu0 %6588 }
0x1541   : > { %18354 = vrsqrt.f32 %v6625_v43  ;;  %v6615_v36 = vmul.f32 0.03125, %v6589_v45 }
0x1542   : > { %v6628_v22 = vadd.f32 1e-05, %v6616_v4 }
0x1543   : > { %v6627_v54 = vadd.f32 1e-05, %v6615_v36  ;;  %v6598_v15 = vpop.xlane.xlu1 %6597 }
0x1544   : > { %18356 = vrsqrt.f32 %v6628_v22  ;;  %v6618_v26 = vmul.f32 0.03125, %v6598_v15  ;;  %v6595_v58 = vpop.xlane.xlu0 %6594 }
0x1545   : > { %18358 = vrsqrt.f32 %v6627_v54  ;;  %v6617_v51 = vmul.f32 0.03125, %v6595_v58 }
0x1546   : > { %v18349_v61 = vpop.eup %18348  ;;  %v6630_v57 = vadd.f32 1e-05, %v6618_v26 }
0x1547   : > { %v18351_v44 = vpop.eup %18350  ;;  %v6648_v39 = vmul.f32 %v18349_v61, %v21249_v19  ;;  %v6629_v8 = vadd.f32 1e-05, %v6617_v51  ;;  %v6604_v17 = vpop.xlane.xlu1 %6603 }
0x1548   : > { %v6647_v11 = vmul.f32 %v18351_v44, %v21251_v32  ;;  %18360 = vrsqrt.f32 %v6630_v57  ;;  %v6620_v28 = vmul.f32 0.03125, %v6604_v17  ;;  %v6601_v37 = vpop.xlane.xlu0 %6600 }
0x1549   : > { %v6666_v62 = vmul.f32 %v21332_v50, %v6648_v39  ;;  %18362 = vrsqrt.f32 %v6629_v8  ;;  %v6619_v20 = vmul.f32 0.03125, %v6601_v37  ;;  %v21476_v39 = vld [vmem:[%s23662_s12 + $0xc] ss:$0 sm:$0xff] }
0x154a   : > { %v18353_v27 = vpop.eup %18352  ;;  %v6665_v29 = vmul.f32 %v21332_v50, %v6647_v11  ;;  %v6632_v31 = vadd.f32 1e-05, %v6620_v28 }
0x154b   : > { %v18355_v21 = vpop.eup %18354  ;;  %v6650_v19 = vmul.f32 %v18353_v27, %v21257_v10  ;;  %v6631_v0 = vadd.f32 1e-05, %v6619_v20  ;;  %v6610_v18 = vpop.xlane.xlu1 %6609  ;;  %v21346_v46 = vadd.f32 %v21336_v12, %v6666_v62 }
0x154c   : > { %v21342_v32 = vadd.f32 %v21336_v12, %v6665_v29  ;;  %v6649_v9 = vmul.f32 %v18355_v21, %v21260_v30  ;;  %18364 = vrsqrt.f32 %v6632_v31  ;;  %v6622_v33 = vmul.f32 0.03125, %v6610_v18  ;;  %v6607_v14 = vpop.xlane.xlu0 %6606 }
0x154d   : > { %v6668_v40 = vmul.f32 %v21332_v50, %v6650_v19  ;;  %18366 = vrsqrt.f32 %v6631_v0  ;;  %v6621_v1 = vmul.f32 0.03125, %v6607_v14 }
0x154e   : > { %v18357_v6 = vpop.eup %18356  ;;  %v6667_v10 = vmul.f32 %v21332_v50, %v6649_v9  ;;  %v6634_v34 = vadd.f32 1e-05, %v6622_v33  ;;  %16420 = vmatprep.mubr.msk.f32.mxu0 %vm1447_vm4, %v21342_v32  ;;  %16440 = vmatprep.mubr.msk.f32.mxu1 %vm1447_vm4, %v21342_v32 }
0x154f   : > { %v18359_v30 = vpop.eup %18358  ;;  %v6652_v42 = vmul.f32 %v18357_v6, %v21267_v38  ;;  %v6633_v60 = vadd.f32 1e-05, %v6621_v1  ;;  %16421 = vmatmul.mubr.msk.f32.vlgmr.msra.gmra.mrb[138].mxu0 %vm1447_vm4, %v21346_v46  ;;  %16441 = vmatmul.mubr.msk.f32.vlgmr.msra.gmra.mrb[150].mxu1 %vm1447_vm4, %v21346_v46  ;;  %v21366_v5 = vadd.f32 %v21336_v12, %v6668_v40 }
0x1550   : > { %v21360_v16 = vadd.f32 %v21336_v12, %v6667_v10  ;;  %v6651_v24 = vmul.f32 %v18359_v30, %v21270_v48  ;;  %18368 = vrsqrt.f32 %v6634_v34  ;;  %16459 = vmatpush3.xpose.msk.msra.mxu0 %vm1447_vm4, %v21328_v35 }
0x1551   : > { %v6670_v38 = vmul.f32 %v21332_v50, %v6652_v42  ;;  %18370 = vrsqrt.f32 %v6633_v60 }
0x1552   : > { %v18361_v7 = vpop.eup %18360  ;;  %v6669_v25 = vmul.f32 %v21332_v50, %v6651_v24  ;;  %16423 = vmatprep.mubr.msk.f32.mxu0 %vm1447_vm4, %v21360_v16  ;;  %16443 = vmatprep.mubr.msk.f32.mxu1 %vm1447_vm4, %v21360_v16 }
0x1553   : > { %v18363_v48 = vpop.eup %18362  ;;  %v6654_v59 = vmul.f32 %v18361_v7, %v21278_v49  ;;  %16424 = vmatmul.mubr.msk.f32.gmra.mrb[140].mxu0 %vm1447_vm4, %v21366_v5  ;;  %16444 = vmatmul.mubr.msk.f32.gmra.mrb[152].mxu1 %vm1447_vm4, %v21366_v5  ;;  %v21384_v52 = vadd.f32 %v21336_v12, %v6670_v38 }
0x1554   : > { %v21380_v35 = vadd.f32 %v21336_v12, %v6669_v25  ;;  %v6653_v55 = vmul.f32 %v18363_v48, %v21282_v56 }
0x1555   : > { %v6672_v43 = vmul.f32 %v21332_v50, %v6654_v59 }
0x1556   : > { %v18365_v53 = vpop.eup %18364  ;;  %v6671_v4 = vmul.f32 %v21332_v50, %v6653_v55  ;;  %16426 = vmatprep.mubr.msk.f32.mxu0 %vm1447_vm4, %v21380_v35  ;;  %16446 = vmatprep.mubr.msk.f32.mxu1 %vm1447_vm4, %v21380_v35 }
0x1557   : > { %v18367_v49 = vpop.eup %18366  ;;  %v6656_v45 = vmul.f32 %v18365_v53, %v21290_v3  ;;  %16427 = vmatmul.mubr.msk.f32.gmra.mrb[142].mxu0 %vm1447_vm4, %v21384_v52  ;;  %16447 = vmatmul.mubr.msk.f32.gmra.mrb[154].mxu1 %vm1447_vm4, %v21384_v52  ;;  %v21402_v22 = vadd.f32 %v21336_v12, %v6672_v43 }
0x1558   : > { %v21398_v56 = vadd.f32 %v21336_v12, %v6671_v4  ;;  %v6655_v36 = vmul.f32 %v18367_v49, %v21294_v47 }
0x1559   : > { %v6674_v54 = vmul.f32 %v21332_v50, %v6656_v45 }
0x155a   : > { %v18369_v15 = vpop.eup %18368  ;;  %v6673_v26 = vmul.f32 %v21332_v50, %v6655_v36  ;;  %16429 = vmatprep.mubr.msk.f32.mxu0 %vm1447_vm4, %v21398_v56  ;;  %16449 = vmatprep.mubr.msk.f32.mxu1 %vm1447_vm4, %v21398_v56 }
0x155b   : > { %v18371_v3 = vpop.eup %18370  ;;  %v6658_v58 = vmul.f32 %v18369_v15, %v21302_v63  ;;  %16430 = vmatmul.mubr.msk.f32.gmra.mrb[144].mxu0 %vm1447_vm4, %v21402_v22  ;;  %16450 = vmatmul.mubr.msk.f32.gmra.mrb[156].mxu1 %vm1447_vm4, %v21402_v22  ;;  %v21420_v61 = vadd.f32 %v21336_v12, %v6674_v54 }
0x155c   : > { %v21416_v47 = vadd.f32 %v21336_v12, %v6673_v26  ;;  %v6657_v51 = vmul.f32 %v18371_v3, %v21306_v41 }
0x155d   : > { %v6676_v57 = vmul.f32 %v21332_v50, %v6658_v58 }
0x155e   : > { %v6675_v44 = vmul.f32 %v21332_v50, %v6657_v51  ;;  %16432 = vmatprep.mubr.msk.f32.mxu0 %vm1447_vm4, %v21416_v47  ;;  %16452 = vmatprep.mubr.msk.f32.mxu1 %vm1447_vm4, %v21416_v47  ;;  %v14126_v50 = vld [vmem:[%s23662_s12 + $0x10] ss:$0 sm:$0xff] }
0x155f   : > { %16433 = vmatmul.mubr.msk.f32.gmra.mrb[146].mxu0 %vm1447_vm4, %v21420_v61  ;;  %16453 = vmatmul.mubr.msk.f32.gmra.mrb[158].mxu1 %vm1447_vm4, %v21420_v61  ;;  %v21436_v41 = vadd.f32 %v21336_v12, %v6676_v57  ;;  %v14142_v57 = vld [vmem:[%s23662_s12 + $0x14] ss:$0 sm:$0xff] }
0x1560   : > { %v21433_v63 = vadd.f32 %v21336_v12, %v6675_v44 }
0x1562   : > { %16435 = vmatprep.mubr.msk.f32.mxu0 %vm1447_vm4, %v21433_v63  ;;  %16455 = vmatprep.mubr.msk.f32.mxu1 %vm1447_vm4, %v21433_v63 }
0x1563   : > { %16436 = vmatmul.mubr.msk.f32.gmra.mrb[148].mxu0 %vm1447_vm4, %v21436_v41  ;;  %16456 = vmatmul.mubr.msk.f32.gmra.mrb[160].mxu1 %vm1447_vm4, %v21436_v41 }
0x1564   : > { %16460 = vmatprep.mubr.msk.f32.mxu0 %vm1447_vm4, %v21342_v32 }
0x1567   : > { %16461 = vmatmul.mubr.msk.f32.vlgmr.msra.gmra.mrb[150].mxu0 %vm1447_vm4, %v21346_v46 }
0x1568   : > { %16463 = vmatprep.mubr.msk.f32.mxu0 %vm1447_vm4, %v21360_v16 }
0x156b   : > { %16464 = vmatmul.mubr.msk.f32.gmra.mrb[152].mxu0 %vm1447_vm4, %v21366_v5 }
0x156c   : > { %16466 = vmatprep.mubr.msk.f32.mxu0 %vm1447_vm4, %v21380_v35 }
0x156f   : > { %16467 = vmatmul.mubr.msk.f32.gmra.mrb[154].mxu0 %vm1447_vm4, %v21384_v52 }
0x1570   : > { %16469 = vmatprep.mubr.msk.f32.mxu0 %vm1447_vm4, %v21398_v56 }
0x1573   : > { %16470 = vmatmul.mubr.msk.f32.gmra.mrb[156].mxu0 %vm1447_vm4, %v21402_v22 }
0x1574   : > { %16472 = vmatprep.mubr.msk.f32.mxu0 %vm1447_vm4, %v21416_v47 }
0x1577   : > { %16473 = vmatmul.mubr.msk.f32.gmra.mrb[158].mxu0 %vm1447_vm4, %v21420_v61 }
0x1578   : > { %16475 = vmatprep.mubr.msk.f32.mxu0 %vm1447_vm4, %v21433_v63 }
0x157b   : > { %16476 = vmatmul.mubr.msk.f32.gmra.mrb[160].mxu0 %vm1447_vm4, %v21436_v41 }
0x1622   : > { %v21478_v8 = vpop.f32.mrb[138].mxu0  ;;  %v16442_v17 = vpop.f32.mrb[150].mxu1 }
0x1623   : > { %v6966_v11 = vadd.f32 %v16442_v17, %v14126_v50  ;;  %v6822_v28 = vpop.f32.mrb[139].mxu0  ;;  %v6960_v37 = vpop.f32.mrb[151].mxu1 }
0x1624   : > { %v6823_v12 = vadd.f32 %v21476_v39, %v6822_v28  ;;  %v6961_v62 = vadd.f32 %v14126_v50, %v6960_v37 }
0x1626   : > { %v17566_v20 = vpack.c.bf16 %v6966_v11, %v6961_v62  ;;  %v21481_v27 = vpop.f32.mrb[140].mxu0  ;;  %v16445_v29 = vpop.f32.mrb[152].mxu1  ;;  %16502 = vmatprep.mubr.msk.f32.mxu1 %vm1888_vm5, %v6823_v12 }
0x1627   : > { %v6976_v31 = vadd.f32 %v16445_v29, %v14126_v50  ;;  %v21484_v21 = vpop.f32.mrb[141].mxu0  ;;  %v6970_v19 = vpop.f32.mrb[153].mxu1 }
0x1628   : > { %v6971_v0 = vadd.f32 %v14126_v50, %v6970_v19  ;;  %17568 = vmatprep.subr.msk.bf16.mxu1 %vm19496_vm6, %v17566_v20 }
0x1629   : > { %17571 = vmatpush3.bf16.xpose.msk.msra.mxu1 %vm19496_vm6, %v17566_v20 }
0x162a   : > { %v17572_v18 = vpack.c.bf16 %v6976_v31, %v6971_v0  ;;  %v21490_v9 = vpop.f32.mrb[142].mxu0  ;;  %v16448_v33 = vpop.f32.mrb[154].mxu1 }
0x162b   : > { %v6986_v14 = vadd.f32 %v16448_v33, %v14126_v50  ;;  %v21492_v40 = vpop.f32.mrb[143].mxu0  ;;  %v6980_v1 = vpop.f32.mrb[155].mxu1 }
0x162c   : > { %v6981_v6 = vadd.f32 %v14126_v50, %v6980_v1  ;;  %17574 = vmatprep.subr.msk.bf16.mxu1 %vm19496_vm6, %v17572_v18 }
0x162e   : > { %v17578_v10 = vpack.c.bf16 %v6986_v14, %v6981_v6  ;;  %v21496_v34 = vpop.f32.mrb[144].mxu0  ;;  %v16451_v30 = vpop.f32.mrb[156].mxu1 }
0x162f   : > { %v6996_v42 = vadd.f32 %v16451_v30, %v14126_v50  ;;  %v21498_v60 = vpop.f32.mrb[145].mxu0  ;;  %v6990_v24 = vpop.f32.mrb[157].mxu1 }
0x1630   : > { %v6991_v38 = vadd.f32 %v14126_v50, %v6990_v24 }
0x1631   : > { %17577 = vmatpush3.bf16.xpose.msk.msra.mxu1 %vm19496_vm6, %v17572_v18 }
0x1632   : > { %v17584_v7 = vpack.c.bf16 %v6996_v42, %v6991_v38  ;;  %v16434_v25 = vpop.f32.mrb[146].mxu0  ;;  %v16454_v48 = vpop.f32.mrb[158].mxu1  ;;  %17580 = vmatprep.subr.msk.bf16.mxu1 %vm19496_vm6, %v17578_v10 }
0x1633   : > { %v21505_v59 = vadd.f32 %v16434_v25, %v21476_v39  ;;  %v7006_v55 = vadd.f32 %v16454_v48, %v14126_v50  ;;  %v21507_v43 = vpop.f32.mrb[147].mxu0  ;;  %v7000_v53 = vpop.f32.mrb[159].mxu1 }
0x1634   : > { %v7001_v4 = vadd.f32 %v14126_v50, %v7000_v53 }
0x1636   : > { %v17590_v49 = vpack.c.bf16 %v7006_v55, %v7001_v4  ;;  %v16437_v45 = vpop.f32.mrb[148].mxu0  ;;  %v16457_v36 = vpop.f32.mrb[160].mxu1 }
0x1637   : > { %v21510_v54 = vadd.f32 %v16437_v45, %v21476_v39  ;;  %v7016_v15 = vadd.f32 %v16457_v36, %v14126_v50  ;;  %v6872_v26 = vpop.f32.mrb[149].mxu0  ;;  %v7010_v3 = vpop.f32.mrb[161].mxu1  ;;  %v14209_v45 = vld [vmem:[%s23661_s11 + $0x88] sm:$0xff] }
0x1638   : > { %v21513_v58 = vadd.f32 %v21476_v39, %v6872_v26  ;;  %v7011_v51 = vadd.f32 %v14126_v50, %v7010_v3  ;;  %v6833_v26 = vadd.f32 %v21476_v39, %v21484_v21  ;;  %v6838_v3 = vadd.f32 %v21481_v27, %v21476_v39 }
0x1639   : > { %17583 = vmatpush3.bf16.xpose.msk.msra.mxu1 %vm19496_vm6, %v17578_v10  ;;  %v6853_v21 = vadd.f32 %v21476_v39, %v21498_v60  ;;  %v6858_v27 = vadd.f32 %v21496_v34, %v21476_v39 }
0x163a   : > { %v17596_v44 = vpack.c.bf16 %v7016_v15, %v7011_v51  ;;  %v16462_v17 = vpop.f32.mrb[150].mxu0  ;;  %17586 = vmatprep.subr.msk.bf16.mxu1 %vm19496_vm6, %v17584_v7  ;;  %v6828_v15 = vadd.f32 %v21478_v8, %v21476_v39  ;;  %v6843_v51 = vadd.f32 %v21476_v39, %v21492_v40  ;;  %v6848_v8 = vadd.f32 %v21490_v9, %v21476_v39  ;;  %v21599_v9 = vld [vmem:[%s23795_s30] sm:$0xff] }
0x163b   : > { %v7104_v11 = vadd.f32 %v16462_v17, %v14142_v57  ;;  %v7098_v28 = vpop.f32.mrb[151].mxu0  ;;  %v6863_v40 = vadd.f32 %v21476_v39, %v21507_v43  ;;  %v21594_v39 = vld [vmem:[%s23795_s30 + $0x8] sm:$0xff] }
0x163c   : > { %v7099_v37 = vadd.f32 %v14142_v57, %v7098_v28 }
0x163e   : > { %v17602_v12 = vpack.c.bf16 %v7104_v11, %v7099_v37  ;;  %v16465_v62 = vpop.f32.mrb[152].mxu0 }
0x163f   : > { %v7114_v20 = vadd.f32 %v16465_v62, %v14142_v57  ;;  %v7108_v29 = vpop.f32.mrb[153].mxu0 }
0x1640   : > { %v7109_v50 = vadd.f32 %v14142_v57, %v7108_v29  ;;  %17603 = vmatprep.subr.bf16.mxu0 %v17602_v12 }
0x1641   : > { %17589 = vmatpush3.bf16.xpose.msk.msra.mxu1 %vm19496_vm6, %v17584_v7  ;;  %17605 = vmatpush3.bf16.msra.mxu0 %v17602_v12  ;;  %v21630_v12 = vld [vmem:[%s23795_s30 + $0x28] sm:$0xff] }
0x1642   : > { %v17606_v31 = vpack.c.bf16 %v7114_v20, %v7109_v50  ;;  %v16468_v19 = vpop.f32.mrb[154].mxu0  ;;  %17592 = vmatprep.subr.msk.bf16.mxu1 %vm19496_vm6, %v17590_v49  ;;  %v21637_v20 = vld [vmem:[%s23795_s30 + $0x20] sm:$0xff] }
0x1643   : > { %v7124_v0 = vadd.f32 %v16468_v19, %v14142_v57  ;;  %v7118_v18 = vpop.f32.mrb[155].mxu0 }
0x1644   : > { %v7119_v33 = vadd.f32 %v14142_v57, %v7118_v18  ;;  %17607 = vmatprep.subr.bf16.mxu0 %v17606_v31  ;;  %v21650_v18 = vld [vmem:[%s23795_s30 + $0x38] sm:$0xff] }
0x1645   : > { %17609 = vmatpush3.bf16.msra.mxu0 %v17606_v31 }
0x1646   : > { %v17610_v14 = vpack.c.bf16 %v7124_v0, %v7119_v33  ;;  %v16471_v1 = vpop.f32.mrb[156].mxu0 }
0x1647   : > { %v7134_v6 = vadd.f32 %v16471_v1, %v14142_v57  ;;  %v7128_v10 = vpop.f32.mrb[157].mxu0 }
0x1648   : > { %v7129_v30 = vadd.f32 %v14142_v57, %v7128_v10  ;;  %17611 = vmatprep.subr.bf16.mxu0 %v17610_v14 }
0x1649   : > { %17595 = vmatpush3.bf16.xpose.msk.msra.mxu1 %vm19496_vm6, %v17590_v49  ;;  %17613 = vmatpush3.bf16.msra.mxu0 %v17610_v14  ;;  %v21657_v14 = vld [vmem:[%s23795_s30 + $0x30] sm:$0xff] }
0x164a   : > { %v17614_v42 = vpack.c.bf16 %v7134_v6, %v7129_v30  ;;  %v16474_v24 = vpop.f32.mrb[158].mxu0  ;;  %17598 = vmatprep.subr.msk.bf16.mxu1 %vm19496_vm6, %v17596_v44 }
0x164b   : > { %v7144_v38 = vadd.f32 %v16474_v24, %v14142_v57  ;;  %v7138_v7 = vpop.f32.mrb[159].mxu0  ;;  %v21670_v24 = vld [vmem:[%s23795_s30 + $0x48] sm:$0xff] }
0x164c   : > { %v7139_v25 = vadd.f32 %v14142_v57, %v7138_v7  ;;  %17615 = vmatprep.subr.bf16.mxu0 %v17614_v42  ;;  %v21677_v7 = vld [vmem:[%s23795_s30 + $0x40] sm:$0xff] }
0x164d   : > { %17617 = vmatpush3.bf16.msra.mxu0 %v17614_v42 }
0x164e   : > { %v17618_v48 = vpack.c.bf16 %v7144_v38, %v7139_v25  ;;  %v16477_v55 = vpop.f32.mrb[160].mxu0 }
0x164f   : > { %v7154_v53 = vadd.f32 %v16477_v55, %v14142_v57  ;;  %v7148_v4 = vpop.f32.mrb[161].mxu0 }
0x1650   : > { %v7149_v49 = vadd.f32 %v14142_v57, %v7148_v4  ;;  %17619 = vmatprep.subr.bf16.mxu0 %v17618_v48  ;;  %v21617_v57 = vld [vmem:[%s23795_s30 + $0x10] sm:$0xff] }
0x1651   : > { %17601 = vmatpush3.bf16.xpose.msk.msra.mxu1 %vm19496_vm6, %v17596_v44  ;;  %17621 = vmatpush3.bf16.msra.mxu0 %v17618_v48 }
0x1652   : > { %v17622_v36 = vpack.c.bf16 %v7154_v53, %v7149_v49  ;;  %16582 = vmatprep.subr.msk.mxu1 %vm1447_vm4, %v14209_v45 }
0x1654   : > { %17623 = vmatprep.subr.bf16.mxu0 %v17622_v36 }
0x1655   : > { %17625 = vmatpush3.bf16.msra.mxu0 %v17622_v36  ;;  %v21697_v36 = vld [vmem:[%s23795_s30 + $0x50] sm:$0xff] }
0x1658   : > { %16503 = vmatmul.mubr.msk.f32.vlgmr.msra.gmra.mrb[162].mxu1 %vm1888_vm5, %v6828_v15 }
0x1659   : > { %16505 = vmatprep.mubr.msk.f32.mxu1 %vm1888_vm5, %v6833_v26  ;;  %16583 = vmatpush3.xpose.msk.msra.mxu1 %vm1447_vm4, %v14209_v45  ;;  %v21690_v45 = vld [vmem:[%s23795_s30 + $0x58] sm:$0xff] }
0x165c   : > { %16506 = vmatmul.mubr.msk.f32.gmra.mrb[164].mxu1 %vm1888_vm5, %v6838_v3 }
0x165d   : > { %16508 = vmatprep.mubr.msk.f32.mxu1 %vm1888_vm5, %v6843_v51 }
0x1660   : > { %16509 = vmatmul.mubr.msk.f32.gmra.mrb[166].mxu1 %vm1888_vm5, %v6848_v8 }
0x1661   : > { %16511 = vmatprep.mubr.msk.f32.mxu1 %vm1888_vm5, %v6853_v21  ;;  %v14211_v21 = vld [vmem:[%s23662_s12 + $0x11] ss:$0 sm:$0xff] }
0x1664   : > { %16512 = vmatmul.mubr.msk.f32.gmra.mrb[168].mxu1 %vm1888_vm5, %v6858_v27 }
0x1665   : > { %16514 = vmatprep.mubr.msk.f32.mxu1 %vm1888_vm5, %v6863_v40 }
0x1668   : > { %16515 = vmatmul.mubr.msk.f32.gmra.mrb[170].mxu1 %vm1888_vm5, %v21505_v59 }
0x1669   : > { %16517 = vmatprep.mubr.msk.f32.mxu1 %vm1888_vm5, %v21513_v58 }
0x166c   : > { %16518 = vmatmul.mubr.msk.f32.gmra.mrb[172].mxu1 %vm1888_vm5, %v21510_v54  ;;  %v21610_v54 = vld [vmem:[%s23795_s30 + $0x18] sm:$0xff] }
0x166d   : > { %16584 = vmatprep.mubr.msk.f32.mxu1 %vm1447_vm4, %v21342_v32 }
0x1670   : > { %16585 = vmatmul.mubr.msk.f32.vlgmr.msra.gmra.mrb[174].mxu1 %vm1447_vm4, %v21346_v46 }
0x1671   : > { %16587 = vmatprep.mubr.msk.f32.mxu1 %vm1447_vm4, %v21360_v16 }
0x1674   : > { %16588 = vmatmul.mubr.msk.f32.gmra.mrb[176].mxu1 %vm1447_vm4, %v21366_v5 }
0x1675   : > { %16590 = vmatprep.mubr.msk.f32.mxu1 %vm1447_vm4, %v21380_v35 }
0x1678   : > { %16591 = vmatmul.mubr.msk.f32.gmra.mrb[178].mxu1 %vm1447_vm4, %v21384_v52 }
0x1679   : > { %16593 = vmatprep.mubr.msk.f32.mxu1 %vm1447_vm4, %v21398_v56 }
0x167c   : > { %16594 = vmatmul.mubr.msk.f32.gmra.mrb[180].mxu1 %vm1447_vm4, %v21402_v22 }
0x167d   : > { %16596 = vmatprep.mubr.msk.f32.mxu1 %vm1447_vm4, %v21416_v47 }
0x1680   : > { %16597 = vmatmul.mubr.msk.f32.gmra.mrb[182].mxu1 %vm1447_vm4, %v21420_v61 }
0x1681   : > { %16599 = vmatprep.mubr.msk.f32.mxu1 %vm1447_vm4, %v21433_v63 }
0x1684   : > { %16600 = vmatmul.mubr.msk.f32.gmra.mrb[184].mxu1 %vm1447_vm4, %v21436_v41 }
0x172b   : > { %v16504_v34 = vpop.f32.mrb[162].mxu1 }
0x172c   : > { %v21602_v60 = vadd.f32 %v16504_v34, %v21594_v39  ;;  %v7295_v59 = vpop.f32.mrb[163].mxu1 }
0x172d   : > { %v21605_v43 = vadd.f32 %v7295_v59, %v21599_v9 }
0x172e   : > { %v7357_v58 = vsel %vm2086_vm7, %v21602_v60, -inf }
0x172f   : > { %7358 = vmax.xlane.f32.xlu1 %v7357_v58  ;;  %v16507_v44 = vpop.f32.mrb[164].mxu1  ;;  %v7354_v17 = vsel %vm2086_vm7, %v21605_v43, -inf }
0x1730   : > { %v21622_v11 = vadd.f32 %v16507_v44, %v21610_v54  ;;  %v7305_v28 = vpop.f32.mrb[165].mxu1  ;;  %7355 = vmax.xlane.f32.xlu0 %v7354_v17 }
0x1731   : > { %v21625_v37 = vadd.f32 %v7305_v28, %v21617_v57 }
0x1732   : > { %v7363_v62 = vsel %vm2086_vm7, %v21622_v11, -inf }
0x1733   : > { %7364 = vmax.xlane.f32.xlu1 %v7363_v62  ;;  %v16510_v29 = vpop.f32.mrb[166].mxu1  ;;  %v7360_v50 = vsel %vm2086_vm7, %v21625_v37, -inf }
0x1734   : > { %v21642_v31 = vadd.f32 %v16510_v29, %v21630_v12  ;;  %v7315_v19 = vpop.f32.mrb[167].mxu1  ;;  %7361 = vmax.xlane.f32.xlu0 %v7360_v50 }
0x1735   : > { %v21645_v0 = vadd.f32 %v7315_v19, %v21637_v20 }
0x1736   : > { %v7369_v33 = vsel %vm2086_vm7, %v21642_v31, -inf }
0x1737   : > { %7370 = vmax.xlane.f32.xlu1 %v7369_v33  ;;  %v16513_v1 = vpop.f32.mrb[168].mxu1  ;;  %v7366_v6 = vsel %vm2086_vm7, %v21645_v0, -inf }
0x1738   : > { %v21662_v10 = vadd.f32 %v16513_v1, %v21650_v18  ;;  %v7325_v30 = vpop.f32.mrb[169].mxu1  ;;  %7367 = vmax.xlane.f32.xlu0 %v7366_v6 }
0x1739   : > { %v21665_v42 = vadd.f32 %v7325_v30, %v21657_v14 }
0x173a   : > { %v7375_v38 = vsel %vm2086_vm7, %v21662_v10, -inf }
0x173b   : > { %7376 = vmax.xlane.f32.xlu1 %v7375_v38  ;;  %v16516_v25 = vpop.f32.mrb[170].mxu1  ;;  %v7372_v48 = vsel %vm2086_vm7, %v21665_v42, -inf }
0x173c   : > { %v21682_v55 = vadd.f32 %v16516_v25, %v21670_v24  ;;  %v7335_v53 = vpop.f32.mrb[171].mxu1  ;;  %7373 = vmax.xlane.f32.xlu0 %v7372_v48 }
0x173d   : > { %v21685_v4 = vadd.f32 %v7335_v53, %v21677_v7 }
0x173e   : > { %v7381_v49 = vsel %vm2086_vm7, %v21682_v55, -inf }
0x173f   : > { %7382 = vmax.xlane.f32.xlu1 %v7381_v49  ;;  %v16519_v15 = vpop.f32.mrb[172].mxu1  ;;  %v7378_v26 = vsel %vm2086_vm7, %v21685_v4, -inf }
0x1740   : > { %v21702_v3 = vadd.f32 %v16519_v15, %v21690_v45  ;;  %7379 = vmax.xlane.f32.xlu0 %v7378_v26  ;;  %v7345_v51 = vpop.f32.mrb[173].mxu1 }
0x1741   : > { %v21705_v8 = vadd.f32 %v7345_v51, %v21697_v36 }
0x1742   : > { %v7387_v27 = vsel %vm2086_vm7, %v21702_v3, -inf }
0x1743   : > { %7388 = vmax.xlane.f32.xlu1 %v7387_v27  ;;  %v16586_v40 = vpop.f32.mrb[174].mxu1  ;;  %v7384_v34 = vsel %vm2086_vm7, %v21705_v8, -inf }
0x1744   : > { %v7872_v59 = vadd.f32 %v16586_v40, %v14211_v21  ;;  %v7866_v58 = vpop.f32.mrb[175].mxu1  ;;  %7385 = vmax.xlane.f32.xlu0 %v7384_v34 }
0x1745   : > { %v7867_v44 = vadd.f32 %v14211_v21, %v7866_v58 }
0x1747   : > { %v17626_v17 = vpack.c.bf16 %v7872_v59, %v7867_v44  ;;  %v16589_v28 = vpop.f32.mrb[176].mxu1 }
0x1748   : > { %v7882_v62 = vadd.f32 %v16589_v28, %v14211_v21  ;;  %v7876_v29 = vpop.f32.mrb[177].mxu1 }
0x1749   : > { %v7877_v50 = vadd.f32 %v14211_v21, %v7876_v29  ;;  %17628 = vmatprep.subr.msk.bf16.mxu1 %vm19496_vm6, %v17626_v17 }
0x174a   : > { %17631 = vmatpush3.bf16.xpose.msk.msra.mxu1 %vm19496_vm6, %v17626_v17 }
0x174b   : > { %v17632_v19 = vpack.c.bf16 %v7882_v62, %v7877_v50  ;;  %v16592_v33 = vpop.f32.mrb[178].mxu1 }
0x174c   : > { %v7892_v1 = vadd.f32 %v16592_v33, %v14211_v21  ;;  %v7886_v6 = vpop.f32.mrb[179].mxu1 }
0x174d   : > { %v7887_v30 = vadd.f32 %v14211_v21, %v7886_v6  ;;  %17634 = vmatprep.subr.msk.bf16.mxu1 %vm19496_vm6, %v17632_v19 }
0x174f   : > { %v17638_v38 = vpack.c.bf16 %v7892_v1, %v7887_v30  ;;  %v16595_v25 = vpop.f32.mrb[180].mxu1 }
0x1750   : > { %v7902_v48 = vadd.f32 %v16595_v25, %v14211_v21  ;;  %v7896_v53 = vpop.f32.mrb[181].mxu1 }
0x1751   : > { %v7897_v49 = vadd.f32 %v14211_v21, %v7896_v53 }
0x1752   : > { %17637 = vmatpush3.bf16.xpose.msk.msra.mxu1 %vm19496_vm6, %v17632_v19 }
0x1753   : > { %v17644_v15 = vpack.c.bf16 %v7902_v48, %v7897_v49  ;;  %v16598_v26 = vpop.f32.mrb[182].mxu1  ;;  %17640 = vmatprep.subr.msk.bf16.mxu1 %vm19496_vm6, %v17638_v38 }
0x1754   : > { %v7912_v51 = vadd.f32 %v16598_v26, %v14211_v21  ;;  %v7906_v27 = vpop.f32.mrb[183].mxu1 }
0x1755   : > { %v7907_v40 = vadd.f32 %v14211_v21, %v7906_v27 }
0x1757   : > { %v17650_v34 = vpack.c.bf16 %v7912_v51, %v7907_v40  ;;  %v16601_v59 = vpop.f32.mrb[184].mxu1 }
0x1758   : > { %v7922_v58 = vadd.f32 %v16601_v59, %v14211_v21  ;;  %v7916_v44 = vpop.f32.mrb[185].mxu1 }
0x1759   : > { %v7917_v17 = vadd.f32 %v14211_v21, %v7916_v44 }
0x175a   : > { %17643 = vmatpush3.bf16.xpose.msk.msra.mxu1 %vm19496_vm6, %v17638_v38 }
0x175b   : > { %v17656_v28 = vpack.c.bf16 %v7922_v58, %v7917_v17  ;;  %17646 = vmatprep.subr.msk.bf16.mxu1 %vm19496_vm6, %v17644_v15 }
0x1762   : > { %17649 = vmatpush3.bf16.xpose.msk.msra.mxu1 %vm19496_vm6, %v17644_v15 }
0x1763   : > { %17652 = vmatprep.subr.msk.bf16.mxu1 %vm19496_vm6, %v17650_v34 }
0x176a   : > { %17655 = vmatpush3.bf16.xpose.msk.msra.mxu1 %vm19496_vm6, %v17650_v34 }
0x176b   : > { %17658 = vmatprep.subr.msk.bf16.mxu1 %vm19496_vm6, %v17656_v28 }
0x1772   : > { %17661 = vmatpush3.bf16.xpose.msk.msra.mxu1 %vm19496_vm6, %v17656_v28 }
0x17bc   : > { %v7359_v21 = vpop.xlane.xlu1 %7358 }
0x17bd   : > { %v7391_v62 = vsub.f32 %v21602_v60, %v7359_v21  ;;  %v7356_v29 = vpop.xlane.xlu0 %7355 }
0x17be   : > { %v7390_v50 = vsub.f32 %v21605_v43, %v7356_v29 }
0x17bf   : > { %v7404_v19 = vmul.f32 1.442695, %v7391_v62 }
0x17c0   : > { %v7402_v33 = vmul.f32 1.442695, %v7390_v50  ;;  %v7365_v1 = vpop.xlane.xlu1 %7364 }
0x17c1   : > { %18372 = vpow2.f32 %v7404_v19  ;;  %v7393_v6 = vsub.f32 %v21622_v11, %v7365_v1  ;;  %v7362_v30 = vpop.xlane.xlu0 %7361 }
0x17c2   : > { %18374 = vpow2.f32 %v7402_v33  ;;  %v7392_v38 = vsub.f32 %v21625_v37, %v7362_v30 }
0x17c3   : > { %v7408_v25 = vmul.f32 1.442695, %v7393_v6 }
0x17c4   : > { %v7406_v48 = vmul.f32 1.442695, %v7392_v38  ;;  %v7371_v53 = vpop.xlane.xlu1 %7370 }
0x17c5   : > { %18376 = vpow2.f32 %v7408_v25  ;;  %v7395_v49 = vsub.f32 %v21642_v31, %v7371_v53  ;;  %v7368_v60 = vpop.xlane.xlu0 %7367 }
0x17c6   : > { %18378 = vpow2.f32 %v7406_v48  ;;  %v7394_v43 = vsub.f32 %v21645_v0, %v7368_v60 }
0x17c7   : > { %v7412_v15 = vmul.f32 1.442695, %v7395_v49 }
0x17c8   : > { %v7410_v26 = vmul.f32 1.442695, %v7394_v43  ;;  %v7377_v51 = vpop.xlane.xlu1 %7376 }
0x17c9   : > { %18380 = vpow2.f32 %v7412_v15  ;;  %v7397_v11 = vsub.f32 %v21662_v10, %v7377_v51  ;;  %v7374_v27 = vpop.xlane.xlu0 %7373 }
0x17ca   : > { %18382 = vpow2.f32 %v7410_v26  ;;  %v7396_v37 = vsub.f32 %v21665_v42, %v7374_v27 }
0x17cb   : > { %v21746_v40 = vpop.eup %18372  ;;  %v7416_v34 = vmul.f32 1.442695, %v7397_v11 }
0x17cc   : > { %v21748_v59 = vpop.eup %18374  ;;  %v7414_v31 = vmul.f32 1.442695, %v7396_v37  ;;  %v7383_v58 = vpop.xlane.xlu1 %7382  ;;  %v7429_v0 = vsel %vm2086_vm7, %v21746_v40, 0.0 }
0x17cd   : > { %18384 = vpow2.f32 %v7416_v34  ;;  %v7399_v44 = vsub.f32 %v21682_v55, %v7383_v58  ;;  %v7380_v17 = vpop.xlane.xlu0 %7379  ;;  %7430 = vadd.xlane.f32.xlu1 %v7429_v0  ;;  %v7426_v10 = vsel %vm2086_vm7, %v21748_v59, 0.0 }
0x17ce   : > { %18386 = vpow2.f32 %v7414_v31  ;;  %v7398_v42 = vsub.f32 %v21685_v4, %v7380_v17  ;;  %7427 = vadd.xlane.f32.xlu0 %v7426_v10  ;;  %v14193_v31 = vld [vmem:[%s23661_s11 + $0x68] sm:$0xff] }
0x17cf   : > { %v21756_v28 = vpop.eup %18376  ;;  %v7420_v21 = vmul.f32 1.442695, %v7399_v44  ;;  %16562 = vmatprep.subr.msk.mxu0 %vm1447_vm4, %v14193_v31 }
0x17d0   : > { %v21758_v62 = vpop.eup %18378  ;;  %v7418_v29 = vmul.f32 1.442695, %v7398_v42  ;;  %v7389_v50 = vpop.xlane.xlu1 %7388  ;;  %v7435_v19 = vsel %vm2086_vm7, %v21756_v28, 0.0 }
0x17d1   : > { %18388 = vpow2.f32 %v7420_v21  ;;  %v7401_v55 = vsub.f32 %v21702_v3, %v7389_v50  ;;  %7436 = vadd.xlane.f32.xlu1 %v7435_v19  ;;  %v7386_v33 = vpop.xlane.xlu0 %7385  ;;  %v7432_v1 = vsel %vm2086_vm7, %v21758_v62, 0.0 }
0x17d2   : > { %18390 = vpow2.f32 %v7418_v29  ;;  %v7400_v4 = vsub.f32 %v21705_v8, %v7386_v33  ;;  %7433 = vadd.xlane.f32.xlu0 %v7432_v1 }
0x17d3   : > { %v21766_v6 = vpop.eup %18380  ;;  %v7424_v30 = vmul.f32 1.442695, %v7401_v55 }
0x17d4   : > { %v21768_v38 = vpop.eup %18382  ;;  %v7422_v25 = vmul.f32 1.442695, %v7400_v4  ;;  %v7441_v48 = vsel %vm2086_vm7, %v21766_v6, 0.0  ;;  %v14225_v4 = vld [vmem:[%s23661_s11 + $0xa8] sm:$0xff] }
0x17d5   : > { %18392 = vpow2.f32 %v7424_v30  ;;  %7442 = vadd.xlane.f32.xlu1 %v7441_v48  ;;  %v7438_v3 = vsel %vm2086_vm7, %v21768_v38, 0.0 }
0x17d6   : > { %18394 = vpow2.f32 %v7422_v25  ;;  %7439 = vadd.xlane.f32.xlu0 %v7438_v3 }
0x17d7   : > { %v21774_v53 = vpop.eup %18384 }
0x17d8   : > { %v21776_v8 = vpop.eup %18386  ;;  %v7447_v49 = vsel %vm2086_vm7, %v21774_v53, 0.0 }
0x17d9   : > { %7448 = vadd.xlane.f32.xlu1 %v7447_v49  ;;  %v7444_v60 = vsel %vm2086_vm7, %v21776_v8, 0.0 }
0x17da   : > { %7445 = vadd.xlane.f32.xlu0 %v7444_v60 }
0x17db   : > { %v21782_v43 = vpop.eup %18388 }
0x17dc   : > { %v21784_v15 = vpop.eup %18390  ;;  %v7453_v26 = vsel %vm2086_vm7, %v21782_v43, 0.0 }
0x17dd   : > { %7454 = vadd.xlane.f32.xlu1 %v7453_v26  ;;  %v7450_v51 = vsel %vm2086_vm7, %v21784_v15, 0.0 }
0x17de   : > { %7451 = vadd.xlane.f32.xlu0 %v7450_v51 }
0x17df   : > { %v21790_v11 = vpop.eup %18392 }
0x17e0   : > { %v21792_v27 = vpop.eup %18394  ;;  %v7459_v37 = vsel %vm2086_vm7, %v21790_v11, 0.0 }
0x17e1   : > { %7460 = vadd.xlane.f32.xlu1 %v7459_v37  ;;  %v7456_v34 = vsel %vm2086_vm7, %v21792_v27, 0.0 }
0x17e2   : > { %7457 = vadd.xlane.f32.xlu0 %v7456_v34 }
0x185a   : > { %v7431_v58 = vpop.xlane.xlu1 %7430 }
0x185b   : > { %18396 = vrcp.f32 %v7431_v58  ;;  %v7428_v0 = vpop.xlane.xlu0 %7427 }
0x185c   : > { %18398 = vrcp.f32 %v7428_v0 }
0x185e   : > { %v7437_v44 = vpop.xlane.xlu1 %7436 }
0x185f   : > { %18400 = vrcp.f32 %v7437_v44  ;;  %v7434_v17 = vpop.xlane.xlu0 %7433 }
0x1860   : > { %18402 = vrcp.f32 %v7434_v17 }
0x1862   : > { %v7443_v10 = vpop.xlane.xlu1 %7442 }
0x1863   : > { %18404 = vrcp.f32 %v7443_v10  ;;  %v7440_v42 = vpop.xlane.xlu0 %7439 }
0x1864   : > { %18406 = vrcp.f32 %v7440_v42 }
0x1865   : > { %v18397_v21 = vpop.eup %18396 }
0x1866   : > { %v18399_v29 = vpop.eup %18398  ;;  %v7449_v50 = vpop.xlane.xlu1 %7448  ;;  %v7465_v33 = vmul.f32 %v18397_v21, %v21746_v40 }
0x1867   : > { %18408 = vrcp.f32 %v7449_v50  ;;  %v7446_v19 = vpop.xlane.xlu0 %7445  ;;  %v7463_v55 = vmul.f32 %v18399_v29, %v21748_v59 }
0x1868   : > { %18410 = vrcp.f32 %v7446_v19 }
0x1869   : > { %v18401_v1 = vpop.eup %18400  ;;  %16544 = vmatprep.mubr.msk.f32.mxu0 %vm2086_vm7, %v7463_v55 }
0x186a   : > { %v18403_v30 = vpop.eup %18402  ;;  %v7455_v25 = vpop.xlane.xlu1 %7454  ;;  %16545 = vmatmul.mubr.msk.f32.vlgmr.msra.gmra.mrb[162].mxu0 %vm2086_vm7, %v7465_v33  ;;  %v7469_v40 = vmul.f32 %v18401_v1, %v21756_v28 }
0x186b   : > { %18412 = vrcp.f32 %v7455_v25  ;;  %v7452_v48 = vpop.xlane.xlu0 %7451  ;;  %v7467_v3 = vmul.f32 %v18403_v30, %v21758_v62  ;;  %16563 = vmatpush3.xpose.msk.msra.mxu0 %vm1447_vm4, %v14193_v31 }
0x186c   : > { %18414 = vrcp.f32 %v7452_v48  ;;  %16602 = vmatprep.subr.msk.mxu0 %vm1447_vm4, %v14225_v4 }
0x186d   : > { %v18405_v59 = vpop.eup %18404  ;;  %16547 = vmatprep.mubr.msk.f32.mxu0 %vm2086_vm7, %v7467_v3 }
0x186e   : > { %v18407_v49 = vpop.eup %18406  ;;  %v7461_v60 = vpop.xlane.xlu1 %7460  ;;  %16548 = vmatmul.mubr.msk.f32.gmra.mrb[164].mxu0 %vm2086_vm7, %v7469_v40  ;;  %v7473_v62 = vmul.f32 %v18405_v59, %v21766_v6  ;;  %v14318_v59 = vld [vmem:[%s23661_s11 + $0x90] sm:$0xff] }
0x186f   : > { %18416 = vrcp.f32 %v7461_v60  ;;  %v7458_v26 = vpop.xlane.xlu0 %7457  ;;  %v7471_v51 = vmul.f32 %v18407_v49, %v21768_v38 }
0x1870   : > { %18418 = vrcp.f32 %v7458_v26 }
0x1871   : > { %v18409_v37 = vpop.eup %18408  ;;  %16550 = vmatprep.mubr.msk.f32.mxu0 %vm2086_vm7, %v7471_v51 }
0x1872   : > { %v18411_v28 = vpop.eup %18410  ;;  %16551 = vmatmul.mubr.msk.f32.gmra.mrb[166].mxu0 %vm2086_vm7, %v7473_v62  ;;  %v7477_v31 = vmul.f32 %v18409_v37, %v21774_v53 }
0x1873   : > { %v7475_v34 = vmul.f32 %v18411_v28, %v21776_v8 }
0x1875   : > { %v18413_v58 = vpop.eup %18412  ;;  %16553 = vmatprep.mubr.msk.f32.mxu0 %vm2086_vm7, %v7475_v34 }
0x1876   : > { %v18415_v0 = vpop.eup %18414  ;;  %16554 = vmatmul.mubr.msk.f32.gmra.mrb[168].mxu0 %vm2086_vm7, %v7477_v31  ;;  %v7481_v6 = vmul.f32 %v18413_v58, %v21782_v43  ;;  %v14302_v43 = vld [vmem:[%s23661_s11 + $0x70] sm:$0xff] }
0x1877   : > { %v7479_v38 = vmul.f32 %v18415_v0, %v21784_v15  ;;  %16746 = vmatprep.subr.msk.mxu1 %vm1447_vm4, %v14302_v43 }
0x1879   : > { %v18417_v44 = vpop.eup %18416  ;;  %16556 = vmatprep.mubr.msk.f32.mxu0 %vm2086_vm7, %v7479_v38 }
0x187a   : > { %v18419_v17 = vpop.eup %18418  ;;  %16557 = vmatmul.mubr.msk.f32.gmra.mrb[170].mxu0 %vm2086_vm7, %v7481_v6  ;;  %v7485_v53 = vmul.f32 %v18417_v44, %v21790_v11 }
0x187b   : > { %v7483_v8 = vmul.f32 %v18419_v17, %v21792_v27 }
0x187d   : > { %16559 = vmatprep.mubr.msk.f32.mxu0 %vm2086_vm7, %v7483_v8 }
0x187e   : > { %16560 = vmatmul.mubr.msk.f32.gmra.mrb[172].mxu0 %vm2086_vm7, %v7485_v53 }
0x187f   : > { %16564 = vmatprep.mubr.msk.f32.mxu0 %vm1447_vm4, %v21342_v32 }
0x1882   : > { %16565 = vmatmul.mubr.msk.f32.vlgmr.msra.gmra.mrb[174].mxu0 %vm1447_vm4, %v21346_v46 }
0x1883   : > { %16567 = vmatprep.mubr.msk.f32.mxu0 %vm1447_vm4, %v21360_v16  ;;  %16603 = vmatpush3.xpose.msk.msra.mxu0 %vm1447_vm4, %v14225_v4  ;;  %v14195_v4 = vld [vmem:[%s23662_s12 + $0xd] ss:$0 sm:$0xff] }
0x1886   : > { %16568 = vmatmul.mubr.msk.f32.gmra.mrb[176].mxu0 %vm1447_vm4, %v21366_v5 }
0x1887   : > { %16570 = vmatprep.mubr.msk.f32.mxu0 %vm1447_vm4, %v21380_v35 }
0x188a   : > { %16571 = vmatmul.mubr.msk.f32.gmra.mrb[178].mxu0 %vm1447_vm4, %v21384_v52 }
0x188b   : > { %16573 = vmatprep.mubr.msk.f32.mxu0 %vm1447_vm4, %v21398_v56 }
0x188e   : > { %16574 = vmatmul.mubr.msk.f32.gmra.mrb[180].mxu0 %vm1447_vm4, %v21402_v22 }
0x188f   : > { %16576 = vmatprep.mubr.msk.f32.mxu0 %vm1447_vm4, %v21416_v47 }
0x1892   : > { %16577 = vmatmul.mubr.msk.f32.gmra.mrb[182].mxu0 %vm1447_vm4, %v21420_v61 }
0x1893   : > { %16579 = vmatprep.mubr.msk.f32.mxu0 %vm1447_vm4, %v21433_v63 }
0x1896   : > { %16580 = vmatmul.mubr.msk.f32.gmra.mrb[184].mxu0 %vm1447_vm4, %v21436_v41 }
0x1897   : > { %16604 = vmatprep.mubr.msk.f32.mxu0 %vm1447_vm4, %v21342_v32 }
0x189a   : > { %16605 = vmatmul.mubr.msk.f32.vlgmr.msra.gmra.mrb[186].mxu0 %vm1447_vm4, %v21346_v46 }
0x189b   : > { %16607 = vmatprep.mubr.msk.f32.mxu0 %vm1447_vm4, %v21360_v16 }
0x189e   : > { %16608 = vmatmul.mubr.msk.f32.gmra.mrb[188].mxu0 %vm1447_vm4, %v21366_v5 }
0x189f   : > { %16610 = vmatprep.mubr.msk.f32.mxu0 %vm1447_vm4, %v21380_v35 }
0x18a2   : > { %16611 = vmatmul.mubr.msk.f32.gmra.mrb[190].mxu0 %vm1447_vm4, %v21384_v52 }
0x18a3   : > { %16613 = vmatprep.mubr.msk.f32.mxu0 %vm1447_vm4, %v21398_v56 }
0x18a6   : > { %16614 = vmatmul.mubr.msk.f32.gmra.mrb[192].mxu0 %vm1447_vm4, %v21402_v22 }
0x18a7   : > { %16616 = vmatprep.mubr.msk.f32.mxu0 %vm1447_vm4, %v21416_v47 }
0x18aa   : > { %16617 = vmatmul.mubr.msk.f32.gmra.mrb[194].mxu0 %vm1447_vm4, %v21420_v61 }
0x18ab   : > { %16619 = vmatprep.mubr.msk.f32.mxu0 %vm1447_vm4, %v21433_v63 }
0x18ae   : > { %16620 = vmatmul.mubr.msk.f32.gmra.mrb[196].mxu0 %vm1447_vm4, %v21436_v41 }
0x193d   : > { %v21884_v15 = vpop.f32.mrb[162].mxu0 }
0x193e   : > { %v21886_v11 = vpop.f32.mrb[163].mxu0 }
0x1941   : > { %v21888_v27 = vpop.f32.mrb[164].mxu0 }
0x1942   : > { %v21890_v10 = vpop.f32.mrb[165].mxu0 }
0x1945   : > { %v21892_v42 = vpop.f32.mrb[166].mxu0 }
0x1946   : > { %v21894_v21 = vpop.f32.mrb[167].mxu0 }
0x1949   : > { %v21896_v29 = vpop.f32.mrb[168].mxu0 }
0x194a   : > { %v21898_v50 = vpop.f32.mrb[169].mxu0 }
0x194d   : > { %v21900_v19 = vpop.f32.mrb[170].mxu0 }
0x194e   : > { %v21902_v55 = vpop.f32.mrb[171].mxu0 }
0x1951   : > { %v21904_v33 = vpop.f32.mrb[172].mxu0 }
0x1952   : > { %23796 = vst [vmem:[#allocation30_spill] sm:$0xff] %v21904_v33  ;;  %v21906_v1 = vpop.f32.mrb[173].mxu0 }
0x1953   : > { %23797 = vst [vmem:[#allocation32_spill] sm:$0xff] %v21906_v1 }
0x1955   : > { %v16566_v30 = vpop.f32.mrb[174].mxu0 }
0x1956   : > { %v7728_v25 = vpop.f32.mrb[175].mxu0  ;;  %v7734_v3 = vadd.f32 %v16566_v30, %v14195_v4  ;;  %v14227_v30 = vld [vmem:[%s23662_s12 + $0x15] ss:$0 sm:$0xff] }
0x1957   : > { %v7729_v48 = vadd.f32 %v14195_v4, %v7728_v25 }
0x1959   : > { %v16569_v40 = vpop.f32.mrb[176].mxu0  ;;  %16646 = vmatprep.mubr.msk.f32.mxu1 %vm1888_vm5, %v7729_v48 }
0x195a   : > { %v7738_v49 = vpop.f32.mrb[177].mxu0  ;;  %16647 = vmatmul.mubr.msk.f32.vlgmr.msra.gmra.mrb[186].mxu1 %vm1888_vm5, %v7734_v3  ;;  %v7744_v26 = vadd.f32 %v16569_v40, %v14195_v4 }
0x195b   : > { %v7739_v60 = vadd.f32 %v14195_v4, %v7738_v49  ;;  %16747 = vmatpush3.xpose.msk.msra.mxu1 %vm1447_vm4, %v14302_v43 }
0x195c   : > { %16766 = vmatprep.subr.msk.mxu1 %vm1447_vm4, %v14318_v59 }
0x195d   : > { %v16572_v51 = vpop.f32.mrb[178].mxu0  ;;  %16649 = vmatprep.mubr.msk.f32.mxu1 %vm1888_vm5, %v7739_v60 }
0x195e   : > { %v7748_v62 = vpop.f32.mrb[179].mxu0  ;;  %16650 = vmatmul.mubr.msk.f32.gmra.mrb[188].mxu1 %vm1888_vm5, %v7744_v26  ;;  %v7754_v28 = vadd.f32 %v16572_v51, %v14195_v4 }
0x195f   : > { %v7749_v37 = vadd.f32 %v14195_v4, %v7748_v62 }
0x1961   : > { %v16575_v34 = vpop.f32.mrb[180].mxu0  ;;  %16652 = vmatprep.mubr.msk.f32.mxu1 %vm1888_vm5, %v7749_v37 }
0x1962   : > { %v7758_v31 = vpop.f32.mrb[181].mxu0  ;;  %16653 = vmatmul.mubr.msk.f32.gmra.mrb[190].mxu1 %vm1888_vm5, %v7754_v28  ;;  %v7764_v0 = vadd.f32 %v16575_v34, %v14195_v4 }
0x1963   : > { %v7759_v58 = vadd.f32 %v14195_v4, %v7758_v31 }
0x1965   : > { %v16578_v38 = vpop.f32.mrb[182].mxu0  ;;  %16655 = vmatprep.mubr.msk.f32.mxu1 %vm1888_vm5, %v7759_v58 }
0x1966   : > { %v7768_v6 = vpop.f32.mrb[183].mxu0  ;;  %16656 = vmatmul.mubr.msk.f32.gmra.mrb[192].mxu1 %vm1888_vm5, %v7764_v0  ;;  %v7774_v17 = vadd.f32 %v16578_v38, %v14195_v4 }
0x1967   : > { %v7769_v44 = vadd.f32 %v14195_v4, %v7768_v6 }
0x1969   : > { %v16581_v8 = vpop.f32.mrb[184].mxu0  ;;  %16658 = vmatprep.mubr.msk.f32.mxu1 %vm1888_vm5, %v7769_v44 }
0x196a   : > { %v7778_v53 = vpop.f32.mrb[185].mxu0  ;;  %16659 = vmatmul.mubr.msk.f32.gmra.mrb[194].mxu1 %vm1888_vm5, %v7774_v17  ;;  %v7784_v25 = vadd.f32 %v16581_v8, %v14195_v4 }
0x196b   : > { %v7779_v43 = vadd.f32 %v14195_v4, %v7778_v53 }
0x196d   : > { %v16606_v48 = vpop.f32.mrb[186].mxu0  ;;  %16661 = vmatprep.mubr.msk.f32.mxu1 %vm1888_vm5, %v7779_v43 }
0x196e   : > { %v8010_v3 = vadd.f32 %v16606_v48, %v14227_v30  ;;  %v8004_v40 = vpop.f32.mrb[187].mxu0  ;;  %16662 = vmatmul.mubr.msk.f32.gmra.mrb[196].mxu1 %vm1888_vm5, %v7784_v25 }
0x196f   : > { %v8005_v49 = vadd.f32 %v14227_v30, %v8004_v40  ;;  %16748 = vmatprep.mubr.msk.f32.mxu1 %vm1447_vm4, %v21342_v32 }
0x1971   : > { %v17662_v60 = vpack.c.bf16 %v8010_v3, %v8005_v49  ;;  %v16609_v26 = vpop.f32.mrb[188].mxu0 }
0x1972   : > { %v8020_v51 = vadd.f32 %v16609_v26, %v14227_v30  ;;  %v8014_v62 = vpop.f32.mrb[189].mxu0  ;;  %16749 = vmatmul.mubr.msk.f32.vlgmr.msra.gmra.mrb[198].mxu1 %vm1447_vm4, %v21346_v46 }
0x1973   : > { %v8015_v37 = vadd.f32 %v14227_v30, %v8014_v62  ;;  %17663 = vmatprep.subr.bf16.mxu0 %v17662_v60  ;;  %16751 = vmatprep.mubr.msk.f32.mxu1 %vm1447_vm4, %v21360_v16 }
0x1974   : > { %17665 = vmatpush3.bf16.msra.mxu0 %v17662_v60  ;;  %16767 = vmatpush3.xpose.msk.msra.mxu1 %vm1447_vm4, %v14318_v59 }
0x1975   : > { %v17666_v4 = vpack.c.bf16 %v8020_v51, %v8015_v37  ;;  %v16612_v28 = vpop.f32.mrb[190].mxu0 }
0x1976   : > { %v8030_v34 = vadd.f32 %v16612_v28, %v14227_v30  ;;  %v8024_v31 = vpop.f32.mrb[191].mxu0  ;;  %16752 = vmatmul.mubr.msk.f32.gmra.mrb[200].mxu1 %vm1447_vm4, %v21366_v5 }
0x1977   : > { %v8025_v58 = vadd.f32 %v14227_v30, %v8024_v31  ;;  %17667 = vmatprep.subr.bf16.mxu0 %v17666_v4  ;;  %16754 = vmatprep.mubr.msk.f32.mxu1 %vm1447_vm4, %v21380_v35 }
0x1978   : > { %17669 = vmatpush3.bf16.msra.mxu0 %v17666_v4 }
0x1979   : > { %v17670_v0 = vpack.c.bf16 %v8030_v34, %v8025_v58  ;;  %v16615_v38 = vpop.f32.mrb[192].mxu0 }
0x197a   : > { %v8040_v6 = vadd.f32 %v16615_v38, %v14227_v30  ;;  %v8034_v44 = vpop.f32.mrb[193].mxu0  ;;  %16755 = vmatmul.mubr.msk.f32.gmra.mrb[202].mxu1 %vm1447_vm4, %v21384_v52 }
0x197b   : > { %v8035_v59 = vadd.f32 %v14227_v30, %v8034_v44  ;;  %17671 = vmatprep.subr.bf16.mxu0 %v17670_v0  ;;  %16757 = vmatprep.mubr.msk.f32.mxu1 %vm1447_vm4, %v21398_v56 }
0x197c   : > { %17673 = vmatpush3.bf16.msra.mxu0 %v17670_v0 }
0x197d   : > { %v17674_v17 = vpack.c.bf16 %v8040_v6, %v8035_v59  ;;  %v16618_v8 = vpop.f32.mrb[194].mxu0 }
0x197e   : > { %v8050_v53 = vadd.f32 %v16618_v8, %v14227_v30  ;;  %v8044_v43 = vpop.f32.mrb[195].mxu0  ;;  %16758 = vmatmul.mubr.msk.f32.gmra.mrb[204].mxu1 %vm1447_vm4, %v21402_v22 }
0x197f   : > { %v8045_v25 = vadd.f32 %v14227_v30, %v8044_v43  ;;  %17675 = vmatprep.subr.bf16.mxu0 %v17674_v17  ;;  %16760 = vmatprep.mubr.msk.f32.mxu1 %vm1447_vm4, %v21416_v47 }
0x1980   : > { %17677 = vmatpush3.bf16.msra.mxu0 %v17674_v17 }
0x1981   : > { %v17678_v48 = vpack.c.bf16 %v8050_v53, %v8045_v25  ;;  %v16621_v3 = vpop.f32.mrb[196].mxu0 }
0x1982   : > { %v8060_v40 = vadd.f32 %v16621_v3, %v14227_v30  ;;  %v8054_v49 = vpop.f32.mrb[197].mxu0  ;;  %16761 = vmatmul.mubr.msk.f32.gmra.mrb[206].mxu1 %vm1447_vm4, %v21420_v61 }
0x1983   : > { %v8055_v60 = vadd.f32 %v14227_v30, %v8054_v49  ;;  %17679 = vmatprep.subr.bf16.mxu0 %v17678_v48  ;;  %16763 = vmatprep.mubr.msk.f32.mxu1 %vm1447_vm4, %v21433_v63 }
0x1984   : > { %17681 = vmatpush3.bf16.msra.mxu0 %v17678_v48 }
0x1985   : > { %v17682_v26 = vpack.c.bf16 %v8060_v40, %v8055_v60 }
0x1986   : > { %16764 = vmatmul.mubr.msk.f32.gmra.mrb[208].mxu1 %vm1447_vm4, %v21436_v41 }
0x1987   : > { %17683 = vmatprep.subr.bf16.mxu0 %v17682_v26  ;;  %16768 = vmatprep.mubr.msk.f32.mxu1 %vm1447_vm4, %v21342_v32 }
0x1988   : > { %17685 = vmatpush3.bf16.msra.mxu0 %v17682_v26 }
0x198a   : > { %16769 = vmatmul.mubr.msk.f32.vlgmr.msra.gmra.mrb[210].mxu1 %vm1447_vm4, %v21346_v46 }
0x198b   : > { %16771 = vmatprep.mubr.msk.f32.mxu1 %vm1447_vm4, %v21360_v16 }
0x198e   : > { %16772 = vmatmul.mubr.msk.f32.gmra.mrb[212].mxu1 %vm1447_vm4, %v21366_v5 }
0x198f   : > { %16774 = vmatprep.mubr.msk.f32.mxu1 %vm1447_vm4, %v21380_v35 }
0x1992   : > { %16775 = vmatmul.mubr.msk.f32.gmra.mrb[214].mxu1 %vm1447_vm4, %v21384_v52 }
0x1993   : > { %16777 = vmatprep.mubr.msk.f32.mxu1 %vm1447_vm4, %v21398_v56 }
0x1996   : > { %16778 = vmatmul.mubr.msk.f32.gmra.mrb[216].mxu1 %vm1447_vm4, %v21402_v22 }
0x1997   : > { %16780 = vmatprep.mubr.msk.f32.mxu1 %vm1447_vm4, %v21416_v47 }
0x199a   : > { %16781 = vmatmul.mubr.msk.f32.gmra.mrb[218].mxu1 %vm1447_vm4, %v21420_v61 }
0x199b   : > { %16783 = vmatprep.mubr.msk.f32.mxu1 %vm1447_vm4, %v21433_v63 }
0x199e   : > { %16784 = vmatmul.mubr.msk.f32.gmra.mrb[220].mxu1 %vm1447_vm4, %v21436_v41 }
0x1a2d   : > { %v16648_v30 = vpop.f32.mrb[186].mxu1 }
0x1a2e   : > { %v21981_v51 = vadd.f32 %v16648_v30, %v21594_v39  ;;  %v8201_v62 = vpop.f32.mrb[187].mxu1 }
0x1a2f   : > { %v21984_v37 = vadd.f32 %v8201_v62, %v21599_v9 }
0x1a30   : > { %v8263_v4 = vsel %vm2086_vm7, %v21981_v51, -inf }
0x1a31   : > { %8264 = vmax.xlane.f32.xlu1 %v8263_v4  ;;  %v16651_v28 = vpop.f32.mrb[188].mxu1  ;;  %v8260_v34 = vsel %vm2086_vm7, %v21984_v37, -inf }
0x1a32   : > { %v21991_v31 = vadd.f32 %v16651_v28, %v21610_v54  ;;  %v8211_v58 = vpop.f32.mrb[189].mxu1  ;;  %8261 = vmax.xlane.f32.xlu0 %v8260_v34 }
0x1a33   : > { %v21994_v39 = vadd.f32 %v8211_v58, %v21617_v57 }
0x1a34   : > { %v8269_v9 = vsel %vm2086_vm7, %v21991_v31, -inf }
0x1a35   : > { %8270 = vmax.xlane.f32.xlu1 %v8269_v9  ;;  %v16654_v0 = vpop.f32.mrb[190].mxu1  ;;  %v8266_v38 = vsel %vm2086_vm7, %v21994_v39, -inf }
0x1a36   : > { %v22001_v6 = vadd.f32 %v16654_v0, %v21630_v12  ;;  %v8221_v44 = vpop.f32.mrb[191].mxu1  ;;  %8267 = vmax.xlane.f32.xlu0 %v8266_v38 }
0x1a37   : > { %v22004_v54 = vadd.f32 %v8221_v44, %v21637_v20 }
0x1a38   : > { %v8275_v57 = vsel %vm2086_vm7, %v22001_v6, -inf }
0x1a39   : > { %8276 = vmax.xlane.f32.xlu1 %v8275_v57  ;;  %v16657_v59 = vpop.f32.mrb[192].mxu1  ;;  %v8272_v17 = vsel %vm2086_vm7, %v22004_v54, -inf }
0x1a3a   : > { %v22011_v8 = vadd.f32 %v16657_v59, %v21650_v18  ;;  %v8231_v53 = vpop.f32.mrb[193].mxu1  ;;  %8273 = vmax.xlane.f32.xlu0 %v8272_v17 }
0x1a3b   : > { %v22014_v12 = vadd.f32 %v8231_v53, %v21657_v14 }
0x1a3c   : > { %v8281_v20 = vsel %vm2086_vm7, %v22011_v8, -inf }
0x1a3d   : > { %8282 = vmax.xlane.f32.xlu1 %v8281_v20  ;;  %v16660_v43 = vpop.f32.mrb[194].mxu1  ;;  %v8278_v25 = vsel %vm2086_vm7, %v22014_v12, -inf }
0x1a3e   : > { %v22021_v48 = vadd.f32 %v16660_v43, %v21670_v24  ;;  %v8241_v3 = vpop.f32.mrb[195].mxu1  ;;  %8279 = vmax.xlane.f32.xlu0 %v8278_v25 }
0x1a3f   : > { %v22024_v18 = vadd.f32 %v8241_v3, %v21677_v7  ;;  %v14304_v7 = vld [vmem:[%s23662_s12 + $0xe] ss:$0 sm:$0xff] }
0x1a40   : > { %v8287_v14 = vsel %vm2086_vm7, %v22021_v48, -inf }
0x1a41   : > { %8288 = vmax.xlane.f32.xlu1 %v8287_v14  ;;  %v16663_v40 = vpop.f32.mrb[196].mxu1  ;;  %v8284_v49 = vsel %vm2086_vm7, %v22024_v18, -inf }
0x1a42   : > { %v22031_v60 = vadd.f32 %v16663_v40, %v21690_v45  ;;  %v8251_v26 = vpop.f32.mrb[197].mxu1  ;;  %8285 = vmax.xlane.f32.xlu0 %v8284_v49 }
0x1a43   : > { %v22034_v24 = vadd.f32 %v8251_v26, %v21697_v36 }
0x1a44   : > { %v8293_v30 = vsel %vm2086_vm7, %v22031_v60, -inf }
0x1a45   : > { %8294 = vmax.xlane.f32.xlu1 %v8293_v30  ;;  %v16750_v62 = vpop.f32.mrb[198].mxu1  ;;  %v8290_v4 = vsel %vm2086_vm7, %v22034_v24, -inf }
0x1a46   : > { %v22043_v28 = vadd.f32 %v16750_v62, %v14304_v7  ;;  %v8956_v45 = vpop.f32.mrb[199].mxu1  ;;  %8291 = vmax.xlane.f32.xlu0 %v8290_v4  ;;  %v14320_v4 = vld [vmem:[%s23662_s12 + $0x12] ss:$0 sm:$0xff] }
0x1a47   : > { %v8957_v34 = vadd.f32 %v14304_v7, %v8956_v45 }
0x1a49   : > { %v16753_v58 = vpop.f32.mrb[200].mxu1  ;;  %16830 = vmatprep.mubr.msk.f32.mxu1 %vm1888_vm5, %v8957_v34 }
0x1a4a   : > { %v22046_v36 = vadd.f32 %v16753_v58, %v14304_v7  ;;  %v8966_v9 = vpop.f32.mrb[201].mxu1 }
0x1a4b   : > { %v22048_v0 = vadd.f32 %v14304_v7, %v8966_v9 }
0x1a4d   : > { %v16756_v38 = vpop.f32.mrb[202].mxu1 }
0x1a4e   : > { %v22050_v44 = vadd.f32 %v16756_v38, %v14304_v7  ;;  %v8976_v57 = vpop.f32.mrb[203].mxu1 }
0x1a4f   : > { %v22052_v59 = vadd.f32 %v14304_v7, %v8976_v57 }
0x1a51   : > { %v16759_v17 = vpop.f32.mrb[204].mxu1 }
0x1a52   : > { %v22054_v53 = vadd.f32 %v16759_v17, %v14304_v7  ;;  %v8986_v20 = vpop.f32.mrb[205].mxu1 }
0x1a53   : > { %v8987_v43 = vadd.f32 %v14304_v7, %v8986_v20 }
0x1a55   : > { %v16762_v25 = vpop.f32.mrb[206].mxu1 }
0x1a56   : > { %v22056_v3 = vadd.f32 %v16762_v25, %v14304_v7  ;;  %v8996_v14 = vpop.f32.mrb[207].mxu1 }
0x1a57   : > { %v8997_v40 = vadd.f32 %v14304_v7, %v8996_v14 }
0x1a59   : > { %v16765_v49 = vpop.f32.mrb[208].mxu1 }
0x1a5a   : > { %v9012_v26 = vadd.f32 %v16765_v49, %v14304_v7  ;;  %v9006_v30 = vpop.f32.mrb[209].mxu1 }
0x1a5b   : > { %v9007_v62 = vadd.f32 %v14304_v7, %v9006_v30 }
0x1a5d   : > { %v16770_v45 = vpop.f32.mrb[210].mxu1 }
0x1a5e   : > { %v9100_v34 = vadd.f32 %v16770_v45, %v14320_v4  ;;  %v9094_v58 = vpop.f32.mrb[211].mxu1 }
0x1a5f   : > { %v9095_v9 = vadd.f32 %v14320_v4, %v9094_v58 }
0x1a61   : > { %v17686_v38 = vpack.c.bf16 %v9100_v34, %v9095_v9  ;;  %v16773_v57 = vpop.f32.mrb[212].mxu1 }
0x1a62   : > { %v9110_v17 = vadd.f32 %v16773_v57, %v14320_v4  ;;  %v9104_v20 = vpop.f32.mrb[213].mxu1 }
0x1a63   : > { %v9105_v25 = vadd.f32 %v14320_v4, %v9104_v20  ;;  %17688 = vmatprep.subr.msk.bf16.mxu1 %vm19496_vm6, %v17686_v38 }
0x1a64   : > { %17691 = vmatpush3.bf16.xpose.msk.msra.mxu1 %vm19496_vm6, %v17686_v38 }
0x1a65   : > { %v17692_v7 = vpack.c.bf16 %v9110_v17, %v9105_v25  ;;  %v16776_v14 = vpop.f32.mrb[214].mxu1 }
0x1a66   : > { %v9120_v49 = vadd.f32 %v16776_v14, %v14320_v4  ;;  %v9114_v30 = vpop.f32.mrb[215].mxu1 }
0x1a67   : > { %v9115_v23 = vadd.f32 %v14320_v4, %v9114_v30  ;;  %17694 = vmatprep.subr.msk.bf16.mxu1 %vm19496_vm6, %v17692_v7 }
0x1a69   : > { %v17698_v45 = vpack.c.bf16 %v9120_v49, %v9115_v23  ;;  %v16779_v34 = vpop.f32.mrb[216].mxu1 }
0x1a6a   : > { %v9130_v58 = vadd.f32 %v16779_v34, %v14320_v4  ;;  %v9124_v9 = vpop.f32.mrb[217].mxu1 }
0x1a6b   : > { %v9125_v57 = vadd.f32 %v14320_v4, %v9124_v9 }
0x1a6c   : > { %17697 = vmatpush3.bf16.xpose.msk.msra.mxu1 %vm19496_vm6, %v17692_v7 }
0x1a6d   : > { %v17704_v20 = vpack.c.bf16 %v9130_v58, %v9125_v57  ;;  %v16782_v2 = vpop.f32.mrb[218].mxu1  ;;  %17700 = vmatprep.subr.msk.bf16.mxu1 %vm19496_vm6, %v17698_v45 }
0x1a6e   : > { %v9140_v38 = vadd.f32 %v16782_v2, %v14320_v4  ;;  %v9134_v17 = vpop.f32.mrb[219].mxu1  ;;  %v14399_v2 = vld [vmem:[%s23661_s11 + $0x78] sm:$0xff] }
0x1a6f   : > { %v9135_v25 = vadd.f32 %v14320_v4, %v9134_v17 }
0x1a71   : > { %v17710_v14 = vpack.c.bf16 %v9140_v38, %v9135_v25  ;;  %v16785_v30 = vpop.f32.mrb[220].mxu1 }
0x1a72   : > { %v9150_v33 = vadd.f32 %v16785_v30, %v14320_v4  ;;  %v9144_v1 = vpop.f32.mrb[221].mxu1 }
0x1a73   : > { %v9145_v23 = vadd.f32 %v14320_v4, %v9144_v1 }
0x1a74   : > { %17703 = vmatpush3.bf16.xpose.msk.msra.mxu1 %vm19496_vm6, %v17698_v45 }
0x1a75   : > { %v17716_v49 = vpack.c.bf16 %v9150_v33, %v9145_v23  ;;  %17706 = vmatprep.subr.msk.bf16.mxu1 %vm19496_vm6, %v17704_v20  ;;  %v14431_v33 = vld [vmem:[%s23661_s11 + $0xb8] sm:$0xff] }
0x1a7c   : > { %17709 = vmatpush3.bf16.xpose.msk.msra.mxu1 %vm19496_vm6, %v17704_v20 }
0x1a7d   : > { %17712 = vmatprep.subr.msk.bf16.mxu1 %vm19496_vm6, %v17710_v14 }
0x1a84   : > { %17715 = vmatpush3.bf16.xpose.msk.msra.mxu1 %vm19496_vm6, %v17710_v14 }
0x1a85   : > { %17718 = vmatprep.subr.msk.bf16.mxu1 %vm19496_vm6, %v17716_v49 }
0x1a8c   : > { %17721 = vmatpush3.bf16.xpose.msk.msra.mxu1 %vm19496_vm6, %v17716_v49 }
0x1a8d   : > { %16910 = vmatprep.subr.msk.mxu1 %vm1447_vm4, %v14399_v2 }
0x1a93   : > { %16831 = vmatmul.mubr.msk.f32.vlgmr.msra.gmra.mrb[222].mxu1 %vm1888_vm5, %v22043_v28 }
0x1a94   : > { %16833 = vmatprep.mubr.msk.f32.mxu1 %vm1888_vm5, %v22048_v0  ;;  %16911 = vmatpush3.xpose.msk.msra.mxu1 %vm1447_vm4, %v14399_v2 }
0x1a95   : > { %16950 = vmatprep.subr.msk.mxu1 %vm1447_vm4, %v14431_v33 }
0x1a97   : > { %16834 = vmatmul.mubr.msk.f32.gmra.mrb[224].mxu1 %vm1888_vm5, %v22046_v36 }
0x1a98   : > { %16836 = vmatprep.mubr.msk.f32.mxu1 %vm1888_vm5, %v22052_v59 }
0x1a9b   : > { %16837 = vmatmul.mubr.msk.f32.gmra.mrb[226].mxu1 %vm1888_vm5, %v22050_v44 }
0x1a9c   : > { %16839 = vmatprep.mubr.msk.f32.mxu1 %vm1888_vm5, %v8987_v43 }
0x1a9f   : > { %16840 = vmatmul.mubr.msk.f32.gmra.mrb[228].mxu1 %vm1888_vm5, %v22054_v53 }
0x1aa0   : > { %16842 = vmatprep.mubr.msk.f32.mxu1 %vm1888_vm5, %v8997_v40 }
0x1aa3   : > { %16843 = vmatmul.mubr.msk.f32.gmra.mrb[230].mxu1 %vm1888_vm5, %v22056_v3 }
0x1aa4   : > { %16845 = vmatprep.mubr.msk.f32.mxu1 %vm1888_vm5, %v9007_v62 }
0x1aa7   : > { %16846 = vmatmul.mubr.msk.f32.gmra.mrb[232].mxu1 %vm1888_vm5, %v9012_v26 }
0x1aa8   : > { %16912 = vmatprep.mubr.msk.f32.mxu1 %vm1447_vm4, %v21342_v32 }
0x1aab   : > { %16913 = vmatmul.mubr.msk.f32.vlgmr.msra.gmra.mrb[234].mxu1 %vm1447_vm4, %v21346_v46 }
0x1aac   : > { %16915 = vmatprep.mubr.msk.f32.mxu1 %vm1447_vm4, %v21360_v16  ;;  %16951 = vmatpush3.xpose.msk.msra.mxu1 %vm1447_vm4, %v14431_v33 }
0x1aaf   : > { %16916 = vmatmul.mubr.msk.f32.gmra.mrb[236].mxu1 %vm1447_vm4, %v21366_v5 }
0x1ab0   : > { %16918 = vmatprep.mubr.msk.f32.mxu1 %vm1447_vm4, %v21380_v35 }
0x1ab3   : > { %16919 = vmatmul.mubr.msk.f32.gmra.mrb[238].mxu1 %vm1447_vm4, %v21384_v52 }
0x1ab4   : > { %16921 = vmatprep.mubr.msk.f32.mxu1 %vm1447_vm4, %v21398_v56 }
0x1ab7   : > { %16922 = vmatmul.mubr.msk.f32.gmra.mrb[240].mxu1 %vm1447_vm4, %v21402_v22 }
0x1ab8   : > { %16924 = vmatprep.mubr.msk.f32.mxu1 %vm1447_vm4, %v21416_v47 }
0x1abb   : > { %16925 = vmatmul.mubr.msk.f32.gmra.mrb[242].mxu1 %vm1447_vm4, %v21420_v61 }
0x1abc   : > { %16927 = vmatprep.mubr.msk.f32.mxu1 %vm1447_vm4, %v21433_v63 }
0x1abe   : > { %v8265_v1 = vpop.xlane.xlu1 %8264 }
0x1abf   : > { %v8297_v28 = vsub.f32 %v21981_v51, %v8265_v1  ;;  %16928 = vmatmul.mubr.msk.f32.gmra.mrb[244].mxu1 %vm1447_vm4, %v21436_v41  ;;  %v8262_v36 = vpop.xlane.xlu0 %8261 }
0x1ac0   : > { %v8296_v0 = vsub.f32 %v21984_v37, %v8262_v36  ;;  %16952 = vmatprep.mubr.msk.f32.mxu1 %vm1447_vm4, %v21342_v32 }
0x1ac1   : > { %v8310_v44 = vmul.f32 1.442695, %v8297_v28 }
0x1ac2   : > { %v8308_v59 = vmul.f32 1.442695, %v8296_v0  ;;  %v8271_v53 = vpop.xlane.xlu1 %8270 }
0x1ac3   : > { %18420 = vpow2.f32 %v8310_v44  ;;  %v8299_v43 = vsub.f32 %v21991_v31, %v8271_v53  ;;  %16953 = vmatmul.mubr.msk.f32.vlgmr.msra.gmra.mrb[246].mxu1 %vm1447_vm4, %v21346_v46  ;;  %v8268_v3 = vpop.xlane.xlu0 %8267 }
0x1ac4   : > { %18422 = vpow2.f32 %v8308_v59  ;;  %v8298_v51 = vsub.f32 %v21994_v39, %v8268_v3  ;;  %16955 = vmatprep.mubr.msk.f32.mxu1 %vm1447_vm4, %v21360_v16 }
0x1ac5   : > { %v8314_v37 = vmul.f32 1.442695, %v8299_v43 }
0x1ac6   : > { %v8312_v40 = vmul.f32 1.442695, %v8298_v51  ;;  %v8277_v26 = vpop.xlane.xlu1 %8276 }
0x1ac7   : > { %18424 = vpow2.f32 %v8314_v37  ;;  %v8301_v62 = vsub.f32 %v22001_v6, %v8277_v26  ;;  %16956 = vmatmul.mubr.msk.f32.gmra.mrb[248].mxu1 %vm1447_vm4, %v21366_v5  ;;  %v8274_v31 = vpop.xlane.xlu0 %8273 }
0x1ac8   : > { %18426 = vpow2.f32 %v8312_v40  ;;  %v8300_v4 = vsub.f32 %v22004_v54, %v8274_v31  ;;  %16958 = vmatprep.mubr.msk.f32.mxu1 %vm1447_vm4, %v21380_v35 }
0x1ac9   : > { %v8318_v39 = vmul.f32 1.442695, %v8301_v62 }
0x1aca   : > { %v8316_v7 = vmul.f32 1.442695, %v8300_v4  ;;  %v8283_v45 = vpop.xlane.xlu1 %8282 }
0x1acb   : > { %18428 = vpow2.f32 %v8318_v39  ;;  %v8303_v34 = vsub.f32 %v22011_v8, %v8283_v45  ;;  %16959 = vmatmul.mubr.msk.f32.gmra.mrb[250].mxu1 %vm1447_vm4, %v21384_v52  ;;  %v8280_v6 = vpop.xlane.xlu0 %8279 }
0x1acc   : > { %18430 = vpow2.f32 %v8316_v7  ;;  %v8302_v58 = vsub.f32 %v22014_v12, %v8280_v6  ;;  %16961 = vmatprep.mubr.msk.f32.mxu1 %vm1447_vm4, %v21398_v56 }
0x1acd   : > { %v22159_v54 = vpop.eup %18420  ;;  %v8322_v9 = vmul.f32 1.442695, %v8303_v34 }
0x1ace   : > { %v22161_v57 = vpop.eup %18422  ;;  %v8320_v20 = vmul.f32 1.442695, %v8302_v58  ;;  %v8289_v38 = vpop.xlane.xlu1 %8288  ;;  %v8335_v8 = vsel %vm2086_vm7, %v22159_v54, 0.0 }
0x1acf   : > { %18432 = vpow2.f32 %v8322_v9  ;;  %v8305_v17 = vsub.f32 %v22021_v48, %v8289_v38  ;;  %8336 = vadd.xlane.f32.xlu1 %v8335_v8  ;;  %16962 = vmatmul.mubr.msk.f32.gmra.mrb[252].mxu1 %vm1447_vm4, %v21402_v22  ;;  %v8286_v12 = vpop.xlane.xlu0 %8285  ;;  %v8332_v25 = vsel %vm2086_vm7, %v22161_v57, 0.0 }
0x1ad0   : > { %18434 = vpow2.f32 %v8320_v20  ;;  %v8304_v14 = vsub.f32 %v22024_v18, %v8286_v12  ;;  %16964 = vmatprep.mubr.msk.f32.mxu1 %vm1447_vm4, %v21416_v47  ;;  %8333 = vadd.xlane.f32.xlu0 %v8332_v25  ;;  %v22224_v12 = vld [vmem:[%s23795_s30 + $0x8] sm:$0xff] }
0x1ad1   : > { %v22173_v30 = vpop.eup %18424  ;;  %v8326_v23 = vmul.f32 1.442695, %v8305_v17  ;;  %23798 = vst [vmem:[#allocation31_spill] sm:$0xff] %v22224_v12 }
0x1ad2   : > { %v22175_v49 = vpop.eup %18426  ;;  %v8324_v48 = vmul.f32 1.442695, %v8304_v14  ;;  %v8295_v2 = vpop.xlane.xlu1 %8294  ;;  %v8341_v33 = vsel %vm2086_vm7, %v22173_v30, 0.0 }
0x1ad3   : > { %18436 = vpow2.f32 %v8326_v23  ;;  %v8307_v1 = vsub.f32 %v22031_v60, %v8295_v2  ;;  %8342 = vadd.xlane.f32.xlu1 %v8341_v33  ;;  %16965 = vmatmul.mubr.msk.f32.gmra.mrb[254].mxu1 %vm1447_vm4, %v21420_v61  ;;  %v8292_v18 = vpop.xlane.xlu0 %8291  ;;  %v8338_v28 = vsel %vm2086_vm7, %v22175_v49, 0.0 }
0x1ad4   : > { %18438 = vpow2.f32 %v8324_v48  ;;  %v8306_v36 = vsub.f32 %v22034_v24, %v8292_v18  ;;  %16967 = vmatprep.mubr.msk.f32.mxu1 %vm1447_vm4, %v21433_v63  ;;  %8339 = vadd.xlane.f32.xlu0 %v8338_v28  ;;  %v22232_v48 = vld [vmem:[%s23795_s30] sm:$0xff] }
0x1ad5   : > { %v22187_v0 = vpop.eup %18428  ;;  %v8330_v44 = vmul.f32 1.442695, %v8307_v1  ;;  %23799 = vst [vmem:[#allocation18_spill] sm:$0xff] %v22232_v48 }
0x1ad6   : > { %v22189_v59 = vpop.eup %18430  ;;  %v8328_v60 = vmul.f32 1.442695, %v8306_v36  ;;  %v8347_v53 = vsel %vm2086_vm7, %v22187_v0, 0.0 }
0x1ad7   : > { %18440 = vpow2.f32 %v8330_v44  ;;  %8348 = vadd.xlane.f32.xlu1 %v8347_v53  ;;  %16968 = vmatmul.mubr.msk.f32.gmra.mrb[0].mxu1 %vm1447_vm4, %v21436_v41  ;;  %v8344_v24 = vsel %vm2086_vm7, %v22189_v59, 0.0 }
0x1ad8   : > { %18442 = vpow2.f32 %v8328_v60  ;;  %8345 = vadd.xlane.f32.xlu0 %v8344_v24  ;;  %v22246_v24 = vld [vmem:[%s23795_s30 + $0x18] sm:$0xff] }
0x1ad9   : > { %v22197_v43 = vpop.eup %18432  ;;  %23800 = vst [vmem:[#allocation19_spill] sm:$0xff] %v22246_v24 }
0x1ada   : > { %v22199_v3 = vpop.eup %18434  ;;  %v8353_v51 = vsel %vm2086_vm7, %v22197_v43, 0.0 }
0x1adb   : > { %8354 = vadd.xlane.f32.xlu1 %v8353_v51  ;;  %v8350_v37 = vsel %vm2086_vm7, %v22199_v3, 0.0 }
0x1adc   : > { %8351 = vadd.xlane.f32.xlu0 %v8350_v37 }
0x1add   : > { %v22205_v40 = vpop.eup %18436 }
0x1ade   : > { %v22207_v26 = vpop.eup %18438  ;;  %v8359_v62 = vsel %vm2086_vm7, %v22205_v40, 0.0 }
0x1adf   : > { %8360 = vadd.xlane.f32.xlu1 %v8359_v62  ;;  %v8356_v31 = vsel %vm2086_vm7, %v22207_v26, 0.0 }
0x1ae0   : > { %8357 = vadd.xlane.f32.xlu0 %v8356_v31 }
0x1ae1   : > { %v22213_v4 = vpop.eup %18440 }
0x1ae2   : > { %v22215_v39 = vpop.eup %18442  ;;  %v8365_v7 = vsel %vm2086_vm7, %v22213_v4, 0.0 }
0x1ae3   : > { %8366 = vadd.xlane.f32.xlu1 %v8365_v7  ;;  %v8362_v45 = vsel %vm2086_vm7, %v22215_v39, 0.0 }
0x1ae4   : > { %8363 = vadd.xlane.f32.xlu0 %v8362_v45 }
0x1b5c   : > { %v8337_v34 = vpop.xlane.xlu1 %8336 }
0x1b5d   : > { %18444 = vrcp.f32 %v8337_v34  ;;  %v8334_v6 = vpop.xlane.xlu0 %8333 }
0x1b5e   : > { %18446 = vrcp.f32 %v8334_v6 }
0x1b60   : > { %v8343_v58 = vpop.xlane.xlu1 %8342 }
0x1b61   : > { %18448 = vrcp.f32 %v8343_v58  ;;  %v8340_v9 = vpop.xlane.xlu0 %8339 }
0x1b62   : > { %18450 = vrcp.f32 %v8340_v9 }
0x1b64   : > { %v8349_v20 = vpop.xlane.xlu1 %8348 }
0x1b65   : > { %18452 = vrcp.f32 %v8349_v20  ;;  %v8346_v38 = vpop.xlane.xlu0 %8345 }
0x1b66   : > { %18454 = vrcp.f32 %v8346_v38  ;;  %v16832_v8 = vpop.f32.mrb[222].mxu1  ;;  %v18692_v38 = vld [vmem:[%s23795_s30 + $0x28] sm:$0xff] }
0x1b67   : > { %v18445_v17 = vpop.eup %18444  ;;  %v22227_v25 = vadd.f32 %v22224_v12, %v16832_v8  ;;  %v9429_v14 = vpop.f32.mrb[223].mxu1 }
0x1b68   : > { %v18447_v23 = vpop.eup %18446  ;;  %v22235_v2 = vadd.f32 %v22232_v48, %v9429_v14  ;;  %v8355_v33 = vpop.xlane.xlu1 %8354  ;;  %v8371_v36 = vmul.f32 %v18445_v17, %v22159_v54  ;;  %v18693_v14 = vld [vmem:[%s23795_s30 + $0x20] sm:$0xff] }
0x1b69   : > { %18456 = vrcp.f32 %v8355_v33  ;;  %v8352_v1 = vpop.xlane.xlu0 %8351  ;;  %v9491_v18 = vsel %vm2086_vm7, %v22227_v25, -inf  ;;  %v8369_v28 = vmul.f32 %v18447_v23, %v22161_v57  ;;  %v22255_v57 = vld [vmem:[%s23795_s30 + $0x10] sm:$0xff] }
0x1b6a   : > { %18458 = vrcp.f32 %v8352_v1  ;;  %9492 = vmax.xlane.f32.xlu1 %v9491_v18  ;;  %v16835_v44 = vpop.f32.mrb[224].mxu1  ;;  %v9488_v60 = vsel %vm2086_vm7, %v22235_v2, -inf  ;;  %23801 = vst [vmem:[#allocation20_spill] sm:$0xff] %v22255_v57 }
0x1b6b   : > { %v18449_v53 = vpop.eup %18448  ;;  %v22249_v51 = vadd.f32 %v22246_v24, %v16835_v44  ;;  %v9439_v37 = vpop.f32.mrb[225].mxu1  ;;  %9489 = vmax.xlane.f32.xlu0 %v9488_v60  ;;  %16688 = vmatprep.mubr.msk.f32.mxu0 %vm2086_vm7, %v8369_v28 }
0x1b6c   : > { %v18451_v54 = vpop.eup %18450  ;;  %v22258_v62 = vadd.f32 %v22255_v57, %v9439_v37  ;;  %v8361_v31 = vpop.xlane.xlu1 %8360  ;;  %16689 = vmatmul.mubr.msk.f32.vlgmr.msra.gmra.mrb[198].mxu0 %vm2086_vm7, %v8371_v36  ;;  %v8375_v9 = vmul.f32 %v18449_v53, %v22173_v30  ;;  %v22288_v53 = vld [vmem:[%s23795_s30 + $0x38] sm:$0xff] }
0x1b6d   : > { %18460 = vrcp.f32 %v8361_v31  ;;  %v8358_v7 = vpop.xlane.xlu0 %8357  ;;  %v9497_v45 = vsel %vm2086_vm7, %v22249_v51, -inf  ;;  %v8373_v34 = vmul.f32 %v18451_v54, %v22175_v49  ;;  %23802 = vst [vmem:[#allocation21_spill] sm:$0xff] %v22288_v53  ;;  %v22297_v31 = vld [vmem:[%s23795_s30 + $0x30] sm:$0xff] }
0x1b6e   : > { %18462 = vrcp.f32 %v8358_v7  ;;  %9498 = vmax.xlane.f32.xlu1 %v9497_v45  ;;  %v16838_v6 = vpop.f32.mrb[226].mxu1  ;;  %v9494_v58 = vsel %vm2086_vm7, %v22258_v62, -inf  ;;  %23803 = vst [vmem:[#allocation22_spill] sm:$0xff] %v22297_v31 }
0x1b6f   : > { %v18453_v20 = vpop.eup %18452  ;;  %v22270_v8 = vadd.f32 %v18692_v38, %v16838_v6  ;;  %v9449_v17 = vpop.f32.mrb[227].mxu1  ;;  %9495 = vmax.xlane.f32.xlu0 %v9494_v58  ;;  %16691 = vmatprep.mubr.msk.f32.mxu0 %vm2086_vm7, %v8373_v34 }
0x1b70   : > { %v18455_v49 = vpop.eup %18454  ;;  %v22276_v23 = vadd.f32 %v18693_v14, %v9449_v17  ;;  %v8367_v33 = vpop.xlane.xlu1 %8366  ;;  %16692 = vmatmul.mubr.msk.f32.gmra.mrb[200].mxu0 %vm2086_vm7, %v8375_v9  ;;  %v8379_v44 = vmul.f32 %v18453_v20, %v22187_v0  ;;  %v22312_v20 = vld [vmem:[%s23795_s30 + $0x48] sm:$0xff] }
0x1b71   : > { %18464 = vrcp.f32 %v8367_v33  ;;  %v8364_v30 = vpop.xlane.xlu0 %8363  ;;  %v9503_v1 = vsel %vm2086_vm7, %v22270_v8, -inf  ;;  %v8377_v18 = vmul.f32 %v18455_v49, %v22189_v59  ;;  %23804 = vst [vmem:[#allocation23_spill] sm:$0xff] %v22312_v20  ;;  %v22321_v49 = vld [vmem:[%s23795_s30 + $0x40] sm:$0xff] }
0x1b72   : > { %18466 = vrcp.f32 %v8364_v30  ;;  %9504 = vmax.xlane.f32.xlu1 %v9503_v1  ;;  %v16841_v28 = vpop.f32.mrb[228].mxu1  ;;  %v9500_v36 = vsel %vm2086_vm7, %v22276_v23, -inf  ;;  %23805 = vst [vmem:[#allocation24_spill] sm:$0xff] %v22321_v49 }
0x1b73   : > { %v18457_v60 = vpop.eup %18456  ;;  %v22291_v37 = vadd.f32 %v22288_v53, %v16841_v28  ;;  %v9459_v54 = vpop.f32.mrb[229].mxu1  ;;  %9501 = vmax.xlane.f32.xlu0 %v9500_v36  ;;  %16694 = vmatprep.mubr.msk.f32.mxu0 %vm2086_vm7, %v8377_v18  ;;  %v22336_v36 = vld [vmem:[%s23795_s30 + $0x58] sm:$0xff] }
0x1b74   : > { %v18459_v59 = vpop.eup %18458  ;;  %v22300_v0 = vadd.f32 %v22297_v31, %v9459_v54  ;;  %16695 = vmatmul.mubr.msk.f32.gmra.mrb[202].mxu0 %vm2086_vm7, %v8379_v44  ;;  %v8383_v58 = vmul.f32 %v18457_v60, %v22197_v43  ;;  %23806 = vst [vmem:[#allocation25_spill] sm:$0xff] %v22336_v36  ;;  %v22345_v54 = vld [vmem:[%s23795_s30 + $0x50] sm:$0xff] }
0x1b75   : > { %v9509_v7 = vsel %vm2086_vm7, %v22291_v37, -inf  ;;  %v8381_v45 = vmul.f32 %v18459_v59, %v22199_v3  ;;  %23807 = vst [vmem:[#allocation26_spill] sm:$0xff] %v22345_v54  ;;  %v22354_v59 = vld [vmem:[%s23662_s12 + $0xf] ss:$0 sm:$0xff] }
0x1b76   : > { %9510 = vmax.xlane.f32.xlu1 %v9509_v7  ;;  %v16844_v34 = vpop.f32.mrb[230].mxu1  ;;  %v9506_v6 = vsel %vm2086_vm7, %v22300_v0, -inf }
0x1b77   : > { %v18461_v9 = vpop.eup %18460  ;;  %v22315_v38 = vadd.f32 %v22312_v20, %v16844_v34  ;;  %v9469_v17 = vpop.f32.mrb[231].mxu1  ;;  %9507 = vmax.xlane.f32.xlu0 %v9506_v6  ;;  %16697 = vmatprep.mubr.msk.f32.mxu0 %vm2086_vm7, %v8381_v45 }
0x1b78   : > { %v18463_v3 = vpop.eup %18462  ;;  %v22324_v43 = vadd.f32 %v22321_v49, %v9469_v17  ;;  %16698 = vmatmul.mubr.msk.f32.gmra.mrb[204].mxu0 %vm2086_vm7, %v8383_v58  ;;  %v8387_v18 = vmul.f32 %v18461_v9, %v22205_v40 }
0x1b79   : > { %v9515_v14 = vsel %vm2086_vm7, %v22315_v38, -inf  ;;  %v8385_v33 = vmul.f32 %v18463_v3, %v22207_v26 }
0x1b7a   : > { %9516 = vmax.xlane.f32.xlu1 %v9515_v14  ;;  %v16847_v30 = vpop.f32.mrb[232].mxu1  ;;  %v9512_v1 = vsel %vm2086_vm7, %v22324_v43, -inf }
0x1b7b   : > { %v18465_v28 = vpop.eup %18464  ;;  %v22339_v44 = vadd.f32 %v22336_v36, %v16847_v30  ;;  %v9479_v60 = vpop.f32.mrb[233].mxu1  ;;  %9513 = vmax.xlane.f32.xlu0 %v9512_v1  ;;  %16700 = vmatprep.mubr.msk.f32.mxu0 %vm2086_vm7, %v8385_v33 }
0x1b7c   : > { %v18467_v26 = vpop.eup %18466  ;;  %v22348_v40 = vadd.f32 %v22345_v54, %v9479_v60  ;;  %16701 = vmatmul.mubr.msk.f32.gmra.mrb[206].mxu0 %vm2086_vm7, %v8387_v18  ;;  %v8391_v58 = vmul.f32 %v18465_v28, %v22213_v4 }
0x1b7d   : > { %v9521_v7 = vsel %vm2086_vm7, %v22339_v44, -inf  ;;  %v8389_v45 = vmul.f32 %v18467_v26, %v22215_v39 }
0x1b7e   : > { %9522 = vmax.xlane.f32.xlu1 %v9521_v7  ;;  %v16914_v34 = vpop.f32.mrb[234].mxu1  ;;  %v9518_v6 = vsel %vm2086_vm7, %v22348_v40, -inf }
0x1b7f   : > { %v22363_v9 = vadd.f32 %v16914_v34, %v22354_v59  ;;  %v22365_v17 = vpop.f32.mrb[235].mxu1  ;;  %9519 = vmax.xlane.f32.xlu0 %v9518_v6  ;;  %16703 = vmatprep.mubr.msk.f32.mxu0 %vm2086_vm7, %v8389_v45 }
0x1b80   : > { %16704 = vmatmul.mubr.msk.f32.gmra.mrb[208].mxu0 %vm2086_vm7, %v8391_v58 }
0x1b82   : > { %v16917_v3 = vpop.f32.mrb[236].mxu1 }
0x1b83   : > { %v22370_v39 = vadd.f32 %v16917_v3, %v22354_v59  ;;  %v10045_v14 = vpop.f32.mrb[237].mxu1 }
0x1b84   : > { %v22373_v33 = vadd.f32 %v22354_v59, %v10045_v14 }
0x1b86   : > { %v16920_v30 = vpop.f32.mrb[238].mxu1 }
0x1b87   : > { %v22376_v4 = vadd.f32 %v16920_v30, %v22354_v59  ;;  %v10055_v1 = vpop.f32.mrb[239].mxu1 }
0x1b88   : > { %v22379_v18 = vadd.f32 %v22354_v59, %v10055_v1 }
0x1b8a   : > { %v16923_v28 = vpop.f32.mrb[240].mxu1 }
0x1b8b   : > { %v22382_v60 = vadd.f32 %v16923_v28, %v22354_v59  ;;  %v10065_v26 = vpop.f32.mrb[241].mxu1  ;;  %v14433_v28 = vld [vmem:[%s23662_s12 + $0x17] ss:$0 sm:$0xff] }
0x1b8c   : > { %v22385_v7 = vadd.f32 %v22354_v59, %v10065_v26 }
0x1b8e   : > { %v16926_v45 = vpop.f32.mrb[242].mxu1 }
0x1b8f   : > { %v22388_v34 = vadd.f32 %v16926_v45, %v22354_v59  ;;  %v10075_v6 = vpop.f32.mrb[243].mxu1 }
0x1b90   : > { %v22391_v58 = vadd.f32 %v22354_v59, %v10075_v6 }
0x1b91   : > { %23808 = vst [vmem:[#allocation27_spill] sm:$0xff] %v22388_v34 }
0x1b92   : > { %v16929_v3 = vpop.f32.mrb[244].mxu1 }
0x1b93   : > { %v22394_v14 = vadd.f32 %v16929_v3, %v22354_v59  ;;  %v10085_v30 = vpop.f32.mrb[245].mxu1  ;;  %v14277_v3 = vld [vmem:[%s23663_s13 + $0x28] sm:$0xff] }
0x1b94   : > { %v22397_v1 = vadd.f32 %v22354_v59, %v10085_v30  ;;  %16706 = vmatprep.subr.mxu0 %v14277_v3 }
0x1b95   : > { %23809 = vst [vmem:[#allocation28_spill] sm:$0xff] %v22394_v14  ;;  %16707 = vmatpush3.msra.mxu0 %v14277_v3 }
0x1b96   : > { %23810 = vst [vmem:[#allocation29_spill] sm:$0xff] %v22397_v1  ;;  %v16954_v26 = vpop.f32.mrb[246].mxu1 }
0x1b97   : > { %v10317_v54 = vadd.f32 %v16954_v26, %v14433_v28  ;;  %v10311_v45 = vpop.f32.mrb[247].mxu1 }
0x1b98   : > { %v10312_v36 = vadd.f32 %v14433_v28, %v10311_v45  ;;  %v23813_v13 = vld [vmem:[#allocation27_spill] sm:$0xff] }
0x1b9a   : > { %v17782_v49 = vpack.c.bf16 %v10317_v54, %v10312_v36  ;;  %v16957_v20 = vpop.f32.mrb[248].mxu1 }
0x1b9b   : > { %v10327_v6 = vadd.f32 %v16957_v20, %v14433_v28  ;;  %v10321_v31 = vpop.f32.mrb[249].mxu1 }
0x1b9c   : > { %v10322_v53 = vadd.f32 %v14433_v28, %v10321_v31  ;;  %17783 = vmatprep.subr.bf16.mxu1 %v17782_v49 }
0x1b9d   : > { %17785 = vmatpush3.bf16.msra.mxu1 %v17782_v49 }
0x1b9e   : > { %v17786_v30 = vpack.c.bf16 %v10327_v6, %v10322_v53  ;;  %v16960_v57 = vpop.f32.mrb[250].mxu1 }
0x1b9f   : > { %v10337_v24 = vadd.f32 %v16960_v57, %v14433_v28  ;;  %v10331_v48 = vpop.f32.mrb[251].mxu1 }
0x1ba0   : > { %v10332_v26 = vadd.f32 %v14433_v28, %v10331_v48  ;;  %17787 = vmatprep.subr.bf16.mxu1 %v17786_v30 }
0x1ba1   : > { %17789 = vmatpush3.bf16.msra.mxu1 %v17786_v30  ;;  %v22408_v30 = vld [vmem:[%s23663_s13 + $0x20] sm:$0xff] }
0x1ba2   : > { %v17790_v36 = vpack.c.bf16 %v10337_v24, %v10332_v26  ;;  %v16963_v54 = vpop.f32.mrb[252].mxu1  ;;  %16726 = vmatprep.subr.mxu0 %v22408_v30 }
0x1ba3   : > { %v10347_v20 = vadd.f32 %v16963_v54, %v14433_v28  ;;  %v10341_v45 = vpop.f32.mrb[253].mxu1 }
0x1ba4   : > { %v10342_v31 = vadd.f32 %v14433_v28, %v10341_v45  ;;  %17791 = vmatprep.subr.bf16.mxu1 %v17790_v36 }
0x1ba5   : > { %17793 = vmatpush3.bf16.msra.mxu1 %v17790_v36 }
0x1ba6   : > { %v17794_v49 = vpack.c.bf16 %v10347_v20, %v10342_v31  ;;  %v16966_v12 = vpop.f32.mrb[254].mxu1 }
0x1ba7   : > { %v10357_v14 = vadd.f32 %v16966_v12, %v14433_v28  ;;  %v10351_v1 = vpop.f32.mrb[255].mxu1 }
0x1ba8   : > { %v10352_v53 = vadd.f32 %v14433_v28, %v10351_v1  ;;  %17795 = vmatprep.subr.bf16.mxu1 %v17794_v49 }
0x1ba9   : > { %17797 = vmatpush3.bf16.msra.mxu1 %v17794_v49 }
0x1baa   : > { %v17798_v57 = vpack.c.bf16 %v10357_v14, %v10352_v53  ;;  %v16969_v6 = vpop.f32.mrb[0].mxu1 }
0x1bab   : > { %v10367_v3 = vadd.f32 %v16969_v6, %v14433_v28  ;;  %v10361_v48 = vpop.f32.mrb[1].mxu1 }
0x1bac   : > { %v10362_v34 = vadd.f32 %v14433_v28, %v10361_v48  ;;  %17799 = vmatprep.subr.bf16.mxu1 %v17798_v57 }
0x1bad   : > { %17801 = vmatpush3.bf16.msra.mxu1 %v17798_v57 }
0x1bae   : > { %v17802_v24 = vpack.c.bf16 %v10367_v3, %v10362_v34 }
0x1bb0   : > { %17803 = vmatprep.subr.bf16.mxu1 %v17802_v24 }
0x1bb1   : > { %17805 = vmatpush3.bf16.msra.mxu1 %v17802_v24 }
0x1bf7   : > { %v9493_v12 = vpop.xlane.xlu1 %9492 }
0x1bf8   : > { %v9525_v1 = vsub.f32 %v22227_v25, %v9493_v12  ;;  %v9490_v14 = vpop.xlane.xlu0 %9489 }
0x1bf9   : > { %v9524_v26 = vsub.f32 %v22235_v2, %v9490_v14 }
0x1bfa   : > { %v9538_v36 = vmul.f32 1.442695, %v9525_v1 }
0x1bfb   : > { %v9536_v28 = vmul.f32 1.442695, %v9524_v26  ;;  %v9499_v54 = vpop.xlane.xlu1 %9498 }
0x1bfc   : > { %18468 = vpow2.f32 %v9538_v36  ;;  %v9527_v34 = vsub.f32 %v22249_v51, %v9499_v54  ;;  %v9496_v20 = vpop.xlane.xlu0 %9495 }
0x1bfd   : > { %18470 = vpow2.f32 %v9536_v28  ;;  %v9526_v45 = vsub.f32 %v22258_v62, %v9496_v20 }
0x1bfe   : > { %v9542_v31 = vmul.f32 1.442695, %v9527_v34 }
0x1bff   : > { %v9540_v49 = vmul.f32 1.442695, %v9526_v45  ;;  %v9505_v53 = vpop.xlane.xlu1 %9504 }
0x1c00   : > { %18472 = vpow2.f32 %v9542_v31  ;;  %v9529_v57 = vsub.f32 %v22270_v8, %v9505_v53  ;;  %v9502_v25 = vpop.xlane.xlu0 %9501 }
0x1c01   : > { %18474 = vpow2.f32 %v9540_v49  ;;  %v9528_v2 = vsub.f32 %v22276_v23, %v9502_v25 }
0x1c02   : > { %v9546_v6 = vmul.f32 1.442695, %v9529_v57 }
0x1c03   : > { %v9544_v3 = vmul.f32 1.442695, %v9528_v2  ;;  %v9511_v48 = vpop.xlane.xlu1 %9510 }
0x1c04   : > { %18476 = vpow2.f32 %v9546_v6  ;;  %v9531_v51 = vsub.f32 %v22291_v37, %v9511_v48  ;;  %v9508_v24 = vpop.xlane.xlu0 %9507 }
0x1c05   : > { %18478 = vpow2.f32 %v9544_v3  ;;  %v9530_v62 = vsub.f32 %v22300_v0, %v9508_v24 }
0x1c06   : > { %v22419_v12 = vpop.eup %18468  ;;  %v9550_v1 = vmul.f32 1.442695, %v9531_v51 }
0x1c07   : > { %v22421_v14 = vpop.eup %18470  ;;  %v9548_v8 = vmul.f32 1.442695, %v9530_v62  ;;  %v9517_v26 = vpop.xlane.xlu1 %9516  ;;  %v9563_v23 = vsel %vm2086_vm7, %v22419_v12, 0.0 }
0x1c08   : > { %18480 = vpow2.f32 %v9550_v1  ;;  %v9533_v36 = vsub.f32 %v22315_v38, %v9517_v26  ;;  %9564 = vadd.xlane.f32.xlu1 %v9563_v23  ;;  %v9514_v28 = vpop.xlane.xlu0 %9513  ;;  %v9560_v37 = vsel %vm2086_vm7, %v22421_v14, 0.0 }
0x1c09   : > { %18482 = vpow2.f32 %v9548_v8  ;;  %v9532_v0 = vsub.f32 %v22324_v43, %v9514_v28  ;;  %9561 = vadd.xlane.f32.xlu0 %v9560_v37 }
0x1c0a   : > { %v22429_v54 = vpop.eup %18472  ;;  %v9554_v34 = vmul.f32 1.442695, %v9533_v36 }
0x1c0b   : > { %v22431_v20 = vpop.eup %18474  ;;  %v9552_v45 = vmul.f32 1.442695, %v9532_v0  ;;  %v9523_v31 = vpop.xlane.xlu1 %9522  ;;  %v9569_v49 = vsel %vm2086_vm7, %v22429_v54, 0.0 }
0x1c0c   : > { %18484 = vpow2.f32 %v9554_v34  ;;  %v9535_v38 = vsub.f32 %v22339_v44, %v9523_v31  ;;  %9570 = vadd.xlane.f32.xlu1 %v9569_v49  ;;  %v9520_v53 = vpop.xlane.xlu0 %9519  ;;  %v9566_v57 = vsel %vm2086_vm7, %v22431_v20, 0.0  ;;  %v14334_v31 = vld [vmem:[%s23661_s11 + $0xb0] sm:$0xff] }
0x1c0d   : > { %18486 = vpow2.f32 %v9552_v45  ;;  %v9534_v43 = vsub.f32 %v22348_v40, %v9520_v53  ;;  %9567 = vadd.xlane.f32.xlu0 %v9566_v57 }
0x1c0e   : > { %v22439_v25 = vpop.eup %18476  ;;  %v9558_v2 = vmul.f32 1.442695, %v9535_v38 }
0x1c0f   : > { %v22441_v6 = vpop.eup %18478  ;;  %v9556_v3 = vmul.f32 1.442695, %v9534_v43  ;;  %v9575_v48 = vsel %vm2086_vm7, %v22439_v25, 0.0 }
0x1c10   : > { %18488 = vpow2.f32 %v9558_v2  ;;  %9576 = vadd.xlane.f32.xlu1 %v9575_v48  ;;  %v9572_v44 = vsel %vm2086_vm7, %v22441_v6, 0.0 }
0x1c11   : > { %18490 = vpow2.f32 %v9556_v3  ;;  %9573 = vadd.xlane.f32.xlu0 %v9572_v44 }
0x1c12   : > { %v22447_v51 = vpop.eup %18480 }
0x1c13   : > { %v22449_v40 = vpop.eup %18482  ;;  %v9581_v24 = vsel %vm2086_vm7, %v22447_v51, 0.0 }
0x1c14   : > { %9582 = vadd.xlane.f32.xlu1 %v9581_v24  ;;  %v9578_v62 = vsel %vm2086_vm7, %v22449_v40, 0.0 }
0x1c15   : > { %9579 = vadd.xlane.f32.xlu0 %v9578_v62 }
0x1c16   : > { %v22455_v1 = vpop.eup %18484 }
0x1c17   : > { %v22457_v8 = vpop.eup %18486  ;;  %v9587_v26 = vsel %vm2086_vm7, %v22455_v1, 0.0 }
0x1c18   : > { %9588 = vadd.xlane.f32.xlu1 %v9587_v26  ;;  %v9584_v23 = vsel %vm2086_vm7, %v22457_v8, 0.0 }
0x1c19   : > { %9585 = vadd.xlane.f32.xlu0 %v9584_v23 }
0x1c1a   : > { %v22463_v36 = vpop.eup %18488 }
0x1c1b   : > { %v22465_v28 = vpop.eup %18490  ;;  %v9593_v37 = vsel %vm2086_vm7, %v22463_v36, 0.0 }
0x1c1c   : > { %9594 = vadd.xlane.f32.xlu1 %v9593_v37  ;;  %v9590_v0 = vsel %vm2086_vm7, %v22465_v28, 0.0 }
0x1c1d   : > { %9591 = vadd.xlane.f32.xlu0 %v9590_v0 }
0x1c3f   : > { %v16690_v34 = vpop.f32.mrb[198].mxu0 }
0x1c40   : > { %v8494_v45 = vpop.f32.mrb[199].mxu0 }
0x1c41   : > { %16708 = vmatprep.mubr.msk.f32.mxu0 %vm1888_vm5, %v8494_v45 }
0x1c42   : > { %16709 = vmatmul.mubr.msk.f32.vlgmr.msra.gmra.mrb[210].mxu0 %vm1888_vm5, %v16690_v34 }
0x1c43   : > { %v16693_v49 = vpop.f32.mrb[200].mxu0  ;;  %16727 = vmatpush3.msra.mxu0 %v22408_v30 }
0x1c44   : > { %v8504_v38 = vpop.f32.mrb[201].mxu0  ;;  %16786 = vmatprep.subr.msk.mxu0 %vm1447_vm4, %v14334_v31 }
0x1c45   : > { %16711 = vmatprep.mubr.msk.f32.mxu0 %vm1888_vm5, %v8504_v38 }
0x1c46   : > { %16712 = vmatmul.mubr.msk.f32.gmra.mrb[212].mxu0 %vm1888_vm5, %v16693_v49 }
0x1c47   : > { %v16696_v53 = vpop.f32.mrb[202].mxu0 }
0x1c48   : > { %v8514_v57 = vpop.f32.mrb[203].mxu0 }
0x1c49   : > { %16714 = vmatprep.mubr.msk.f32.mxu0 %vm1888_vm5, %v8514_v57 }
0x1c4a   : > { %16715 = vmatmul.mubr.msk.f32.gmra.mrb[214].mxu0 %vm1888_vm5, %v16696_v53 }
0x1c4b   : > { %v16699_v43 = vpop.f32.mrb[204].mxu0 }
0x1c4c   : > { %v8524_v2 = vpop.f32.mrb[205].mxu0 }
0x1c4d   : > { %16717 = vmatprep.mubr.msk.f32.mxu0 %vm1888_vm5, %v8524_v2 }
0x1c4e   : > { %16718 = vmatmul.mubr.msk.f32.gmra.mrb[216].mxu0 %vm1888_vm5, %v16699_v43 }
0x1c4f   : > { %v16702_v30 = vpop.f32.mrb[206].mxu0 }
0x1c50   : > { %v8534_v3 = vpop.f32.mrb[207].mxu0 }
0x1c51   : > { %16720 = vmatprep.mubr.msk.f32.mxu0 %vm1888_vm5, %v8534_v3 }
0x1c52   : > { %16721 = vmatmul.mubr.msk.f32.gmra.mrb[218].mxu0 %vm1888_vm5, %v16702_v30 }
0x1c53   : > { %v16705_v48 = vpop.f32.mrb[208].mxu0 }
0x1c54   : > { %v8544_v44 = vpop.f32.mrb[209].mxu0 }
0x1c55   : > { %16723 = vmatprep.mubr.msk.f32.mxu0 %vm1888_vm5, %v8544_v44 }
0x1c56   : > { %16724 = vmatmul.mubr.msk.f32.gmra.mrb[220].mxu0 %vm1888_vm5, %v16705_v48 }
0x1c57   : > { %16728 = vmatprep.mubr.msk.f32.mxu0 %vm1888_vm5, %v21886_v11  ;;  %v23812_v11 = vld [vmem:[#allocation30_spill] sm:$0xff] }
0x1c5a   : > { %16729 = vmatmul.mubr.msk.f32.vlgmr.msra.gmra.mrb[210].mxu0 %vm1888_vm5, %v21884_v15  ;;  %v23811_v15 = vld [vmem:[#allocation32_spill] sm:$0xff] }
0x1c5b   : > { %16731 = vmatprep.mubr.msk.f32.mxu0 %vm1888_vm5, %v21890_v10  ;;  %16787 = vmatpush3.xpose.msk.msra.mxu0 %vm1447_vm4, %v14334_v31 }
0x1c5e   : > { %16732 = vmatmul.mubr.msk.f32.gmra.mrb[212].mxu0 %vm1888_vm5, %v21888_v27 }
0x1c5f   : > { %16734 = vmatprep.mubr.msk.f32.mxu0 %vm1888_vm5, %v21894_v21  ;;  %v14336_v21 = vld [vmem:[%s23662_s12 + $0x16] ss:$0 sm:$0xff] }
0x1c62   : > { %16735 = vmatmul.mubr.msk.f32.gmra.mrb[214].mxu0 %vm1888_vm5, %v21892_v42 }
0x1c63   : > { %16737 = vmatprep.mubr.msk.f32.mxu0 %vm1888_vm5, %v21898_v50 }
0x1c66   : > { %16738 = vmatmul.mubr.msk.f32.gmra.mrb[216].mxu0 %vm1888_vm5, %v21896_v29 }
0x1c67   : > { %16740 = vmatprep.mubr.msk.f32.mxu0 %vm1888_vm5, %v21902_v55 }
0x1c6a   : > { %16741 = vmatmul.mubr.msk.f32.gmra.mrb[218].mxu0 %vm1888_vm5, %v21900_v19 }
0x1c6b   : > { %16743 = vmatprep.mubr.msk.f32.mxu0 %vm1888_vm5, %v23811_v15 }
0x1c6e   : > { %16744 = vmatmul.mubr.msk.f32.gmra.mrb[220].mxu0 %vm1888_vm5, %v23812_v11 }
0x1c6f   : > { %16788 = vmatprep.mubr.msk.f32.mxu0 %vm1447_vm4, %v21342_v32 }
0x1c72   : > { %16789 = vmatmul.mubr.msk.f32.vlgmr.msra.gmra.mrb[222].mxu0 %vm1447_vm4, %v21346_v46 }
0x1c73   : > { %16791 = vmatprep.mubr.msk.f32.mxu0 %vm1447_vm4, %v21360_v16 }
0x1c76   : > { %16792 = vmatmul.mubr.msk.f32.gmra.mrb[224].mxu0 %vm1447_vm4, %v21366_v5 }
0x1c77   : > { %16794 = vmatprep.mubr.msk.f32.mxu0 %vm1447_vm4, %v21380_v35 }
0x1c7a   : > { %16795 = vmatmul.mubr.msk.f32.gmra.mrb[226].mxu0 %vm1447_vm4, %v21384_v52 }
0x1c7b   : > { %16797 = vmatprep.mubr.msk.f32.mxu0 %vm1447_vm4, %v21398_v56 }
0x1c7e   : > { %16798 = vmatmul.mubr.msk.f32.gmra.mrb[228].mxu0 %vm1447_vm4, %v21402_v22 }
0x1c7f   : > { %16800 = vmatprep.mubr.msk.f32.mxu0 %vm1447_vm4, %v21416_v47 }
0x1c82   : > { %16801 = vmatmul.mubr.msk.f32.gmra.mrb[230].mxu0 %vm1447_vm4, %v21420_v61 }
0x1c83   : > { %16803 = vmatprep.mubr.msk.f32.mxu0 %vm1447_vm4, %v21433_v63 }
0x1c86   : > { %16804 = vmatmul.mubr.msk.f32.gmra.mrb[232].mxu0 %vm1447_vm4, %v21436_v41 }
0x1c95   : > { %v9565_v55 = vpop.xlane.xlu1 %9564 }
0x1c96   : > { %v9562_v27 = vpop.xlane.xlu0 %9561 }
0x1c97   : > { %18492 = vrcp.f32 %v9562_v27 }
0x1c98   : > { %18494 = vrcp.f32 %v9565_v55 }
0x1c9a   : > { %v9568_v23 = vpop.xlane.xlu0 %9567 }
0x1c9b   : > { %18496 = vrcp.f32 %v9568_v23 }
0x1c9e   : > { %v9574_v57 = vpop.xlane.xlu0 %9573 }
0x1ca1   : > { %v18493_v10 = vpop.eup %18492 }
0x1ca2   : > { %v9597_v42 = vmul.f32 %v18493_v10, %v22421_v14  ;;  %v9571_v14 = vpop.xlane.xlu1 %9570  ;;  %v9580_v27 = vpop.xlane.xlu0 %9579 }
0x1ca3   : > { %18498 = vrcp.f32 %v9571_v14 }
0x1ca4   : > { %16872 = vmatprep.mubr.msk.f32.mxu0 %vm2086_vm7, %v9597_v42  ;;  %18500 = vrcp.f32 %v9574_v57 }
0x1ca6   : > { %v9577_v48 = vpop.xlane.xlu1 %9576  ;;  %v9586_v55 = vpop.xlane.xlu0 %9585 }
0x1ca7   : > { %18502 = vrcp.f32 %v9577_v48 }
0x1ca8   : > { %18504 = vrcp.f32 %v9580_v27 }
0x1d45   : > { %v16790_v29 = vpop.f32.mrb[222].mxu0 }
0x1d46   : > { %v9238_v50 = vadd.f32 %v16790_v29, %v14336_v21  ;;  %v9232_v19 = vpop.f32.mrb[223].mxu0 }
0x1d47   : > { %v9233_v24 = vadd.f32 %v14336_v21, %v9232_v19 }
0x1d49   : > { %v17722_v62 = vpack.c.bf16 %v9238_v50, %v9233_v24  ;;  %v16793_v26 = vpop.f32.mrb[224].mxu0  ;;  %v9583_v50 = vpop.xlane.xlu1 %9582 }
0x1d4a   : > { %v9248_v37 = vadd.f32 %v16793_v26, %v14336_v21  ;;  %v9242_v0 = vpop.f32.mrb[225].mxu0  ;;  %18506 = vrcp.f32 %v9583_v50 }
0x1d4b   : > { %v9243_v34 = vadd.f32 %v14336_v21, %v9242_v0  ;;  %17723 = vmatprep.subr.bf16.mxu0 %v17722_v62  ;;  %v18495_v0 = vpop.eup %18494  ;;  %18508 = vrcp.f32 %v9586_v55  ;;  %v10036_v55 = vadd.f32 %v22354_v59, %v22365_v17 }
0x1d4c   : > { %17725 = vmatpush3.bf16.msra.mxu0 %v17722_v62  ;;  %v18497_v14 = vpop.eup %18496 }
0x1d4d   : > { %v17726_v45 = vpack.c.bf16 %v9248_v37, %v9243_v34  ;;  %v16796_v31 = vpop.f32.mrb[226].mxu0  ;;  %v14386_v34 = vld [vmem:[%s23663_s13 + $0x30] sm:$0xff] }
0x1d4e   : > { %v9258_v49 = vadd.f32 %v16796_v31, %v14336_v21  ;;  %v9252_v38 = vpop.f32.mrb[227].mxu0  ;;  %v9599_v31 = vmul.f32 %v18495_v0, %v22419_v12 }
0x1d4f   : > { %v9253_v53 = vadd.f32 %v14336_v21, %v9252_v38  ;;  %17727 = vmatprep.subr.bf16.mxu0 %v17726_v45  ;;  %v9601_v38 = vmul.f32 %v18497_v14, %v22431_v20 }
0x1d50   : > { %17729 = vmatpush3.bf16.msra.mxu0 %v17726_v45  ;;  %v9589_v45 = vpop.xlane.xlu1 %9588 }
0x1d51   : > { %v17730_v43 = vpack.c.bf16 %v9258_v49, %v9253_v53  ;;  %v16799_v2 = vpop.f32.mrb[228].mxu0  ;;  %v9592_v49 = vpop.xlane.xlu0 %9591  ;;  %18510 = vrcp.f32 %v9589_v45 }
0x1d52   : > { %v9268_v30 = vadd.f32 %v16799_v2, %v14336_v21  ;;  %v9262_v3 = vpop.f32.mrb[229].mxu0  ;;  %18512 = vrcp.f32 %v9592_v49 }
0x1d53   : > { %v9263_v44 = vadd.f32 %v14336_v21, %v9262_v3  ;;  %17731 = vmatprep.subr.bf16.mxu0 %v17730_v43 }
0x1d54   : > { %17733 = vmatpush3.bf16.msra.mxu0 %v17730_v43  ;;  %v9595_v57 = vpop.xlane.xlu1 %9594 }
0x1d55   : > { %v17734_v15 = vpack.c.bf16 %v9268_v30, %v9263_v44  ;;  %v16802_v11 = vpop.f32.mrb[230].mxu0  ;;  %18514 = vrcp.f32 %v9595_v57 }
0x1d56   : > { %v9278_v10 = vadd.f32 %v16802_v11, %v14336_v21  ;;  %v9272_v42 = vpop.f32.mrb[231].mxu0 }
0x1d57   : > { %v9273_v29 = vadd.f32 %v14336_v21, %v9272_v42  ;;  %17735 = vmatprep.subr.bf16.mxu0 %v17734_v15 }
0x1d58   : > { %17737 = vmatpush3.bf16.msra.mxu0 %v17734_v15 }
0x1d59   : > { %v17738_v19 = vpack.c.bf16 %v9278_v10, %v9273_v29  ;;  %v16805_v24 = vpop.f32.mrb[232].mxu0 }
0x1d5a   : > { %v9288_v62 = vadd.f32 %v16805_v24, %v14336_v21  ;;  %v9282_v26 = vpop.f32.mrb[233].mxu0 }
0x1d5b   : > { %v9283_v37 = vadd.f32 %v14336_v21, %v9282_v26  ;;  %17739 = vmatprep.subr.bf16.mxu0 %v17738_v19  ;;  %v18499_v21 = vpop.eup %18498 }
0x1d5c   : > { %17741 = vmatpush3.bf16.msra.mxu0 %v17738_v19  ;;  %v18501_v53 = vpop.eup %18500  ;;  %v9603_v43 = vmul.f32 %v18499_v21, %v22429_v54 }
0x1d5d   : > { %v17742_v23 = vpack.c.bf16 %v9288_v62, %v9283_v37  ;;  %v18503_v2 = vpop.eup %18502  ;;  %v9605_v12 = vmul.f32 %v18501_v53, %v22441_v6 }
0x1d5e   : > { %v18505_v30 = vpop.eup %18504  ;;  %v9607_v20 = vmul.f32 %v18503_v2, %v22439_v25 }
0x1d5f   : > { %17743 = vmatprep.subr.bf16.mxu0 %v17742_v23  ;;  %v18507_v3 = vpop.eup %18506  ;;  %v9609_v48 = vmul.f32 %v18505_v30, %v22449_v40 }
0x1d60   : > { %17745 = vmatpush3.bf16.msra.mxu0 %v17742_v23  ;;  %v18509_v44 = vpop.eup %18508  ;;  %v9611_v54 = vmul.f32 %v18507_v3, %v22447_v51  ;;  %v14415_v51 = vld [vmem:[%s23661_s11 + $0x98] sm:$0xff]  ;;  %v14417_v23 = vld [vmem:[%s23662_s12 + $0x13] ss:$0 sm:$0xff] }
0x1d61   : > { %16890 = vmatprep.subr.mxu0 %v14386_v34  ;;  %v18511_v15 = vpop.eup %18510  ;;  %v9613_v6 = vmul.f32 %v18509_v44, %v22457_v8 }
0x1d62   : > { %v18513_v11 = vpop.eup %18512  ;;  %v9615_v25 = vmul.f32 %v18511_v15, %v22455_v1 }
0x1d63   : > { %16873 = vmatmul.mubr.msk.f32.vlgmr.msra.gmra.mrb[234].mxu0 %vm2086_vm7, %v9599_v31  ;;  %v18515_v27 = vpop.eup %18514  ;;  %v9617_v40 = vmul.f32 %v18513_v11, %v22465_v28 }
0x1d64   : > { %16875 = vmatprep.mubr.msk.f32.mxu0 %vm2086_vm7, %v9601_v38  ;;  %16891 = vmatpush3.msra.mxu0 %v14386_v34  ;;  %v9619_v10 = vmul.f32 %v18515_v27, %v22463_v36 }
0x1d65   : > { %16930 = vmatprep.subr.msk.mxu0 %vm1447_vm4, %v14415_v51 }
0x1d67   : > { %16876 = vmatmul.mubr.msk.f32.gmra.mrb[236].mxu0 %vm2086_vm7, %v9603_v43 }
0x1d68   : > { %16878 = vmatprep.mubr.msk.f32.mxu0 %vm2086_vm7, %v9605_v12 }
0x1d6b   : > { %16879 = vmatmul.mubr.msk.f32.gmra.mrb[238].mxu0 %vm2086_vm7, %v9607_v20 }
0x1d6c   : > { %16881 = vmatprep.mubr.msk.f32.mxu0 %vm2086_vm7, %v9609_v48 }
0x1d6f   : > { %16882 = vmatmul.mubr.msk.f32.gmra.mrb[240].mxu0 %vm2086_vm7, %v9611_v54 }
0x1d70   : > { %16884 = vmatprep.mubr.msk.f32.mxu0 %vm2086_vm7, %v9613_v6 }
0x1d73   : > { %16885 = vmatmul.mubr.msk.f32.gmra.mrb[242].mxu0 %vm2086_vm7, %v9615_v25 }
0x1d74   : > { %16887 = vmatprep.mubr.msk.f32.mxu0 %vm2086_vm7, %v9617_v40 }
0x1d77   : > { %16888 = vmatmul.mubr.msk.f32.gmra.mrb[244].mxu0 %vm2086_vm7, %v9619_v10 }
0x1e36   : > { %v16874_v8 = vpop.f32.mrb[234].mxu0 }
0x1e37   : > { %v9722_v42 = vpop.f32.mrb[235].mxu0 }
0x1e38   : > { %16892 = vmatprep.mubr.msk.f32.mxu0 %vm1888_vm5, %v9722_v42 }
0x1e39   : > { %16893 = vmatmul.mubr.msk.f32.vlgmr.msra.gmra.mrb[210].mxu0 %vm1888_vm5, %v16874_v8 }
0x1e3a   : > { %v16877_v1 = vpop.f32.mrb[236].mxu0  ;;  %16931 = vmatpush3.xpose.msk.msra.mxu0 %vm1447_vm4, %v14415_v51 }
0x1e3b   : > { %v9732_v28 = vpop.f32.mrb[237].mxu0 }
0x1e3c   : > { %16895 = vmatprep.mubr.msk.f32.mxu0 %vm1888_vm5, %v9732_v28 }
0x1e3d   : > { %16896 = vmatmul.mubr.msk.f32.gmra.mrb[212].mxu0 %vm1888_vm5, %v16877_v1 }
0x1e3e   : > { %v16880_v36 = vpop.f32.mrb[238].mxu0 }
0x1e3f   : > { %v9742_v29 = vpop.f32.mrb[239].mxu0 }
0x1e40   : > { %16898 = vmatprep.mubr.msk.f32.mxu0 %vm1888_vm5, %v9742_v29 }
0x1e41   : > { %16899 = vmatmul.mubr.msk.f32.gmra.mrb[214].mxu0 %vm1888_vm5, %v16880_v36  ;;  %v23818_v36 = vld [vmem:[#allocation19_spill] sm:$0xff] }
0x1e42   : > { %v16883_v50 = vpop.f32.mrb[240].mxu0 }
0x1e43   : > { %v9752_v19 = vpop.f32.mrb[241].mxu0 }
0x1e44   : > { %16901 = vmatprep.mubr.msk.f32.mxu0 %vm1888_vm5, %v9752_v19  ;;  %v23819_v19 = vld [vmem:[#allocation20_spill] sm:$0xff] }
0x1e45   : > { %16902 = vmatmul.mubr.msk.f32.gmra.mrb[216].mxu0 %vm1888_vm5, %v16883_v50 }
0x1e46   : > { %v16886_v24 = vpop.f32.mrb[242].mxu0 }
0x1e47   : > { %v9762_v62 = vpop.f32.mrb[243].mxu0 }
0x1e48   : > { %16904 = vmatprep.mubr.msk.f32.mxu0 %vm1888_vm5, %v9762_v62 }
0x1e49   : > { %16905 = vmatmul.mubr.msk.f32.gmra.mrb[218].mxu0 %vm1888_vm5, %v16886_v24 }
0x1e4a   : > { %v16889_v26 = vpop.f32.mrb[244].mxu0 }
0x1e4b   : > { %v9772_v37 = vpop.f32.mrb[245].mxu0 }
0x1e4c   : > { %16907 = vmatprep.mubr.msk.f32.mxu0 %vm1888_vm5, %v9772_v37 }
0x1e4d   : > { %16908 = vmatmul.mubr.msk.f32.gmra.mrb[220].mxu0 %vm1888_vm5, %v16889_v26 }
0x1e4e   : > { %16932 = vmatprep.mubr.msk.f32.mxu0 %vm1447_vm4, %v21342_v32 }
0x1e51   : > { %16933 = vmatmul.mubr.msk.f32.vlgmr.msra.gmra.mrb[246].mxu0 %vm1447_vm4, %v21346_v46 }
0x1e52   : > { %16935 = vmatprep.mubr.msk.f32.mxu0 %vm1447_vm4, %v21360_v16 }
0x1e55   : > { %16936 = vmatmul.mubr.msk.f32.gmra.mrb[248].mxu0 %vm1447_vm4, %v21366_v5 }
0x1e56   : > { %16938 = vmatprep.mubr.msk.f32.mxu0 %vm1447_vm4, %v21380_v35 }
0x1e59   : > { %16939 = vmatmul.mubr.msk.f32.gmra.mrb[250].mxu0 %vm1447_vm4, %v21384_v52 }
0x1e5a   : > { %16941 = vmatprep.mubr.msk.f32.mxu0 %vm1447_vm4, %v21398_v56 }
0x1e5d   : > { %16942 = vmatmul.mubr.msk.f32.gmra.mrb[252].mxu0 %vm1447_vm4, %v21402_v22 }
0x1e5e   : > { %16944 = vmatprep.mubr.msk.f32.mxu0 %vm1447_vm4, %v21416_v47 }
0x1e61   : > { %16945 = vmatmul.mubr.msk.f32.gmra.mrb[254].mxu0 %vm1447_vm4, %v21420_v61 }
0x1e62   : > { %16947 = vmatprep.mubr.msk.f32.mxu0 %vm1447_vm4, %v21433_v63 }
0x1e65   : > { %16948 = vmatmul.mubr.msk.f32.gmra.mrb[0].mxu0 %vm1447_vm4, %v21436_v41 }
0x1e66   : > { %16994 = vmatprep.mubr.msk.f32.mxu0 %vm1888_vm5, %v10036_v55 }
0x1f24   : > { %v16934_v0 = vpop.f32.mrb[246].mxu0 }
0x1f25   : > { %v10179_v34 = vadd.f32 %v16934_v0, %v14417_v23  ;;  %v10173_v14 = vpop.f32.mrb[247].mxu0 }
0x1f26   : > { %v10174_v45 = vadd.f32 %v14417_v23, %v10173_v14 }
0x1f28   : > { %v17746_v31 = vpack.c.bf16 %v10179_v34, %v10174_v45  ;;  %v16937_v21 = vpop.f32.mrb[248].mxu0 }
0x1f29   : > { %v10189_v49 = vadd.f32 %v16937_v21, %v14417_v23  ;;  %v10183_v38 = vpop.f32.mrb[249].mxu0 }
0x1f2a   : > { %v10184_v53 = vadd.f32 %v14417_v23, %v10183_v38  ;;  %17748 = vmatprep.subr.msk.bf16.mxu0 %vm19496_vm6, %v17746_v31 }
0x1f2b   : > { %17751 = vmatpush3.bf16.xpose.msk.msra.mxu0 %vm19496_vm6, %v17746_v31 }
0x1f2c   : > { %v17752_v59 = vpack.c.bf16 %v10189_v49, %v10184_v53  ;;  %v16940_v17 = vpop.f32.mrb[250].mxu0 }
0x1f2d   : > { %v10199_v57 = vadd.f32 %v16940_v17, %v14417_v23  ;;  %v10193_v43 = vpop.f32.mrb[251].mxu0 }
0x1f2e   : > { %v10194_v2 = vadd.f32 %v14417_v23, %v10193_v43  ;;  %17754 = vmatprep.subr.msk.bf16.mxu0 %vm19496_vm6, %v17752_v59 }
0x1f30   : > { %v17758_v12 = vpack.c.bf16 %v10199_v57, %v10194_v2  ;;  %v16943_v30 = vpop.f32.mrb[252].mxu0 }
0x1f31   : > { %v10209_v20 = vadd.f32 %v16943_v30, %v14417_v23  ;;  %v10203_v3 = vpop.f32.mrb[253].mxu0 }
0x1f32   : > { %v10204_v48 = vadd.f32 %v14417_v23, %v10203_v3 }
0x1f33   : > { %17757 = vmatpush3.bf16.xpose.msk.msra.mxu0 %vm19496_vm6, %v17752_v59 }
0x1f34   : > { %v17764_v44 = vpack.c.bf16 %v10209_v20, %v10204_v48  ;;  %v16946_v54 = vpop.f32.mrb[254].mxu0  ;;  %17760 = vmatprep.subr.msk.bf16.mxu0 %vm19496_vm6, %v17758_v12 }
0x1f35   : > { %v10219_v15 = vadd.f32 %v16946_v54, %v14417_v23  ;;  %v10213_v6 = vpop.f32.mrb[255].mxu0 }
0x1f36   : > { %v10214_v11 = vadd.f32 %v14417_v23, %v10213_v6 }
0x1f38   : > { %v17770_v25 = vpack.c.bf16 %v10219_v15, %v10214_v11  ;;  %v16949_v27 = vpop.f32.mrb[0].mxu0  ;;  %v18700_v11 = vld [vmem:[%s23795_s30 + $0x28] sm:$0xff] }
0x1f39   : > { %v10229_v40 = vadd.f32 %v16949_v27, %v14417_v23  ;;  %v10223_v10 = vpop.f32.mrb[1].mxu0 }
0x1f3a   : > { %v10224_v51 = vadd.f32 %v14417_v23, %v10223_v10 }
0x1f3b   : > { %17763 = vmatpush3.bf16.xpose.msk.msra.mxu0 %vm19496_vm6, %v17758_v12 }
0x1f3c   : > { %v17776_v8 = vpack.c.bf16 %v10229_v40, %v10224_v51  ;;  %17766 = vmatprep.subr.msk.bf16.mxu0 %vm19496_vm6, %v17764_v44  ;;  %v18701_v40 = vld [vmem:[%s23795_s30 + $0x20] sm:$0xff] }
0x1f43   : > { %17769 = vmatpush3.bf16.xpose.msk.msra.mxu0 %vm19496_vm6, %v17764_v44 }
0x1f44   : > { %17772 = vmatprep.subr.msk.bf16.mxu0 %vm19496_vm6, %v17770_v25 }
0x1f4b   : > { %17775 = vmatpush3.bf16.xpose.msk.msra.mxu0 %vm19496_vm6, %v17770_v25 }
0x1f4c   : > { %17778 = vmatprep.subr.msk.bf16.mxu0 %vm19496_vm6, %v17776_v8 }
0x1f53   : > { %17781 = vmatpush3.bf16.xpose.msk.msra.mxu0 %vm19496_vm6, %v17776_v8  ;;  %v23820_v8 = vld [vmem:[#allocation21_spill] sm:$0xff] }
0x1f5a   : > { %16995 = vmatmul.mubr.msk.f32.vlgmr.msra.gmra.mrb[2].mxu0 %vm1888_vm5, %v22363_v9  ;;  %v23814_v9 = vld [vmem:[#allocation29_spill] sm:$0xff] }
0x1f5b   : > { %16997 = vmatprep.mubr.msk.f32.mxu0 %vm1888_vm5, %v22373_v33 }
0x1f5e   : > { %16998 = vmatmul.mubr.msk.f32.gmra.mrb[4].mxu0 %vm1888_vm5, %v22370_v39  ;;  %v23815_v39 = vld [vmem:[#allocation28_spill] sm:$0xff] }
0x1f5f   : > { %17000 = vmatprep.mubr.msk.f32.mxu0 %vm1888_vm5, %v22379_v18 }
0x1f62   : > { %17001 = vmatmul.mubr.msk.f32.gmra.mrb[6].mxu0 %vm1888_vm5, %v22376_v4  ;;  %v23816_v4 = vld [vmem:[#allocation31_spill] sm:$0xff] }
0x1f63   : > { %17003 = vmatprep.mubr.msk.f32.mxu0 %vm1888_vm5, %v22385_v7  ;;  %v23817_v7 = vld [vmem:[#allocation18_spill] sm:$0xff] }
0x1f66   : > { %17004 = vmatmul.mubr.msk.f32.gmra.mrb[8].mxu0 %vm1888_vm5, %v22382_v60 }
0x1f67   : > { %17006 = vmatprep.mubr.msk.f32.mxu0 %vm1888_vm5, %v22391_v58 }
0x1f6a   : > { %17007 = vmatmul.mubr.msk.f32.gmra.mrb[10].mxu0 %vm1888_vm5, %v23813_v13 }
0x1f6b   : > { %17009 = vmatprep.mubr.msk.f32.mxu0 %vm1888_vm5, %v23814_v9 }
0x1f6e   : > { %17010 = vmatmul.mubr.msk.f32.gmra.mrb[12].mxu0 %vm1888_vm5, %v23815_v39  ;;  %v23821_v39 = vld [vmem:[#allocation22_spill] sm:$0xff] }
0x202d   : > { %v16996_v33 = vpop.f32.mrb[2].mxu0 }
0x202e   : > { %v10514_v18 = vadd.f32 %v23816_v4, %v16996_v33  ;;  %v10508_v42 = vpop.f32.mrb[3].mxu0 }
0x202f   : > { %v10509_v1 = vadd.f32 %v23817_v7, %v10508_v42 }
0x2030   : > { %v10570_v60 = vsel %vm2086_vm7, %v10514_v18, -inf }
0x2031   : > { %10571 = vmax.xlane.f32.xlu1 %v10570_v60  ;;  %v16999_v28 = vpop.f32.mrb[4].mxu0  ;;  %v10567_v58 = vsel %vm2086_vm7, %v10509_v1, -inf }
0x2032   : > { %v10524_v29 = vadd.f32 %v23818_v36, %v16999_v28  ;;  %v10518_v50 = vpop.f32.mrb[5].mxu0  ;;  %10568 = vmax.xlane.f32.xlu0 %v10567_v58  ;;  %v23824_v58 = vld [vmem:[#allocation25_spill] sm:$0xff] }
0x2033   : > { %v10519_v24 = vadd.f32 %v23819_v19, %v10518_v50  ;;  %v23825_v50 = vld [vmem:[#allocation26_spill] sm:$0xff] }
0x2034   : > { %v10576_v62 = vsel %vm2086_vm7, %v10524_v29, -inf }
0x2035   : > { %10577 = vmax.xlane.f32.xlu1 %v10576_v62  ;;  %v17002_v26 = vpop.f32.mrb[6].mxu0  ;;  %v10573_v37 = vsel %vm2086_vm7, %v10519_v24, -inf }
0x2036   : > { %v10528_v55 = vpop.f32.mrb[7].mxu0  ;;  %10574 = vmax.xlane.f32.xlu0 %v10573_v37  ;;  %v10534_v25 = vadd.f32 %v18700_v11, %v17002_v26 }
0x2037   : > { %v10529_v10 = vadd.f32 %v18701_v40, %v10528_v55 }
0x2038   : > { %v10582_v9 = vsel %vm2086_vm7, %v10534_v25, -inf }
0x2039   : > { %v17005_v23 = vpop.f32.mrb[8].mxu0  ;;  %v10579_v4 = vsel %vm2086_vm7, %v10529_v10, -inf }
0x203a   : > { %v10538_v0 = vpop.f32.mrb[9].mxu0  ;;  %v10544_v13 = vadd.f32 %v23820_v8, %v17005_v23 }
0x203b   : > { %v10539_v33 = vadd.f32 %v23821_v39, %v10538_v0 }
0x203c   : > { %v10588_v7 = vsel %vm2086_vm7, %v10544_v13, -inf }
0x203d   : > { %v17008_v34 = vpop.f32.mrb[10].mxu0  ;;  %v10585_v28 = vsel %vm2086_vm7, %v10539_v33, -inf }
0x203e   : > { %v10548_v14 = vpop.f32.mrb[11].mxu0 }
0x2041   : > { %v17011_v45 = vpop.f32.mrb[12].mxu0 }
0x2042   : > { %v10558_v31 = vpop.f32.mrb[13].mxu0  ;;  %v10564_v36 = vadd.f32 %v23824_v58, %v17011_v45 }
0x2043   : > { %v10559_v19 = vadd.f32 %v23825_v50, %v10558_v31 }
0x2044   : > { %v10600_v62 = vsel %vm2086_vm7, %v10564_v36, -inf }
0x2045   : > { %v10597_v26 = vsel %vm2086_vm7, %v10559_v19, -inf }
0x20be   : > { %v10572_v21 = vpop.xlane.xlu1 %10571 }
0x20bf   : > { %v10604_v49 = vsub.f32 %v10514_v18, %v10572_v21  ;;  %v10569_v38 = vpop.xlane.xlu0 %10568  ;;  %v23822_v18 = vld [vmem:[#allocation23_spill] sm:$0xff] }
0x20c0   : > { %v10603_v53 = vsub.f32 %v10509_v1, %v10569_v38  ;;  %v10554_v42 = vadd.f32 %v23822_v18, %v17008_v34  ;;  %v23823_v1 = vld [vmem:[#allocation24_spill] sm:$0xff] }
0x20c1   : > { %v10617_v59 = vmul.f32 1.442695, %v10604_v49  ;;  %v10549_v60 = vadd.f32 %v23823_v1, %v10548_v14 }
0x20c2   : > { %v10615_v17 = vmul.f32 1.442695, %v10603_v53  ;;  %v10578_v57 = vpop.xlane.xlu1 %10577 }
0x20c3   : > { %18516 = vpow2.f32 %v10617_v59  ;;  %v10606_v43 = vsub.f32 %v10524_v29, %v10578_v57  ;;  %v10575_v2 = vpop.xlane.xlu0 %10574  ;;  %v10594_v29 = vsel %vm2086_vm7, %v10554_v42, -inf }
0x20c4   : > { %18518 = vpow2.f32 %v10615_v17  ;;  %v10605_v12 = vsub.f32 %v10519_v24, %v10575_v2  ;;  %v10591_v24 = vsel %vm2086_vm7, %v10549_v60, -inf }
0x20c5   : > { %v10621_v30 = vmul.f32 1.442695, %v10606_v43 }
0x20c6   : > { %v10619_v20 = vmul.f32 1.442695, %v10605_v12 }
0x20c7   : > { %18520 = vpow2.f32 %v10621_v30 }
0x20c8   : > { %18522 = vpow2.f32 %v10619_v20 }
0x20cd   : > { %v18517_v3 = vpop.eup %18516 }
0x20ce   : > { %v18519_v48 = vpop.eup %18518  ;;  %v10642_v44 = vsel %vm2086_vm7, %v18517_v3, 0.0 }
0x20cf   : > { %10643 = vadd.xlane.f32.xlu1 %v10642_v44  ;;  %v10639_v54 = vsel %vm2086_vm7, %v18519_v48, 0.0 }
0x20d0   : > { %10640 = vadd.xlane.f32.xlu0 %v10639_v54 }
0x20d1   : > { %v22670_v15 = vpop.eup %18520 }
0x20d2   : > { %v22672_v6 = vpop.eup %18522  ;;  %v10648_v27 = vsel %vm2086_vm7, %v22670_v15, 0.0 }
0x20d3   : > { %10649 = vadd.xlane.f32.xlu1 %v10648_v27  ;;  %v10645_v51 = vsel %vm2086_vm7, %v22672_v6, 0.0 }
0x20d4   : > { %10646 = vadd.xlane.f32.xlu0 %v10645_v51 }
0x20d7   : > { %10583 = vmax.xlane.f32.xlu1 %v10582_v9 }
0x20d8   : > { %10580 = vmax.xlane.f32.xlu0 %v10579_v4 }
0x20db   : > { %10589 = vmax.xlane.f32.xlu1 %v10588_v7 }
0x20dc   : > { %10586 = vmax.xlane.f32.xlu0 %v10585_v28 }
0x20df   : > { %10595 = vmax.xlane.f32.xlu1 %v10594_v29 }
0x20e0   : > { %10592 = vmax.xlane.f32.xlu0 %v10591_v24 }
0x20e3   : > { %10601 = vmax.xlane.f32.xlu1 %v10600_v62 }
0x20e4   : > { %10598 = vmax.xlane.f32.xlu0 %v10597_v26 }
0x215c   : > { %v10644_v37 = vpop.xlane.xlu1 %10643 }
0x215d   : > { %18524 = vrcp.f32 %v10644_v37  ;;  %v10641_v55 = vpop.xlane.xlu0 %10640  ;;  %v14483_v37 = vld [vmem:[%s23663_s13 + $0x38] sm:$0xff] }
0x215e   : > { %18526 = vrcp.f32 %v10641_v55  ;;  %17054 = vmatprep.subr.mxu0 %v14483_v37 }
0x215f   : > { %17055 = vmatpush3.msra.mxu0 %v14483_v37  ;;  %v14499_v37 = vld [vmem:[%s23665_s15 + $0x40] sm:$0xff] }
0x2160   : > { %v10650_v23 = vpop.xlane.xlu1 %10649 }
0x2161   : > { %18528 = vrcp.f32 %v10650_v23  ;;  %v10647_v0 = vpop.xlane.xlu0 %10646 }
0x2162   : > { %18530 = vrcp.f32 %v10647_v0 }
0x2164   : > { %v10584_v34 = vpop.xlane.xlu1 %10583 }
0x2165   : > { %v10608_v14 = vsub.f32 %v10534_v25, %v10584_v34  ;;  %v10581_v45 = vpop.xlane.xlu0 %10580 }
0x2166   : > { %v10607_v31 = vsub.f32 %v10529_v10, %v10581_v45 }
0x2167   : > { %v18525_v21 = vpop.eup %18524  ;;  %v10625_v49 = vmul.f32 1.442695, %v10608_v14 }
0x2168   : > { %v18527_v38 = vpop.eup %18526  ;;  %v10623_v53 = vmul.f32 1.442695, %v10607_v31  ;;  %v10590_v59 = vpop.xlane.xlu1 %10589  ;;  %v10678_v2 = vmul.f32 %v18525_v21, %v18517_v3 }
0x2169   : > { %18532 = vpow2.f32 %v10625_v49  ;;  %v10610_v17 = vsub.f32 %v10544_v13, %v10590_v59  ;;  %v10587_v57 = vpop.xlane.xlu0 %10586  ;;  %v10676_v43 = vmul.f32 %v18527_v38, %v18519_v48 }
0x216a   : > { %18534 = vpow2.f32 %v10623_v53  ;;  %v10609_v12 = vsub.f32 %v10539_v33, %v10587_v57 }
0x216b   : > { %v18529_v30 = vpop.eup %18528  ;;  %v10629_v20 = vmul.f32 1.442695, %v10610_v17  ;;  %17036 = vmatprep.mubr.msk.f32.mxu1 %vm2086_vm7, %v10676_v43 }
0x216c   : > { %v18531_v44 = vpop.eup %18530  ;;  %v10627_v54 = vmul.f32 1.442695, %v10609_v12  ;;  %v10596_v11 = vpop.xlane.xlu1 %10595  ;;  %17037 = vmatmul.mubr.msk.f32.vlgmr.msra.gmra.mrb[2].mxu1 %vm2086_vm7, %v10678_v2  ;;  %v10682_v10 = vmul.f32 %v18529_v30, %v22670_v15 }
0x216d   : > { %18536 = vpow2.f32 %v10629_v20  ;;  %v10612_v25 = vsub.f32 %v10554_v42, %v10596_v11  ;;  %v10593_v27 = vpop.xlane.xlu0 %10592  ;;  %v10680_v40 = vmul.f32 %v18531_v44, %v22672_v6 }
0x216e   : > { %18538 = vpow2.f32 %v10627_v54  ;;  %v10611_v3 = vsub.f32 %v10549_v60, %v10593_v27 }
0x216f   : > { %v10633_v48 = vmul.f32 1.442695, %v10612_v25  ;;  %17039 = vmatprep.mubr.msk.f32.mxu1 %vm2086_vm7, %v10680_v40 }
0x2170   : > { %v10631_v51 = vmul.f32 1.442695, %v10611_v3  ;;  %v10602_v8 = vpop.xlane.xlu1 %10601  ;;  %17040 = vmatmul.mubr.msk.f32.gmra.mrb[4].mxu1 %vm2086_vm7, %v10682_v10 }
0x2171   : > { %18540 = vpow2.f32 %v10633_v48  ;;  %v10614_v13 = vsub.f32 %v10564_v36, %v10602_v8  ;;  %v10599_v9 = vpop.xlane.xlu0 %10598 }
0x2172   : > { %18542 = vpow2.f32 %v10631_v51  ;;  %v10613_v39 = vsub.f32 %v10559_v19, %v10599_v9 }
0x2173   : > { %v18533_v33 = vpop.eup %18532  ;;  %v10637_v4 = vmul.f32 1.442695, %v10614_v13 }
0x2174   : > { %v18535_v18 = vpop.eup %18534  ;;  %v10635_v6 = vmul.f32 1.442695, %v10613_v39  ;;  %v10654_v15 = vsel %vm2086_vm7, %v18533_v33, 0.0 }
0x2175   : > { %18544 = vpow2.f32 %v10637_v4  ;;  %10655 = vadd.xlane.f32.xlu1 %v10654_v15  ;;  %v10651_v42 = vsel %vm2086_vm7, %v18535_v18, 0.0 }
0x2176   : > { %18546 = vpow2.f32 %v10635_v6  ;;  %10652 = vadd.xlane.f32.xlu0 %v10651_v42  ;;  %v22735_v6 = vld [vmem:[#allocation6 + $0x1] ss:$0 sm:$0xff] }
0x2177   : > { %v18537_v7 = vpop.eup %18536 }
0x2178   : > { %v18539_v1 = vpop.eup %18538  ;;  %v10660_v60 = vsel %vm2086_vm7, %v18537_v7, 0.0 }
0x2179   : > { %10661 = vadd.xlane.f32.xlu1 %v10660_v60  ;;  %v10657_v28 = vsel %vm2086_vm7, %v18539_v1, 0.0 }
0x217a   : > { %10658 = vadd.xlane.f32.xlu0 %v10657_v28 }
0x217b   : > { %v18541_v58 = vpop.eup %18540 }
0x217c   : > { %v18543_v36 = vpop.eup %18542  ;;  %v10666_v29 = vsel %vm2086_vm7, %v18541_v58, 0.0 }
0x217d   : > { %10667 = vadd.xlane.f32.xlu1 %v10666_v29  ;;  %v10663_v50 = vsel %vm2086_vm7, %v18543_v36, 0.0 }
0x217e   : > { %10664 = vadd.xlane.f32.xlu0 %v10663_v50 }
0x217f   : > { %v18545_v19 = vpop.eup %18544 }
0x2180   : > { %v18547_v24 = vpop.eup %18546  ;;  %v10672_v62 = vsel %vm2086_vm7, %v18545_v19, 0.0 }
0x2181   : > { %10673 = vadd.xlane.f32.xlu1 %v10672_v62  ;;  %v10669_v26 = vsel %vm2086_vm7, %v18547_v24, 0.0 }
0x2182   : > { %10670 = vadd.xlane.f32.xlu0 %v10669_v26 }
0x2202   : > { %v10656_v55 = vpop.xlane.xlu1 %10655 }
0x2203   : > { %18548 = vrcp.f32 %v10656_v55  ;;  %v10653_v23 = vpop.xlane.xlu0 %10652  ;;  %v14500_v55 = vld [vmem:[%s23665_s15 + $0x48] sm:$0xff] }
0x2204   : > { %18550 = vrcp.f32 %v10653_v23  ;;  %v17806_v23 = vpack.c.bf16 %v14500_v55, %v14499_v37  ;;  %v14506_v37 = vld [vmem:[%s23665_s15 + $0x78] sm:$0xff] }
0x2206   : > { %v10662_v0 = vpop.xlane.xlu1 %10661  ;;  %17808 = vmatprep.subr.msk.bf16.mxu1 %vm20873_vm8, %v17806_v23 }
0x2207   : > { %18552 = vrcp.f32 %v10662_v0  ;;  %v10659_v34 = vpop.xlane.xlu0 %10658  ;;  %17811 = vmatpush3.bf16.xpose.msk.msra.mxu1 %vm20873_vm8, %v17806_v23 }
0x2208   : > { %18554 = vrcp.f32 %v10659_v34 }
0x220a   : > { %v10668_v14 = vpop.xlane.xlu1 %10667 }
0x220b   : > { %18556 = vrcp.f32 %v10668_v14  ;;  %v10665_v45 = vpop.xlane.xlu0 %10664 }
0x220c   : > { %18558 = vrcp.f32 %v10665_v45 }
0x220d   : > { %v18549_v31 = vpop.eup %18548 }
0x220e   : > { %v18551_v21 = vpop.eup %18550  ;;  %v10674_v49 = vpop.xlane.xlu1 %10673  ;;  %v10686_v59 = vmul.f32 %v18549_v31, %v18533_v33 }
0x220f   : > { %18560 = vrcp.f32 %v10674_v49  ;;  %v10671_v38 = vpop.xlane.xlu0 %10670  ;;  %v10684_v53 = vmul.f32 %v18551_v21, %v18535_v18 }
0x2210   : > { %18562 = vrcp.f32 %v10671_v38 }
0x2211   : > { %v18553_v17 = vpop.eup %18552  ;;  %17042 = vmatprep.mubr.msk.f32.mxu1 %vm2086_vm7, %v10684_v53 }
0x2212   : > { %v18555_v57 = vpop.eup %18554  ;;  %17043 = vmatmul.mubr.msk.f32.gmra.mrb[6].mxu1 %vm2086_vm7, %v10686_v59  ;;  %v10690_v2 = vmul.f32 %v18553_v17, %v18537_v7 }
0x2213   : > { %v10688_v43 = vmul.f32 %v18555_v57, %v18539_v1 }
0x2215   : > { %v18557_v12 = vpop.eup %18556  ;;  %17045 = vmatprep.mubr.msk.f32.mxu1 %vm2086_vm7, %v10688_v43 }
0x2216   : > { %v18559_v30 = vpop.eup %18558  ;;  %17046 = vmatmul.mubr.msk.f32.gmra.mrb[8].mxu1 %vm2086_vm7, %v10690_v2  ;;  %v10694_v44 = vmul.f32 %v18557_v12, %v18541_v58 }
0x2217   : > { %v10692_v20 = vmul.f32 %v18559_v30, %v18543_v36 }
0x2219   : > { %v18561_v54 = vpop.eup %18560  ;;  %17048 = vmatprep.mubr.msk.f32.mxu1 %vm2086_vm7, %v10692_v20 }
0x221a   : > { %v18563_v11 = vpop.eup %18562  ;;  %17049 = vmatmul.mubr.msk.f32.gmra.mrb[10].mxu1 %vm2086_vm7, %v10694_v44  ;;  %v10698_v27 = vmul.f32 %v18561_v54, %v18545_v19 }
0x221b   : > { %v10696_v25 = vmul.f32 %v18563_v11, %v18547_v24 }
0x221d   : > { %17051 = vmatprep.mubr.msk.f32.mxu1 %vm2086_vm7, %v10696_v25 }
0x221e   : > { %17052 = vmatmul.mubr.msk.f32.gmra.mrb[12].mxu1 %vm2086_vm7, %v10698_v27 }
0x223f   : > { %v17038_v40 = vpop.f32.mrb[2].mxu1 }
0x2240   : > { %v10801_v10 = vpop.f32.mrb[3].mxu1 }
0x2241   : > { %17056 = vmatprep.mubr.msk.f32.mxu0 %vm1888_vm5, %v10801_v10 }
0x2242   : > { %17057 = vmatmul.mubr.msk.f32.vlgmr.msra.gmra.mrb[210].mxu0 %vm1888_vm5, %v17038_v40 }
0x2243   : > { %v17041_v3 = vpop.f32.mrb[4].mxu1 }
0x2244   : > { %v10811_v48 = vpop.f32.mrb[5].mxu1 }
0x2245   : > { %17059 = vmatprep.mubr.msk.f32.mxu0 %vm1888_vm5, %v10811_v48 }
0x2246   : > { %17060 = vmatmul.mubr.msk.f32.gmra.mrb[212].mxu0 %vm1888_vm5, %v17041_v3 }
0x22e5   : > { %v17044_v51 = vpop.f32.mrb[6].mxu1 }
0x22e6   : > { %v10821_v8 = vpop.f32.mrb[7].mxu1 }
0x22e7   : > { %17062 = vmatprep.mubr.msk.f32.mxu0 %vm1888_vm5, %v10821_v8 }
0x22e8   : > { %17063 = vmatmul.mubr.msk.f32.gmra.mrb[214].mxu0 %vm1888_vm5, %v17044_v51 }
0x22e9   : > { %v17047_v13 = vpop.f32.mrb[8].mxu1 }
0x22ea   : > { %v10831_v9 = vpop.f32.mrb[9].mxu1 }
0x22eb   : > { %17065 = vmatprep.mubr.msk.f32.mxu0 %vm1888_vm5, %v10831_v9 }
0x22ec   : > { %17066 = vmatmul.mubr.msk.f32.gmra.mrb[216].mxu0 %vm1888_vm5, %v17047_v13 }
0x22ed   : > { %v17050_v39 = vpop.f32.mrb[10].mxu1 }
0x22ee   : > { %v10841_v33 = vpop.f32.mrb[11].mxu1 }
0x22ef   : > { %17068 = vmatprep.mubr.msk.f32.mxu0 %vm1888_vm5, %v10841_v33 }
0x22f0   : > { %17069 = vmatmul.mubr.msk.f32.gmra.mrb[218].mxu0 %vm1888_vm5, %v17050_v39 }
0x22f1   : > { %v17053_v4 = vpop.f32.mrb[12].mxu1 }
0x22f2   : > { %v10851_v18 = vpop.f32.mrb[13].mxu1 }
0x22f3   : > { %17071 = vmatprep.mubr.msk.f32.mxu0 %vm1888_vm5, %v10851_v18 }
0x22f4   : > { %17072 = vmatmul.mubr.msk.f32.gmra.mrb[220].mxu0 %vm1888_vm5, %v17053_v4 }
0x2315   : > { %v17058_v15 = vpop.f32.mrb[210].mxu0 }
0x2316   : > { %v11044_v42 = vadd.f32 %v17058_v15, %v22735_v6  ;;  %v10964_v7 = vpop.f32.mrb[211].mxu0 }
0x2317   : > { %v11043_v1 = vadd.f32 %v22735_v6, %v10964_v7  ;;  %v14504_v7 = vld [vmem:[%s23665_s15 + $0x68] sm:$0xff] }
0x2318   : > { %v11056_v60 = vadd.f32 %v11044_v42, %v21346_v46  ;;  %v14503_v42 = vld [vmem:[%s23665_s15 + $0x60] sm:$0xff] }
0x2319   : > { %v11055_v28 = vadd.f32 %v11043_v1, %v21342_v32  ;;  %v17061_v58 = vpop.f32.mrb[212].mxu0 }
0x231a   : > { %v11046_v36 = vadd.f32 %v17061_v58, %v22735_v6  ;;  %v10974_v29 = vpop.f32.mrb[213].mxu0  ;;  %v11074_v50 = vsel %vm1447_vm4, %v11056_v60, 0.0 }
0x231b   : > { %v11045_v19 = vadd.f32 %v22735_v6, %v10974_v29  ;;  %11075 = vadd.xlane.f32.xlu1 %v11074_v50  ;;  %v11071_v24 = vsel %vm1447_vm4, %v11055_v28, 0.0 }
0x231c   : > { %v11058_v62 = vadd.f32 %v11046_v36, %v21366_v5  ;;  %11072 = vadd.xlane.f32.xlu0 %v11071_v24  ;;  %v14501_v5 = vld [vmem:[%s23665_s15 + $0x50] sm:$0xff] }
0x231d   : > { %v11057_v26 = vadd.f32 %v11045_v19, %v21360_v16  ;;  %v14502_v16 = vld [vmem:[%s23665_s15 + $0x58] sm:$0xff] }
0x231e   : > { %v11080_v46 = vsel %vm1447_vm4, %v11058_v62, 0.0  ;;  %v17812_v0 = vpack.c.bf16 %v14502_v16, %v14501_v5 }
0x231f   : > { %11081 = vadd.xlane.f32.xlu1 %v11080_v46  ;;  %v11077_v32 = vsel %vm1447_vm4, %v11057_v26, 0.0 }
0x2320   : > { %11078 = vadd.xlane.f32.xlu0 %v11077_v32  ;;  %17814 = vmatprep.subr.msk.bf16.mxu1 %vm20873_vm8, %v17812_v0  ;;  %v14505_v32 = vld [vmem:[%s23665_s15 + $0x70] sm:$0xff] }
0x2321   : > { %17817 = vmatpush3.bf16.xpose.msk.msra.mxu1 %vm20873_vm8, %v17812_v0  ;;  %v17824_v55 = vpack.c.bf16 %v14506_v37, %v14505_v32 }
0x23a8   : > { %v11076_v14 = vpop.xlane.xlu1 %11075 }
0x23a9   : > { %v11108_v45 = vmul.f32 0.03125, %v11076_v14  ;;  %v11073_v31 = vpop.xlane.xlu0 %11072 }
0x23aa   : > { %v11107_v21 = vmul.f32 0.03125, %v11073_v31 }
0x23ab   : > { %v22769_v49 = vsub.f32 %v11056_v60, %v11108_v45 }
0x23ac   : > { %v22771_v38 = vsub.f32 %v11055_v28, %v11107_v21  ;;  %v11082_v53 = vpop.xlane.xlu1 %11081  ;;  %v17818_v28 = vpack.c.bf16 %v14504_v7, %v14503_v42 }
0x23ad   : > { %v11110_v59 = vmul.f32 0.03125, %v11082_v53  ;;  %v11079_v17 = vpop.xlane.xlu0 %11078  ;;  %v11132_v57 = vmul.f32 %v22769_v49, %v22769_v49 }
0x23ae   : > { %v11109_v43 = vmul.f32 0.03125, %v11079_v17  ;;  %v11131_v2 = vmul.f32 %v22771_v38, %v22771_v38  ;;  %17820 = vmatprep.subr.msk.bf16.mxu1 %vm20873_vm8, %v17818_v28 }
0x23af   : > { %v22777_v12 = vsub.f32 %v11058_v62, %v11110_v59  ;;  %v11146_v30 = vsel %vm1447_vm4, %v11132_v57, 0.0  ;;  %17823 = vmatpush3.bf16.xpose.msk.msra.mxu1 %vm20873_vm8, %v17818_v28 }
0x23b0   : > { %v22780_v20 = vsub.f32 %v11057_v26, %v11109_v43  ;;  %11147 = vadd.xlane.f32.xlu1 %v11146_v30  ;;  %v11143_v44 = vsel %vm1447_vm4, %v11131_v2, 0.0  ;;  %17826 = vmatprep.subr.msk.bf16.mxu1 %vm20873_vm8, %v17824_v55  ;;  %v22857_v43 = vld [vmem:[#allocation10 + $0x4] ss:$0 sm:$0xff] }
0x23b1   : > { %11144 = vadd.xlane.f32.xlu0 %v11143_v44  ;;  %v11134_v54 = vmul.f32 %v22777_v12, %v22777_v12 }
0x23b2   : > { %v11133_v11 = vmul.f32 %v22780_v20, %v22780_v20 }
0x23b3   : > { %v11152_v25 = vsel %vm1447_vm4, %v11134_v54, 0.0 }
0x23b4   : > { %11153 = vadd.xlane.f32.xlu1 %v11152_v25  ;;  %v11149_v27 = vsel %vm1447_vm4, %v11133_v11, 0.0  ;;  %v22861_v11 = vld [vmem:[#allocation10 + $0x5] ss:$0 sm:$0xff] }
0x23b5   : > { %11150 = vadd.xlane.f32.xlu0 %v11149_v27 }
0x23b7   : > { %17829 = vmatpush3.bf16.xpose.msk.msra.mxu1 %vm20873_vm8, %v17824_v55 }
0x23bb   : > { %v17064_v40 = vpop.f32.mrb[214].mxu0 }
0x23bc   : > { %v11048_v10 = vadd.f32 %v17064_v40, %v22735_v6  ;;  %v10984_v3 = vpop.f32.mrb[215].mxu0 }
0x23bd   : > { %v11047_v48 = vadd.f32 %v22735_v6, %v10984_v3 }
0x23be   : > { %v22792_v51 = vadd.f32 %v11048_v10, %v21384_v52 }
0x23bf   : > { %v22795_v8 = vadd.f32 %v11047_v48, %v21380_v35  ;;  %v17067_v13 = vpop.f32.mrb[216].mxu0 }
0x23c0   : > { %v11050_v9 = vadd.f32 %v17067_v13, %v22735_v6  ;;  %v10994_v39 = vpop.f32.mrb[217].mxu0  ;;  %v11086_v33 = vsel %vm1447_vm4, %v22792_v51, 0.0 }
0x23c1   : > { %v11049_v4 = vadd.f32 %v22735_v6, %v10994_v39  ;;  %11087 = vadd.xlane.f32.xlu1 %v11086_v33  ;;  %v11083_v18 = vsel %vm1447_vm4, %v22795_v8, 0.0 }
0x23c2   : > { %v22804_v15 = vadd.f32 %v11050_v9, %v21402_v22  ;;  %11084 = vadd.xlane.f32.xlu0 %v11083_v18 }
0x23c3   : > { %v22807_v35 = vadd.f32 %v11049_v4, %v21398_v56  ;;  %v17070_v52 = vpop.f32.mrb[218].mxu0 }
0x23c4   : > { %v11052_v1 = vadd.f32 %v17070_v52, %v22735_v6  ;;  %v11004_v60 = vpop.f32.mrb[219].mxu0  ;;  %v11092_v22 = vsel %vm1447_vm4, %v22804_v15, 0.0 }
0x23c5   : > { %v11051_v58 = vadd.f32 %v22735_v6, %v11004_v60  ;;  %11093 = vadd.xlane.f32.xlu1 %v11092_v22  ;;  %v11089_v56 = vsel %vm1447_vm4, %v22807_v35, 0.0 }
0x23c6   : > { %v22822_v36 = vadd.f32 %v11052_v1, %v21420_v61  ;;  %11090 = vadd.xlane.f32.xlu0 %v11089_v56 }
0x23c7   : > { %v22827_v29 = vadd.f32 %v11051_v58, %v21416_v47  ;;  %v17073_v50 = vpop.f32.mrb[220].mxu0 }
0x23c8   : > { %v11054_v19 = vadd.f32 %v17073_v50, %v22735_v6  ;;  %v11014_v24 = vpop.f32.mrb[221].mxu0  ;;  %v11098_v62 = vsel %vm1447_vm4, %v22822_v36, 0.0 }
0x23c9   : > { %v11053_v61 = vadd.f32 %v22735_v6, %v11014_v24  ;;  %11099 = vadd.xlane.f32.xlu1 %v11098_v62  ;;  %v11095_v26 = vsel %vm1447_vm4, %v22827_v29, 0.0 }
0x23ca   : > { %v22838_v46 = vadd.f32 %v11054_v19, %v21436_v41  ;;  %11096 = vadd.xlane.f32.xlu0 %v11095_v26 }
0x23cb   : > { %v22841_v47 = vadd.f32 %v11053_v61, %v21433_v63 }
0x23cc   : > { %v11104_v6 = vsel %vm1447_vm4, %v22838_v46, 0.0 }
0x23cd   : > { %11105 = vadd.xlane.f32.xlu1 %v11104_v6  ;;  %v11101_v41 = vsel %vm1447_vm4, %v22841_v47, 0.0 }
0x23ce   : > { %11102 = vadd.xlane.f32.xlu0 %v11101_v41 }
0x243d   : > { %v11148_v63 = vpop.xlane.xlu1 %11147 }
0x243e   : > { %v11180_v5 = vmul.f32 0.03125, %v11148_v63  ;;  %v11145_v23 = vpop.xlane.xlu0 %11144 }
0x243f   : > { %v11179_v16 = vmul.f32 0.03125, %v11145_v23 }
0x2440   : > { %v11192_v0 = vadd.f32 1e-05, %v11180_v5 }
0x2441   : > { %v11191_v14 = vadd.f32 1e-05, %v11179_v16  ;;  %v11154_v45 = vpop.xlane.xlu1 %11153 }
0x2442   : > { %18564 = vrsqrt.f32 %v11192_v0  ;;  %v11182_v31 = vmul.f32 0.03125, %v11154_v45  ;;  %v11151_v21 = vpop.xlane.xlu0 %11150 }
0x2443   : > { %18566 = vrsqrt.f32 %v11191_v14  ;;  %v11181_v53 = vmul.f32 0.03125, %v11151_v21  ;;  %v14529_v21 = vld [vmem:[%s23791_s7 + $0x28] sm:$0xff] }
0x2444   : > { %v11194_v59 = vadd.f32 1e-05, %v11182_v31 }
0x2445   : > { %v11193_v17 = vadd.f32 1e-05, %v11181_v53 }
0x2446   : > { %18568 = vrsqrt.f32 %v11194_v59 }
0x2447   : > { %18570 = vrsqrt.f32 %v11193_v17  ;;  %v14530_v17 = vld [vmem:[%s23791_s7 + $0x30] sm:$0xff] }
0x244c   : > { %v18565_v57 = vpop.eup %18564 }
0x244d   : > { %v18567_v2 = vpop.eup %18566  ;;  %v11216_v30 = vmul.f32 %v18565_v57, %v22769_v49  ;;  %v14531_v57 = vld [vmem:[%s23791_s7 + $0x38] sm:$0xff] }
0x244e   : > { %v11088_v44 = vpop.xlane.xlu1 %11087  ;;  %v11215_v54 = vmul.f32 %v18567_v2, %v22771_v38  ;;  %v17836_v2 = vpack.c.bf16 %v14531_v57, %v14530_v17 }
0x244f   : > { %v11234_v25 = vmul.f32 %v22857_v43, %v11216_v30  ;;  %v11112_v27 = vmul.f32 0.03125, %v11088_v44  ;;  %v11085_v40 = vpop.xlane.xlu0 %11084 }
0x2450   : > { %v18569_v10 = vpop.eup %18568  ;;  %v11111_v3 = vmul.f32 0.03125, %v11085_v40  ;;  %v11233_v48 = vmul.f32 %v22857_v43, %v11215_v54 }
0x2451   : > { %v18571_v13 = vpop.eup %18570  ;;  %v11218_v9 = vmul.f32 %v18569_v10, %v22777_v12  ;;  %v22867_v39 = vsub.f32 %v22792_v51, %v11112_v27  ;;  %v22877_v18 = vadd.f32 %v22861_v11, %v11234_v25 }
0x2452   : > { %v22870_v49 = vsub.f32 %v22795_v8, %v11111_v3  ;;  %v11094_v38 = vpop.xlane.xlu1 %11093  ;;  %v22873_v33 = vadd.f32 %v22861_v11, %v11233_v48  ;;  %v11217_v4 = vmul.f32 %v18571_v13, %v22780_v20 }
0x2453   : > { %v11236_v52 = vmul.f32 %v22857_v43, %v11218_v9  ;;  %v11114_v42 = vmul.f32 0.03125, %v11094_v38  ;;  %v11091_v7 = vpop.xlane.xlu0 %11090  ;;  %v11136_v12 = vmul.f32 %v22867_v39, %v22867_v39 }
0x2454   : > { %v11113_v51 = vmul.f32 0.03125, %v11091_v7  ;;  %17090 = vmatprep.mubr.msk.f32.mxu1 %vm1447_vm4, %v22873_v33  ;;  %v11135_v8 = vmul.f32 %v22870_v49, %v22870_v49  ;;  %v11235_v1 = vmul.f32 %v22857_v43, %v11217_v4 }
0x2455   : > { %v22888_v20 = vsub.f32 %v22804_v15, %v11114_v42  ;;  %17091 = vmatmul.mubr.msk.f32.vlgmr.msra.gmra.mrb[14].mxu1 %vm1447_vm4, %v22877_v18  ;;  %v11158_v60 = vsel %vm1447_vm4, %v11136_v12, 0.0  ;;  %v22901_v50 = vadd.f32 %v22861_v11, %v11236_v52 }
0x2456   : > { %v22894_v22 = vsub.f32 %v22807_v35, %v11113_v51  ;;  %v11100_v28 = vpop.xlane.xlu1 %11099  ;;  %11159 = vadd.xlane.f32.xlu1 %v11158_v60  ;;  %v11155_v58 = vsel %vm1447_vm4, %v11135_v8, 0.0  ;;  %v22898_v56 = vadd.f32 %v22861_v11, %v11235_v1 }
0x2457   : > { %v11116_v15 = vmul.f32 0.03125, %v11100_v28  ;;  %11156 = vadd.xlane.f32.xlu0 %v11155_v58  ;;  %v11097_v19 = vpop.xlane.xlu0 %11096  ;;  %v11138_v24 = vmul.f32 %v22888_v20, %v22888_v20 }
0x2458   : > { %v11115_v62 = vmul.f32 0.03125, %v11097_v19  ;;  %17093 = vmatprep.mubr.msk.f32.mxu1 %vm1447_vm4, %v22898_v56  ;;  %v11137_v35 = vmul.f32 %v22894_v22, %v22894_v22 }
0x2459   : > { %v22910_v61 = vsub.f32 %v22822_v36, %v11116_v15  ;;  %17094 = vmatmul.mubr.msk.f32.gmra.mrb[16].mxu1 %vm1447_vm4, %v22901_v50  ;;  %v11164_v26 = vsel %vm1447_vm4, %v11138_v24, 0.0 }
0x245a   : > { %v22916_v32 = vsub.f32 %v22827_v29, %v11115_v62  ;;  %11165 = vadd.xlane.f32.xlu1 %v11164_v26  ;;  %v11106_v37 = vpop.xlane.xlu1 %11105  ;;  %v11161_v6 = vsel %vm1447_vm4, %v11137_v35, 0.0 }
0x245b   : > { %v11118_v55 = vmul.f32 0.03125, %v11106_v37  ;;  %11162 = vadd.xlane.f32.xlu0 %v11161_v6  ;;  %v11103_v41 = vpop.xlane.xlu0 %11102  ;;  %v11140_v63 = vmul.f32 %v22910_v61, %v22910_v61 }
0x245c   : > { %v11117_v36 = vmul.f32 0.03125, %v11103_v41  ;;  %v11139_v5 = vmul.f32 %v22916_v32, %v22916_v32 }
0x245d   : > { %v22924_v23 = vsub.f32 %v22838_v46, %v11118_v55  ;;  %v11170_v29 = vsel %vm1447_vm4, %v11140_v63, 0.0 }
0x245e   : > { %v22928_v16 = vsub.f32 %v22841_v47, %v11117_v36  ;;  %11171 = vadd.xlane.f32.xlu1 %v11170_v29  ;;  %v11167_v0 = vsel %vm1447_vm4, %v11139_v5, 0.0  ;;  %v14528_v47 = vld [vmem:[%s23791_s7 + $0x20] sm:$0xff] }
0x245f   : > { %11168 = vadd.xlane.f32.xlu0 %v11167_v0  ;;  %v11142_v14 = vmul.f32 %v22924_v23, %v22924_v23  ;;  %v17830_v53 = vpack.c.bf16 %v14529_v21, %v14528_v47 }
0x2460   : > { %v11141_v45 = vmul.f32 %v22928_v16, %v22928_v16 }
0x2461   : > { %v11176_v31 = vsel %vm1447_vm4, %v11142_v14, 0.0  ;;  %17832 = vmatprep.subr.msk.bf16.mxu1 %vm21079_vm10, %v17830_v53 }
0x2462   : > { %11177 = vadd.xlane.f32.xlu1 %v11176_v31  ;;  %v11173_v46 = vsel %vm1447_vm4, %v11141_v45, 0.0  ;;  %17835 = vmatpush3.bf16.xpose.msk.msra.mxu1 %vm21079_vm10, %v17830_v53 }
0x2463   : > { %11174 = vadd.xlane.f32.xlu0 %v11173_v46  ;;  %17838 = vmatprep.subr.msk.bf16.mxu1 %vm21079_vm10, %v17836_v2 }
0x246a   : > { %17841 = vmatpush3.bf16.xpose.msk.msra.mxu1 %vm21079_vm10, %v17836_v2 }
0x24e3   : > { %v11160_v30 = vpop.xlane.xlu1 %11159 }
0x24e4   : > { %v11184_v44 = vmul.f32 0.03125, %v11160_v30  ;;  %v11157_v54 = vpop.xlane.xlu0 %11156 }
0x24e5   : > { %v11183_v25 = vmul.f32 0.03125, %v11157_v54 }
0x24e6   : > { %v11196_v27 = vadd.f32 1e-05, %v11184_v44 }
0x24e7   : > { %v11195_v40 = vadd.f32 1e-05, %v11183_v25  ;;  %v11166_v10 = vpop.xlane.xlu1 %11165 }
0x24e8   : > { %18572 = vrsqrt.f32 %v11196_v27  ;;  %v11186_v3 = vmul.f32 0.03125, %v11166_v10  ;;  %v11163_v48 = vpop.xlane.xlu0 %11162 }
0x24e9   : > { %18574 = vrsqrt.f32 %v11195_v40  ;;  %v11185_v13 = vmul.f32 0.03125, %v11163_v48 }
0x24ea   : > { %v11198_v9 = vadd.f32 1e-05, %v11186_v3 }
0x24eb   : > { %v11197_v38 = vadd.f32 1e-05, %v11185_v13  ;;  %v11172_v4 = vpop.xlane.xlu1 %11171 }
0x24ec   : > { %18576 = vrsqrt.f32 %v11198_v9  ;;  %v11188_v52 = vmul.f32 0.03125, %v11172_v4  ;;  %v11169_v42 = vpop.xlane.xlu0 %11168 }
0x24ed   : > { %18578 = vrsqrt.f32 %v11197_v38  ;;  %v11187_v7 = vmul.f32 0.03125, %v11169_v42 }
0x24ee   : > { %v11200_v12 = vadd.f32 1e-05, %v11188_v52 }
0x24ef   : > { %v11199_v51 = vadd.f32 1e-05, %v11187_v7  ;;  %v11178_v8 = vpop.xlane.xlu1 %11177 }
0x24f0   : > { %18580 = vrsqrt.f32 %v11200_v12  ;;  %v11190_v1 = vmul.f32 0.03125, %v11178_v8  ;;  %v11175_v60 = vpop.xlane.xlu0 %11174 }
0x24f1   : > { %18582 = vrsqrt.f32 %v11199_v51  ;;  %v11189_v28 = vmul.f32 0.03125, %v11175_v60 }
0x24f2   : > { %v18573_v58 = vpop.eup %18572  ;;  %v11202_v15 = vadd.f32 1e-05, %v11190_v1 }
0x24f3   : > { %v18575_v19 = vpop.eup %18574  ;;  %v11220_v24 = vmul.f32 %v18573_v58, %v22867_v39  ;;  %v11201_v62 = vadd.f32 1e-05, %v11189_v28 }
0x24f4   : > { %18584 = vrsqrt.f32 %v11202_v15  ;;  %v11219_v35 = vmul.f32 %v18575_v19, %v22870_v49 }
0x24f5   : > { %v11238_v26 = vmul.f32 %v22857_v43, %v11220_v24  ;;  %18586 = vrsqrt.f32 %v11201_v62 }
0x24f6   : > { %v18577_v37 = vpop.eup %18576  ;;  %v11237_v6 = vmul.f32 %v22857_v43, %v11219_v35 }
0x24f7   : > { %v18579_v55 = vpop.eup %18578  ;;  %v11222_v41 = vmul.f32 %v18577_v37, %v22888_v20  ;;  %v11256_v5 = vadd.f32 %v22861_v11, %v11238_v26 }
0x24f8   : > { %v11255_v63 = vadd.f32 %v22861_v11, %v11237_v6  ;;  %v11221_v36 = vmul.f32 %v18579_v55, %v22894_v22 }
0x24f9   : > { %v11240_v39 = vmul.f32 %v22857_v43, %v11222_v41 }
0x24fa   : > { %v18581_v29 = vpop.eup %18580  ;;  %17096 = vmatprep.mubr.msk.f32.mxu1 %vm1447_vm4, %v11255_v63  ;;  %v11239_v49 = vmul.f32 %v22857_v43, %v11221_v36 }
0x24fb   : > { %v18583_v0 = vpop.eup %18582  ;;  %v11224_v14 = vmul.f32 %v18581_v29, %v22910_v61  ;;  %17097 = vmatmul.mubr.msk.f32.gmra.mrb[18].mxu1 %vm1447_vm4, %v11256_v5  ;;  %v22975_v22 = vadd.f32 %v22861_v11, %v11240_v39 }
0x24fc   : > { %v22971_v20 = vadd.f32 %v22861_v11, %v11239_v49  ;;  %v11223_v45 = vmul.f32 %v18583_v0, %v22916_v32 }
0x24fd   : > { %v11242_v31 = vmul.f32 %v22857_v43, %v11224_v14 }
0x24fe   : > { %v18585_v46 = vpop.eup %18584  ;;  %17099 = vmatprep.mubr.msk.f32.mxu1 %vm1447_vm4, %v22971_v20  ;;  %v11241_v47 = vmul.f32 %v22857_v43, %v11223_v45 }
0x24ff   : > { %v18587_v21 = vpop.eup %18586  ;;  %v11226_v61 = vmul.f32 %v18585_v46, %v22924_v23  ;;  %17100 = vmatmul.mubr.msk.f32.gmra.mrb[20].mxu1 %vm1447_vm4, %v22975_v22  ;;  %v22989_v59 = vadd.f32 %v22861_v11, %v11242_v31 }
0x2500   : > { %v22985_v53 = vadd.f32 %v22861_v11, %v11241_v47  ;;  %v11225_v32 = vmul.f32 %v18587_v21, %v22928_v16  ;;  %v23001_v16 = vld [vmem:[#allocation7 + $0x1] ss:$0 sm:$0xff] }
0x2501   : > { %v11244_v17 = vmul.f32 %v22857_v43, %v11226_v61 }
0x2502   : > { %17102 = vmatprep.mubr.msk.f32.mxu1 %vm1447_vm4, %v22985_v53  ;;  %v11243_v57 = vmul.f32 %v22857_v43, %v11225_v32 }
0x2503   : > { %17103 = vmatmul.mubr.msk.f32.gmra.mrb[22].mxu1 %vm1447_vm4, %v22989_v59  ;;  %v11262_v2 = vadd.f32 %v22861_v11, %v11244_v17 }
0x2504   : > { %v11261_v23 = vadd.f32 %v22861_v11, %v11243_v57 }
0x2506   : > { %17105 = vmatprep.mubr.msk.f32.mxu1 %vm1447_vm4, %v11261_v23 }
0x2507   : > { %17106 = vmatmul.mubr.msk.f32.gmra.mrb[24].mxu1 %vm1447_vm4, %v11262_v2 }
0x2528   : > { %v17092_v30 = vpop.f32.mrb[14].mxu1 }
0x2529   : > { %v11412_v44 = vadd.f32 %v17092_v30, %v23001_v16  ;;  %v11406_v54 = vpop.f32.mrb[15].mxu1 }
0x252a   : > { %v11407_v25 = vadd.f32 %v23001_v16, %v11406_v54 }
0x252b   : > { %v11466_v43 = vmul.f32 %v11412_v44, %v11412_v44 }
0x252c   : > { %v11465_v27 = vmul.f32 %v11407_v25, %v11407_v25  ;;  %v17095_v40 = vpop.f32.mrb[16].mxu1 }
0x252d   : > { %v11478_v10 = vmul.f32 %v11466_v43, %v11412_v44  ;;  %v11422_v3 = vadd.f32 %v17095_v40, %v23001_v16  ;;  %v11416_v48 = vpop.f32.mrb[17].mxu1 }
0x252e   : > { %v11477_v11 = vmul.f32 %v11465_v27, %v11407_v25  ;;  %v11417_v13 = vadd.f32 %v23001_v16, %v11416_v48 }
0x252f   : > { %v11490_v9 = vmul.f32 0.044715, %v11478_v10  ;;  %v11468_v38 = vmul.f32 %v11422_v3, %v11422_v3 }
0x2530   : > { %v11489_v4 = vmul.f32 0.044715, %v11477_v11  ;;  %v11467_v52 = vmul.f32 %v11417_v13, %v11417_v13 }
0x2531   : > { %v11502_v42 = vadd.f32 %v11490_v9, %v11412_v44  ;;  %v11480_v7 = vmul.f32 %v11468_v38, %v11422_v3 }
0x2532   : > { %v11501_v12 = vadd.f32 %v11489_v4, %v11407_v25  ;;  %v11479_v51 = vmul.f32 %v11467_v52, %v11417_v13 }
0x2533   : > { %v11514_v8 = vmul.f32 0.7978846, %v11502_v42  ;;  %v11492_v1 = vmul.f32 0.044715, %v11480_v7 }
0x2534   : > { %v11513_v60 = vmul.f32 0.7978846, %v11501_v12  ;;  %v11491_v28 = vmul.f32 0.044715, %v11479_v51 }
0x2535   : > { %18588 = vtanh.f32 %v11514_v8  ;;  %v11504_v58 = vadd.f32 %v11492_v1, %v11422_v3 }
0x2536   : > { %18590 = vtanh.f32 %v11513_v60  ;;  %v11503_v15 = vadd.f32 %v11491_v28, %v11417_v13 }
0x2537   : > { %v11516_v19 = vmul.f32 0.7978846, %v11504_v58 }
0x2538   : > { %v11515_v24 = vmul.f32 0.7978846, %v11503_v15 }
0x2539   : > { %18592 = vtanh.f32 %v11516_v19 }
0x253a   : > { %18594 = vtanh.f32 %v11515_v24 }
0x253f   : > { %v18589_v62 = vpop.eup %18588 }
0x2540   : > { %v18591_v35 = vpop.eup %18590  ;;  %v11538_v26 = vadd.f32 1.0, %v18589_v62 }
0x2541   : > { %v11537_v37 = vadd.f32 1.0, %v18591_v35 }
0x2542   : > { %v11550_v6 = vmul.f32 0.5, %v11538_v26 }
0x2543   : > { %v18593_v55 = vpop.eup %18592  ;;  %v11549_v41 = vmul.f32 0.5, %v11537_v37 }
0x2544   : > { %v18595_v63 = vpop.eup %18594  ;;  %v11540_v36 = vadd.f32 1.0, %v18593_v55  ;;  %v11562_v29 = vmul.f32 %v11550_v6, %v11412_v44 }
0x2545   : > { %v11561_v5 = vmul.f32 %v11549_v41, %v11407_v25  ;;  %v11539_v39 = vadd.f32 1.0, %v18595_v63 }
0x2546   : > { %v11552_v49 = vmul.f32 0.5, %v11540_v36 }
0x2547   : > { %17116 = vmatprep.mubr.msk.f32.mxu1 %vm6313_vm9, %v11561_v5  ;;  %v11551_v0 = vmul.f32 0.5, %v11539_v39 }
0x2548   : > { %17117 = vmatmul.mubr.msk.f32.vlgmr.msra.gmra.mrb[26].mxu1 %vm6313_vm9, %v11562_v29  ;;  %v11564_v45 = vmul.f32 %v11552_v49, %v11422_v3 }
0x2549   : > { %v11563_v14 = vmul.f32 %v11551_v0, %v11417_v13 }
0x254b   : > { %17119 = vmatprep.mubr.msk.f32.mxu1 %vm6313_vm9, %v11563_v14 }
0x254c   : > { %17120 = vmatmul.mubr.msk.f32.gmra.mrb[28].mxu1 %vm6313_vm9, %v11564_v45 }
0x25ce   : > { %v17098_v31 = vpop.f32.mrb[18].mxu1 }
0x25cf   : > { %v23012_v46 = vadd.f32 %v17098_v31, %v23001_v16  ;;  %v11426_v47 = vpop.f32.mrb[19].mxu1 }
0x25d0   : > { %v23015_v21 = vadd.f32 %v23001_v16, %v11426_v47 }
0x25d1   : > { %v11470_v61 = vmul.f32 %v23012_v46, %v23012_v46 }
0x25d2   : > { %v11469_v32 = vmul.f32 %v23015_v21, %v23015_v21  ;;  %v17101_v17 = vpop.f32.mrb[20].mxu1 }
0x25d3   : > { %v11482_v57 = vmul.f32 %v11470_v61, %v23012_v46  ;;  %v23023_v23 = vadd.f32 %v17101_v17, %v23001_v16  ;;  %v11436_v2 = vpop.f32.mrb[21].mxu1 }
0x25d4   : > { %v11481_v30 = vmul.f32 %v11469_v32, %v23015_v21  ;;  %v23027_v44 = vadd.f32 %v23001_v16, %v11436_v2 }
0x25d5   : > { %v11494_v54 = vmul.f32 0.044715, %v11482_v57  ;;  %v11472_v25 = vmul.f32 %v23023_v23, %v23023_v23 }
0x25d6   : > { %v11493_v43 = vmul.f32 0.044715, %v11481_v30  ;;  %v11471_v27 = vmul.f32 %v23027_v44, %v23027_v44  ;;  %v17104_v40 = vpop.f32.mrb[22].mxu1 }
0x25d7   : > { %v11506_v10 = vadd.f32 %v11494_v54, %v23012_v46  ;;  %v11484_v3 = vmul.f32 %v11472_v25, %v23023_v23  ;;  %v23036_v48 = vadd.f32 %v17104_v40, %v23001_v16  ;;  %v11446_v11 = vpop.f32.mrb[23].mxu1 }
0x25d8   : > { %v11505_v13 = vadd.f32 %v11493_v43, %v23015_v21  ;;  %v11483_v9 = vmul.f32 %v11471_v27, %v23027_v44  ;;  %v23041_v38 = vadd.f32 %v23001_v16, %v11446_v11 }
0x25d9   : > { %v11518_v4 = vmul.f32 0.7978846, %v11506_v10  ;;  %v11496_v52 = vmul.f32 0.044715, %v11484_v3  ;;  %v11474_v42 = vmul.f32 %v23036_v48, %v23036_v48 }
0x25da   : > { %v11517_v7 = vmul.f32 0.7978846, %v11505_v13  ;;  %v11495_v12 = vmul.f32 0.044715, %v11483_v9  ;;  %v11473_v51 = vmul.f32 %v23041_v38, %v23041_v38  ;;  %v17107_v8 = vpop.f32.mrb[24].mxu1 }
0x25db   : > { %18596 = vtanh.f32 %v11518_v4  ;;  %v11508_v1 = vadd.f32 %v11496_v52, %v23023_v23  ;;  %v11486_v60 = vmul.f32 %v11474_v42, %v23036_v48  ;;  %v23050_v28 = vadd.f32 %v17107_v8, %v23001_v16  ;;  %v11456_v58 = vpop.f32.mrb[25].mxu1 }
0x25dc   : > { %18598 = vtanh.f32 %v11517_v7  ;;  %v11507_v15 = vadd.f32 %v11495_v12, %v23027_v44  ;;  %v11485_v19 = vmul.f32 %v11473_v51, %v23041_v38  ;;  %v11457_v24 = vadd.f32 %v23001_v16, %v11456_v58 }
0x25dd   : > { %v11520_v62 = vmul.f32 0.7978846, %v11508_v1  ;;  %v11498_v35 = vmul.f32 0.044715, %v11486_v60  ;;  %v11476_v26 = vmul.f32 %v23050_v28, %v23050_v28 }
0x25de   : > { %v11519_v37 = vmul.f32 0.7978846, %v11507_v15  ;;  %v11497_v6 = vmul.f32 0.044715, %v11485_v19  ;;  %v11475_v55 = vmul.f32 %v11457_v24, %v11457_v24  ;;  %v14532_v19 = vld [vmem:[#allocation9 + $0x1] ss:$0 sm:$0xff] }
0x25df   : > { %18600 = vtanh.f32 %v11520_v62  ;;  %v11510_v41 = vadd.f32 %v11498_v35, %v23036_v48  ;;  %v11488_v63 = vmul.f32 %v11476_v26, %v23050_v28 }
0x25e0   : > { %18602 = vtanh.f32 %v11519_v37  ;;  %v11509_v36 = vadd.f32 %v11497_v6, %v23041_v38  ;;  %v11487_v5 = vmul.f32 %v11475_v55, %v11457_v24 }
0x25e1   : > { %v11522_v39 = vmul.f32 0.7978846, %v11510_v41  ;;  %v11500_v29 = vmul.f32 0.044715, %v11488_v63 }
0x25e2   : > { %v11521_v16 = vmul.f32 0.7978846, %v11509_v36  ;;  %v11499_v49 = vmul.f32 0.044715, %v11487_v5 }
0x25e3   : > { %18604 = vtanh.f32 %v11522_v39  ;;  %v11512_v0 = vadd.f32 %v11500_v29, %v23050_v28 }
0x25e4   : > { %18606 = vtanh.f32 %v11521_v16  ;;  %v11511_v14 = vadd.f32 %v11499_v49, %v11457_v24 }
0x25e5   : > { %v18597_v45 = vpop.eup %18596  ;;  %v11524_v31 = vmul.f32 0.7978846, %v11512_v0 }
0x25e6   : > { %v18599_v47 = vpop.eup %18598  ;;  %v11542_v61 = vadd.f32 1.0, %v18597_v45  ;;  %v11523_v32 = vmul.f32 0.7978846, %v11511_v14 }
0x25e7   : > { %18608 = vtanh.f32 %v11524_v31  ;;  %v11541_v17 = vadd.f32 1.0, %v18599_v47 }
0x25e8   : > { %v11554_v57 = vmul.f32 0.5, %v11542_v61  ;;  %18610 = vtanh.f32 %v11523_v32 }
0x25e9   : > { %v18601_v2 = vpop.eup %18600  ;;  %v11553_v30 = vmul.f32 0.5, %v11541_v17 }
0x25ea   : > { %v18603_v54 = vpop.eup %18602  ;;  %v11544_v25 = vadd.f32 1.0, %v18601_v2  ;;  %v11566_v40 = vmul.f32 %v11554_v57, %v23012_v46 }
0x25eb   : > { %v11565_v43 = vmul.f32 %v11553_v30, %v23015_v21  ;;  %v11543_v27 = vadd.f32 1.0, %v18603_v54 }
0x25ec   : > { %v11556_v10 = vmul.f32 0.5, %v11544_v25 }
0x25ed   : > { %v18605_v3 = vpop.eup %18604  ;;  %17122 = vmatprep.mubr.msk.f32.mxu1 %vm6313_vm9, %v11565_v43  ;;  %v11555_v11 = vmul.f32 0.5, %v11543_v27 }
0x25ee   : > { %v18607_v13 = vpop.eup %18606  ;;  %v11546_v9 = vadd.f32 1.0, %v18605_v3  ;;  %17123 = vmatmul.mubr.msk.f32.gmra.mrb[30].mxu1 %vm6313_vm9, %v11566_v40  ;;  %v11568_v42 = vmul.f32 %v11556_v10, %v23023_v23 }
0x25ef   : > { %v11567_v4 = vmul.f32 %v11555_v11, %v23027_v44  ;;  %v11545_v52 = vadd.f32 1.0, %v18607_v13 }
0x25f0   : > { %v11558_v7 = vmul.f32 0.5, %v11546_v9 }
0x25f1   : > { %v18609_v12 = vpop.eup %18608  ;;  %17125 = vmatprep.mubr.msk.f32.mxu1 %vm6313_vm9, %v11567_v4  ;;  %v11557_v21 = vmul.f32 0.5, %v11545_v52 }
0x25f2   : > { %v18611_v46 = vpop.eup %18610  ;;  %v11548_v51 = vadd.f32 1.0, %v18609_v12  ;;  %17126 = vmatmul.mubr.msk.f32.gmra.mrb[32].mxu1 %vm6313_vm9, %v11568_v42  ;;  %v11570_v60 = vmul.f32 %v11558_v7, %v23036_v48 }
0x25f3   : > { %v11569_v8 = vmul.f32 %v11557_v21, %v23041_v38  ;;  %v11547_v1 = vadd.f32 1.0, %v18611_v46 }
0x25f4   : > { %v11560_v58 = vmul.f32 0.5, %v11548_v51 }
0x25f5   : > { %17128 = vmatprep.mubr.msk.f32.mxu1 %vm6313_vm9, %v11569_v8  ;;  %v11559_v44 = vmul.f32 0.5, %v11547_v1 }
0x25f6   : > { %17129 = vmatmul.mubr.msk.f32.gmra.mrb[34].mxu1 %vm6313_vm9, %v11570_v60  ;;  %v11572_v15 = vmul.f32 %v11560_v58, %v23050_v28 }
0x25f7   : > { %v11571_v23 = vmul.f32 %v11559_v44, %v11457_v24  ;;  %v23139_v44 = vld [vmem:[%s23830_s10 + $0x20] sm:$0xff] }
0x25f9   : > { %17131 = vmatprep.mubr.msk.f32.mxu1 %vm6313_vm9, %v11571_v23  ;;  %v23144_v23 = vld [vmem:[%s23831_s29 + $0x8] sm:$0xff] }
0x25fa   : > { %17132 = vmatmul.mubr.msk.f32.gmra.mrb[36].mxu1 %vm6313_vm9, %v11572_v15  ;;  %v23153_v15 = vld [vmem:[%s23830_s10 + $0x8] sm:$0xff] }
0x25fb   : > { %17158 = vmatprep.mubr.msk.f32.mxu1 %vm1888_vm5, %v23139_v44 }
0x261b   : > { %v17118_v62 = vpop.f32.mrb[26].mxu1 }
0x261c   : > { %v11706_v35 = vadd.f32 %v17118_v62, %v14532_v19  ;;  %v11700_v38 = vpop.f32.mrb[27].mxu1  ;;  %v23168_v62 = vld [vmem:[%s23831_s29 + $0x10] sm:$0xff] }
0x261d   : > { %v11701_v26 = vadd.f32 %v14532_v19, %v11700_v38  ;;  %v23179_v38 = vld [vmem:[%s23831_s29 + $0x18] sm:$0xff] }
0x261e   : > { %v11756_v48 = vadd.f32 %v11706_v35, %v22877_v18  ;;  %v23173_v35 = vld [vmem:[%s23831_s29] sm:$0xff] }
0x261f   : > { %v11755_v37 = vadd.f32 %v11701_v26, %v22873_v33  ;;  %v17121_v6 = vpop.f32.mrb[28].mxu1  ;;  %v18931_v33 = vmov 0   ;;  %v23185_v26 = vld [vmem:[%s23830_s10 + $0x10] sm:$0xff] }
0x2620   : > { %v11716_v55 = vadd.f32 %v17121_v6, %v14532_v19  ;;  %v11710_v41 = vpop.f32.mrb[29].mxu1  ;;  %v11770_v24 = vsel %vm1447_vm4, %v11756_v48, 0.0  ;;  %18107 = vset.pattern.permute.xlu1 %v18931_v33  ;;  %18106 = vset.pattern.permute.xlu0 %v18931_v33  ;;  %v23204_v6 = vld [vmem:[%s23830_s10 + $0x38] sm:$0xff] }
0x2621   : > { %v11711_v63 = vadd.f32 %v14532_v19, %v11710_v41  ;;  %11771 = vadd.xlane.f32.xlu1 %v11770_v24  ;;  %v11767_v28 = vsel %vm1447_vm4, %v11755_v37, 0.0  ;;  %v23214_v41 = vld [vmem:[%s23832_s8 + $0x20] sm:$0xff] }
0x2622   : > { %v11758_v36 = vadd.f32 %v11716_v55, %v22901_v50  ;;  %11768 = vadd.xlane.f32.xlu0 %v11767_v28  ;;  %v23209_v55 = vld [vmem:[%s23832_s8] sm:$0xff]  ;;  %v23240_v28 = vld [vmem:[%s23831_s29 + $0x30] sm:$0xff] }
0x2623   : > { %v11757_v5 = vadd.f32 %v11711_v63, %v22898_v56  ;;  %v23222_v24 = vld [vmem:[%s23831_s29 + $0x20] sm:$0xff]  ;;  %v23234_v63 = vld [vmem:[%s23831_s29 + $0x28] sm:$0xff] }
0x2624   : > { %v11776_v39 = vsel %vm1447_vm4, %v11758_v36, 0.0 }
0x2625   : > { %11777 = vadd.xlane.f32.xlu1 %v11776_v39  ;;  %v11773_v18 = vsel %vm1447_vm4, %v11757_v5, 0.0 }
0x2626   : > { %11774 = vadd.xlane.f32.xlu0 %v11773_v18 }
0x26ae   : > { %v11772_v29 = vpop.xlane.xlu1 %11771 }
0x26af   : > { %v11792_v16 = vmul.f32 0.03125, %v11772_v29  ;;  %v11769_v49 = vpop.xlane.xlu0 %11768 }
0x26b0   : > { %v11791_v0 = vmul.f32 0.03125, %v11769_v49 }
0x26b1   : > { %v23084_v14 = vsub.f32 %v11756_v48, %v11792_v16  ;;  %v23190_v48 = vld [vmem:[%s23830_s10 + $0x30] sm:$0xff] }
0x26b2   : > { %v23086_v45 = vsub.f32 %v11755_v37, %v11791_v0  ;;  %v11778_v50 = vpop.xlane.xlu1 %11777  ;;  %v23195_v37 = vld [vmem:[%s23830_s10 + $0x18] sm:$0xff] }
0x26b3   : > { %v11794_v31 = vmul.f32 0.03125, %v11778_v50  ;;  %v11775_v56 = vpop.xlane.xlu0 %11774  ;;  %v11808_v47 = vmul.f32 %v23084_v14, %v23084_v14 }
0x26b4   : > { %v11793_v61 = vmul.f32 0.03125, %v11775_v56  ;;  %v11807_v32 = vmul.f32 %v23086_v45, %v23086_v45 }
0x26b5   : > { %v23092_v17 = vsub.f32 %v11758_v36, %v11794_v31  ;;  %v11818_v57 = vsel %vm1447_vm4, %v11808_v47, 0.0  ;;  %v23246_v36 = vld [vmem:[%s23831_s29 + $0x38] sm:$0xff] }
0x26b6   : > { %v23095_v2 = vsub.f32 %v11757_v5, %v11793_v61  ;;  %11819 = vadd.xlane.f32.xlu1 %v11818_v57  ;;  %v11815_v30 = vsel %vm1447_vm4, %v11807_v32, 0.0  ;;  %v23249_v32 = vld [vmem:[#allocation10 + $0x6] ss:$0 sm:$0xff] }
0x26b7   : > { %11816 = vadd.xlane.f32.xlu0 %v11815_v30  ;;  %v11810_v54 = vmul.f32 %v23092_v17, %v23092_v17 }
0x26b8   : > { %v11809_v25 = vmul.f32 %v23095_v2, %v23095_v2 }
0x26b9   : > { %v11824_v43 = vsel %vm1447_vm4, %v11810_v54, 0.0 }
0x26ba   : > { %11825 = vadd.xlane.f32.xlu1 %v11824_v43  ;;  %v11821_v27 = vsel %vm1447_vm4, %v11809_v25, 0.0  ;;  %v23253_v25 = vld [vmem:[#allocation10 + $0x7] ss:$0 sm:$0xff] }
0x26bb   : > { %11822 = vadd.xlane.f32.xlu0 %v11821_v27 }
0x26c1   : > { %v17124_v40 = vpop.f32.mrb[30].mxu1 }
0x26c2   : > { %v11720_v10 = vpop.f32.mrb[31].mxu1 }
0x26c5   : > { %v17127_v3 = vpop.f32.mrb[32].mxu1 }
0x26c6   : > { %v11734_v11 = vadd.f32 %v17127_v3, %v14532_v19  ;;  %v11728_v13 = vpop.f32.mrb[33].mxu1 }
0x26c7   : > { %v11729_v9 = vadd.f32 %v14532_v19, %v11728_v13 }
0x26c8   : > { %v23105_v4 = vadd.f32 %v11734_v11, %v22975_v22 }
0x26c9   : > { %v23108_v52 = vadd.f32 %v11729_v9, %v22971_v20  ;;  %v17130_v42 = vpop.f32.mrb[34].mxu1 }
0x26ca   : > { %v11744_v7 = vadd.f32 %v17130_v42, %v14532_v19  ;;  %v11738_v12 = vpop.f32.mrb[35].mxu1  ;;  %v11782_v21 = vsel %vm1447_vm4, %v23105_v4, 0.0 }
0x26cb   : > { %v11739_v46 = vadd.f32 %v14532_v19, %v11738_v12  ;;  %11783 = vadd.xlane.f32.xlu1 %v11782_v21  ;;  %v11779_v51 = vsel %vm1447_vm4, %v23108_v52, 0.0  ;;  %v23158_v19 = vld [vmem:[%s23830_s10 + $0x28] sm:$0xff] }
0x26cc   : > { %v23115_v8 = vadd.f32 %v11744_v7, %v22989_v59  ;;  %11780 = vadd.xlane.f32.xlu0 %v11779_v51  ;;  %v11899_v59 = vld [vmem:[%s23128_s5] sm:$0xff] }
0x26cd   : > { %v23118_v22 = vadd.f32 %v11739_v46, %v22985_v53  ;;  %v17133_v20 = vpop.f32.mrb[36].mxu1  ;;  %17134 = vmatprep.subr.mxu0 %v11899_v59  ;;  %17156 = vmatprep.subr.mxu1 %v11899_v59  ;;  %v23134_v53 = vld [vmem:[%s23829_s28] sm:$0xff] }
0x26ce   : > { %v11748_v1 = vpop.f32.mrb[37].mxu1  ;;  %v11788_v60 = vsel %vm1447_vm4, %v23115_v8, 0.0  ;;  %17135 = vmatpush3.msra.mxu0 %v11899_v59  ;;  %17157 = vmatpush3.msra.mxu1 %v11899_v59 }
0x26cf   : > { %11789 = vadd.xlane.f32.xlu1 %v11788_v60  ;;  %v11785_v58 = vsel %vm1447_vm4, %v23118_v22, 0.0  ;;  %17136 = vmatprep.mubr.msk.f32.mxu0 %vm1888_vm5, %v23134_v53 }
0x26d0   : > { %11786 = vadd.xlane.f32.xlu0 %v11785_v58  ;;  %17137 = vmatmul.mubr.msk.f32.vlgmr.msra.gmra.mrb[14].mxu0 %vm1888_vm5, %v23153_v15 }
0x26d1   : > { %17159 = vmatmul.mubr.msk.f32.vlgmr.msra.gmra.mrb[38].mxu1 %vm1888_vm5, %v23158_v19  ;;  %17139 = vmatprep.mubr.msk.f32.mxu0 %vm1888_vm5, %v23185_v26 }
0x26d2   : > { %17161 = vmatprep.mubr.msk.f32.mxu1 %vm1888_vm5, %v23190_v48 }
0x26d4   : > { %17140 = vmatmul.mubr.msk.f32.gmra.mrb[16].mxu0 %vm1888_vm5, %v23195_v37 }
0x26d5   : > { %17162 = vmatmul.mubr.msk.f32.gmra.mrb[40].mxu1 %vm1888_vm5, %v23204_v6  ;;  %17150 = vmatprep.mubr.msk.f32.mxu0 %vm1447_vm4, %v23209_v55 }
0x26d6   : > { %17172 = vmatprep.mubr.msk.f32.mxu1 %vm1447_vm4, %v23214_v41 }
0x26e0   : > { %12125 = vperm.xlu1 %18107, %v23144_v23  }
0x26e4   : > { %12130 = vperm.xlu1 %18107, %v23168_v62  }
0x26e6   : > { %12120 = vperm.xlu0 %18106, %v23173_v35  }
0x26e8   : > { %12135 = vperm.xlu1 %18107, %v23179_v38  }
0x26ec   : > { %12353 = vperm.xlu1 %18107, %v23222_v24  }
0x26f0   : > { %12358 = vperm.xlu1 %18107, %v23234_v63  }
0x26f4   : > { %12363 = vperm.xlu1 %18107, %v23240_v28  }
0x26f8   : > { %12368 = vperm.xlu1 %18107, %v23246_v36  }
0x2743   : > { %v11820_v5 = vpop.xlane.xlu1 %11819 }
0x2744   : > { %v11840_v39 = vmul.f32 0.03125, %v11820_v5  ;;  %v11817_v18 = vpop.xlane.xlu0 %11816 }
0x2745   : > { %v11839_v33 = vmul.f32 0.03125, %v11817_v18 }
0x2746   : > { %v11848_v29 = vadd.f32 1e-05, %v11840_v39 }
0x2747   : > { %v11847_v16 = vadd.f32 1e-05, %v11839_v33  ;;  %v11826_v49 = vpop.xlane.xlu1 %11825 }
0x2748   : > { %18612 = vrsqrt.f32 %v11848_v29  ;;  %v11842_v0 = vmul.f32 0.03125, %v11826_v49  ;;  %v11823_v50 = vpop.xlane.xlu0 %11822 }
0x2749   : > { %18614 = vrsqrt.f32 %v11847_v16  ;;  %v11841_v31 = vmul.f32 0.03125, %v11823_v50  ;;  %v23313_v50 = vld [vmem:[%s23832_s8 + $0x28] sm:$0xff] }
0x274a   : > { %v11850_v56 = vadd.f32 1e-05, %v11842_v0  ;;  %v23308_v0 = vld [vmem:[%s23832_s8 + $0x8] sm:$0xff] }
0x274b   : > { %v11849_v47 = vadd.f32 1e-05, %v11841_v31  ;;  %v23318_v31 = vld [vmem:[%s23832_s8 + $0x10] sm:$0xff] }
0x274c   : > { %18616 = vrsqrt.f32 %v11850_v56  ;;  %v23323_v56 = vld [vmem:[%s23832_s8 + $0x30] sm:$0xff] }
0x274d   : > { %18618 = vrsqrt.f32 %v11849_v47  ;;  %v23334_v47 = vld [vmem:[%s23832_s8 + $0x18] sm:$0xff] }
0x2752   : > { %v18613_v61 = vpop.eup %18612 }
0x2753   : > { %v18615_v57 = vpop.eup %18614  ;;  %v11864_v30 = vmul.f32 %v18613_v61, %v23084_v14  ;;  %v23341_v61 = vld [vmem:[%s23832_s8 + $0x38] sm:$0xff] }
0x2754   : > { %v11863_v54 = vmul.f32 %v18615_v57, %v23086_v45  ;;  %v23354_v57 = vld [vmem:[%s23128_s5 + $0x8] sm:$0xff]  ;;  %s23835_s5 = sld [smem:[#allocation34_spill]] }
0x2755   : > { %v11878_v43 = vmul.f32 %v23249_v32, %v11864_v30 }
0x2756   : > { %v18617_v27 = vpop.eup %18616  ;;  %v11877_v40 = vmul.f32 %v23249_v32, %v11863_v54 }
0x2757   : > { %v18619_v10 = vpop.eup %18618  ;;  %v11866_v3 = vmul.f32 %v18617_v27, %v23092_v17  ;;  %v11892_v11 = vadd.f32 %v23253_v25, %v11878_v43  ;;  %v23405_v43 = vld [vmem:[%s23833_s24] sm:$0xff] }
0x2758   : > { %v11865_v13 = vmul.f32 %v18619_v10, %v23095_v2  ;;  %v11784_v9 = vpop.xlane.xlu1 %11783  ;;  %v11891_v42 = vadd.f32 %v23253_v25, %v11877_v40 }
0x2759   : > { %v11796_v14 = vmul.f32 0.03125, %v11784_v9  ;;  %v11781_v7 = vpop.xlane.xlu0 %11780  ;;  %v11880_v45 = vmul.f32 %v23249_v32, %v11866_v3 }
0x275a   : > { %v11795_v12 = vmul.f32 0.03125, %v11781_v7  ;;  %v17842_v21 = vpack.c.bf16 %v11892_v11, %v11891_v42  ;;  %v11879_v46 = vmul.f32 %v23249_v32, %v11865_v13  ;;  %s23560_s21 = scalar_lea.vmem %s23835_s5, %s23834_s4  ;;  %s23836_s4 = sld [smem:[#allocation49_spill]] }
0x275b   : > { %v23264_v51 = vsub.f32 %v23105_v4, %v11796_v14  ;;  %v11894_v17 = vadd.f32 %v23253_v25, %v11880_v45 }
0x275c   : > { %v23268_v20 = vsub.f32 %v23108_v52, %v11795_v12  ;;  %v11790_v2 = vpop.xlane.xlu1 %11789  ;;  %17844 = vmatprep.subr.msk.bf16.mxu0 %vm20873_vm8, %v17842_v21  ;;  %17856 = vmatprep.subr.msk.bf16.mxu1 %vm20873_vm8, %v17842_v21  ;;  %v11893_v1 = vadd.f32 %v23253_v25, %v11879_v46 }
0x275d   : > { %v11798_v60 = vmul.f32 0.03125, %v11790_v2  ;;  %17847 = vmatpush3.bf16.xpose.msk.msra.mxu0 %vm20873_vm8, %v17842_v21  ;;  %v11787_v4 = vpop.xlane.xlu0 %11786  ;;  %17859 = vmatpush3.bf16.xpose.msk.msra.mxu1 %vm20873_vm8, %v17842_v21  ;;  %v11812_v52 = vmul.f32 %v23264_v51, %v23264_v51 }
0x275e   : > { %v11797_v58 = vmul.f32 0.03125, %v11787_v4  ;;  %v17848_v59 = vpack.c.bf16 %v11894_v17, %v11893_v1  ;;  %v11811_v5 = vmul.f32 %v23268_v20, %v23268_v20 }
0x275f   : > { %v23284_v39 = vsub.f32 %v23115_v8, %v11798_v60  ;;  %v11830_v18 = vsel %vm1447_vm4, %v11812_v52, 0.0 }
0x2760   : > { %v23288_v33 = vsub.f32 %v23118_v22, %v11797_v58  ;;  %11831 = vadd.xlane.f32.xlu0 %v11830_v18  ;;  %17850 = vmatprep.subr.msk.bf16.mxu0 %vm20873_vm8, %v17848_v59  ;;  %v11827_v29 = vsel %vm1447_vm4, %v11811_v5, 0.0  ;;  %s23574_s1 = scalar_lea.vmem %s23836_s4, %s14689_s22 }
0x2761   : > { %17862 = vmatprep.subr.msk.bf16.mxu1 %vm20873_vm8, %v17848_v59  ;;  %11828 = vadd.xlane.f32.xlu1 %v11827_v29  ;;  %v11814_v16 = vmul.f32 %v23284_v39, %v23284_v39 }
0x2762   : > { %v11813_v8 = vmul.f32 %v23288_v33, %v23288_v33 }
0x2763   : > { %v11836_v49 = vsel %vm1447_vm4, %v11814_v16, 0.0 }
0x2764   : > { %v11833_v22 = vsel %vm1447_vm4, %v11813_v8, 0.0 }
0x2765   : > { %17853 = vmatpush3.bf16.xpose.msk.msra.mxu0 %vm20873_vm8, %v17848_v59  ;;  %11837 = vadd.xlane.f32.xlu1 %v11836_v49  ;;  %v12121_v54 = vpop.permute.xlu0 %12120 }
0x2766   : > { %11834 = vadd.xlane.f32.xlu0 %v11833_v22  ;;  %17865 = vmatpush3.bf16.xpose.msk.msra.mxu1 %vm20873_vm8, %v17848_v59 }
0x2767   : > { %17228 = vmatprep.subr.mxu1 %v23354_v57 }
0x276c   : > { %17151 = vmatmul.mubr.msk.f32.vlgmr.msra.gmra.mrb[14].mxu0 %vm1447_vm4, %v23308_v0 }
0x276d   : > { %17173 = vmatmul.mubr.msk.f32.vlgmr.msra.gmra.mrb[38].mxu1 %vm1447_vm4, %v23313_v50  ;;  %17153 = vmatprep.mubr.msk.f32.mxu0 %vm1447_vm4, %v23318_v31 }
0x276e   : > { %17175 = vmatprep.mubr.msk.f32.mxu1 %vm1447_vm4, %v23323_v56  ;;  %17229 = vmatpush3.msra.mxu1 %v23354_v57 }
0x2770   : > { %17154 = vmatmul.mubr.msk.f32.gmra.mrb[16].mxu0 %vm1447_vm4, %v23334_v47 }
0x2771   : > { %17176 = vmatmul.mubr.msk.f32.gmra.mrb[40].mxu1 %vm1447_vm4, %v23341_v61  ;;  %17186 = vmatprep.mubr.msk.f32.mxu0 %vm1447_vm4, %v23405_v43 }
0x2772   : > { %17230 = vmatprep.mubr.msk.f32.mxu1 %vm1888_vm5, %v23139_v44  ;;  %v14595_v44 = vld [vmem:[%s23831_s29 + $0x40] sm:$0xff] }
0x2775   : > { %17231 = vmatmul.mubr.msk.f32.vlgmr.msra.gmra.mrb[42].mxu1 %vm1888_vm5, %v23158_v19  ;;  %v14596_v19 = vld [vmem:[%s23831_s29 + $0x48] sm:$0xff] }
0x2776   : > { %12911 = vperm.xlu1 %18107, %v23144_v23   ;;  %17233 = vmatprep.mubr.msk.f32.mxu1 %vm1888_vm5, %v23190_v48  ;;  %v14597_v23 = vld [vmem:[%s23831_s29 + $0x50] sm:$0xff]  ;;  %v14604_v48 = vld [vmem:[%s23831_s29 + $0x68] sm:$0xff] }
0x2779   : > { %17234 = vmatmul.mubr.msk.f32.gmra.mrb[44].mxu1 %vm1888_vm5, %v23204_v6  ;;  %v14606_v6 = vld [vmem:[%s23831_s29 + $0x78] sm:$0xff] }
0x277a   : > { %12916 = vperm.xlu1 %18107, %v23168_v62   ;;  %17244 = vmatprep.mubr.msk.f32.mxu1 %vm1447_vm4, %v23214_v41  ;;  %v14598_v62 = vld [vmem:[%s23831_s29 + $0x58] sm:$0xff]  ;;  %v12126_v41 = vpop.permute.xlu1 %12125 }
0x277c   : > { %12906 = vperm.xlu0 %18106, %v23173_v35   ;;  %v14603_v35 = vld [vmem:[%s23831_s29 + $0x60] sm:$0xff] }
0x277e   : > { %13136 = vperm.xlu1 %18107, %v23222_v24   ;;  %v23394_v24 = vpop.permute.xlu1 %12130 }
0x2780   : > { %12921 = vperm.xlu0 %18106, %v23179_v38   ;;  %v14605_v38 = vld [vmem:[%s23831_s29 + $0x70] sm:$0xff] }
0x2782   : > { %13146 = vperm.xlu1 %18107, %v23240_v28  }
0x2784   : > { %13141 = vperm.xlu0 %18106, %v23234_v63   ;;  %v12136_v63 = vpop.permute.xlu1 %12135 }
0x2786   : > { %12523 = vperm.xlu1 %18107, %v14595_v44  }
0x2788   : > { %13151 = vperm.xlu0 %18106, %v23246_v36   ;;  %v23396_v28 = vpop.permute.xlu1 %12353 }
0x278a   : > { %12533 = vperm.xlu1 %18107, %v14597_v23  }
0x278c   : > { %12528 = vperm.xlu0 %18106, %v14596_v19   ;;  %v23398_v36 = vpop.permute.xlu1 %12358 }
0x278e   : > { %13306 = vperm.xlu1 %18107, %v14595_v44  }
0x2790   : > { %12538 = vperm.xlu0 %18106, %v14598_v62   ;;  %v23400_v30 = vpop.permute.xlu1 %12363 }
0x2792   : > { %13316 = vperm.xlu1 %18107, %v14597_v23  }
0x2794   : > { %13311 = vperm.xlu0 %18106, %v14596_v19   ;;  %v23407_v27 = vpop.permute.xlu1 %12368 }
0x2796   : > { %12561 = vperm.xlu1 %18107, %v14603_v35  }
0x2798   : > { %13321 = vperm.xlu0 %18106, %v14598_v62  }
0x279a   : > { %12571 = vperm.xlu1 %18107, %v14605_v38  }
0x279c   : > { %12566 = vperm.xlu0 %18106, %v14604_v48  }
0x279e   : > { %13342 = vperm.xlu1 %18107, %v14603_v35  }
0x27a0   : > { %12576 = vperm.xlu0 %18106, %v14606_v6  }
0x27a2   : > { %13352 = vperm.xlu1 %18107, %v14605_v38  }
0x27a4   : > { %13347 = vperm.xlu0 %18106, %v14604_v48  }
0x27a8   : > { %13357 = vperm.xlu0 %18106, %v14606_v6  }
0x27ed   : > { %v11832_v40 = vpop.xlane.xlu0 %11831 }
0x27ee   : > { %v11844_v10 = vmul.f32 0.03125, %v11832_v40  ;;  %v11829_v3 = vpop.xlane.xlu1 %11828 }
0x27ef   : > { %v11843_v11 = vmul.f32 0.03125, %v11829_v3 }
0x27f0   : > { %v11852_v13 = vadd.f32 1e-05, %v11844_v10 }
0x27f1   : > { %v11851_v9 = vadd.f32 1e-05, %v11843_v11 }
0x27f2   : > { %18620 = vrsqrt.f32 %v11852_v13  ;;  %v11838_v42 = vpop.xlane.xlu1 %11837 }
0x27f3   : > { %18622 = vrsqrt.f32 %v11851_v9  ;;  %v11846_v14 = vmul.f32 0.03125, %v11838_v42  ;;  %v11835_v7 = vpop.xlane.xlu0 %11834 }
0x27f4   : > { %v11845_v45 = vmul.f32 0.03125, %v11835_v7 }
0x27f5   : > { %v11854_v12 = vadd.f32 1e-05, %v11846_v14 }
0x27f6   : > { %v11853_v21 = vadd.f32 1e-05, %v11845_v45 }
0x27f7   : > { %18624 = vrsqrt.f32 %v11854_v12 }
0x27f8   : > { %18626 = vrsqrt.f32 %v11853_v21 }
0x27fc   : > { %v18621_v46 = vpop.eup %18620 }
0x27fd   : > { %v18623_v17 = vpop.eup %18622  ;;  %v11868_v2 = vmul.f32 %v18621_v46, %v23264_v51 }
0x27fe   : > { %v11867_v1 = vmul.f32 %v18623_v17, %v23268_v20 }
0x27ff   : > { %v11882_v60 = vmul.f32 %v23249_v32, %v11868_v2 }
0x2800   : > { %v11881_v4 = vmul.f32 %v23249_v32, %v11867_v1 }
0x2801   : > { %v18625_v52 = vpop.eup %18624  ;;  %v11896_v58 = vadd.f32 %v23253_v25, %v11882_v60 }
0x2802   : > { %v18627_v59 = vpop.eup %18626  ;;  %v11870_v5 = vmul.f32 %v18625_v52, %v23284_v39  ;;  %v11895_v18 = vadd.f32 %v23253_v25, %v11881_v4 }
0x2803   : > { %v11869_v29 = vmul.f32 %v18627_v59, %v23288_v33  ;;  %v23460_v59 = vld [vmem:[%s23833_s24 + $0x8] sm:$0xff] }
0x2804   : > { %v23419_v16 = vpack.c.bf16 %v11896_v58, %v11895_v18  ;;  %v11884_v51 = vmul.f32 %v23249_v32, %v11870_v5  ;;  %v23465_v5 = vld [vmem:[%s23833_s24 + $0x10] sm:$0xff]  ;;  %v23474_v18 = vld [vmem:[%s23833_s24 + $0x18] sm:$0xff] }
0x2805   : > { %v11883_v20 = vmul.f32 %v23249_v32, %v11869_v29  ;;  %v23448_v32 = vld [vmem:[%s23833_s24 + $0x20] sm:$0xff]  ;;  %v23483_v29 = vld [vmem:[%s23833_s24 + $0x28] sm:$0xff] }
0x2806   : > { %17896 = vmatprep.subr.msk.bf16.mxu1 %vm20873_vm8, %v23419_v16  ;;  %v11898_v8 = vadd.f32 %v23253_v25, %v11884_v51  ;;  %v23489_v51 = vld [vmem:[%s23833_s24 + $0x30] sm:$0xff] }
0x2807   : > { %17899 = vmatpush3.bf16.xpose.msk.msra.mxu1 %vm20873_vm8, %v23419_v16  ;;  %v11897_v39 = vadd.f32 %v23253_v25, %v11883_v20  ;;  %v23499_v20 = vld [vmem:[%s23833_s24 + $0x38] sm:$0xff] }
0x2809   : > { %v23431_v49 = vpack.c.bf16 %v11898_v8, %v11897_v39 }
0x280b   : > { %17902 = vmatprep.subr.msk.bf16.mxu1 %vm20873_vm8, %v23431_v49 }
0x280f   : > { %17905 = vmatpush3.bf16.xpose.msk.msra.mxu1 %vm20873_vm8, %v23431_v49 }
0x2816   : > { %17245 = vmatmul.mubr.msk.f32.vlgmr.msra.gmra.mrb[42].mxu1 %vm1447_vm4, %v23313_v50 }
0x2817   : > { %17247 = vmatprep.mubr.msk.f32.mxu1 %vm1447_vm4, %v23323_v56 }
0x281a   : > { %17248 = vmatmul.mubr.msk.f32.gmra.mrb[44].mxu1 %vm1447_vm4, %v23341_v61 }
0x281b   : > { %17272 = vmatprep.mubr.msk.f32.mxu1 %vm1447_vm4, %v23448_v32 }
0x283f   : > { %v17152_v25 = vpop.f32.mrb[14].mxu0 }
0x2840   : > { %v12139_v33 = vadd.f32 %v17152_v25, %v12126_v41  ;;  %v17174_v22 = vpop.f32.mrb[38].mxu1  ;;  %v12095_v44 = vpop.f32.mrb[15].mxu0 }
0x2841   : > { %v12138_v23 = vadd.f32 %v12121_v54, %v12095_v44  ;;  %v12327_v50 = vpop.f32.mrb[39].mxu1  ;;  %v12372_v41 = vadd.f32 %v17174_v22, %v23398_v36 }
0x2842   : > { %v14588_v19 = vmul.f32 -1.442695, %v12139_v33  ;;  %v12371_v54 = vadd.f32 %v23396_v28, %v12327_v50  ;;  %v12407_v50 = vld [vmem:[%s23560_s21] sm:$0xff] }
0x2843   : > { %v14587_v62 = vmul.f32 -1.442695, %v12138_v23  ;;  %v17155_v56 = vpop.f32.mrb[16].mxu0  ;;  %v12408_v23 = vld [vmem:[%s23560_s21 + $0x8] sm:$0xff] }
0x2844   : > { %18628 = vpow2.f32 %v14588_v19  ;;  %v12141_v35 = vadd.f32 %v17155_v56, %v12136_v63  ;;  %v17177_v61 = vpop.f32.mrb[40].mxu1  ;;  %v12105_v38 = vpop.f32.mrb[17].mxu0 }
0x2845   : > { %18630 = vpow2.f32 %v14587_v62  ;;  %v12140_v48 = vadd.f32 %v23394_v24, %v12105_v38  ;;  %v12337_v6 = vpop.f32.mrb[41].mxu1  ;;  %v12374_v63 = vadd.f32 %v17177_v61, %v23407_v27 }
0x2846   : > { %v14590_v40 = vmul.f32 -1.442695, %v12141_v35  ;;  %v12373_v42 = vadd.f32 %v23400_v30, %v12337_v6 }
0x2847   : > { %v14589_v10 = vmul.f32 -1.442695, %v12140_v48  ;;  %v12410_v48 = vld [vmem:[%s23560_s21 + $0x18] sm:$0xff] }
0x2848   : > { %18632 = vpow2.f32 %v14590_v40  ;;  %v12409_v40 = vld [vmem:[%s23560_s21 + $0x10] sm:$0xff] }
0x2849   : > { %18634 = vpow2.f32 %v14589_v10 }
0x284a   : > { %18636 = vtanh.f32 %v12372_v41 }
0x284b   : > { %18638 = vtanh.f32 %v12371_v54 }
0x284e   : > { %v18629_v3 = vpop.eup %18628 }
0x284f   : > { %v18631_v11 = vpop.eup %18630  ;;  %v12388_v13 = vadd.f32 1.0, %v18629_v3 }
0x2850   : > { %v12387_v9 = vadd.f32 1.0, %v18631_v11 }
0x2851   : > { %18640 = vrcp.f32 %v12388_v13 }
0x2852   : > { %v18633_v24 = vpop.eup %18632  ;;  %18642 = vrcp.f32 %v12387_v9 }
0x2853   : > { %v18635_v14 = vpop.eup %18634  ;;  %v12390_v7 = vadd.f32 1.0, %v18633_v24  ;;  %18644 = vtanh.f32 %v12374_v63 }
0x2854   : > { %v12389_v45 = vadd.f32 1.0, %v18635_v14  ;;  %18646 = vtanh.f32 %v12373_v42  ;;  %v18637_v28 = vpop.eup %18636 }
0x2855   : > { %18648 = vrcp.f32 %v12390_v7  ;;  %v18639_v36 = vpop.eup %18638 }
0x2856   : > { %18650 = vrcp.f32 %v12389_v45 }
0x285b   : > { %v18641_v12 = vpop.eup %18640 }
0x285c   : > { %v18643_v21 = vpop.eup %18642  ;;  %v12404_v46 = vmul.f32 %v18641_v12, %v18637_v28 }
0x285d   : > { %v18645_v27 = vpop.eup %18644  ;;  %v12403_v17 = vmul.f32 %v18643_v21, %v18639_v36 }
0x285e   : > { %v18647_v2 = vpop.eup %18646 }
0x285f   : > { %v18649_v1 = vpop.eup %18648  ;;  %v17866_v30 = vpack.c.bf16 %v12404_v46, %v12403_v17 }
0x2860   : > { %v18651_v60 = vpop.eup %18650  ;;  %v12406_v4 = vmul.f32 %v18649_v1, %v18645_v27 }
0x2861   : > { %17867 = vmatprep.subr.bf16.mxu0 %v17866_v30  ;;  %v12405_v52 = vmul.f32 %v18651_v60, %v18647_v2 }
0x2862   : > { %17869 = vmatpush3.bf16.msra.mxu0 %v17866_v30 }
0x2863   : > { %v17870_v58 = vpack.c.bf16 %v12406_v4, %v12405_v52 }
0x2865   : > { %17871 = vmatprep.subr.bf16.mxu0 %v17870_v58 }
0x2866   : > { %17873 = vmatpush3.bf16.msra.mxu0 %v17870_v58 }
0x2867   : > { %17875 = vmatprep.subr.bf16.mxu0 %v17866_v30 }
0x2869   : > { %17187 = vmatmul.mubr.msk.f32.vlgmr.msra.gmra.mrb[18].mxu0 %vm1447_vm4, %v23460_v59 }
0x286a   : > { %17877 = vmatpush3.bf16.msra.mxu0 %v17866_v30  ;;  %17189 = vmatprep.mubr.msk.f32.mxu0 %vm1447_vm4, %v23465_v5 }
0x286b   : > { %17879 = vmatprep.subr.bf16.mxu0 %v17870_v58 }
0x286d   : > { %17190 = vmatmul.mubr.msk.f32.gmra.mrb[20].mxu0 %vm1447_vm4, %v23474_v18 }
0x286e   : > { %17881 = vmatpush3.bf16.msra.mxu0 %v17870_v58  ;;  %17200 = vmatprep.mubr.msk.f32.mxu0 %vm1447_vm4, %v23448_v32 }
0x286f   : > { %17206 = vmatprep.subr.mxu0 %v23354_v57 }
0x2871   : > { %17201 = vmatmul.mubr.msk.f32.vlgmr.msra.gmra.mrb[22].mxu0 %vm1447_vm4, %v23483_v29 }
0x2872   : > { %17207 = vmatpush3.msra.mxu0 %v23354_v57  ;;  %17203 = vmatprep.mubr.msk.f32.mxu0 %vm1447_vm4, %v23489_v51 }
0x2873   : > { %17884 = vmatprep.subr.msk.bf16.mxu0 %vm20873_vm8, %v23419_v16 }
0x2875   : > { %17204 = vmatmul.mubr.msk.f32.gmra.mrb[24].mxu0 %vm1447_vm4, %v23499_v20 }
0x2876   : > { %17208 = vmatprep.mubr.msk.f32.mxu0 %vm1888_vm5, %v23134_v53  ;;  %v23533_v53 = vpop.permute.xlu0 %12906 }
0x2879   : > { %17209 = vmatmul.mubr.msk.f32.vlgmr.msra.gmra.mrb[26].mxu0 %vm1888_vm5, %v23153_v15 }
0x287a   : > { %17887 = vmatpush3.bf16.xpose.msk.msra.mxu0 %vm20873_vm8, %v23419_v16  ;;  %17211 = vmatprep.mubr.msk.f32.mxu0 %vm1888_vm5, %v23185_v26  ;;  %v23535_v15 = vpop.permute.xlu0 %12921 }
0x287b   : > { %17890 = vmatprep.subr.msk.bf16.mxu0 %vm20873_vm8, %v23431_v49 }
0x287d   : > { %17212 = vmatmul.mubr.msk.f32.gmra.mrb[28].mxu0 %vm1888_vm5, %v23195_v37 }
0x287e   : > { %17222 = vmatprep.mubr.msk.f32.mxu0 %vm1447_vm4, %v23209_v55  ;;  %v13142_v26 = vpop.permute.xlu0 %13141 }
0x2882   : > { %17893 = vmatpush3.bf16.xpose.msk.msra.mxu0 %vm20873_vm8, %v23431_v49 }
0x2889   : > { %17223 = vmatmul.mubr.msk.f32.vlgmr.msra.gmra.mrb[26].mxu0 %vm1447_vm4, %v23308_v0  ;;  %v13152_v0 = vpop.permute.xlu0 %13151 }
0x288a   : > { %17225 = vmatprep.mubr.msk.f32.mxu0 %vm1447_vm4, %v23318_v31 }
0x288d   : > { %17226 = vmatmul.mubr.msk.f32.gmra.mrb[28].mxu0 %vm1447_vm4, %v23334_v47  ;;  %v12912_v47 = vpop.permute.xlu1 %12911  ;;  %v12529_v49 = vpop.permute.xlu0 %12528 }
0x288e   : > { %17258 = vmatprep.mubr.msk.f32.mxu0 %vm1447_vm4, %v23405_v43 }
0x2891   : > { %v23545_v43 = vpop.permute.xlu1 %12916  ;;  %v12539_v25 = vpop.permute.xlu0 %12538 }
0x2895   : > { %v23547_v8 = vpop.permute.xlu1 %13136  ;;  %v23551_v22 = vpop.permute.xlu0 %13311 }
0x2899   : > { %v23549_v39 = vpop.permute.xlu1 %13146  ;;  %v23564_v19 = vpop.permute.xlu0 %13321 }
0x289d   : > { %v12524_v32 = vpop.permute.xlu1 %12523  ;;  %v12567_v13 = vpop.permute.xlu0 %12566 }
0x28a1   : > { %v12534_v33 = vpop.permute.xlu1 %12533  ;;  %v12577_v46 = vpop.permute.xlu0 %12576 }
0x28a5   : > { %v23553_v44 = vpop.permute.xlu1 %13306 }
0x28a9   : > { %v23567_v56 = vpop.permute.xlu1 %13316 }
0x28ad   : > { %v12562_v42 = vpop.permute.xlu1 %12561 }
0x28b1   : > { %v12572_v17 = vpop.permute.xlu1 %12571 }
0x28e9   : > { %v17246_v37 = vpop.f32.mrb[42].mxu1 }
0x28ea   : > { %v23537_v34 = vadd.f32 %v17246_v37, %v13142_v26  ;;  %v23539_v55 = vpop.f32.mrb[43].mxu1 }
0x28ed   : > { %v17249_v57 = vpop.f32.mrb[44].mxu1 }
0x28ee   : > { %v23541_v31 = vadd.f32 %v17249_v57, %v13152_v0  ;;  %v23543_v16 = vpop.f32.mrb[45].mxu1 }
0x293c   : > { %v17188_v62 = vpop.f32.mrb[18].mxu0 }
0x293d   : > { %v12513_v35 = vadd.f32 %v17188_v62, %v12408_v23  ;;  %v12493_v61 = vpop.f32.mrb[19].mxu0 }
0x293e   : > { %v12512_v38 = vadd.f32 %v12493_v61, %v12407_v50 }
0x293f   : > { %v12542_v6 = vadd.f32 %v12529_v49, %v12513_v35 }
0x2940   : > { %v12541_v10 = vadd.f32 %v12524_v32, %v12512_v38  ;;  %v17191_v41 = vpop.f32.mrb[20].mxu0 }
0x2941   : > { %v12546_v54 = vmul.f32 0.70710677, %v12542_v6  ;;  %v12515_v3 = vadd.f32 %v17191_v41, %v12410_v48  ;;  %v12503_v11 = vpop.f32.mrb[21].mxu0 }
0x2942   : > { %v12545_v63 = vmul.f32 0.70710677, %v12541_v10  ;;  %v12514_v9 = vadd.f32 %v12503_v11, %v12409_v40 }
0x2943   : > { %12677 = vst.msk [vmem:[%s23574_s1 + $0x8] sm:$0xff] %vm1447_vm4, %v12546_v54  ;;  %v12544_v24 = vadd.f32 %v12539_v25, %v12515_v3 }
0x2944   : > { %12676 = vst.msk [vmem:[%s23574_s1] sm:$0xff] %vm1447_vm4, %v12545_v63  ;;  %v12543_v14 = vadd.f32 %v12534_v33, %v12514_v9  ;;  %v17202_v7 = vpop.f32.mrb[22].mxu0  ;;  %v13348_v63 = vpop.permute.xlu0 %13347  ;;  %v14652_v9 = vld [vmem:[%s23560_s21 + $0x20] sm:$0xff] }
0x2945   : > { %v12548_v45 = vmul.f32 0.70710677, %v12544_v24  ;;  %v12663_v28 = vadd.f32 %v17202_v7, %v12567_v13  ;;  %v12657_v36 = vpop.f32.mrb[23].mxu0  ;;  %v13343_v13 = vpop.permute.xlu1 %13342 }
0x2946   : > { %v12547_v12 = vmul.f32 0.70710677, %v12543_v14  ;;  %v12658_v21 = vadd.f32 %v12657_v36, %v12562_v42 }
0x2947   : > { %12679 = vst.msk [vmem:[%s23574_s1 + $0x18] sm:$0xff] %vm1447_vm4, %v12548_v45  ;;  %12681 = vst.msk [vmem:[%s23574_s1 + $0x28] sm:$0xff] %vm1447_vm4, %v12663_v28  ;;  %v14655_v28 = vld [vmem:[%s23560_s21 + $0x38] sm:$0xff] }
0x2948   : > { %12678 = vst.msk [vmem:[%s23574_s1 + $0x10] sm:$0xff] %vm1447_vm4, %v12547_v12  ;;  %12680 = vst.msk [vmem:[%s23574_s1 + $0x20] sm:$0xff] %vm1447_vm4, %v12658_v21  ;;  %v17205_v27 = vpop.f32.mrb[24].mxu0  ;;  %v13358_v36 = vpop.permute.xlu0 %13357  ;;  %v14654_v12 = vld [vmem:[%s23560_s21 + $0x30] sm:$0xff] }
0x2949   : > { %v12673_v2 = vadd.f32 %v17205_v27, %v12577_v46  ;;  %v12667_v1 = vpop.f32.mrb[25].mxu0 }
0x294a   : > { %v12668_v30 = vadd.f32 %v12667_v1, %v12572_v17 }
0x294b   : > { %12683 = vst.msk [vmem:[%s23574_s1 + $0x38] sm:$0xff] %vm1447_vm4, %v12673_v2 }
0x294c   : > { %12682 = vst.msk [vmem:[%s23574_s1 + $0x30] sm:$0xff] %vm1447_vm4, %v12668_v30 }
0x295c   : > { %v17224_v60 = vpop.f32.mrb[26].mxu0 }
0x295d   : > { %v12925_v4 = vadd.f32 %v17224_v60, %v12912_v47  ;;  %v12881_v52 = vpop.f32.mrb[27].mxu0  ;;  %v13154_v47 = vadd.f32 %v23547_v8, %v23539_v55 }
0x295e   : > { %v12924_v58 = vadd.f32 %v23533_v53, %v12881_v52 }
0x295f   : > { %v14649_v26 = vmul.f32 -1.442695, %v12925_v4 }
0x2960   : > { %v14648_v37 = vmul.f32 -1.442695, %v12924_v58  ;;  %v17227_v0 = vpop.f32.mrb[28].mxu0 }
0x2961   : > { %18652 = vpow2.f32 %v14649_v26  ;;  %v12927_v57 = vadd.f32 %v17227_v0, %v23535_v15  ;;  %v12891_v49 = vpop.f32.mrb[29].mxu0  ;;  %v13156_v15 = vadd.f32 %v23549_v39, %v23543_v16 }
0x2962   : > { %18654 = vpow2.f32 %v14648_v37  ;;  %v12926_v32 = vadd.f32 %v23545_v43, %v12891_v49 }
0x2963   : > { %v14651_v25 = vmul.f32 -1.442695, %v12927_v57 }
0x2964   : > { %v14650_v33 = vmul.f32 -1.442695, %v12926_v32 }
0x2965   : > { %18656 = vpow2.f32 %v14651_v25 }
0x2966   : > { %18658 = vpow2.f32 %v14650_v33 }
0x2967   : > { %18660 = vtanh.f32 %v23537_v34 }
0x2968   : > { %18662 = vtanh.f32 %v13154_v47 }
0x296b   : > { %v18653_v23 = vpop.eup %18652 }
0x296c   : > { %v18655_v50 = vpop.eup %18654  ;;  %v13171_v53 = vadd.f32 1.0, %v18653_v23 }
0x296d   : > { %v13170_v62 = vadd.f32 1.0, %v18655_v50 }
0x296e   : > { %18664 = vrcp.f32 %v13171_v53 }
0x296f   : > { %v18657_v35 = vpop.eup %18656  ;;  %18666 = vrcp.f32 %v13170_v62 }
0x2970   : > { %v18659_v43 = vpop.eup %18658  ;;  %18668 = vtanh.f32 %v23541_v31  ;;  %v13173_v61 = vadd.f32 1.0, %v18657_v35 }
0x2971   : > { %18670 = vtanh.f32 %v13156_v15  ;;  %v13172_v38 = vadd.f32 1.0, %v18659_v43  ;;  %v18661_v55 = vpop.eup %18660 }
0x2972   : > { %18672 = vrcp.f32 %v13173_v61  ;;  %v18663_v8 = vpop.eup %18662 }
0x2973   : > { %18674 = vrcp.f32 %v13172_v38 }
0x2978   : > { %v18665_v34 = vpop.eup %18664 }
0x2979   : > { %v18667_v48 = vpop.eup %18666  ;;  %v13187_v6 = vmul.f32 %v18665_v34, %v18661_v55 }
0x297a   : > { %v18669_v40 = vpop.eup %18668  ;;  %v13186_v10 = vmul.f32 %v18667_v48, %v18663_v8 }
0x297b   : > { %v18671_v16 = vpop.eup %18670 }
0x297c   : > { %v18673_v39 = vpop.eup %18672  ;;  %v17906_v41 = vpack.c.bf16 %v13187_v6, %v13186_v10 }
0x297d   : > { %v18675_v54 = vpop.eup %18674  ;;  %v13189_v3 = vmul.f32 %v18673_v39, %v18669_v40 }
0x297e   : > { %17907 = vmatprep.subr.bf16.mxu0 %v17906_v41  ;;  %17915 = vmatprep.subr.bf16.mxu1 %v17906_v41  ;;  %v13188_v31 = vmul.f32 %v18675_v54, %v18671_v16 }
0x297f   : > { %17909 = vmatpush3.bf16.msra.mxu0 %v17906_v41  ;;  %17917 = vmatpush3.bf16.msra.mxu1 %v17906_v41 }
0x2980   : > { %v17910_v11 = vpack.c.bf16 %v13189_v3, %v13188_v31 }
0x2982   : > { %17911 = vmatprep.subr.bf16.mxu0 %v17910_v11  ;;  %17919 = vmatprep.subr.bf16.mxu1 %v17910_v11 }
0x2983   : > { %17913 = vmatpush3.bf16.msra.mxu0 %v17910_v11  ;;  %17921 = vmatpush3.bf16.msra.mxu1 %v17910_v11 }
0x2986   : > { %17259 = vmatmul.mubr.msk.f32.vlgmr.msra.gmra.mrb[30].mxu0 %vm1447_vm4, %v23460_v59  ;;  %17273 = vmatmul.mubr.msk.f32.vlgmr.msra.gmra.mrb[46].mxu1 %vm1447_vm4, %v23483_v29  ;;  %v14653_v59 = vld [vmem:[%s23560_s21 + $0x28] sm:$0xff] }
0x2987   : > { %17261 = vmatprep.mubr.msk.f32.mxu0 %vm1447_vm4, %v23465_v5  ;;  %17275 = vmatprep.mubr.msk.f32.mxu1 %vm1447_vm4, %v23489_v51 }
0x298a   : > { %17262 = vmatmul.mubr.msk.f32.gmra.mrb[32].mxu0 %vm1447_vm4, %v23474_v18  ;;  %17276 = vmatmul.mubr.msk.f32.gmra.mrb[48].mxu1 %vm1447_vm4, %v23499_v20  ;;  %v13353_v18 = vpop.permute.xlu1 %13352 }
0x2a59   : > { %v17260_v29 = vpop.f32.mrb[30].mxu0  ;;  %v17274_v42 = vpop.f32.mrb[46].mxu1 }
0x2a5a   : > { %v13297_v5 = vadd.f32 %v17260_v29, %v14653_v59  ;;  %v13444_v24 = vadd.f32 %v17274_v42, %v13348_v63  ;;  %v13277_v14 = vpop.f32.mrb[31].mxu0  ;;  %v13438_v7 = vpop.f32.mrb[47].mxu1 }
0x2a5b   : > { %v13296_v51 = vadd.f32 %v14652_v9, %v13277_v14  ;;  %v13439_v45 = vadd.f32 %v13438_v7, %v13343_v13 }
0x2a5c   : > { %v13325_v20 = vadd.f32 %v23551_v22, %v13297_v5  ;;  %14681 = vst.msk [vmem:[%s23574_s1 + $0x68] sm:$0xff] %vm1447_vm4, %v13444_v24 }
0x2a5d   : > { %v13324_v21 = vadd.f32 %v23553_v44, %v13296_v51  ;;  %14680 = vst.msk [vmem:[%s23574_s1 + $0x60] sm:$0xff] %vm1447_vm4, %v13439_v45  ;;  %v17263_v46 = vpop.f32.mrb[32].mxu0  ;;  %v17277_v27 = vpop.f32.mrb[48].mxu1 }
0x2a5e   : > { %v13329_v17 = vmul.f32 0.70710677, %v13325_v20  ;;  %v13299_v2 = vadd.f32 %v17263_v46, %v14655_v28  ;;  %v13454_v1 = vadd.f32 %v17277_v27, %v13358_v36  ;;  %v13287_v30 = vpop.f32.mrb[33].mxu0  ;;  %v13448_v60 = vpop.f32.mrb[49].mxu1 }
0x2a5f   : > { %v13328_v22 = vmul.f32 0.70710677, %v13324_v21  ;;  %v13298_v4 = vadd.f32 %v14654_v12, %v13287_v30  ;;  %v13449_v52 = vadd.f32 %v13448_v60, %v13353_v18 }
0x2a60   : > { %14677 = vst.msk [vmem:[%s23574_s1 + $0x48] sm:$0xff] %vm1447_vm4, %v13329_v17  ;;  %v13327_v58 = vadd.f32 %v23564_v19, %v13299_v2  ;;  %14683 = vst.msk [vmem:[%s23574_s1 + $0x78] sm:$0xff] %vm1447_vm4, %v13454_v1 }
0x2a61   : > { %14676 = vst.msk [vmem:[%s23574_s1 + $0x40] sm:$0xff] %vm1447_vm4, %v13328_v22  ;;  %v13326_v44 = vadd.f32 %v23567_v56, %v13298_v4  ;;  %14682 = vst.msk [vmem:[%s23574_s1 + $0x70] sm:$0xff] %vm1447_vm4, %v13449_v52 }
0x2a62   : > { %v13331_v26 = vmul.f32 0.70710677, %v13327_v58 }
0x2a63   : > { %v13330_v37 = vmul.f32 0.70710677, %v13326_v44 }
0x2a64   : > { %14679 = vst.msk [vmem:[%s23574_s1 + $0x58] sm:$0xff] %vm1447_vm4, %v13331_v26 }
0x2a65   : > { %14678 = vst.msk [vmem:[%s23574_s1 + $0x50] sm:$0xff] %vm1447_vm4, %v13330_v37 }
0x2a66 PF: > { %p37_p5 = scmp.ge.s32.totalorder %s19221_s25, 4   ;;  %s23837_s5 = smov %s18910_s26 }
0x2a67   : > { %s23838_s26 = smov %s18914_s27  ;;  %s23839_s27 = smov %s19232_s17 }
0x2a68   : > { %s23840_s28 = smov %s19221_s25  ;;  %39 = sbr.rel (!%p37_p5) target bundleno = 24 (0x18), region = 265 }
0x2a6f   :  { %13490 = vsyncpa [#allocation3], 1 }
0x2a70   :  { %13492 = vsyncpa [#allocation3 + $0x1], 1 }
0x2a71   :  { %13493 = vsyncpa [#allocation5], 1 }
0x2a72   :  { %13494 = vsyncpa [#allocation8], 1 }
0x2a73   :  { %13495 = vsyncpa [#allocation11], 1 }

</bundles_post_ra>
